<compile_context>
chip_gen: v7x
topology: tpu7x:2x2x1
jax: 0.10.0
libtpu: 0.0.40
codegen_flags: <defaults>
</compile_context>

<pallas_src>
import functools
import math

import numpy as np
import jax
import jax.numpy as jnp
from jax import lax
from jax.experimental import pallas as pl
from jax.experimental.pallas import tpu as pltpu


_LANES = 128
_MAX_TM = 512                      # cap on row-tile size (85%+ of HBM roofline at 512)
_VMEM_LIMIT = 48 * 1024 * 1024     # <= v7x physical 64 MiB; plenty of headroom on v5e/v6e


def _round_up(x, m):
    return (x + m - 1) // m * m


def _pick_tm(m):
    # Target >= 2 grid steps so v7x's two TensorCores both get work; cap the block rows.
    return max(8, min(_MAX_TM, _round_up(-(-m // 2), 8)))


def _mish(x):
    # x * tanh(softplus(x)) with a single transcendental:
    #   u = 1 + e^x  =>  tanh(softplus(x)) = (u^2 - 1) / (u^2 + 1)
    u = 1.0 + jnp.exp(jnp.minimum(x, 20.0))
    n = u * u
    return x * (n - 1.0) * pl.reciprocal(n + 1.0, approx=True)


def _epilogue(acc, prm, *, has_ln, n_real, act, eps):
    # prm rows: 0 bias, 1 gamma, 2 beta, 3 real-channel mask (all lane-padded with zeros).
    acc = acc + prm[0:1, :]
    if has_ln:
        gamma, beta, mask = prm[1:2, :], prm[2:3, :], prm[3:4, :]
        inv_n = 1.0 / n_real
        mu = jnp.sum(acc, axis=-1, keepdims=True) * inv_n   # padded cols are exactly 0
        d = (acc - mu) * mask                               # centered variance, pad masked
        var = jnp.sum(d * d, axis=-1, keepdims=True) * inv_n
        acc = (acc - mu) * lax.rsqrt(var + eps) * gamma + beta  # padded gamma/beta = 0
    if act == "mish":
        acc = _mish(acc)
    return acc


def _make_prm(n_pad, n_real, bias, gamma=None, beta=None):
    prm = jnp.zeros((4, n_pad), jnp.float32)
    prm = prm.at[0, :n_real].set(bias.astype(jnp.float32))
    if gamma is not None:
        prm = prm.at[1, :n_real].set(gamma.astype(jnp.float32))
        prm = prm.at[2, :n_real].set(beta.astype(jnp.float32))
        prm = prm.at[3, :n_real].set(1.0)
    return prm


# --------------------------- fused GEMM kernel -----------------------------

def _gemm_kernel(a_ref, w_ref, p_ref, o_ref, *, has_ln, n_real, act, eps):
    a = a_ref[...].astype(jnp.bfloat16)             # cast in-kernel (no wrapper copy pass)
    acc = jnp.dot(a, w_ref[...], preferred_element_type=jnp.float32)
    acc = _epilogue(acc, p_ref[...], has_ln=has_ln, n_real=n_real, act=act, eps=eps)
    o_ref[...] = acc.astype(o_ref.dtype)


def gemm_fused(a, w, bias, *, gamma=None, beta=None, act="none", eps=1e-5,
               out_dtype=jnp.bfloat16):
    """(M,K) @ (K,N) + bias [+ LayerNorm over N] [+ Mish], bf16 MXU / f32 accumulation.

    Returns a row- and lane-padded (round_up(M,tm), round_up(N,128)) slab in out_dtype;
    real data lives in [:M, :N], padded columns are exactly zero.
    """
    M, K = a.shape
    K2, N = w.shape
    assert K == K2
    n_pad = _round_up(N, _LANES)
    tm = _pick_tm(M)
    m_pad = _round_up(M, tm)
    if m_pad != M:                                  # rows only; never a dtype-cast copy
        a = jnp.pad(a, ((0, m_pad - M), (0, 0)))
    w_p = jnp.pad(w.astype(jnp.bfloat16), ((0, 0), (0, n_pad - N)))
    prm = _make_prm(n_pad, N, bias, gamma, beta)

    kernel = functools.partial(_gemm_kernel, has_ln=gamma is not None, n_real=N,
                               act=act, eps=eps)
    # TODO(synk): add a K grid axis with a VMEM accumulator once K grows beyond a few
    # thousand (v7x 64 MiB VMEM); every K in this model is <= 128.
    return pl.pallas_call(
        kernel,
        out_shape=jax.ShapeDtypeStruct((m_pad, n_pad), out_dtype),
        grid_spec=pltpu.PrefetchScalarGridSpec(
            num_scalar_prefetch=0,
            grid=(m_pad // tm,),
            in_specs=[pl.BlockSpec((tm, K), lambda i: (i, 0)),
                      pl.BlockSpec((K, n_pad), lambda i: (0, 0)),
                      pl.BlockSpec((4, n_pad), lambda i: (0, 0))],
            out_specs=pl.BlockSpec((tm, n_pad), lambda i: (i, 0)),
        ),
        compiler_params=pltpu.CompilerParams(
            dimension_semantics=("parallel",),
            vmem_limit_bytes=_VMEM_LIMIT,
        ),
    )(a, w_p, prm)


# -------------------- fused conv (in-kernel tap accumulation) ---------------

def _conv_kernel(x_ref, w_ref, m_ref, p_ref, o_ref, *, C, shifts, halo,
                 has_ln, n_real, act, eps):
    HW = x_ref.shape[0]
    x = x_ref[...][:, :C].astype(jnp.float32)            # (HW, C) -- one image
    if halo:
        zpad = jnp.zeros((halo, C), jnp.float32)
        xp = jnp.concatenate([zpad, x, zpad], axis=0)     # zero halo so shifts never OOB
    else:
        xp = x
    w = w_ref[...]
    masks = m_ref[...]
    n_out = o_ref.shape[-1]
    acc = jnp.zeros((HW, n_out), jnp.float32)
    for t, s in enumerate(shifts):
        xs = xp[halo + s: halo + s + HW, :] * masks[:, t:t + 1]
        acc = acc + jnp.dot(xs.astype(jnp.bfloat16), w[t * C:(t + 1) * C, :],
                            preferred_element_type=jnp.float32)
    acc = _epilogue(acc, p_ref[...], has_ln=has_ln, n_real=n_real, act=act, eps=eps)
    o_ref[...] = acc.astype(o_ref.dtype)


def conv_fused(x_slab, w, bias, *, B, H, W, cin, ksize, padding,
               gamma=None, beta=None, act="none", eps=1e-5, out_dtype=jnp.bfloat16):
    """k x k 'same' conv over a lane-padded NHWC slab, fused bias [+LN(channels)] [+Mish].

    x_slab: (B*H*W, lane_pad) with real input channels in [:cin]. Taps are accumulated
    in-kernel from row-shifted views of the per-image block (no HBM im2col). The grid is
    over batch, so v7x's two TensorCores split the images.
    """
    M, in_pad = x_slab.shape
    HW = H * W
    assert M == B * HW and HW % 8 == 0
    assert 2 * padding == ksize - 1, "kernel assumes a 'same' convolution"
    kkc, cout = w.shape
    assert kkc == ksize * ksize * cin
    n_pad = _round_up(cout, _LANES)

    w_p = jnp.pad(w.astype(jnp.bfloat16), ((0, 0), (0, n_pad - cout)))
    prm = _make_prm(n_pad, cout, bias, gamma, beta)

    # Per-tap flattened-row shifts and validity masks (host-side constants).
    shifts = []
    masks = np.zeros((HW, ksize * ksize), np.float32)
    rows = np.arange(HW)
    ri, rj = rows // W, rows % W
    for t in range(ksize * ksize):
        di, dj = t // ksize, t % ksize
        shifts.append((di - padding) * W + (dj - padding))
        ii, jj = ri + di - padding, rj + dj - padding
        masks[:, t] = ((ii >= 0) & (ii < H) & (jj >= 0) & (jj < W)).astype(np.float32)
    halo = max(abs(s) for s in shifts)

    kernel = functools.partial(_conv_kernel, C=cin, shifts=tuple(shifts), halo=halo,
                               has_ln=gamma is not None, n_real=cout, act=act, eps=eps)
    # TODO(synk): for large H*W, split image rows over a second grid axis with a halo
    # instead of one whole image per step.
    return pl.pallas_call(
        kernel,
        out_shape=jax.ShapeDtypeStruct((M, n_pad), out_dtype),
        grid_spec=pltpu.PrefetchScalarGridSpec(
            num_scalar_prefetch=0,
            grid=(B,),
            in_specs=[pl.BlockSpec((HW, in_pad), lambda b: (b, 0)),
                      pl.BlockSpec((kkc, n_pad), lambda b: (0, 0)),
                      pl.BlockSpec((HW, ksize * ksize), lambda b: (0, 0)),
                      pl.BlockSpec((4, n_pad), lambda b: (0, 0))],
            out_specs=pl.BlockSpec((HW, n_pad), lambda b: (b, 0)),
        ),
        compiler_params=pltpu.CompilerParams(
            dimension_semantics=("parallel",),
            vmem_limit_bytes=_VMEM_LIMIT,
        ),
    )(x_slab, w_p, jnp.asarray(masks), prm)


# ------------------ fused FFC block epilogue (combine kernel) ---------------

def _combine_kernel(cv_ref, ys_ref, res_ref, w3_ref, p_ref, o_ref, *, c_l, c_g, eps):
    # p_ref rows: 0 gamma, 1 beta, 2 local mask, 3 global mask, 4 spectral-expand bias.
    prm = p_ref[...]
    gamma, beta = prm[0:1, :], prm[1:2, :]
    m_l, m_g = prm[2:3, :], prm[3:4, :]

    # conv(ll+gl | lg) output + spectral-transform 1x1 expand (fused matmul) + its bias
    t = cv_ref[...].astype(jnp.float32)
    t = t + jnp.dot(ys_ref[...].astype(jnp.bfloat16), w3_ref[...],
                    preferred_element_type=jnp.float32)
    t = t + prm[4:5, :]

    def stats(m, n):
        mu = jnp.sum(t * m, axis=-1, keepdims=True) * (1.0 / n)
        d = (t - mu) * m
        var = jnp.sum(d * d, axis=-1, keepdims=True) * (1.0 / n)
        return mu, lax.rsqrt(var + eps)

    mu_l, inv_l = stats(m_l, c_l)
    mu_g, inv_g = stats(m_g, c_g)
    mu = mu_l * m_l + mu_g * m_g
    inv = inv_l * m_l + inv_g * m_g
    y = (t - mu) * inv * gamma + beta                  # grouped LayerNorm (local / global)
    o_ref[...] = (res_ref[...].astype(jnp.float32) + _mish(y)).astype(o_ref.dtype)


def ffc_block_combine(conv_slab, ys, res_slab, w3, b3, gamma, beta, *,
                      B, HW, c_l, c_g, eps=1e-5):
    """Per-block epilogue: conv + spectral branches, grouped LN, Mish, residual add."""
    M, n_pad = conv_slab.shape
    assert res_slab.shape == (M, n_pad) and M == B * HW
    C = c_l + c_g
    assert C <= n_pad
    cm = w3.shape[0]
    cm_p = _round_up(cm, _LANES)

    ys_p = jnp.pad(ys, ((0, 0), (0, cm_p - cm)))                       # (M, cm_p)
    w3_p = jnp.zeros((cm_p, n_pad), jnp.bfloat16).at[:cm, c_l:C].set(w3.astype(jnp.bfloat16))
    prm = jnp.zeros((8, n_pad), jnp.float32)
    prm = prm.at[0, :C].set(gamma.astype(jnp.float32))
    prm = prm.at[1, :C].set(beta.astype(jnp.float32))
    prm = prm.at[2, :c_l].set(1.0)
    prm = prm.at[3, c_l:C].set(1.0)
    prm = prm.at[4, c_l:C].set(b3.astype(jnp.float32))

    kernel = functools.partial(_combine_kernel, c_l=c_l, c_g=c_g, eps=eps)
    return pl.pallas_call(
        kernel,
        out_shape=jax.ShapeDtypeStruct((M, n_pad), jnp.bfloat16),
        grid_spec=pltpu.PrefetchScalarGridSpec(
            num_scalar_prefetch=0,
            grid=(B,),
            in_specs=[pl.BlockSpec((HW, n_pad), lambda b: (b, 0)),
                      pl.BlockSpec((HW, cm_p), lambda b: (b, 0)),
                      pl.BlockSpec((HW, n_pad), lambda b: (b, 0)),
                      pl.BlockSpec((cm_p, n_pad), lambda b: (0, 0)),
                      pl.BlockSpec((8, n_pad), lambda b: (0, 0))],
            out_specs=pl.BlockSpec((HW, n_pad), lambda b: (b, 0)),
        ),
        compiler_params=pltpu.CompilerParams(
            dimension_semantics=("parallel",),
            vmem_limit_bytes=_VMEM_LIMIT,
        ),
    )(conv_slab, ys_p, res_slab, w3_p, prm)


# ------------------------------- StftConv ----------------------------------

def stft_conv_to_nhwc(x, fft_len, hop):
    """StftConv ('complex' features) as one Pallas GEMM against a Hann-windowed DFT basis,
    emitted directly in the NHWC layout (B, F-1, T, 2C) the FFC stem consumes (the DC bin
    is dropped inside the basis, so no post-hoc slice is needed)."""
    B, C, L = x.shape
    assert 2 * hop == fft_len, "StftConv uses win_hop = fft_len // 2"
    T = (L - fft_len) // hop + 1
    F = fft_len // 2 + 1

    n = jnp.arange(fft_len)
    win = 0.5 - 0.5 * jnp.cos(2.0 * jnp.pi * n / fft_len)               # Hann
    kbin = jnp.arange(1, F)                                             # drop DC in the basis
    ang = 2.0 * jnp.pi * jnp.outer(kbin, n) / fft_len
    basis = jnp.concatenate([jnp.cos(ang) * win, -jnp.sin(ang) * win], axis=0).T

    # Half-overlap framing via reshape + concat (no gather, no advanced indexing).
    segs = x[:, :, :(T + 1) * hop].reshape(B, C, T + 1, hop)
    frames = jnp.concatenate([segs[:, :, :T, :], segs[:, :, 1:T + 1, :]], axis=-1)

    out = gemm_fused(frames.reshape(B * C * T, fft_len), basis,
                     jnp.zeros((2 * (F - 1),), jnp.float32))
    out = out[:B * C * T, :2 * (F - 1)].reshape(B, C, T, 2, F - 1)
    # == torch: permute(0,2,3,1,4) -> view(B,F,T,2C) -> permute(0,3,1,2) -> drop DC (NHWC here)
    return jnp.transpose(out, (0, 4, 2, 1, 3)).reshape(B, F - 1, T, 2 * C)


# ------------------------------ FFC backbone --------------------------------

def ffc_resnet_forward(p, z, *, mid_channels, ratio_gout, ksize, padding, enable_lfu=False):
    # TODO(synk): enable_lfu local-Fourier-unit branch not reconstructed; run enable_lfu=False.
    c_g = int(mid_channels * ratio_gout)
    c_l = mid_channels - c_g
    B, H, W, cin = z.shape
    M, HW = B * H * W, H * W
    n_pad = _round_up(mid_channels, _LANES)

    # one-time lane pad; activation slabs stay row-exact / lane-padded bf16 end-to-end
    x_slab = jnp.pad(z.reshape(M, cin), ((0, 0), (0, _round_up(cin, _LANES) - cin)))

    # stem: conv + LayerNorm(channels) + Mish fused in one tap-accumulating kernel
    y_slab = conv_fused(x_slab, p["stem_w"].reshape(ksize * ksize * cin, mid_channels),
                        p["stem_b"], B=B, H=H, W=W, cin=cin, ksize=ksize, padding=padding,
                        gamma=p["stem_ln_g"], beta=p["stem_ln_b"], act="mish")

    for bp in p["blocks"]:
        # local + global conv branches as ONE block-structured conv over the full y slab:
        #   [[w_ll | w_lg], [w_gl | 0]]  ->  cols [0,c_l)=ll+gl, cols [c_l,mid)=lg
        w_blk = jnp.zeros((ksize, ksize, mid_channels, mid_channels), jnp.float32)
        w_blk = w_blk.at[:, :, :c_l, :c_l].set(bp["w_ll"])
        w_blk = w_blk.at[:, :, :c_l, c_l:].set(bp["w_lg"])
        w_blk = w_blk.at[:, :, c_l:, :c_l].set(bp["w_gl"])
        b_blk = jnp.concatenate([bp["b_ll"] + bp["b_gl"], bp["b_lg"]])
        conv_slab = conv_fused(y_slab,
                               w_blk.reshape(ksize * ksize * mid_channels, mid_channels),
                               b_blk, B=B, H=H, W=W, cin=mid_channels,
                               ksize=ksize, padding=padding, act="none")

        # spectral transform: 1x1 reduce reads the padded y slab directly (weight rows
        # outside the global channel range are zero), FourierUnit in between, and the
        # 1x1 expand is fused into the combine kernel below.
        cm = bp["st_w_in"].shape[1]
        w_in = jnp.zeros((y_slab.shape[1], cm), jnp.float32)
        w_in = w_in.at[c_l:c_l + c_g, :].set(bp["st_w_in"])
        red = gemm_fused(y_slab, w_in, bp["st_b_in"], act="mish")
        yr = red[:M, :cm].astype(jnp.float32).reshape(B, H, W, cm)
        # TODO(synk): rfft2/irfft2 have no Pallas TPU primitive; small 2D DFT left to XLA.
        yf = jnp.fft.rfft2(yr, axes=(1, 2), norm="ortho")
        Wf = yf.shape[2]
        yri = jnp.concatenate([yf.real, yf.imag], axis=-1).reshape(B * H * Wf, 2 * cm)
        z2 = gemm_fused(yri, bp["st_w_freq"], bp["st_b_freq"], act="mish")
        z2 = z2[:B * H * Wf, :2 * cm].astype(jnp.float32).reshape(B, H, Wf, 2 * cm)
        zr, zi = jnp.split(z2, 2, axis=-1)
        ys = jnp.fft.irfft2(zr + 1j * zi, s=(H, W), axes=(1, 2), norm="ortho").reshape(M, cm)

        # fused epilogue: + spectral 1x1 expand, grouped LN, Mish, residual add
        gamma = jnp.concatenate([bp["ln_l_g"], bp["ln_g_g"]])
        beta = jnp.concatenate([bp["ln_l_b"], bp["ln_g_b"]])
        y_slab = ffc_block_combine(conv_slab, ys, y_slab, bp["st_w_out"], bp["st_b_out"],
                                   gamma, beta, B=B, HW=HW, c_l=c_l, c_g=c_g)

    # head: global average pool + tiny GEMM (plain jnp -- pallas_call overhead > compute)
    feat = jnp.mean(y_slab.astype(jnp.float32).reshape(B, HW, n_pad), axis=1)[:, :mid_channels]
    return feat @ p["head_w"] + p["head_b"]


def ffcnet_forward(params, x, *, fft_len, mid_channels, ratio_gout, ksize,
                   padding, enable_lfu=False):
    hop = fft_len // 2
    z = stft_conv_to_nhwc(x, fft_len, hop)                   # (B, F-1, T, 2C)
    return ffc_resnet_forward(params, z, mid_channels=mid_channels, ratio_gout=ratio_gout,
                              ksize=ksize, padding=padding, enable_lfu=enable_lfu)


# ------------------------------ param init ----------------------------------

def _dense_init(key, shape, fan_in):
    return jax.random.normal(key, shape, jnp.float32) * (1.0 / math.sqrt(fan_in))


def init_ffcnet_params(key, *, in_channels, mid_channels, num_classes,
                       num_blocks, ratio_gout, ksize):
    in_ch = 2 * in_channels
    c_g = int(mid_channels * ratio_gout)
    c_l = mid_channels - c_g
    cm = max(c_g // 2, 1)
    keys = iter(jax.random.split(key, 8 + 8 * num_blocks))
    p = {}
    # conv weights stored HWIO (k, k, Cin, Cout) to match NHWC tap-major/channel-minor order
    p["stem_w"] = _dense_init(next(keys), (ksize, ksize, in_ch, mid_channels),
                              in_ch * ksize * ksize)
    p["stem_b"] = jnp.zeros((mid_channels,), jnp.float32)
    p["stem_ln_g"] = jnp.ones((mid_channels,), jnp.float32)
    p["stem_ln_b"] = jnp.zeros((mid_channels,), jnp.float32)
    blocks = []
    for _ in range(num_blocks):
        bp = {}
        bp["w_ll"] = _dense_init(next(keys), (ksize, ksize, c_l, c_l), c_l * ksize * ksize)
        bp["b_ll"] = jnp.zeros((c_l,), jnp.float32)
        bp["w_lg"] = _dense_init(next(keys), (ksize, ksize, c_l, c_g), c_l * ksize * ksize)
        bp["b_lg"] = jnp.zeros((c_g,), jnp.float32)
        bp["w_gl"] = _dense_init(next(keys), (ksize, ksize, c_g, c_l), c_g * ksize * ksize)
        bp["b_gl"] = jnp.zeros((c_l,), jnp.float32)
        bp["st_w_in"] = _dense_init(next(keys), (c_g, cm), c_g)
        bp["st_b_in"] = jnp.zeros((cm,), jnp.float32)
        bp["st_w_freq"] = _dense_init(next(keys), (2 * cm, 2 * cm), 2 * cm)
        bp["st_b_freq"] = jnp.zeros((2 * cm,), jnp.float32)
        bp["st_w_out"] = _dense_init(next(keys), (cm, c_g), cm)
        bp["st_b_out"] = jnp.zeros((c_g,), jnp.float32)
        bp["ln_l_g"] = jnp.ones((c_l,), jnp.float32)
        bp["ln_l_b"] = jnp.zeros((c_l,), jnp.float32)
        bp["ln_g_g"] = jnp.ones((c_g,), jnp.float32)
        bp["ln_g_b"] = jnp.zeros((c_g,), jnp.float32)
        blocks.append(bp)
    p["blocks"] = blocks
    p["head_w"] = _dense_init(next(keys), (mid_channels, num_classes), mid_channels)
    p["head_b"] = jnp.zeros((num_classes,), jnp.float32)
    return p


# ---------------------------------- main -------------------------------------

if __name__ == "__main__":
    # small shapes consistent with the module's forward
    fft_len = 32
    in_channels = 1
    hop = fft_len // 2
    in_time = 8
    L = fft_len + (in_time - 1) * hop          # 144 samples -> T = 8 frames
    in_freq = fft_len // 2                     # 16 freq bins after dropping DC
    mid_channels = 8
    num_classes = 5
    num_blocks = 2
    ratio_gin = ratio_gout = 0.5
    ksize, stride, padding = 3, 1, 1

    key = jax.random.PRNGKey(0)
    kx, kp = jax.random.split(key)
    x = jax.random.normal(kx, (2, in_channels, L), jnp.float32)    # (B, C, L) audio

    params = init_ffcnet_params(kp, in_channels=in_channels,
                                mid_channels=mid_channels,
                                num_classes=num_classes,
                                num_blocks=num_blocks,
                                ratio_gout=ratio_gout, ksize=ksize)

    fwd = jax.jit(functools.partial(
        ffcnet_forward, fft_len=fft_len, mid_channels=mid_channels,
        ratio_gout=ratio_gout, ksize=ksize, padding=padding, enable_lfu=False))

    out = jax.block_until_ready(fwd(params, x))
    assert out.shape == (2, num_classes), out.shape
    assert bool(jnp.all(jnp.isfinite(out)))
    print("KERNEL_OK")
</pallas_src>

<mosaic_0001>
module attributes {stable_mosaic.version = 11 : i64} {
  func.func @_gemm_kernel(%arg0: i32, %arg1: memref<8x32xf32, #tpu.memory_space<vmem>>, %arg2: memref<32x128xbf16, #tpu.memory_space<vmem>>, %arg3: memref<4x128xf32, #tpu.memory_space<vmem>>, %arg4: memref<8x128xbf16, #tpu.memory_space<vmem>>) attributes {dimension_semantics = [#tpu.dimension_semantics<parallel>], iteration_bounds = array<i64: 2>, scalar_prefetch = 0 : i64, scratch_operands = 0 : i64, tpu.core_type = #tpu.core_type<tc>, window_params = [{transform_indices = @transform_0, window_bounds = array<i64: 8, 32>}, {pipeline_mode = #tpu.pipeline_mode<synchronous>, transform_indices = @transform_1, window_bounds = array<i64: 32, 128>}, {pipeline_mode = #tpu.pipeline_mode<synchronous>, transform_indices = @transform_2, window_bounds = array<i64: 4, 128>}, {transform_indices = @transform_3, window_bounds = array<i64: 8, 128>}]} {
    %c0 = arith.constant 0 : index
    %c0_0 = arith.constant 0 : index
    %0 = vector.load %arg1[%c0, %c0_0] : memref<8x32xf32, #tpu.memory_space<vmem>>, vector<8x32xf32>
    %1 = arith.truncf %0 : vector<8x32xf32> to vector<8x32xbf16>
    %c0_1 = arith.constant 0 : index
    %c0_2 = arith.constant 0 : index
    %2 = vector.load %arg2[%c0_1, %c0_2] : memref<32x128xbf16, #tpu.memory_space<vmem>>, vector<32x128xbf16>
    %cst = arith.constant dense<0.000000e+00> : vector<8x128xf32>
    %3 = tpu.matmul %1, %2, %cst {dimension_numbers = #tpu.dot_dimension_numbers<[1], [0], [0], [1], [0, 0, 1, 1], [], []>} : vector<8x32xbf16>, vector<32x128xbf16>, vector<8x128xf32> -> vector<8x128xf32>
    %c0_3 = arith.constant 0 : index
    %c0_4 = arith.constant 0 : index
    %4 = vector.load %arg3[%c0_3, %c0_4] : memref<4x128xf32, #tpu.memory_space<vmem>>, vector<4x128xf32>
    %5 = vector.extract_strided_slice %4 {offsets = [0, 0], sizes = [1, 128], strides = [1, 1]} : vector<4x128xf32> to vector<1x128xf32>
    %6 = vector.broadcast %5 : vector<1x128xf32> to vector<8x128xf32>
    %7 = arith.addf %3, %6 : vector<8x128xf32>
    %8 = arith.truncf %7 : vector<8x128xf32> to vector<8x128xbf16>
    %c0_5 = arith.constant 0 : index
    %c0_6 = arith.constant 0 : index
    %9 = vector.load %arg4[%c0_5, %c0_6] : memref<8x128xbf16, #tpu.memory_space<vmem>>, vector<8x128xbf16>
    tpu.vector_store %arg4[%c0_5, %c0_6], %8 {strides = array<i32>} : memref<8x128xbf16, #tpu.memory_space<vmem>>, vector<8x128xbf16>,
    return
  }
  func.func @transform_0(%arg0: i32) -> (i32, i32) {
    %c0_i32 = arith.constant 0 : i32
    %c0_i32_0 = arith.constant 0 : i32
    return %arg0, %c0_i32 : i32, i32
  }
  func.func @transform_1(%arg0: i32) -> (i32, i32) {
    %c0_i32 = arith.constant 0 : i32
    %c0_i32_0 = arith.constant 0 : i32
    %c0_i32_1 = arith.constant 0 : i32
    return %c0_i32, %c0_i32_0 : i32, i32
  }
  func.func @transform_2(%arg0: i32) -> (i32, i32) {
    %c0_i32 = arith.constant 0 : i32
    %c0_i32_0 = arith.constant 0 : i32
    %c0_i32_1 = arith.constant 0 : i32
    return %c0_i32, %c0_i32_0 : i32, i32
  }
  func.func @transform_3(%arg0: i32) -> (i32, i32) {
    %c0_i32 = arith.constant 0 : i32
    %c0_i32_0 = arith.constant 0 : i32
    return %arg0, %c0_i32 : i32, i32
  }
}

module attributes {stable_mosaic.version = 11 : i64} {
  func.func @_conv_kernel(%arg0: i32, %arg1: memref<128x128xbf16, #tpu.memory_space<vmem>>, %arg2: memref<18x128xbf16, #tpu.memory_space<vmem>>, %arg3: memref<128x9xf32, #tpu.memory_space<vmem>>, %arg4: memref<4x128xf32, #tpu.memory_space<vmem>>, %arg5: memref<128x128xbf16, #tpu.memory_space<vmem>>) attributes {dimension_semantics = [#tpu.dimension_semantics<parallel>], iteration_bounds = array<i64: 2>, scalar_prefetch = 0 : i64, scratch_operands = 0 : i64, tpu.core_type = #tpu.core_type<tc>, window_params = [{transform_indices = @transform_0, window_bounds = array<i64: 128, 128>}, {pipeline_mode = #tpu.pipeline_mode<synchronous>, transform_indices = @transform_1, window_bounds = array<i64: 18, 128>}, {pipeline_mode = #tpu.pipeline_mode<synchronous>, transform_indices = @transform_2, window_bounds = array<i64: 128, 9>}, {pipeline_mode = #tpu.pipeline_mode<synchronous>, transform_indices = @transform_3, window_bounds = array<i64: 4, 128>}, {transform_indices = @transform_4, window_bounds = array<i64: 128, 128>}]} {
    %c0 = arith.constant 0 : index
    %c0_0 = arith.constant 0 : index
    %0 = vector.load %arg1[%c0, %c0_0] : memref<128x128xbf16, #tpu.memory_space<vmem>>, vector<128x128xbf16>
    %1 = vector.extract_strided_slice %0 {offsets = [0, 0], sizes = [128, 2], strides = [1, 1]} : vector<128x128xbf16> to vector<128x2xbf16>
    %2 = arith.extf %1 : vector<128x2xbf16> to vector<128x2xf32>
    %cst = arith.constant 0.000000e+00 : f32
    %3 = vector.broadcast %cst : f32 to vector<9x2xf32>
    %4 = tpu.concatenate %3, %2, %3 in 0 : vector<9x2xf32>, vector<128x2xf32>, vector<9x2xf32> -> vector<146x2xf32>
    %c0_1 = arith.constant 0 : index
    %c0_2 = arith.constant 0 : index
    %5 = vector.load %arg2[%c0_1, %c0_2] : memref<18x128xbf16, #tpu.memory_space<vmem>>, vector<18x128xbf16>
    %c0_3 = arith.constant 0 : index
    %c0_4 = arith.constant 0 : index
    %6 = vector.load %arg3[%c0_3, %c0_4] : memref<128x9xf32, #tpu.memory_space<vmem>>, vector<128x9xf32>
    %cst_5 = arith.constant 0.000000e+00 : f32
    %7 = vector.broadcast %cst_5 : f32 to vector<128x128xf32>
    %8 = vector.extract_strided_slice %4 {offsets = [0, 0], sizes = [128, 2], strides = [1, 1]} : vector<146x2xf32> to vector<128x2xf32>
    %9 = vector.extract_strided_slice %6 {offsets = [0, 0], sizes = [128, 1], strides = [1, 1]} : vector<128x9xf32> to vector<128x1xf32>
    %10 = vector.broadcast %9 : vector<128x1xf32> to vector<128x2xf32>
    %11 = arith.mulf %8, %10 : vector<128x2xf32>
    %12 = arith.truncf %11 : vector<128x2xf32> to vector<128x2xbf16>
    %13 = vector.extract_strided_slice %5 {offsets = [0, 0], sizes = [2, 128], strides = [1, 1]} : vector<18x128xbf16> to vector<2x128xbf16>
    %cst_6 = arith.constant dense<0.000000e+00> : vector<128x128xf32>
    %14 = tpu.matmul %12, %13, %cst_6 {dimension_numbers = #tpu.dot_dimension_numbers<[1], [0], [0], [1], [0, 0, 1, 1], [], []>} : vector<128x2xbf16>, vector<2x128xbf16>, vector<128x128xf32> -> vector<128x128xf32>
    %15 = arith.addf %7, %14 : vector<128x128xf32>
    %16 = vector.extract_strided_slice %4 {offsets = [1, 0], sizes = [128, 2], strides = [1, 1]} : vector<146x2xf32> to vector<128x2xf32>
    %17 = vector.extract_strided_slice %6 {offsets = [0, 1], sizes = [128, 1], strides = [1, 1]} : vector<128x9xf32> to vector<128x1xf32>
    %18 = vector.broadcast %17 : vector<128x1xf32> to vector<128x2xf32>
    %19 = arith.mulf %16, %18 : vector<128x2xf32>
    %20 = arith.truncf %19 : vector<128x2xf32> to vector<128x2xbf16>
    %21 = vector.extract_strided_slice %5 {offsets = [2, 0], sizes = [2, 128], strides = [1, 1]} : vector<18x128xbf16> to vector<2x128xbf16>
    %cst_7 = arith.constant dense<0.000000e+00> : vector<128x128xf32>
    %22 = tpu.matmul %20, %21, %cst_7 {dimension_numbers = #tpu.dot_dimension_numbers<[1], [0], [0], [1], [0, 0, 1, 1], [], []>} : vector<128x2xbf16>, vector<2x128xbf16>, vector<128x128xf32> -> vector<128x128xf32>
    %23 = arith.addf %15, %22 : vector<128x128xf32>
    %24 = vector.extract_strided_slice %4 {offsets = [2, 0], sizes = [128, 2], strides = [1, 1]} : vector<146x2xf32> to vector<128x2xf32>
    %25 = vector.extract_strided_slice %6 {offsets = [0, 2], sizes = [128, 1], strides = [1, 1]} : vector<128x9xf32> to vector<128x1xf32>
    %26 = vector.broadcast %25 : vector<128x1xf32> to vector<128x2xf32>
    %27 = arith.mulf %24, %26 : vector<128x2xf32>
    %28 = arith.truncf %27 : vector<128x2xf32> to vector<128x2xbf16>
    %29 = vector.extract_strided_slice %5 {offsets = [4, 0], sizes = [2, 128], strides = [1, 1]} : vector<18x128xbf16> to vector<2x128xbf16>
    %cst_8 = arith.constant dense<0.000000e+00> : vector<128x128xf32>
    %30 = tpu.matmul %28, %29, %cst_8 {dimension_numbers = #tpu.dot_dimension_numbers<[1], [0], [0], [1], [0, 0, 1, 1], [], []>} : vector<128x2xbf16>, vector<2x128xbf16>, vector<128x128xf32> -> vector<128x128xf32>
    %31 = arith.addf %23, %30 : vector<128x128xf32>
    %32 = vector.extract_strided_slice %4 {offsets = [8, 0], sizes = [128, 2], strides = [1, 1]} : vector<146x2xf32> to vector<128x2xf32>
    %33 = vector.extract_strided_slice %6 {offsets = [0, 3], sizes = [128, 1], strides = [1, 1]} : vector<128x9xf32> to vector<128x1xf32>
    %34 = vector.broadcast %33 : vector<128x1xf32> to vector<128x2xf32>
    %35 = arith.mulf %32, %34 : vector<128x2xf32>
    %36 = arith.truncf %35 : vector<128x2xf32> to vector<128x2xbf16>
    %37 = vector.extract_strided_slice %5 {offsets = [6, 0], sizes = [2, 128], strides = [1, 1]} : vector<18x128xbf16> to vector<2x128xbf16>
    %cst_9 = arith.constant dense<0.000000e+00> : vector<128x128xf32>
    %38 = tpu.matmul %36, %37, %cst_9 {dimension_numbers = #tpu.dot_dimension_numbers<[1], [0], [0], [1], [0, 0, 1, 1], [], []>} : vector<128x2xbf16>, vector<2x128xbf16>, vector<128x128xf32> -> vector<128x128xf32>
    %39 = arith.addf %31, %38 : vector<128x128xf32>
    %40 = vector.extract_strided_slice %4 {offsets = [9, 0], sizes = [128, 2], strides = [1, 1]} : vector<146x2xf32> to vector<128x2xf32>
    %41 = vector.extract_strided_slice %6 {offsets = [0, 4], sizes = [128, 1], strides = [1, 1]} : vector<128x9xf32> to vector<128x1xf32>
    %42 = vector.broadcast %41 : vector<128x1xf32> to vector<128x2xf32>
    %43 = arith.mulf %40, %42 : vector<128x2xf32>
    %44 = arith.truncf %43 : vector<128x2xf32> to vector<128x2xbf16>
    %45 = vector.extract_strided_slice %5 {offsets = [8, 0], sizes = [2, 128], strides = [1, 1]} : vector<18x128xbf16> to vector<2x128xbf16>
    %cst_10 = arith.constant dense<0.000000e+00> : vector<128x128xf32>
    %46 = tpu.matmul %44, %45, %cst_10 {dimension_numbers = #tpu.dot_dimension_numbers<[1], [0], [0], [1], [0, 0, 1, 1], [], []>} : vector<128x2xbf16>, vector<2x128xbf16>, vector<128x128xf32> -> vector<128x128xf32>
    %47 = arith.addf %39, %46 : vector<128x128xf32>
    %48 = vector.extract_strided_slice %4 {offsets = [10, 0], sizes = [128, 2], strides = [1, 1]} : vector<146x2xf32> to vector<128x2xf32>
    %49 = vector.extract_strided_slice %6 {offsets = [0, 5], sizes = [128, 1], strides = [1, 1]} : vector<128x9xf32> to vector<128x1xf32>
    %50 = vector.broadcast %49 : vector<128x1xf32> to vector<128x2xf32>
    %51 = arith.mulf %48, %50 : vector<128x2xf32>
    %52 = arith.truncf %51 : vector<128x2xf32> to vector<128x2xbf16>
    %53 = vector.extract_strided_slice %5 {offsets = [10, 0], sizes = [2, 128], strides = [1, 1]} : vector<18x128xbf16> to vector<2x128xbf16>
    %cst_11 = arith.constant dense<0.000000e+00> : vector<128x128xf32>
    %54 = tpu.matmul %52, %53, %cst_11 {dimension_numbers = #tpu.dot_dimension_numbers<[1], [0], [0], [1], [0, 0, 1, 1], [], []>} : vector<128x2xbf16>, vector<2x128xbf16>, vector<128x128xf32> -> vector<128x128xf32>
    %55 = arith.addf %47, %54 : vector<128x128xf32>
    %56 = vector.extract_strided_slice %4 {offsets = [16, 0], sizes = [128, 2], strides = [1, 1]} : vector<146x2xf32> to vector<128x2xf32>
    %57 = vector.extract_strided_slice %6 {offsets = [0, 6], sizes = [128, 1], strides = [1, 1]} : vector<128x9xf32> to vector<128x1xf32>
    %58 = vector.broadcast %57 : vector<128x1xf32> to vector<128x2xf32>
    %59 = arith.mulf %56, %58 : vector<128x2xf32>
    %60 = arith.truncf %59 : vector<128x2xf32> to vector<128x2xbf16>
    %61 = vector.extract_strided_slice %5 {offsets = [12, 0], sizes = [2, 128], strides = [1, 1]} : vector<18x128xbf16> to vector<2x128xbf16>
    %cst_12 = arith.constant dense<0.000000e+00> : vector<128x128xf32>
    %62 = tpu.matmul %60, %61, %cst_12 {dimension_numbers = #tpu.dot_dimension_numbers<[1], [0], [0], [1], [0, 0, 1, 1], [], []>} : vector<128x2xbf16>, vector<2x128xbf16>, vector<128x128xf32> -> vector<128x128xf32>
    %63 = arith.addf %55, %62 : vector<128x128xf32>
    %64 = vector.extract_strided_slice %4 {offsets = [17, 0], sizes = [128, 2], strides = [1, 1]} : vector<146x2xf32> to vector<128x2xf32>
    %65 = vector.extract_strided_slice %6 {offsets = [0, 7], sizes = [128, 1], strides = [1, 1]} : vector<128x9xf32> to vector<128x1xf32>
    %66 = vector.broadcast %65 : vector<128x1xf32> to vector<128x2xf32>
    %67 = arith.mulf %64, %66 : vector<128x2xf32>
    %68 = arith.truncf %67 : vector<128x2xf32> to vector<128x2xbf16>
    %69 = vector.extract_strided_slice %5 {offsets = [14, 0], sizes = [2, 128], strides = [1, 1]} : vector<18x128xbf16> to vector<2x128xbf16>
    %cst_13 = arith.constant dense<0.000000e+00> : vector<128x128xf32>
    %70 = tpu.matmul %68, %69, %cst_13 {dimension_numbers = #tpu.dot_dimension_numbers<[1], [0], [0], [1], [0, 0, 1, 1], [], []>} : vector<128x2xbf16>, vector<2x128xbf16>, vector<128x128xf32> -> vector<128x128xf32>
    %71 = arith.addf %63, %70 : vector<128x128xf32>
    %72 = vector.extract_strided_slice %4 {offsets = [18, 0], sizes = [128, 2], strides = [1, 1]} : vector<146x2xf32> to vector<128x2xf32>
    %73 = vector.extract_strided_slice %6 {offsets = [0, 8], sizes = [128, 1], strides = [1, 1]} : vector<128x9xf32> to vector<128x1xf32>
    %74 = vector.broadcast %73 : vector<128x1xf32> to vector<128x2xf32>
    %75 = arith.mulf %72, %74 : vector<128x2xf32>
    %76 = arith.truncf %75 : vector<128x2xf32> to vector<128x2xbf16>
    %77 = vector.extract_strided_slice %5 {offsets = [16, 0], sizes = [2, 128], strides = [1, 1]} : vector<18x128xbf16> to vector<2x128xbf16>
    %cst_14 = arith.constant dense<0.000000e+00> : vector<128x128xf32>
    %78 = tpu.matmul %76, %77, %cst_14 {dimension_numbers = #tpu.dot_dimension_numbers<[1], [0], [0], [1], [0, 0, 1, 1], [], []>} : vector<128x2xbf16>, vector<2x128xbf16>, vector<128x128xf32> -> vector<128x128xf32>
    %79 = arith.addf %71, %78 : vector<128x128xf32>
    %c0_15 = arith.constant 0 : index
    %c0_16 = arith.constant 0 : index
    %80 = vector.load %arg4[%c0_15, %c0_16] : memref<4x128xf32, #tpu.memory_space<vmem>>, vector<4x128xf32>
    %81 = vector.extract_strided_slice %80 {offsets = [0, 0], sizes = [1, 128], strides = [1, 1]} : vector<4x128xf32> to vector<1x128xf32>
    %82 = vector.broadcast %81 : vector<1x128xf32> to vector<128x128xf32>
    %83 = arith.addf %79, %82 : vector<128x128xf32>
    %84 = vector.extract_strided_slice %80 {offsets = [1, 0], sizes = [1, 128], strides = [1, 1]} : vector<4x128xf32> to vector<1x128xf32>
    %85 = vector.extract_strided_slice %80 {offsets = [2, 0], sizes = [1, 128], strides = [1, 1]} : vector<4x128xf32> to vector<1x128xf32>
    %86 = vector.extract_strided_slice %80 {offsets = [3, 0], sizes = [1, 128], strides = [1, 1]} : vector<4x128xf32> to vector<1x128xf32>
    %cst_17 = arith.constant dense<0.000000e+00> : vector<128xf32>
    %87 = vector.multi_reduction <add>, %83, %cst_17 [1] : vector<128x128xf32> to vector<128xf32>
    %88 = vector.shape_cast %87 : vector<128xf32> to vector<128x1xf32>
    %cst_18 = arith.constant 1.250000e-01 : f32
    %89 = vector.broadcast %cst_18 : f32 to vector<128x1xf32>
    %90 = arith.mulf %88, %89 : vector<128x1xf32>
    %91 = vector.broadcast %90 : vector<128x1xf32> to vector<128x128xf32>
    %92 = arith.subf %83, %91 : vector<128x128xf32>
    %93 = vector.broadcast %86 : vector<1x128xf32> to vector<128x128xf32>
    %94 = arith.mulf %92, %93 : vector<128x128xf32>
    %95 = arith.mulf %94, %94 : vector<128x128xf32>
    %cst_19 = arith.constant dense<0.000000e+00> : vector<128xf32>
    %96 = vector.multi_reduction <add>, %95, %cst_19 [1] : vector<128x128xf32> to vector<128xf32>
    %97 = vector.shape_cast %96 : vector<128xf32> to vector<128x1xf32>
    %cst_20 = arith.constant 1.250000e-01 : f32
    %98 = vector.broadcast %cst_20 : f32 to vector<128x1xf32>
    %99 = arith.mulf %97, %98 : vector<128x1xf32>
    %100 = vector.broadcast %90 : vector<128x1xf32> to vector<128x128xf32>
    %101 = arith.subf %83, %100 : vector<128x128xf32>
    %cst_21 = arith.constant 9.99999974E-6 : f32
    %102 = vector.broadcast %cst_21 : f32 to vector<128x1xf32>
    %103 = arith.addf %99, %102 : vector<128x1xf32>
    %104 = math.rsqrt %103 : vector<128x1xf32>
    %105 = vector.broadcast %104 : vector<128x1xf32> to vector<128x128xf32>
    %106 = arith.mulf %101, %105 : vector<128x128xf32>
    %107 = vector.broadcast %84 : vector<1x128xf32> to vector<128x128xf32>
    %108 = arith.mulf %106, %107 : vector<128x128xf32>
    %109 = vector.broadcast %85 : vector<1x128xf32> to vector<128x128xf32>
    %110 = arith.addf %108, %109 : vector<128x128xf32>
    %cst_22 = arith.constant 2.000000e+01 : f32
    %111 = vector.broadcast %cst_22 : f32 to vector<128x128xf32>
    %112 = arith.minimumf %110, %111 : vector<128x128xf32>
    %113 = math.exp %112 : vector<128x128xf32>
    %cst_23 = arith.constant 1.000000e+00 : f32
    %114 = vector.broadcast %cst_23 : f32 to vector<128x128xf32>
    %115 = arith.addf %114, %113 : vector<128x128xf32>
    %116 = arith.mulf %115, %115 : vector<128x128xf32>
    %cst_24 = arith.constant 1.000000e+00 : f32
    %117 = vector.broadcast %cst_24 : f32 to vector<128x128xf32>
    %118 = arith.subf %116, %117 : vector<128x128xf32>
    %119 = arith.mulf %110, %118 : vector<128x128xf32>
    %cst_25 = arith.constant 1.000000e+00 : f32
    %120 = vector.broadcast %cst_25 : f32 to vector<128x128xf32>
    %121 = arith.addf %116, %120 : vector<128x128xf32>
    %122 = tpu.reciprocal %121 {approx = true} : vector<128x128xf32> -> vector<128x128xf32>
    %123 = arith.mulf %119, %122 : vector<128x128xf32>
    %124 = arith.truncf %123 : vector<128x128xf32> to vector<128x128xbf16>
    %c0_26 = arith.constant 0 : index
    %c0_27 = arith.constant 0 : index
    %125 = vector.load %arg5[%c0_26, %c0_27] : memref<128x128xbf16, #tpu.memory_space<vmem>>, vector<128x128xbf16>
    tpu.vector_store %arg5[%c0_26, %c0_27], %124 {strides = array<i32>} : memref<128x128xbf16, #tpu.memory_space<vmem>>, vector<128x128xbf16>,
    return
  }
  func.func @transform_0(%arg0: i32) -> (i32, i32) {
    %c0_i32 = arith.constant 0 : i32
    %c0_i32_0 = arith.constant 0 : i32
    return %arg0, %c0_i32 : i32, i32
  }
  func.func @transform_1(%arg0: i32) -> (i32, i32) {
    %c0_i32 = arith.constant 0 : i32
    %c0_i32_0 = arith.constant 0 : i32
    %c0_i32_1 = arith.constant 0 : i32
    return %c0_i32, %c0_i32_0 : i32, i32
  }
  func.func @transform_2(%arg0: i32) -> (i32, i32) {
    %c0_i32 = arith.constant 0 : i32
    %c0_i32_0 = arith.constant 0 : i32
    %c0_i32_1 = arith.constant 0 : i32
    return %c0_i32, %c0_i32_0 : i32, i32
  }
  func.func @transform_3(%arg0: i32) -> (i32, i32) {
    %c0_i32 = arith.constant 0 : i32
    %c0_i32_0 = arith.constant 0 : i32
    %c0_i32_1 = arith.constant 0 : i32
    return %c0_i32, %c0_i32_0 : i32, i32
  }
  func.func @transform_4(%arg0: i32) -> (i32, i32) {
    %c0_i32 = arith.constant 0 : i32
    %c0_i32_0 = arith.constant 0 : i32
    return %arg0, %c0_i32 : i32, i32
  }
}

module attributes {stable_mosaic.version = 11 : i64} {
  func.func @_gemm_kernel(%arg0: i32, %arg1: memref<128x128xbf16, #tpu.memory_space<vmem>>, %arg2: memref<128x128xbf16, #tpu.memory_space<vmem>>, %arg3: memref<4x128xf32, #tpu.memory_space<vmem>>, %arg4: memref<128x128xbf16, #tpu.memory_space<vmem>>) attributes {dimension_semantics = [#tpu.dimension_semantics<parallel>], iteration_bounds = array<i64: 2>, scalar_prefetch = 0 : i64, scratch_operands = 0 : i64, tpu.core_type = #tpu.core_type<tc>, window_params = [{transform_indices = @transform_0, window_bounds = array<i64: 128, 128>}, {pipeline_mode = #tpu.pipeline_mode<synchronous>, transform_indices = @transform_1, window_bounds = array<i64: 128, 128>}, {pipeline_mode = #tpu.pipeline_mode<synchronous>, transform_indices = @transform_2, window_bounds = array<i64: 4, 128>}, {transform_indices = @transform_3, window_bounds = array<i64: 128, 128>}]} {
    %c0 = arith.constant 0 : index
    %c0_0 = arith.constant 0 : index
    %0 = vector.load %arg1[%c0, %c0_0] : memref<128x128xbf16, #tpu.memory_space<vmem>>, vector<128x128xbf16>
    %c0_1 = arith.constant 0 : index
    %c0_2 = arith.constant 0 : index
    %1 = vector.load %arg2[%c0_1, %c0_2] : memref<128x128xbf16, #tpu.memory_space<vmem>>, vector<128x128xbf16>
    %cst = arith.constant dense<0.000000e+00> : vector<128x128xf32>
    %2 = tpu.matmul %0, %1, %cst {dimension_numbers = #tpu.dot_dimension_numbers<[1], [0], [0], [1], [0, 0, 1, 1], [], []>} : vector<128x128xbf16>, vector<128x128xbf16>, vector<128x128xf32> -> vector<128x128xf32>
    %c0_3 = arith.constant 0 : index
    %c0_4 = arith.constant 0 : index
    %3 = vector.load %arg3[%c0_3, %c0_4] : memref<4x128xf32, #tpu.memory_space<vmem>>, vector<4x128xf32>
    %4 = vector.extract_strided_slice %3 {offsets = [0, 0], sizes = [1, 128], strides = [1, 1]} : vector<4x128xf32> to vector<1x128xf32>
    %5 = vector.broadcast %4 : vector<1x128xf32> to vector<128x128xf32>
    %6 = arith.addf %2, %5 : vector<128x128xf32>
    %cst_5 = arith.constant 2.000000e+01 : f32
    %7 = vector.broadcast %cst_5 : f32 to vector<128x128xf32>
    %8 = arith.minimumf %6, %7 : vector<128x128xf32>
    %9 = math.exp %8 : vector<128x128xf32>
    %cst_6 = arith.constant 1.000000e+00 : f32
    %10 = vector.broadcast %cst_6 : f32 to vector<128x128xf32>
    %11 = arith.addf %10, %9 : vector<128x128xf32>
    %12 = arith.mulf %11, %11 : vector<128x128xf32>
    %cst_7 = arith.constant 1.000000e+00 : f32
    %13 = vector.broadcast %cst_7 : f32 to vector<128x128xf32>
    %14 = arith.subf %12, %13 : vector<128x128xf32>
    %15 = arith.mulf %6, %14 : vector<128x128xf32>
    %cst_8 = arith.constant 1.000000e+00 : f32
    %16 = vector.broadcast %cst_8 : f32 to vector<128x128xf32>
    %17 = arith.addf %12, %16 : vector<128x128xf32>
    %18 = tpu.reciprocal %17 {approx = true} : vector<128x128xf32> -> vector<128x128xf32>
    %19 = arith.mulf %15, %18 : vector<128x128xf32>
    %20 = arith.truncf %19 : vector<128x128xf32> to vector<128x128xbf16>
    %c0_9 = arith.constant 0 : index
    %c0_10 = arith.constant 0 : index
    %21 = vector.load %arg4[%c0_9, %c0_10] : memref<128x128xbf16, #tpu.memory_space<vmem>>, vector<128x128xbf16>
    tpu.vector_store %arg4[%c0_9, %c0_10], %20 {strides = array<i32>} : memref<128x128xbf16, #tpu.memory_space<vmem>>, vector<128x128xbf16>,
    return
  }
  func.func @transform_0(%arg0: i32) -> (i32, i32) {
    %c0_i32 = arith.constant 0 : i32
    %c0_i32_0 = arith.constant 0 : i32
    return %arg0, %c0_i32 : i32, i32
  }
  func.func @transform_1(%arg0: i32) -> (i32, i32) {
    %c0_i32 = arith.constant 0 : i32
    %c0_i32_0 = arith.constant 0 : i32
    %c0_i32_1 = arith.constant 0 : i32
    return %c0_i32, %c0_i32_0 : i32, i32
  }
  func.func @transform_2(%arg0: i32) -> (i32, i32) {
    %c0_i32 = arith.constant 0 : i32
    %c0_i32_0 = arith.constant 0 : i32
    %c0_i32_1 = arith.constant 0 : i32
    return %c0_i32, %c0_i32_0 : i32, i32
  }
  func.func @transform_3(%arg0: i32) -> (i32, i32) {
    %c0_i32 = arith.constant 0 : i32
    %c0_i32_0 = arith.constant 0 : i32
    return %arg0, %c0_i32 : i32, i32
  }
}

module attributes {stable_mosaic.version = 11 : i64} {
  func.func @_gemm_kernel(%arg0: i32, %arg1: memref<80x4xf32, #tpu.memory_space<vmem>>, %arg2: memref<4x128xbf16, #tpu.memory_space<vmem>>, %arg3: memref<4x128xf32, #tpu.memory_space<vmem>>, %arg4: memref<80x128xbf16, #tpu.memory_space<vmem>>) attributes {dimension_semantics = [#tpu.dimension_semantics<parallel>], iteration_bounds = array<i64: 2>, scalar_prefetch = 0 : i64, scratch_operands = 0 : i64, tpu.core_type = #tpu.core_type<tc>, window_params = [{transform_indices = @transform_0, window_bounds = array<i64: 80, 4>}, {pipeline_mode = #tpu.pipeline_mode<synchronous>, transform_indices = @transform_1, window_bounds = array<i64: 4, 128>}, {pipeline_mode = #tpu.pipeline_mode<synchronous>, transform_indices = @transform_2, window_bounds = array<i64: 4, 128>}, {transform_indices = @transform_3, window_bounds = array<i64: 80, 128>}]} {
    %c0 = arith.constant 0 : index
    %c0_0 = arith.constant 0 : index
    %0 = vector.load %arg1[%c0, %c0_0] : memref<80x4xf32, #tpu.memory_space<vmem>>, vector<80x4xf32>
    %1 = arith.truncf %0 : vector<80x4xf32> to vector<80x4xbf16>
    %c0_1 = arith.constant 0 : index
    %c0_2 = arith.constant 0 : index
    %2 = vector.load %arg2[%c0_1, %c0_2] : memref<4x128xbf16, #tpu.memory_space<vmem>>, vector<4x128xbf16>
    %cst = arith.constant dense<0.000000e+00> : vector<80x128xf32>
    %3 = tpu.matmul %1, %2, %cst {dimension_numbers = #tpu.dot_dimension_numbers<[1], [0], [0], [1], [0, 0, 1, 1], [], []>} : vector<80x4xbf16>, vector<4x128xbf16>, vector<80x128xf32> -> vector<80x128xf32>
    %c0_3 = arith.constant 0 : index
    %c0_4 = arith.constant 0 : index
    %4 = vector.load %arg3[%c0_3, %c0_4] : memref<4x128xf32, #tpu.memory_space<vmem>>, vector<4x128xf32>
    %5 = vector.extract_strided_slice %4 {offsets = [0, 0], sizes = [1, 128], strides = [1, 1]} : vector<4x128xf32> to vector<1x128xf32>
    %6 = vector.broadcast %5 : vector<1x128xf32> to vector<80x128xf32>
    %7 = arith.addf %3, %6 : vector<80x128xf32>
    %cst_5 = arith.constant 2.000000e+01 : f32
    %8 = vector.broadcast %cst_5 : f32 to vector<80x128xf32>
    %9 = arith.minimumf %7, %8 : vector<80x128xf32>
    %10 = math.exp %9 : vector<80x128xf32>
    %cst_6 = arith.constant 1.000000e+00 : f32
    %11 = vector.broadcast %cst_6 : f32 to vector<80x128xf32>
    %12 = arith.addf %11, %10 : vector<80x128xf32>
    %13 = arith.mulf %12, %12 : vector<80x128xf32>
    %cst_7 = arith.constant 1.000000e+00 : f32
    %14 = vector.broadcast %cst_7 : f32 to vector<80x128xf32>
    %15 = arith.subf %13, %14 : vector<80x128xf32>
    %16 = arith.mulf %7, %15 : vector<80x128xf32>
    %cst_8 = arith.constant 1.000000e+00 : f32
    %17 = vector.broadcast %cst_8 : f32 to vector<80x128xf32>
    %18 = arith.addf %13, %17 : vector<80x128xf32>
    %19 = tpu.reciprocal %18 {approx = true} : vector<80x128xf32> -> vector<80x128xf32>
    %20 = arith.mulf %16, %19 : vector<80x128xf32>
    %21 = arith.truncf %20 : vector<80x128xf32> to vector<80x128xbf16>
    %c0_9 = arith.constant 0 : index
    %c0_10 = arith.constant 0 : index
    %22 = vector.load %arg4[%c0_9, %c0_10] : memref<80x128xbf16, #tpu.memory_space<vmem>>, vector<80x128xbf16>
    tpu.vector_store %arg4[%c0_9, %c0_10], %21 {strides = array<i32>} : memref<80x128xbf16, #tpu.memory_space<vmem>>, vector<80x128xbf16>,
    return
  }
  func.func @transform_0(%arg0: i32) -> (i32, i32) {
    %c0_i32 = arith.constant 0 : i32
    %c0_i32_0 = arith.constant 0 : i32
    return %arg0, %c0_i32 : i32, i32
  }
  func.func @transform_1(%arg0: i32) -> (i32, i32) {
    %c0_i32 = arith.constant 0 : i32
    %c0_i32_0 = arith.constant 0 : i32
    %c0_i32_1 = arith.constant 0 : i32
    return %c0_i32, %c0_i32_0 : i32, i32
  }
  func.func @transform_2(%arg0: i32) -> (i32, i32) {
    %c0_i32 = arith.constant 0 : i32
    %c0_i32_0 = arith.constant 0 : i32
    %c0_i32_1 = arith.constant 0 : i32
    return %c0_i32, %c0_i32_0 : i32, i32
  }
  func.func @transform_3(%arg0: i32) -> (i32, i32) {
    %c0_i32 = arith.constant 0 : i32
    %c0_i32_0 = arith.constant 0 : i32
    return %arg0, %c0_i32 : i32, i32
  }
}

module attributes {stable_mosaic.version = 11 : i64} {
  func.func @_conv_kernel(%arg0: i32, %arg1: memref<128x128xbf16, #tpu.memory_space<vmem>>, %arg2: memref<72x128xbf16, #tpu.memory_space<vmem>>, %arg3: memref<128x9xf32, #tpu.memory_space<vmem>>, %arg4: memref<4x128xf32, #tpu.memory_space<vmem>>, %arg5: memref<128x128xbf16, #tpu.memory_space<vmem>>) attributes {dimension_semantics = [#tpu.dimension_semantics<parallel>], iteration_bounds = array<i64: 2>, scalar_prefetch = 0 : i64, scratch_operands = 0 : i64, tpu.core_type = #tpu.core_type<tc>, window_params = [{transform_indices = @transform_0, window_bounds = array<i64: 128, 128>}, {pipeline_mode = #tpu.pipeline_mode<synchronous>, transform_indices = @transform_1, window_bounds = array<i64: 72, 128>}, {pipeline_mode = #tpu.pipeline_mode<synchronous>, transform_indices = @transform_2, window_bounds = array<i64: 128, 9>}, {pipeline_mode = #tpu.pipeline_mode<synchronous>, transform_indices = @transform_3, window_bounds = array<i64: 4, 128>}, {transform_indices = @transform_4, window_bounds = array<i64: 128, 128>}]} {
    %c0 = arith.constant 0 : index
    %c0_0 = arith.constant 0 : index
    %0 = vector.load %arg1[%c0, %c0_0] : memref<128x128xbf16, #tpu.memory_space<vmem>>, vector<128x128xbf16>
    %1 = vector.extract_strided_slice %0 {offsets = [0, 0], sizes = [128, 8], strides = [1, 1]} : vector<128x128xbf16> to vector<128x8xbf16>
    %2 = arith.extf %1 : vector<128x8xbf16> to vector<128x8xf32>
    %cst = arith.constant 0.000000e+00 : f32
    %3 = vector.broadcast %cst : f32 to vector<9x8xf32>
    %4 = tpu.concatenate %3, %2, %3 in 0 : vector<9x8xf32>, vector<128x8xf32>, vector<9x8xf32> -> vector<146x8xf32>
    %c0_1 = arith.constant 0 : index
    %c0_2 = arith.constant 0 : index
    %5 = vector.load %arg2[%c0_1, %c0_2] : memref<72x128xbf16, #tpu.memory_space<vmem>>, vector<72x128xbf16>
    %c0_3 = arith.constant 0 : index
    %c0_4 = arith.constant 0 : index
    %6 = vector.load %arg3[%c0_3, %c0_4] : memref<128x9xf32, #tpu.memory_space<vmem>>, vector<128x9xf32>
    %cst_5 = arith.constant 0.000000e+00 : f32
    %7 = vector.broadcast %cst_5 : f32 to vector<128x128xf32>
    %8 = vector.extract_strided_slice %4 {offsets = [0, 0], sizes = [128, 8], strides = [1, 1]} : vector<146x8xf32> to vector<128x8xf32>
    %9 = vector.extract_strided_slice %6 {offsets = [0, 0], sizes = [128, 1], strides = [1, 1]} : vector<128x9xf32> to vector<128x1xf32>
    %10 = vector.broadcast %9 : vector<128x1xf32> to vector<128x8xf32>
    %11 = arith.mulf %8, %10 : vector<128x8xf32>
    %12 = arith.truncf %11 : vector<128x8xf32> to vector<128x8xbf16>
    %13 = vector.extract_strided_slice %5 {offsets = [0, 0], sizes = [8, 128], strides = [1, 1]} : vector<72x128xbf16> to vector<8x128xbf16>
    %cst_6 = arith.constant dense<0.000000e+00> : vector<128x128xf32>
    %14 = tpu.matmul %12, %13, %cst_6 {dimension_numbers = #tpu.dot_dimension_numbers<[1], [0], [0], [1], [0, 0, 1, 1], [], []>} : vector<128x8xbf16>, vector<8x128xbf16>, vector<128x128xf32> -> vector<128x128xf32>
    %15 = arith.addf %7, %14 : vector<128x128xf32>
    %16 = vector.extract_strided_slice %4 {offsets = [1, 0], sizes = [128, 8], strides = [1, 1]} : vector<146x8xf32> to vector<128x8xf32>
    %17 = vector.extract_strided_slice %6 {offsets = [0, 1], sizes = [128, 1], strides = [1, 1]} : vector<128x9xf32> to vector<128x1xf32>
    %18 = vector.broadcast %17 : vector<128x1xf32> to vector<128x8xf32>
    %19 = arith.mulf %16, %18 : vector<128x8xf32>
    %20 = arith.truncf %19 : vector<128x8xf32> to vector<128x8xbf16>
    %21 = vector.extract_strided_slice %5 {offsets = [8, 0], sizes = [8, 128], strides = [1, 1]} : vector<72x128xbf16> to vector<8x128xbf16>
    %cst_7 = arith.constant dense<0.000000e+00> : vector<128x128xf32>
    %22 = tpu.matmul %20, %21, %cst_7 {dimension_numbers = #tpu.dot_dimension_numbers<[1], [0], [0], [1], [0, 0, 1, 1], [], []>} : vector<128x8xbf16>, vector<8x128xbf16>, vector<128x128xf32> -> vector<128x128xf32>
    %23 = arith.addf %15, %22 : vector<128x128xf32>
    %24 = vector.extract_strided_slice %4 {offsets = [2, 0], sizes = [128, 8], strides = [1, 1]} : vector<146x8xf32> to vector<128x8xf32>
    %25 = vector.extract_strided_slice %6 {offsets = [0, 2], sizes = [128, 1], strides = [1, 1]} : vector<128x9xf32> to vector<128x1xf32>
    %26 = vector.broadcast %25 : vector<128x1xf32> to vector<128x8xf32>
    %27 = arith.mulf %24, %26 : vector<128x8xf32>
    %28 = arith.truncf %27 : vector<128x8xf32> to vector<128x8xbf16>
    %29 = vector.extract_strided_slice %5 {offsets = [16, 0], sizes = [8, 128], strides = [1, 1]} : vector<72x128xbf16> to vector<8x128xbf16>
    %cst_8 = arith.constant dense<0.000000e+00> : vector<128x128xf32>
    %30 = tpu.matmul %28, %29, %cst_8 {dimension_numbers = #tpu.dot_dimension_numbers<[1], [0], [0], [1], [0, 0, 1, 1], [], []>} : vector<128x8xbf16>, vector<8x128xbf16>, vector<128x128xf32> -> vector<128x128xf32>
    %31 = arith.addf %23, %30 : vector<128x128xf32>
    %32 = vector.extract_strided_slice %4 {offsets = [8, 0], sizes = [128, 8], strides = [1, 1]} : vector<146x8xf32> to vector<128x8xf32>
    %33 = vector.extract_strided_slice %6 {offsets = [0, 3], sizes = [128, 1], strides = [1, 1]} : vector<128x9xf32> to vector<128x1xf32>
    %34 = vector.broadcast %33 : vector<128x1xf32> to vector<128x8xf32>
    %35 = arith.mulf %32, %34 : vector<128x8xf32>
    %36 = arith.truncf %35 : vector<128x8xf32> to vector<128x8xbf16>
    %37 = vector.extract_strided_slice %5 {offsets = [24, 0], sizes = [8, 128], strides = [1, 1]} : vector<72x128xbf16> to vector<8x128xbf16>
    %cst_9 = arith.constant dense<0.000000e+00> : vector<128x128xf32>
    %38 = tpu.matmul %36, %37, %cst_9 {dimension_numbers = #tpu.dot_dimension_numbers<[1], [0], [0], [1], [0, 0, 1, 1], [], []>} : vector<128x8xbf16>, vector<8x128xbf16>, vector<128x128xf32> -> vector<128x128xf32>
    %39 = arith.addf %31, %38 : vector<128x128xf32>
    %40 = vector.extract_strided_slice %4 {offsets = [9, 0], sizes = [128, 8], strides = [1, 1]} : vector<146x8xf32> to vector<128x8xf32>
    %41 = vector.extract_strided_slice %6 {offsets = [0, 4], sizes = [128, 1], strides = [1, 1]} : vector<128x9xf32> to vector<128x1xf32>
    %42 = vector.broadcast %41 : vector<128x1xf32> to vector<128x8xf32>
    %43 = arith.mulf %40, %42 : vector<128x8xf32>
    %44 = arith.truncf %43 : vector<128x8xf32> to vector<128x8xbf16>
    %45 = vector.extract_strided_slice %5 {offsets = [32, 0], sizes = [8, 128], strides = [1, 1]} : vector<72x128xbf16> to vector<8x128xbf16>
    %cst_10 = arith.constant dense<0.000000e+00> : vector<128x128xf32>
    %46 = tpu.matmul %44, %45, %cst_10 {dimension_numbers = #tpu.dot_dimension_numbers<[1], [0], [0], [1], [0, 0, 1, 1], [], []>} : vector<128x8xbf16>, vector<8x128xbf16>, vector<128x128xf32> -> vector<128x128xf32>
    %47 = arith.addf %39, %46 : vector<128x128xf32>
    %48 = vector.extract_strided_slice %4 {offsets = [10, 0], sizes = [128, 8], strides = [1, 1]} : vector<146x8xf32> to vector<128x8xf32>
    %49 = vector.extract_strided_slice %6 {offsets = [0, 5], sizes = [128, 1], strides = [1, 1]} : vector<128x9xf32> to vector<128x1xf32>
    %50 = vector.broadcast %49 : vector<128x1xf32> to vector<128x8xf32>
    %51 = arith.mulf %48, %50 : vector<128x8xf32>
    %52 = arith.truncf %51 : vector<128x8xf32> to vector<128x8xbf16>
    %53 = vector.extract_strided_slice %5 {offsets = [40, 0], sizes = [8, 128], strides = [1, 1]} : vector<72x128xbf16> to vector<8x128xbf16>
    %cst_11 = arith.constant dense<0.000000e+00> : vector<128x128xf32>
    %54 = tpu.matmul %52, %53, %cst_11 {dimension_numbers = #tpu.dot_dimension_numbers<[1], [0], [0], [1], [0, 0, 1, 1], [], []>} : vector<128x8xbf16>, vector<8x128xbf16>, vector<128x128xf32> -> vector<128x128xf32>
    %55 = arith.addf %47, %54 : vector<128x128xf32>
    %56 = vector.extract_strided_slice %4 {offsets = [16, 0], sizes = [128, 8], strides = [1, 1]} : vector<146x8xf32> to vector<128x8xf32>
    %57 = vector.extract_strided_slice %6 {offsets = [0, 6], sizes = [128, 1], strides = [1, 1]} : vector<128x9xf32> to vector<128x1xf32>
    %58 = vector.broadcast %57 : vector<128x1xf32> to vector<128x8xf32>
    %59 = arith.mulf %56, %58 : vector<128x8xf32>
    %60 = arith.truncf %59 : vector<128x8xf32> to vector<128x8xbf16>
    %61 = vector.extract_strided_slice %5 {offsets = [48, 0], sizes = [8, 128], strides = [1, 1]} : vector<72x128xbf16> to vector<8x128xbf16>
    %cst_12 = arith.constant dense<0.000000e+00> : vector<128x128xf32>
    %62 = tpu.matmul %60, %61, %cst_12 {dimension_numbers = #tpu.dot_dimension_numbers<[1], [0], [0], [1], [0, 0, 1, 1], [], []>} : vector<128x8xbf16>, vector<8x128xbf16>, vector<128x128xf32> -> vector<128x128xf32>
    %63 = arith.addf %55, %62 : vector<128x128xf32>
    %64 = vector.extract_strided_slice %4 {offsets = [17, 0], sizes = [128, 8], strides = [1, 1]} : vector<146x8xf32> to vector<128x8xf32>
    %65 = vector.extract_strided_slice %6 {offsets = [0, 7], sizes = [128, 1], strides = [1, 1]} : vector<128x9xf32> to vector<128x1xf32>
    %66 = vector.broadcast %65 : vector<128x1xf32> to vector<128x8xf32>
    %67 = arith.mulf %64, %66 : vector<128x8xf32>
    %68 = arith.truncf %67 : vector<128x8xf32> to vector<128x8xbf16>
    %69 = vector.extract_strided_slice %5 {offsets = [56, 0], sizes = [8, 128], strides = [1, 1]} : vector<72x128xbf16> to vector<8x128xbf16>
    %cst_13 = arith.constant dense<0.000000e+00> : vector<128x128xf32>
    %70 = tpu.matmul %68, %69, %cst_13 {dimension_numbers = #tpu.dot_dimension_numbers<[1], [0], [0], [1], [0, 0, 1, 1], [], []>} : vector<128x8xbf16>, vector<8x128xbf16>, vector<128x128xf32> -> vector<128x128xf32>
    %71 = arith.addf %63, %70 : vector<128x128xf32>
    %72 = vector.extract_strided_slice %4 {offsets = [18, 0], sizes = [128, 8], strides = [1, 1]} : vector<146x8xf32> to vector<128x8xf32>
    %73 = vector.extract_strided_slice %6 {offsets = [0, 8], sizes = [128, 1], strides = [1, 1]} : vector<128x9xf32> to vector<128x1xf32>
    %74 = vector.broadcast %73 : vector<128x1xf32> to vector<128x8xf32>
    %75 = arith.mulf %72, %74 : vector<128x8xf32>
    %76 = arith.truncf %75 : vector<128x8xf32> to vector<128x8xbf16>
    %77 = vector.extract_strided_slice %5 {offsets = [64, 0], sizes = [8, 128], strides = [1, 1]} : vector<72x128xbf16> to vector<8x128xbf16>
    %cst_14 = arith.constant dense<0.000000e+00> : vector<128x128xf32>
    %78 = tpu.matmul %76, %77, %cst_14 {dimension_numbers = #tpu.dot_dimension_numbers<[1], [0], [0], [1], [0, 0, 1, 1], [], []>} : vector<128x8xbf16>, vector<8x128xbf16>, vector<128x128xf32> -> vector<128x128xf32>
    %79 = arith.addf %71, %78 : vector<128x128xf32>
    %c0_15 = arith.constant 0 : index
    %c0_16 = arith.constant 0 : index
    %80 = vector.load %arg4[%c0_15, %c0_16] : memref<4x128xf32, #tpu.memory_space<vmem>>, vector<4x128xf32>
    %81 = vector.extract_strided_slice %80 {offsets = [0, 0], sizes = [1, 128], strides = [1, 1]} : vector<4x128xf32> to vector<1x128xf32>
    %82 = vector.broadcast %81 : vector<1x128xf32> to vector<128x128xf32>
    %83 = arith.addf %79, %82 : vector<128x128xf32>
    %84 = arith.truncf %83 : vector<128x128xf32> to vector<128x128xbf16>
    %c0_17 = arith.constant 0 : index
    %c0_18 = arith.constant 0 : index
    %85 = vector.load %arg5[%c0_17, %c0_18] : memref<128x128xbf16, #tpu.memory_space<vmem>>, vector<128x128xbf16>
    tpu.vector_store %arg5[%c0_17, %c0_18], %84 {strides = array<i32>} : memref<128x128xbf16, #tpu.memory_space<vmem>>, vector<128x128xbf16>,
    return
  }
  func.func @transform_0(%arg0: i32) -> (i32, i32) {
    %c0_i32 = arith.constant 0 : i32
    %c0_i32_0 = arith.constant 0 : i32
    return %arg0, %c0_i32 : i32, i32
  }
  func.func @transform_1(%arg0: i32) -> (i32, i32) {
    %c0_i32 = arith.constant 0 : i32
    %c0_i32_0 = arith.constant 0 : i32
    %c0_i32_1 = arith.constant 0 : i32
    return %c0_i32, %c0_i32_0 : i32, i32
  }
  func.func @transform_2(%arg0: i32) -> (i32, i32) {
    %c0_i32 = arith.constant 0 : i32
    %c0_i32_0 = arith.constant 0 : i32
    %c0_i32_1 = arith.constant 0 : i32
    return %c0_i32, %c0_i32_0 : i32, i32
  }
  func.func @transform_3(%arg0: i32) -> (i32, i32) {
    %c0_i32 = arith.constant 0 : i32
    %c0_i32_0 = arith.constant 0 : i32
    %c0_i32_1 = arith.constant 0 : i32
    return %c0_i32, %c0_i32_0 : i32, i32
  }
  func.func @transform_4(%arg0: i32) -> (i32, i32) {
    %c0_i32 = arith.constant 0 : i32
    %c0_i32_0 = arith.constant 0 : i32
    return %arg0, %c0_i32 : i32, i32
  }
}

module attributes {stable_mosaic.version = 11 : i64} {
  func.func @_combine_kernel(%arg0: i32, %arg1: memref<128x128xbf16, #tpu.memory_space<vmem>>, %arg2: memref<128x128xf32, #tpu.memory_space<vmem>>, %arg3: memref<128x128xbf16, #tpu.memory_space<vmem>>, %arg4: memref<128x128xbf16, #tpu.memory_space<vmem>>, %arg5: memref<8x128xf32, #tpu.memory_space<vmem>>, %arg6: memref<128x128xbf16, #tpu.memory_space<vmem>>) attributes {dimension_semantics = [#tpu.dimension_semantics<parallel>], iteration_bounds = array<i64: 2>, scalar_prefetch = 0 : i64, scratch_operands = 0 : i64, tpu.core_type = #tpu.core_type<tc>, window_params = [{transform_indices = @transform_0, window_bounds = array<i64: 128, 128>}, {transform_indices = @transform_1, window_bounds = array<i64: 128, 128>}, {transform_indices = @transform_2, window_bounds = array<i64: 128, 128>}, {pipeline_mode = #tpu.pipeline_mode<synchronous>, transform_indices = @transform_3, window_bounds = array<i64: 128, 128>}, {pipeline_mode = #tpu.pipeline_mode<synchronous>, transform_indices = @transform_4, window_bounds = array<i64: 8, 128>}, {transform_indices = @transform_5, window_bounds = array<i64: 128, 128>}]} {
    %c0 = arith.constant 0 : index
    %c0_0 = arith.constant 0 : index
    %0 = vector.load %arg5[%c0, %c0_0] : memref<8x128xf32, #tpu.memory_space<vmem>>, vector<8x128xf32>
    %1 = vector.extract_strided_slice %0 {offsets = [0, 0], sizes = [1, 128], strides = [1, 1]} : vector<8x128xf32> to vector<1x128xf32>
    %2 = vector.extract_strided_slice %0 {offsets = [1, 0], sizes = [1, 128], strides = [1, 1]} : vector<8x128xf32> to vector<1x128xf32>
    %3 = vector.extract_strided_slice %0 {offsets = [2, 0], sizes = [1, 128], strides = [1, 1]} : vector<8x128xf32> to vector<1x128xf32>
    %4 = vector.extract_strided_slice %0 {offsets = [3, 0], sizes = [1, 128], strides = [1, 1]} : vector<8x128xf32> to vector<1x128xf32>
    %c0_1 = arith.constant 0 : index
    %c0_2 = arith.constant 0 : index
    %5 = vector.load %arg1[%c0_1, %c0_2] : memref<128x128xbf16, #tpu.memory_space<vmem>>, vector<128x128xbf16>
    %6 = arith.extf %5 : vector<128x128xbf16> to vector<128x128xf32>
    %c0_3 = arith.constant 0 : index
    %c0_4 = arith.constant 0 : index
    %7 = vector.load %arg2[%c0_3, %c0_4] : memref<128x128xf32, #tpu.memory_space<vmem>>, vector<128x128xf32>
    %8 = arith.truncf %7 : vector<128x128xf32> to vector<128x128xbf16>
    %c0_5 = arith.constant 0 : index
    %c0_6 = arith.constant 0 : index
    %9 = vector.load %arg4[%c0_5, %c0_6] : memref<128x128xbf16, #tpu.memory_space<vmem>>, vector<128x128xbf16>
    %cst = arith.constant dense<0.000000e+00> : vector<128x128xf32>
    %10 = tpu.matmul %8, %9, %cst {dimension_numbers = #tpu.dot_dimension_numbers<[1], [0], [0], [1], [0, 0, 1, 1], [], []>} : vector<128x128xbf16>, vector<128x128xbf16>, vector<128x128xf32> -> vector<128x128xf32>
    %11 = arith.addf %6, %10 : vector<128x128xf32>
    %12 = vector.extract_strided_slice %0 {offsets = [4, 0], sizes = [1, 128], strides = [1, 1]} : vector<8x128xf32> to vector<1x128xf32>
    %13 = vector.broadcast %12 : vector<1x128xf32> to vector<128x128xf32>
    %14 = arith.addf %11, %13 : vector<128x128xf32>
    %15 = vector.broadcast %3 : vector<1x128xf32> to vector<128x128xf32>
    %16 = arith.mulf %14, %15 : vector<128x128xf32>
    %cst_7 = arith.constant dense<0.000000e+00> : vector<128xf32>
    %17 = vector.multi_reduction <add>, %16, %cst_7 [1] : vector<128x128xf32> to vector<128xf32>
    %18 = vector.shape_cast %17 : vector<128xf32> to vector<128x1xf32>
    %cst_8 = arith.constant 2.500000e-01 : f32
    %19 = vector.broadcast %cst_8 : f32 to vector<128x1xf32>
    %20 = arith.mulf %18, %19 : vector<128x1xf32>
    %21 = vector.broadcast %20 : vector<128x1xf32> to vector<128x128xf32>
    %22 = arith.subf %14, %21 : vector<128x128xf32>
    %23 = vector.broadcast %3 : vector<1x128xf32> to vector<128x128xf32>
    %24 = arith.mulf %22, %23 : vector<128x128xf32>
    %25 = arith.mulf %24, %24 : vector<128x128xf32>
    %cst_9 = arith.constant dense<0.000000e+00> : vector<128xf32>
    %26 = vector.multi_reduction <add>, %25, %cst_9 [1] : vector<128x128xf32> to vector<128xf32>
    %27 = vector.shape_cast %26 : vector<128xf32> to vector<128x1xf32>
    %cst_10 = arith.constant 2.500000e-01 : f32
    %28 = vector.broadcast %cst_10 : f32 to vector<128x1xf32>
    %29 = arith.mulf %27, %28 : vector<128x1xf32>
    %cst_11 = arith.constant 9.99999974E-6 : f32
    %30 = vector.broadcast %cst_11 : f32 to vector<128x1xf32>
    %31 = arith.addf %29, %30 : vector<128x1xf32>
    %32 = math.rsqrt %31 : vector<128x1xf32>
    %33 = vector.broadcast %4 : vector<1x128xf32> to vector<128x128xf32>
    %34 = arith.mulf %14, %33 : vector<128x128xf32>
    %cst_12 = arith.constant dense<0.000000e+00> : vector<128xf32>
    %35 = vector.multi_reduction <add>, %34, %cst_12 [1] : vector<128x128xf32> to vector<128xf32>
    %36 = vector.shape_cast %35 : vector<128xf32> to vector<128x1xf32>
    %cst_13 = arith.constant 2.500000e-01 : f32
    %37 = vector.broadcast %cst_13 : f32 to vector<128x1xf32>
    %38 = arith.mulf %36, %37 : vector<128x1xf32>
    %39 = vector.broadcast %38 : vector<128x1xf32> to vector<128x128xf32>
    %40 = arith.subf %14, %39 : vector<128x128xf32>
    %41 = vector.broadcast %4 : vector<1x128xf32> to vector<128x128xf32>
    %42 = arith.mulf %40, %41 : vector<128x128xf32>
    %43 = arith.mulf %42, %42 : vector<128x128xf32>
    %cst_14 = arith.constant dense<0.000000e+00> : vector<128xf32>
    %44 = vector.multi_reduction <add>, %43, %cst_14 [1] : vector<128x128xf32> to vector<128xf32>
    %45 = vector.shape_cast %44 : vector<128xf32> to vector<128x1xf32>
    %cst_15 = arith.constant 2.500000e-01 : f32
    %46 = vector.broadcast %cst_15 : f32 to vector<128x1xf32>
    %47 = arith.mulf %45, %46 : vector<128x1xf32>
    %cst_16 = arith.constant 9.99999974E-6 : f32
    %48 = vector.broadcast %cst_16 : f32 to vector<128x1xf32>
    %49 = arith.addf %47, %48 : vector<128x1xf32>
    %50 = math.rsqrt %49 : vector<128x1xf32>
    %51 = vector.broadcast %20 : vector<128x1xf32> to vector<128x128xf32>
    %52 = vector.broadcast %3 : vector<1x128xf32> to vector<128x128xf32>
    %53 = arith.mulf %51, %52 : vector<128x128xf32>
    %54 = vector.broadcast %38 : vector<128x1xf32> to vector<128x128xf32>
    %55 = vector.broadcast %4 : vector<1x128xf32> to vector<128x128xf32>
    %56 = arith.mulf %54, %55 : vector<128x128xf32>
    %57 = arith.addf %53, %56 : vector<128x128xf32>
    %58 = vector.broadcast %32 : vector<128x1xf32> to vector<128x128xf32>
    %59 = vector.broadcast %3 : vector<1x128xf32> to vector<128x128xf32>
    %60 = arith.mulf %58, %59 : vector<128x128xf32>
    %61 = vector.broadcast %50 : vector<128x1xf32> to vector<128x128xf32>
    %62 = vector.broadcast %4 : vector<1x128xf32> to vector<128x128xf32>
    %63 = arith.mulf %61, %62 : vector<128x128xf32>
    %64 = arith.addf %60, %63 : vector<128x128xf32>
    %65 = arith.subf %14, %57 : vector<128x128xf32>
    %66 = arith.mulf %65, %64 : vector<128x128xf32>
    %67 = vector.broadcast %1 : vector<1x128xf32> to vector<128x128xf32>
    %68 = arith.mulf %66, %67 : vector<128x128xf32>
    %69 = vector.broadcast %2 : vector<1x128xf32> to vector<128x128xf32>
    %70 = arith.addf %68, %69 : vector<128x128xf32>
    %c0_17 = arith.constant 0 : index
    %c0_18 = arith.constant 0 : index
    %71 = vector.load %arg3[%c0_17, %c0_18] : memref<128x128xbf16, #tpu.memory_space<vmem>>, vector<128x128xbf16>
    %72 = arith.extf %71 : vector<128x128xbf16> to vector<128x128xf32>
    %cst_19 = arith.constant 2.000000e+01 : f32
    %73 = vector.broadcast %cst_19 : f32 to vector<128x128xf32>
    %74 = arith.minimumf %70, %73 : vector<128x128xf32>
    %75 = math.exp %74 : vector<128x128xf32>
    %cst_20 = arith.constant 1.000000e+00 : f32
    %76 = vector.broadcast %cst_20 : f32 to vector<128x128xf32>
    %77 = arith.addf %76, %75 : vector<128x128xf32>
    %78 = arith.mulf %77, %77 : vector<128x128xf32>
    %cst_21 = arith.constant 1.000000e+00 : f32
    %79 = vector.broadcast %cst_21 : f32 to vector<128x128xf32>
    %80 = arith.subf %78, %79 : vector<128x128xf32>
    %81 = arith.mulf %70, %80 : vector<128x128xf32>
    %cst_22 = arith.constant 1.000000e+00 : f32
    %82 = vector.broadcast %cst_22 : f32 to vector<128x128xf32>
    %83 = arith.addf %78, %82 : vector<128x128xf32>
    %84 = tpu.reciprocal %83 {approx = true} : vector<128x128xf32> -> vector<128x128xf32>
    %85 = arith.mulf %81, %84 : vector<128x128xf32>
    %86 = arith.addf %72, %85 : vector<128x128xf32>
    %87 = arith.truncf %86 : vector<128x128xf32> to vector<128x128xbf16>
    %c0_23 = arith.constant 0 : index
    %c0_24 = arith.constant 0 : index
    %88 = vector.load %arg6[%c0_23, %c0_24] : memref<128x128xbf16, #tpu.memory_space<vmem>>, vector<128x128xbf16>
    tpu.vector_store %arg6[%c0_23, %c0_24], %87 {strides = array<i32>} : memref<128x128xbf16, #tpu.memory_space<vmem>>, vector<128x128xbf16>,
    return
  }
  func.func @transform_0(%arg0: i32) -> (i32, i32) {
    %c0_i32 = arith.constant 0 : i32
    %c0_i32_0 = arith.constant 0 : i32
    return %arg0, %c0_i32 : i32, i32
  }
  func.func @transform_1(%arg0: i32) -> (i32, i32) {
    %c0_i32 = arith.constant 0 : i32
    %c0_i32_0 = arith.constant 0 : i32
    return %arg0, %c0_i32 : i32, i32
  }
  func.func @transform_2(%arg0: i32) -> (i32, i32) {
    %c0_i32 = arith.constant 0 : i32
    %c0_i32_0 = arith.constant 0 : i32
    return %arg0, %c0_i32 : i32, i32
  }
  func.func @transform_3(%arg0: i32) -> (i32, i32) {
    %c0_i32 = arith.constant 0 : i32
    %c0_i32_0 = arith.constant 0 : i32
    %c0_i32_1 = arith.constant 0 : i32
    return %c0_i32, %c0_i32_0 : i32, i32
  }
  func.func @transform_4(%arg0: i32) -> (i32, i32) {
    %c0_i32 = arith.constant 0 : i32
    %c0_i32_0 = arith.constant 0 : i32
    %c0_i32_1 = arith.constant 0 : i32
    return %c0_i32, %c0_i32_0 : i32, i32
  }
  func.func @transform_5(%arg0: i32) -> (i32, i32) {
    %c0_i32 = arith.constant 0 : i32
    %c0_i32_0 = arith.constant 0 : i32
    return %arg0, %c0_i32 : i32, i32
  }
}

</mosaic_0001>

<bundles_post_ra>
// kernel: ffcnet_forward.10
= control target key start
LH: loop header
LB: loop body
LE: loop exit
PB: predicated region body
PF: predicated region fallthrough
CT: control target
= control target key end

     0   :  { %s354_s12 = smov 0   ;;  %s380_s0 = inlined_call_operand.vmem [shape: f32[16,32], index: 0, kind: input, shape index: {}]   ;;  %s381_s1 = inlined_call_operand.vmem [shape: bf16[32,128], index: 1, kind: input, shape index: {}]   ;;  %s382_s2 = inlined_call_operand.vmem [shape: f32[4,128], index: 2, kind: input, shape index: {}]   ;;  %s383_s3 = inlined_call_operand.vmem [shape: bf16[16,128], index: 3, kind: output, shape index: {}]  }
   0x1 LB: > { %s289_s13 = sadd.s32 4294967295, %s330_s12   ;;  %p293_p0 = scmp.ge.s32.totalorder %s330_s12, 1  ;;  %s330_s12 = sphi %s354_s12, %s13_s12  }
   0x2   : > { %p136_p1 = scmp.lt.s32.totalorder %s330_s12, 3 }
   0x4   : > { %p137_p2 = pnand %p293_p0, %p136_p1 }
   0x5   : > { %v322_v0 = vld [vmem:[%s381_s1] sm:$0xff] (!%p137_p2)   ;;  %v332_v1 = vmov (!%p137_p2), 0.0   ;;  %v323_v2 = vld [vmem:[%s381_s1 + $0x8] sm:$0xff] (!%p137_p2)   ;;  %vm333_vm0 = vmmov (!%p137_p2), 0   ;;  %p158_p3 = scmp.lt.s32.totalorder (!%p137_p2), %s289_s13, 1  ;;  %vm190_vm1 = vcmask (!%p137_p2), 261120   ;;  %v174_v5 = vlaneseq (!%p137_p2) }
   0x6   : > { %140 = sbr.rel (%p137_p2) target bundleno = 236 (0xec), region = 32  ;;  %304 = vmatprep.subr.bf16.mxu0 (!%p137_p2), %v332_v1  ;;  %308 = vmatprep.mubr.msk.bf16.mxu0 (!%p137_p2), %vm333_vm0, %v332_v1  ;;  %v173_v8 = vld [vmem:[%s382_s2] sm:$0xf] (!%p137_p2) }
   0x7   : > { %305 = vmatpush3.bf16.msra.mxu0 (!%p137_p2), %v322_v0  ;;  %v175_v6 = vshrl.u32 (!%p137_p2), %v174_v5, 7 }
   0x8   : > { %306 = vmatprep.subr.bf16.mxu0 (!%p137_p2), %v332_v1 }
   0x9   : > { %v176_v7 = vsub.s32 (!%p137_p2), 0, %v175_v6 }
   0xb   : > { %307 = vmatpush3.bf16.msra.mxu0 (!%p137_p2), %v323_v2  ;;  %v177_v9 = vrot.slane (!%p137_p2), %v173_v8, %v176_v7 }
   0xd   : > { %s385_s13 = smov (!%p158_p3, %s289_s13), 1 }
   0xe   : > { %s294_s18 = sshll.u32 %s385_s13, 3  ;;  %s295_s24 = sshll.u32 %s385_s13, 2 }
   0xf   : > { %s161_s21 = scalar_lea.vmem %s380_s0, %s294_s18  ;;  %s165_s27 = scalar_lea.vmem %s383_s3, %s295_s24 }
  0x10   : > { %v167_v3 = vld [vmem:[%s161_s21] sm:$0xff] }
  0x11   : > { %v168_v4 = vpack.c.bf16 %v167_v3, %v167_v3 }
  0x13   : > { %309 = vmatmul.mubr.msk.bf16.vlgmr.msra.gmra.mrb[0].mxu0 %vm190_vm1, %v168_v4 }
  0xe6   : > { %v228_v10 = vpop.f32.mrb[0].mxu0 }
  0xe7   : > { %v229_v11 = vadd.f32 %v228_v10, %v177_v9  ;;  %v310_v12 = vpop.f32.mrb[1].mxu0 }
  0xe8   : > { %v231_v13 = vpop.f32.mrb[2].mxu0 }
  0xe9   : > { %v234_v14 = vpack.c.bf16 %v229_v11, %v229_v11  ;;  %v311_v15 = vpop.f32.mrb[3].mxu0 }
  0xeb   : > { %235 = vst [vmem:[%s165_s27] sm:$0xf] %v234_v14 }
  0xec PF: > { %s13_s12 = sadd.s32 1, %s330_s12  }
  0xed   : > { %p10_p4 = scmp.ge.s32.totalorder %s13_s12, 4  }
  0xef   :  { %12 = sbr.rel (!%p10_p4) target bundleno = 1 (0x1), region = 62 }

// kernel: ffcnet_forward.13
= control target key start
LH: loop header
LB: loop body
LE: loop exit
PB: predicated region body
PF: predicated region fallthrough
CT: control target
= control target key end

     0   :  { %s1003_s12 = smov 0   ;;  %s1168_s0 = inlined_call_operand.vmem [shape: bf16[256,128], index: 0, kind: input, shape index: {}]   ;;  %s1169_s1 = inlined_call_operand.vmem [shape: bf16[128,128], index: 1, kind: input, shape index: {}]   ;;  %s1170_s2 = inlined_call_operand.vmem [shape: f32[4,128], index: 2, kind: input, shape index: {}]   ;;  %s1171_s3 = inlined_call_operand.vmem [shape: bf16[256,128], index: 3, kind: output, shape index: {}]  }
   0x1 LB: > { %s701_s13 = sadd.s32 4294967295, %s981_s12   ;;  %p705_p0 = scmp.ge.s32.totalorder %s981_s12, 1  ;;  %s981_s12 = sphi %s1003_s12, %s13_s12  }
   0x2   : > { %p138_p1 = scmp.lt.s32.totalorder %s981_s12, 3 }
   0x4   : > { %p139_p2 = pnand %p705_p0, %p138_p1 }
   0x5   : > { %v895_v0 = vld [vmem:[%s1169_s1] sm:$0xff] (!%p139_p2)   ;;  %s706_s16 = sshll.u32 (!%p139_p2), %s701_s13, 4  ;;  %v896_v1 = vld [vmem:[%s1169_s1 + $0x8] sm:$0xff] (!%p139_p2)   ;;  %v897_v2 = vld [vmem:[%s1169_s1 + $0x10] sm:$0xff] (!%p139_p2)   ;;  %v208_v16 = vlaneseq (!%p139_p2) }
   0x6   : > { %142 = sbr.rel (%p139_p2) target bundleno = 317 (0x13d), region = 32  ;;  %p163_p3 = scmp.lt.s32.totalorder (!%p139_p2), %s706_s16, 31  ;;  %839 = vmatprep.subr.bf16.mxu0 (!%p139_p2), %v895_v0  ;;  %871 = vmatprep.subr.bf16.mxu1 (!%p139_p2), %v895_v0  ;;  %v898_v3 = vld [vmem:[%s1169_s1 + $0x18] sm:$0xff] (!%p139_p2)   ;;  %v899_v6 = vld [vmem:[%s1169_s1 + $0x20] sm:$0xff] (!%p139_p2)   ;;  %v900_v7 = vld [vmem:[%s1169_s1 + $0x28] sm:$0xff] (!%p139_p2)  }
   0x7   : > { %840 = vmatpush3.bf16.msra.mxu0 (!%p139_p2), %v895_v0  ;;  %879 = vmatpush3.bf16.msra.mxu1 (!%p139_p2), %v895_v0  ;;  %v901_v8 = vld [vmem:[%s1169_s1 + $0x30] sm:$0xff] (!%p139_p2)   ;;  %v902_v9 = vld [vmem:[%s1169_s1 + $0x38] sm:$0xff] (!%p139_p2)   ;;  %v209_v17 = vshrl.u32 (!%p139_p2), %v208_v16, 7  ;;  %v207_v19 = vld [vmem:[%s1170_s2] sm:$0xf] (!%p139_p2) }
   0x8   : > { %841 = vmatprep.subr.bf16.mxu0 (!%p139_p2), %v896_v1  ;;  %872 = vmatprep.subr.bf16.mxu1 (!%p139_p2), %v896_v1 }
   0x9   : > { %v210_v18 = vsub.s32 (!%p139_p2), 0, %v209_v17 }
   0xb   : > { %842 = vmatpush3.bf16.msra.mxu0 (!%p139_p2), %v896_v1  ;;  %880 = vmatpush3.bf16.msra.mxu1 (!%p139_p2), %v896_v1  ;;  %v1056_v20 = vrot.slane (!%p139_p2), %v207_v19, %v210_v18 }
   0xc   : > { %843 = vmatprep.subr.bf16.mxu0 (!%p139_p2), %v897_v2  ;;  %873 = vmatprep.subr.bf16.mxu1 (!%p139_p2), %v897_v2 }
   0xd   : > { %s1173_s16 = smov (!%p163_p3, %s706_s16), 31 }
   0xe   : > { %s707_s21 = sshll.u32 %s1173_s16, 2 }
   0xf   : > { %s1028_s24 = scalar_lea.vmem %s1168_s0, %s707_s21  ;;  %844 = vmatpush3.bf16.msra.mxu0 %v897_v2  ;;  %881 = vmatpush3.bf16.msra.mxu1 %v897_v2  ;;  %s1144_s13 = scalar_lea.vmem %s1171_s3, %s707_s21 }
  0x10   : > { %v903_v4 = vld [vmem:[%s1028_s24] sm:$0xff]   ;;  %845 = vmatprep.subr.bf16.mxu0 %v898_v3  ;;  %874 = vmatprep.subr.bf16.mxu1 %v898_v3  ;;  %v905_v10 = vld [vmem:[%s1028_s24 + $0x8] sm:$0xff]   ;;  %v907_v12 = vld [vmem:[%s1028_s24 + $0x10] sm:$0xff]  }
  0x11   : > { %v904_v5 = vld [vmem:[%s1028_s24 + $0x20] sm:$0xff]   ;;  %855 = vmatprep.mubr.bf16.mxu0 %v903_v4  ;;  %v906_v11 = vld [vmem:[%s1028_s24 + $0x28] sm:$0xff]   ;;  %v908_v13 = vld [vmem:[%s1028_s24 + $0x30] sm:$0xff]  }
  0x12   : > { %863 = vmatprep.mubr.bf16.mxu1 %v904_v5  ;;  %v909_v14 = vld [vmem:[%s1028_s24 + $0x18] sm:$0xff]  }
  0x13   : > { %846 = vmatpush3.bf16.msra.mxu0 %v898_v3  ;;  %882 = vmatpush3.bf16.msra.mxu1 %v898_v3  ;;  %v910_v15 = vld [vmem:[%s1028_s24 + $0x38] sm:$0xff]  }
  0x14   : > { %847 = vmatprep.subr.bf16.mxu0 %v899_v6  ;;  %875 = vmatprep.subr.bf16.mxu1 %v899_v6 }
  0x17   : > { %848 = vmatpush3.bf16.msra.mxu0 %v899_v6  ;;  %883 = vmatpush3.bf16.msra.mxu1 %v899_v6 }
  0x18   : > { %849 = vmatprep.subr.bf16.mxu0 %v900_v7  ;;  %876 = vmatprep.subr.bf16.mxu1 %v900_v7 }
  0x1b   : > { %850 = vmatpush3.bf16.msra.mxu0 %v900_v7  ;;  %884 = vmatpush3.bf16.msra.mxu1 %v900_v7 }
  0x1c   : > { %851 = vmatprep.subr.bf16.mxu0 %v901_v8  ;;  %877 = vmatprep.subr.bf16.mxu1 %v901_v8 }
  0x1f   : > { %852 = vmatpush3.bf16.msra.mxu0 %v901_v8  ;;  %885 = vmatpush3.bf16.msra.mxu1 %v901_v8 }
  0x20   : > { %853 = vmatprep.subr.bf16.mxu0 %v902_v9  ;;  %878 = vmatprep.subr.bf16.mxu1 %v902_v9 }
  0x23   : > { %854 = vmatpush3.bf16.msra.mxu0 %v902_v9  ;;  %886 = vmatpush3.bf16.msra.mxu1 %v902_v9 }
  0x26   : > { %856 = vmatmul.mubr.bf16.vlgmr.msra.gmra.mrb[0].mxu0 %v905_v10  ;;  %864 = vmatmul.mubr.bf16.vlgmr.msra.gmra.mrb[0].mxu1 %v906_v11 }
  0x27   : > { %859 = vmatprep.mubr.bf16.mxu0 %v907_v12  ;;  %867 = vmatprep.mubr.bf16.mxu1 %v908_v13 }
  0x2e   : > { %860 = vmatmul.mubr.bf16.gmra.mrb[4].mxu0 %v909_v14  ;;  %868 = vmatmul.mubr.bf16.gmra.mrb[4].mxu1 %v910_v15 }
  0xf9   : > { %v857_v21 = vpop.f32.mrb[0].mxu0  ;;  %v865_v22 = vpop.f32.mrb[0].mxu1 }
  0xfa   : > { %v1059_v23 = vadd.f32 %v857_v21, %v1056_v20  ;;  %v1062_v24 = vadd.f32 %v865_v22, %v1056_v20  ;;  %v342_v25 = vpop.f32.mrb[1].mxu0  ;;  %v374_v26 = vpop.f32.mrb[1].mxu1 }
  0xfb   : > { %v1065_v27 = vadd.f32 %v342_v25, %v1056_v20  ;;  %v1068_v28 = vadd.f32 %v374_v26, %v1056_v20  ;;  %v858_v29 = vpop.f32.mrb[2].mxu0  ;;  %v866_v30 = vpop.f32.mrb[2].mxu1 }
  0xfc   : > { %v407_v31 = vmin.f32 %v1059_v23, 20.0  ;;  %v415_v32 = vmin.f32 %v1062_v24, 20.0  ;;  %v1073_v33 = vadd.f32 %v858_v29, %v1056_v20  ;;  %v1076_v34 = vadd.f32 %v866_v30, %v1056_v20  ;;  %v345_v35 = vpop.f32.mrb[3].mxu0  ;;  %v377_v36 = vpop.f32.mrb[3].mxu1 }
  0xfd   : > { %v405_v37 = vmin.f32 %v1065_v27, 20.0  ;;  %v413_v38 = vmin.f32 %v1068_v28, 20.0  ;;  %v1081_v39 = vadd.f32 %v345_v35, %v1056_v20  ;;  %v1084_v40 = vadd.f32 %v377_v36, %v1056_v20 }
  0xfe   : > { %v425_v41 = vmul.f32 1.442695, %v407_v31  ;;  %v441_v42 = vmul.f32 1.442695, %v415_v32  ;;  %v408_v43 = vmin.f32 %v1073_v33, 20.0  ;;  %v416_v44 = vmin.f32 %v1076_v34, 20.0 }
  0xff   : > { %v421_v45 = vmul.f32 1.442695, %v405_v37  ;;  %v437_v46 = vmul.f32 1.442695, %v413_v38  ;;  %v406_v47 = vmin.f32 %v1081_v39, 20.0  ;;  %v414_v48 = vmin.f32 %v1084_v40, 20.0 }
 0x100   : > { %911 = vpow2.f32 %v425_v41  ;;  %v427_v49 = vmul.f32 1.442695, %v408_v43  ;;  %v443_v50 = vmul.f32 1.442695, %v416_v44 }
 0x101   : > { %913 = vpow2.f32 %v441_v42  ;;  %v861_v51 = vpop.f32.mrb[4].mxu0  ;;  %v869_v52 = vpop.f32.mrb[4].mxu1  ;;  %v423_v53 = vmul.f32 1.442695, %v406_v47  ;;  %v439_v58 = vmul.f32 1.442695, %v414_v48 }
 0x102   : > { %915 = vpow2.f32 %v421_v45  ;;  %v1091_v54 = vadd.f32 %v861_v51, %v1056_v20  ;;  %v1094_v55 = vadd.f32 %v869_v52, %v1056_v20  ;;  %v358_v56 = vpop.f32.mrb[5].mxu0  ;;  %v390_v57 = vpop.f32.mrb[5].mxu1 }
 0x103   : > { %917 = vpow2.f32 %v437_v46  ;;  %v1097_v59 = vadd.f32 %v358_v56, %v1056_v20  ;;  %v862_v60 = vpop.f32.mrb[6].mxu0  ;;  %v870_v61 = vpop.f32.mrb[6].mxu1  ;;  %v1102_v0 = vadd.f32 %v390_v57, %v1056_v20 }
 0x104   : > { %919 = vpow2.f32 %v427_v49  ;;  %v411_v62 = vmin.f32 %v1091_v54, 20.0  ;;  %v419_v63 = vmin.f32 %v1094_v55, 20.0  ;;  %v361_v1 = vpop.f32.mrb[7].mxu0  ;;  %v393_v2 = vpop.f32.mrb[7].mxu1  ;;  %v1106_v4 = vadd.f32 %v862_v60, %v1056_v20 }
 0x105   : > { %921 = vpow2.f32 %v443_v50  ;;  %v409_v3 = vmin.f32 %v1097_v59, 20.0  ;;  %v1109_v7 = vadd.f32 %v870_v61, %v1056_v20  ;;  %v417_v9 = vmin.f32 %v1102_v0, 20.0 }
 0x106   : > { %923 = vpow2.f32 %v423_v53  ;;  %v433_v5 = vmul.f32 1.442695, %v411_v62  ;;  %v449_v6 = vmul.f32 1.442695, %v419_v63  ;;  %v1113_v10 = vadd.f32 %v361_v1, %v1056_v20 }
 0x107   : > { %925 = vpow2.f32 %v439_v58  ;;  %v429_v8 = vmul.f32 1.442695, %v409_v3  ;;  %v412_v11 = vmin.f32 %v1106_v4, 20.0  ;;  %v420_v13 = vmin.f32 %v1109_v7, 20.0 }
 0x108   : > { %927 = vpow2.f32 %v433_v5  ;;  %v410_v16 = vmin.f32 %v1113_v10, 20.0  ;;  %v445_v19 = vmul.f32 1.442695, %v417_v9  ;;  %v1119_v51 = vadd.f32 %v393_v2, %v1056_v20 }
 0x109   : > { %929 = vpow2.f32 %v449_v6  ;;  %v435_v26 = vmul.f32 1.442695, %v412_v11  ;;  %v451_v32 = vmul.f32 1.442695, %v420_v13 }
 0x10a   : > { %v912_v12 = vpop.eup %911  ;;  %931 = vpow2.f32 %v429_v8  ;;  %v431_v38 = vmul.f32 1.442695, %v410_v16  ;;  %v418_v5 = vmin.f32 %v1119_v51, 20.0 }
 0x10b   : > { %v914_v14 = vpop.eup %913  ;;  %v455_v15 = vadd.f32 1.0, %v912_v12  ;;  %933 = vpow2.f32 %v445_v19 }
 0x10c   : > { %v916_v17 = vpop.eup %915  ;;  %v463_v18 = vadd.f32 1.0, %v914_v14  ;;  %935 = vpow2.f32 %v435_v26 }
 0x10d   : > { %v918_v21 = vpop.eup %917  ;;  %v471_v22 = vmul.f32 %v455_v15, %v455_v15  ;;  %v453_v25 = vadd.f32 1.0, %v916_v17  ;;  %937 = vpow2.f32 %v451_v32 }
 0x10e   : > { %v920_v29 = vpop.eup %919  ;;  %v479_v30 = vmul.f32 %v463_v18, %v463_v18  ;;  %v461_v31 = vadd.f32 1.0, %v918_v21  ;;  %939 = vpow2.f32 %v431_v38 }
 0x10f   : > { %v922_v35 = vpop.eup %921  ;;  %v469_v36 = vmul.f32 %v453_v25, %v453_v25  ;;  %v456_v37 = vadd.f32 1.0, %v920_v29  ;;  %v519_v42 = vadd.f32 1.0, %v471_v22  ;;  %v728_v6 = vadd.f32 -1.0, %v471_v22 }
 0x110   : > { %v924_v41 = vpop.eup %923  ;;  %v464_v43 = vadd.f32 1.0, %v922_v35  ;;  %v527_v45 = vadd.f32 1.0, %v479_v30  ;;  %v477_v46 = vmul.f32 %v461_v31, %v461_v31  ;;  %v736_v8 = vadd.f32 -1.0, %v479_v30 }
 0x111   : > { %v926_v44 = vpop.eup %925  ;;  %v517_v47 = vadd.f32 1.0, %v469_v36  ;;  %v472_v49 = vmul.f32 %v456_v37, %v456_v37  ;;  %941 = vrcp.f32 %v519_v42  ;;  %v454_v53 = vadd.f32 1.0, %v924_v41 }
 0x112   : > { %v928_v48 = vpop.eup %927  ;;  %v480_v50 = vmul.f32 %v464_v43, %v464_v43  ;;  %v462_v56 = vadd.f32 1.0, %v926_v44  ;;  %943 = vrcp.f32 %v527_v45  ;;  %v525_v58 = vadd.f32 1.0, %v477_v46 }
 0x113   : > { %v930_v52 = vpop.eup %929  ;;  %v520_v60 = vadd.f32 1.0, %v472_v49  ;;  %945 = vrcp.f32 %v517_v47  ;;  %v470_v62 = vmul.f32 %v454_v53, %v454_v53  ;;  %v459_v1 = vadd.f32 1.0, %v928_v48 }
 0x114   : > { %v932_v57 = vpop.eup %931  ;;  %v528_v61 = vadd.f32 1.0, %v480_v50  ;;  %v478_v63 = vmul.f32 %v462_v56, %v462_v56  ;;  %v467_v3 = vadd.f32 1.0, %v930_v52  ;;  %v726_v9 = vadd.f32 -1.0, %v469_v36 }
 0x115   : > { %947 = vrcp.f32 %v520_v60  ;;  %v518_v20 = vadd.f32 1.0, %v470_v62  ;;  %v457_v2 = vadd.f32 1.0, %v932_v57  ;;  %v934_v12 = vpop.eup %933  ;;  %v734_v13 = vadd.f32 -1.0, %v477_v46 }
 0x116   : > { %949 = vrcp.f32 %v528_v61  ;;  %v526_v11 = vadd.f32 1.0, %v478_v63  ;;  %v729_v14 = vadd.f32 -1.0, %v472_v49  ;;  %v1122_v15 = vmul.f32 %v459_v1, %v459_v1  ;;  %v936_v16 = vpop.eup %935 }
 0x117   : > { %951 = vrcp.f32 %v525_v58  ;;  %v737_v17 = vadd.f32 -1.0, %v480_v50  ;;  %v1124_v18 = vmul.f32 %v467_v3, %v467_v3  ;;  %v938_v19 = vpop.eup %937  ;;  %v727_v21 = vadd.f32 -1.0, %v470_v62 }
 0x118   : > { %953 = vrcp.f32 %v518_v20  ;;  %v1126_v22 = vmul.f32 %v457_v2, %v457_v2  ;;  %v447_v25 = vmul.f32 1.442695, %v418_v5  ;;  %v940_v26 = vpop.eup %939  ;;  %v503_v29 = vmul.f32 %v728_v6, %v1059_v23 }
 0x119   : > { %955 = vrcp.f32 %v526_v11  ;;  %v511_v30 = vmul.f32 %v736_v8, %v1062_v24  ;;  %v735_v31 = vadd.f32 -1.0, %v478_v63  ;;  %v501_v35 = vmul.f32 %v726_v9, %v1065_v27 }
 0x11a   : > { %v509_v36 = vmul.f32 %v734_v13, %v1068_v28  ;;  %v504_v37 = vmul.f32 %v729_v14, %v1073_v33  ;;  %v523_v38 = vadd.f32 1.0, %v1122_v15  ;;  %v512_v42 = vmul.f32 %v737_v17, %v1076_v34 }
 0x11b   : > { %v942_v32 = vpop.eup %941  ;;  %v531_v43 = vadd.f32 1.0, %v1124_v18  ;;  %v460_v44 = vadd.f32 1.0, %v936_v16  ;;  %v468_v45 = vadd.f32 1.0, %v938_v19  ;;  %v502_v24 = vmul.f32 %v727_v21, %v1081_v39 }
 0x11c   : > { %v944_v41 = vpop.eup %943  ;;  %v521_v46 = vadd.f32 1.0, %v1126_v22  ;;  %v458_v27 = vadd.f32 1.0, %v940_v26  ;;  %957 = vpow2.f32 %v447_v25  ;;  %v510_v33 = vmul.f32 %v735_v31, %v1084_v40 }
 0x11d   : > { %v946_v23 = vpop.eup %945  ;;  %v465_v47 = vadd.f32 1.0, %v934_v12  ;;  %v476_v48 = vmul.f32 %v460_v44, %v460_v44  ;;  %v484_v49 = vmul.f32 %v468_v45, %v468_v45  ;;  %v551_v34 = vmul.f32 %v942_v32, %v503_v29 }
 0x11e   : > { %959 = vrcp.f32 %v523_v38  ;;  %v474_v53 = vmul.f32 %v458_v27, %v458_v27  ;;  %v559_v57 = vmul.f32 %v944_v41, %v511_v30  ;;  %v549_v1 = vmul.f32 %v946_v23, %v501_v35 }
 0x11f   : > { %v948_v28 = vpop.eup %947  ;;  %961 = vrcp.f32 %v531_v43  ;;  %v524_v40 = vadd.f32 1.0, %v476_v48  ;;  %v532_v61 = vadd.f32 1.0, %v484_v49  ;;  %v481_v8 = vmul.f32 %v465_v47, %v465_v47 }
 0x120   : > { %v950_v50 = vpop.eup %949  ;;  %v552_v52 = vmul.f32 %v948_v28, %v504_v37  ;;  %963 = vrcp.f32 %v521_v46  ;;  %v522_v62 = vadd.f32 1.0, %v474_v53  ;;  %v732_v12 = vadd.f32 -1.0, %v1122_v15 }
 0x121   : > { %v952_v56 = vpop.eup %951  ;;  %v560_v39 = vmul.f32 %v950_v50, %v512_v42  ;;  %965 = vrcp.f32 %v524_v40  ;;  %v733_v13 = vadd.f32 -1.0, %v476_v48  ;;  %v740_v14 = vadd.f32 -1.0, %v1124_v18 }
 0x122   : > { %v954_v58 = vpop.eup %953  ;;  %v784_v60 = vpack.c.bf16 %v552_v52, %v551_v34  ;;  %v557_v6 = vmul.f32 %v952_v56, %v509_v36  ;;  %967 = vrcp.f32 %v532_v61  ;;  %v529_v16 = vadd.f32 1.0, %v481_v8 }
 0x123   : > { %v956_v63 = vpop.eup %955  ;;  %v804_v3 = vpack.c.bf16 %v560_v39, %v559_v57  ;;  %v550_v5 = vmul.f32 %v954_v58, %v502_v24  ;;  %969 = vrcp.f32 %v522_v62  ;;  %v741_v17 = vadd.f32 -1.0, %v484_v49 }
 0x124   : > { %816 = vst [vmem:[%s1144_s13 + $0x8] sm:$0xff] %v784_v60   ;;  %v558_v20 = vmul.f32 %v956_v63, %v510_v33  ;;  %v730_v25 = vadd.f32 -1.0, %v1126_v22  ;;  %v731_v26 = vadd.f32 -1.0, %v474_v53  ;;  %v507_v32 = vmul.f32 %v732_v12, %v1091_v54 }
 0x125   : > { %820 = vst [vmem:[%s1144_s13 + $0x28] sm:$0xff] %v804_v3   ;;  %v779_v2 = vpack.c.bf16 %v550_v5, %v549_v1  ;;  %v508_v35 = vmul.f32 %v733_v13, %v1106_v4  ;;  %v515_v15 = vmul.f32 %v740_v14, %v1094_v55  ;;  %971 = vrcp.f32 %v529_v16 }
 0x126   : > { %v799_v9 = vpack.c.bf16 %v558_v20, %v557_v6  ;;  %v958_v11 = vpop.eup %957  ;;  %v516_v18 = vmul.f32 %v741_v17, %v1109_v7  ;;  %v505_v22 = vmul.f32 %v730_v25, %v1097_v59  ;;  %v506_v43 = vmul.f32 %v731_v26, %v1113_v10 }
 0x127   : > { %780 = vst [vmem:[%s1144_s13] sm:$0xff] %v779_v2   ;;  %v466_v19 = vadd.f32 1.0, %v958_v11  ;;  %v738_v46 = vadd.f32 -1.0, %v481_v8 }
 0x128   : > { %819 = vst [vmem:[%s1144_s13 + $0x20] sm:$0xff] %v799_v9   ;;  %v960_v21 = vpop.eup %959 }
 0x129   : > { %v962_v29 = vpop.eup %961  ;;  %v482_v30 = vmul.f32 %v466_v19, %v466_v19  ;;  %v555_v41 = vmul.f32 %v960_v21, %v507_v32  ;;  %v513_v59 = vmul.f32 %v738_v46, %v1102_v0 }
 0x12a   : > { %v964_v31 = vpop.eup %963  ;;  %v563_v44 = vmul.f32 %v962_v29, %v515_v15 }
 0x12b   : > { %v966_v36 = vpop.eup %965  ;;  %v530_v37 = vadd.f32 1.0, %v482_v30  ;;  %v553_v45 = vmul.f32 %v964_v31, %v505_v22  ;;  %v739_v27 = vadd.f32 -1.0, %v482_v30 }
 0x12c   : > { %v968_v38 = vpop.eup %967  ;;  %v556_v42 = vmul.f32 %v966_v36, %v508_v35 }
 0x12d   : > { %v970_v54 = vpop.eup %969  ;;  %v564_v4 = vmul.f32 %v968_v38, %v516_v18  ;;  %973 = vrcp.f32 %v530_v37  ;;  %v514_v10 = vmul.f32 %v739_v27, %v1119_v51 }
 0x12e   : > { %v794_v55 = vpack.c.bf16 %v556_v42, %v555_v41  ;;  %v554_v23 = vmul.f32 %v970_v54, %v506_v43 }
 0x12f   : > { %v814_v24 = vpack.c.bf16 %v564_v4, %v563_v44  ;;  %v972_v28 = vpop.eup %971 }
 0x130   : > { %818 = vst [vmem:[%s1144_s13 + $0x18] sm:$0xff] %v794_v55   ;;  %v789_v7 = vpack.c.bf16 %v554_v23, %v553_v45  ;;  %v561_v47 = vmul.f32 %v972_v28, %v513_v59 }
 0x131   : > { %822 = vst [vmem:[%s1144_s13 + $0x38] sm:$0xff] %v814_v24  }
 0x132   : > { %817 = vst [vmem:[%s1144_s13 + $0x10] sm:$0xff] %v789_v7  }
 0x137   : > { %v974_v33 = vpop.eup %973 }
 0x138   : > { %v562_v48 = vmul.f32 %v974_v33, %v514_v10 }
 0x13a   : > { %v809_v49 = vpack.c.bf16 %v562_v48, %v561_v47 }
 0x13c   : > { %821 = vst [vmem:[%s1144_s13 + $0x30] sm:$0xff] %v809_v49  }
 0x13d PF: > { %s13_s12 = sadd.s32 1, %s981_s12  }
 0x13e   : > { %p10_p4 = scmp.ge.s32.totalorder %s13_s12, 4  }
 0x140   :  { %12 = sbr.rel (!%p10_p4) target bundleno = 1 (0x1), region = 62 }

// kernel: ffcnet_forward.11
= control target key start
LH: loop header
LB: loop body
LE: loop exit
PB: predicated region body
PF: predicated region fallthrough
CT: control target
= control target key end

     0   :  { %s4242_s15 = smov 0   ;;  %s5541_s0 = inlined_call_operand.vmem [shape: bf16[256,128], index: 0, kind: input, shape index: {}]   ;;  %s5542_s1 = inlined_call_operand.vmem [shape: bf16[18,128], index: 1, kind: input, shape index: {}]   ;;  %s5543_s2 = inlined_call_operand.vmem [shape: f32[128,9], index: 2, kind: input, shape index: {}]   ;;  %s5544_s3 = inlined_call_operand.vmem [shape: f32[4,128], index: 3, kind: input, shape index: {}]   ;;  %s5545_s4 = inlined_call_operand.vmem [shape: bf16[256,128], index: 4, kind: output, shape index: {}]  }
   0x1 LB: > { %s3411_s16 = sadd.s32 4294967295, %s4206_s15   ;;  %p3415_p0 = scmp.ge.s32.totalorder %s4206_s15, 1  ;;  %s4206_s15 = sphi %s4242_s15, %s14_s15  }
   0x2   : > { %p163_p1 = scmp.lt.s32.totalorder %s4206_s15, 3 }
   0x4   : > { %p164_p2 = pnand %p3415_p0, %p163_p1 }
   0x5   : > { %v4253_v0 = vld [vmem:[%s5543_s2 + $0x10] sm:$0xff] (!%p164_p2)  ;;  %v4208_v1 = vmov (!%p164_p2), 4   ;;  %v4209_v2 = vmov (!%p164_p2), 0   ;;  %v4267_v4 = vld [vmem:[%s5543_s2] sm:$0xff] (!%p164_p2)  ;;  %v4210_v5 = vmov (!%p164_p2), 1   ;;  %v4275_v6 = vld [vmem:[%s5543_s2 + $0x8] sm:$0xff] (!%p164_p2) }
   0x6   : > { %167 = sbr.rel (%p164_p2) target bundleno = 1107 (0x453), region = 36  ;;  %4034 = vset.pattern.permute.xlu0 (!%p164_p2), %v4208_v1  ;;  %4030 = vset.pattern.permute.xlu1 (!%p164_p2), %v4209_v2  ;;  %v4262_v3 = vld [vmem:[%s5543_s2 + $0x30] sm:$0xff] (!%p164_p2)  ;;  %v4286_v7 = vld [vmem:[%s5543_s2 + $0x28] sm:$0xff] (!%p164_p2)  ;;  %v4291_v8 = vld [vmem:[%s5543_s2 + $0x18] sm:$0xff] (!%p164_p2)  ;;  %vm250_vm0 = vcmask (!%p164_p2), 1040384   ;;  %v4211_v19 = vmov (!%p164_p2), 5  }
   0x7   : > { %1395 = vperm.xlu0 (!%p164_p2), %4034, %v4253_v0   ;;  %332 = vperm.xlu1 (!%p164_p2), %4030, %v4253_v0   ;;  %v4300_v9 = vld [vmem:[%s5543_s2 + $0x48] sm:$0xff] (!%p164_p2)  ;;  %v4308_v10 = vld [vmem:[%s5543_s2 + $0x50] sm:$0xff] (!%p164_p2)  ;;  %v4313_v11 = vld [vmem:[%s5543_s2 + $0x20] sm:$0xff] (!%p164_p2)  ;;  %v5550_v28 = vmov (!%p164_p2), 6   ;;  %s3416_s29 = sshll.u32 (!%p164_p2), %s3411_s16, 4  ;;  %v5554_v29 = vmov (!%p164_p2), 2  }
   0x8   : > { %v4321_v12 = vld [vmem:[%s5543_s2 + $0x60] sm:$0xff] (!%p164_p2)  ;;  %v4334_v14 = vld [vmem:[%s5543_s2 + $0x78] sm:$0xff] (!%p164_p2)  ;;  %v4387_v24 = vld [vmem:[%s5543_s2 + $0x68] sm:$0xff] (!%p164_p2)  ;;  %p190_p3 = scmp.lt.s32.totalorder (!%p164_p2), %s3416_s29, 31  ;;  %vm546_vm1 = vsmask.f32 (!%p164_p2), 7424 }
   0x9   : > { %v4328_v13 = vld [vmem:[%s5542_s1] sm:$0xf] (!%p164_p2)  ;;  %v4348_v18 = vld [vmem:[%s5543_s2 + $0x38] sm:$0xff] (!%p164_p2)  ;;  %v302_v20 = vld [vmem:[%s5542_s1 + $0x4] sm:$0xf] (!%p164_p2)  ;;  %vm619_vm2 = vcmask (!%p164_p2), 15360  }
   0xa   : > { %v4338_v15 = vcombine.low (!%p164_p2), %v4328_v13, %v4328_v13  ;;  %4007 = vmatprep.subr.msk.bf16.mxu0 (!%p164_p2), %vm250_vm0, %v302_v20  ;;  %v4363_v21 = vsel (!%p164_p2), %vm250_vm0, %v302_v20, 0  ;;  %v4371_v22 = vld [vmem:[%s5543_s2 + $0x40] sm:$0xff] (!%p164_p2)  ;;  %v4379_v23 = vld [vmem:[%s5543_s2 + $0x58] sm:$0xff] (!%p164_p2)  ;;  %v4394_v25 = vld [vmem:[%s5543_s2 + $0x70] sm:$0xff] (!%p164_p2)  ;;  %v4409_v26 = vcombine.low (!%p164_p2), %v302_v20, %v302_v20  ;;  %vm916_vm3 = vcmask (!%p164_p2), 1041408  }
   0xb   : > { %1407 = vperm.xlu0 (!%p164_p2), %4034, %v4262_v3   ;;  %4031 = vset.pattern.permute.xlu1 (!%p164_p2), %v4210_v5  ;;  %vm1000_vm4 = vcmask (!%p164_p2), 1046528  }
   0xc   : > { %425 = vperm.xlu1 (!%p164_p2), %4031, %v4267_v4   ;;  %v618_v16 = vrot.slane (!%p164_p2), %v4338_v15, 1  ;;  %3784 = vmatpush3.bf16.msra.mxu0 (!%p164_p2), %v4363_v21  ;;  %v1869_v27 = vrot.slane (!%p164_p2), %v4409_v26, 1 }
   0xd   : > { %s5564_s29 = smov (!%p190_p3, %s3416_s29), 31 }
   0xe   : > { %4003 = vmatprep.subr.msk.bf16.mxu1 %vm250_vm0, %v618_v16  ;;  %v645_v17 = vsel %vm250_vm0, %v618_v16, 0  ;;  %4009 = vmatprep.subr.msk.bf16.mxu0 %vm250_vm0, %v1869_v27  ;;  %s3417_s16 = sshll.u32 %s5564_s29, 2 }
   0xf   : > { %4039 = vset.pattern.permute.xlu0 %v4210_v5  ;;  %3712 = vmatpush3.bf16.msra.mxu1 %v645_v17  ;;  %s4451_s6 = scalar_lea.vmem %s5541_s0, %s3417_s16  ;;  %s5466_s24 = scalar_lea.vmem %s5545_s4, %s3417_s16 }
  0x10   : > { %428 = vperm.xlu0 %4039, %v4275_v6   ;;  %4032 = vset.pattern.permute.xlu1 %v4208_v1  ;;  %v3545_v32 = vld [vmem:[%s4451_s6] sm:$0xff]   ;;  %v3616_v43 = vld [vmem:[%s4451_s6 + $0x8] sm:$0xff]   ;;  %v3617_v63 = vld [vmem:[%s4451_s6 + $0x10] sm:$0xff]  }
  0x11   : > { %1389 = vperm.xlu1 %4032, %v4267_v4   ;;  %4004 = vmatprep.subr.msk.bf16.mxu1 %vm250_vm0, %v4328_v13  ;;  %v3546_v33 = vunpack.c.l.bf16 %v3545_v32  ;;  %v3547_v37 = vunpack.c.h.bf16 %v3545_v32  ;;  %v3550_v49 = vunpack.c.l.bf16 %v3616_v43  ;;  %v3551_v54 = vunpack.c.h.bf16 %v3616_v43 }
  0x13   : > { %v251_v36 = vrot.slane %v3546_v33, 7  ;;  %v252_v45 = vrot.slane %v3547_v37, 7  ;;  %v254_v59 = vrot.slane %v3550_v49, 7 }
  0x14   : > { %431 = vperm.xlu0 %4039, %v4253_v0  }
  0x15   : > { %1392 = vperm.xlu1 %4032, %v4275_v6   ;;  %v4465_v40 = vsel %vm250_vm0, 0.0, %v251_v36  ;;  %v4477_v55 = vsel %vm250_vm0, %v251_v36, %v252_v45  ;;  %v4493_v32 = vsel %vm250_vm0, %v252_v45, %v254_v59  ;;  %v4214_v45 = vmov 7  }
  0x18   : > { %440 = vperm.xlu0 %4039, %v4286_v7  }
  0x19   : > { %4033 = vset.pattern.permute.xlu1 %v4210_v5 }
  0x1a   : > { %434 = vperm.xlu1 %4033, %v4291_v8  }
  0x1c   : > { %443 = vperm.xlu0 %4039, %v4262_v3  }
  0x1e   : > { %4035 = vset.pattern.permute.xlu1 %v4208_v1 }
  0x1f   : > { %1398 = vperm.xlu1 %4035, %v4291_v8  }
  0x20   : > { %452 = vperm.xlu0 %4039, %v4300_v9  }
  0x23   : > { %4036 = vset.pattern.permute.xlu1 %v4210_v5 }
  0x24   : > { %455 = vperm.xlu0 %4039, %v4308_v10   ;;  %437 = vperm.xlu1 %4036, %v4313_v11  }
  0x28   : > { %461 = vperm.xlu0 %4039, %v4321_v12   ;;  %4037 = vset.pattern.permute.xlu1 %v4208_v1 }
  0x29   : > { %1401 = vperm.xlu1 %4037, %v4313_v11  }
  0x2c   : > { %470 = vperm.xlu0 %4039, %v4334_v14  }
  0x2d   : > { %1404 = vperm.xlu1 %4037, %v4286_v7  }
  0x30   : > { %4046 = vset.pattern.permute.xlu0 %v4211_v19 }
  0x31   : > { %1719 = vperm.xlu0 %4046, %v4267_v4   ;;  %4038 = vset.pattern.permute.xlu1 %v4210_v5 }
  0x32   : > { %446 = vperm.xlu1 %4038, %v4348_v18  }
  0x35   : > { %1728 = vperm.xlu0 %4046, %v4291_v8  }
  0x36   : > { %4040 = vset.pattern.permute.xlu1 %v4208_v1 }
  0x37   : > { %1410 = vperm.xlu1 %4040, %v4348_v18  }
  0x39   : > { %1734 = vperm.xlu0 %4046, %v4286_v7  }
  0x3b   : > { %4041 = vset.pattern.permute.xlu1 %v4210_v5 }
  0x3c   : > { %449 = vperm.xlu1 %4041, %v4371_v22  }
  0x3d   : > { %1743 = vperm.xlu0 %4046, %v4371_v22  }
  0x40   : > { %4042 = vset.pattern.permute.xlu1 %v4208_v1 }
  0x41   : > { %1752 = vperm.xlu0 %4046, %v4379_v23   ;;  %1413 = vperm.xlu1 %4042, %v4371_v22  }
  0x45   : > { %1758 = vperm.xlu0 %4046, %v4387_v24   ;;  %1416 = vperm.xlu1 %4042, %v4300_v9  }
  0x49   : > { %1761 = vperm.xlu0 %4046, %v4394_v25   ;;  %4043 = vset.pattern.permute.xlu1 %v4210_v5 }
  0x4a   : > { %458 = vperm.xlu1 %4043, %v4379_v23  }
  0x4d   : > { %4049 = vset.pattern.permute.xlu0 %v4209_v2 }
  0x4e   : > { %322 = vperm.xlu0 %4049, %v4267_v4   ;;  %464 = vperm.xlu1 %4043, %v4387_v24  }
  0x52   : > { %327 = vperm.xlu0 %4049, %v4275_v6   ;;  %4044 = vset.pattern.permute.xlu1 %v4211_v19 }
  0x53   : > { %1722 = vperm.xlu1 %4044, %v4275_v6  }
  0x56   : > { %342 = vperm.xlu0 %4049, %v4313_v11  }
  0x57   : > { %1725 = vperm.xlu1 %4044, %v4253_v0  }
  0x5a   : > { %357 = vperm.xlu0 %4049, %v4348_v18  }
  0x5b   : > { %1731 = vperm.xlu1 %4044, %v4313_v11  }
  0x5e   : > { %367 = vperm.xlu0 %4049, %v4300_v9  }
  0x5f   : > { %4045 = vset.pattern.permute.xlu1 %v4210_v5 }
  0x60   : > { %467 = vperm.xlu1 %4045, %v4394_v25  }
  0x62   : > { %382 = vperm.xlu0 %4049, %v4321_v12  }
  0x64   : > { %4047 = vset.pattern.permute.xlu1 %v4211_v19 }
  0x65   : > { %1737 = vperm.xlu1 %4047, %v4262_v3  }
  0x66   : > { %4055 = vset.pattern.permute.xlu0 %v5550_v28 }
  0x67   : > { %2015 = vperm.xlu0 %4055, %v4275_v6  }
  0x69   : > { %1740 = vperm.xlu1 %4047, %v4348_v18  }
  0x6b   : > { %2019 = vperm.xlu0 %4055, %v4253_v0  }
  0x6d   : > { %1746 = vperm.xlu1 %4047, %v4300_v9  }
  0x6f   : > { %2031 = vperm.xlu0 %4055, %v4286_v7  }
  0x71   : > { %1749 = vperm.xlu1 %4047, %v4308_v10  }
  0x73   : > { %2035 = vperm.xlu0 %4055, %v4262_v3  }
  0x75   : > { %1755 = vperm.xlu1 %4047, %v4321_v12  }
  0x77   : > { %2047 = vperm.xlu0 %4055, %v4300_v9  }
  0x79   : > { %4048 = vset.pattern.permute.xlu1 %v4209_v2 }
  0x7a   : > { %337 = vperm.xlu1 %4048, %v4291_v8  }
  0x7b   : > { %2059 = vperm.xlu0 %4055, %v4321_v12  }
  0x7e   : > { %4050 = vset.pattern.permute.xlu1 %v4211_v19 }
  0x7f   : > { %2071 = vperm.xlu0 %4055, %v4334_v14   ;;  %1764 = vperm.xlu1 %4050, %v4334_v14  }
  0x83   : > { %4065 = vset.pattern.permute.xlu0 %v5554_v29  ;;  %4051 = vset.pattern.permute.xlu1 %v4209_v2 }
  0x84   : > { %869 = vperm.xlu0 %4065, %v4267_v4   ;;  %347 = vperm.xlu1 %4051, %v4286_v7  }
  0x86   : > { %v4453_v30 = vpop.permute.xlu1 %332  ;;  %v4455_v31 = vpop.permute.xlu0 %1395 }
  0x87   : > { %v1439_v16 = vrot.slane %v4455_v31, 7 }
  0x88   : > { %878 = vperm.xlu0 %4065, %v4291_v8   ;;  %352 = vperm.xlu1 %4051, %v4262_v3  }
  0x8a   : > { %v4460_v34 = vpop.permute.xlu0 %1407 }
  0x8b   : > { %v426_v35 = vpop.permute.xlu1 %425 }
  0x8c   : > { %884 = vperm.xlu0 %4065, %v4286_v7   ;;  %362 = vperm.xlu1 %4051, %v4371_v22   ;;  %v472_v39 = vrot.slane %v426_v35, 7  ;;  %v3554_v35 = vunpack.c.l.bf16 %v3617_v63 }
  0x8e   : > { %v520_v51 = vmul.f32 0.0, %v472_v39 }
  0x8f   : > { %v429_v38 = vpop.permute.xlu0 %428 }
  0x90   : > { %v473_v41 = vrot.slane %v429_v38, 7  ;;  %887 = vperm.xlu0 %4065, %v4262_v3   ;;  %4052 = vset.pattern.permute.xlu1 %v5550_v28  ;;  %v1390_v42 = vpop.permute.xlu1 %1389 }
  0x91   : > { %2011 = vperm.xlu1 %4052, %v4267_v4   ;;  %v1436_v52 = vrot.slane %v1390_v42, 7 }
  0x92   : > { %v474_v44 = vsel %vm250_vm0, %v472_v39, %v473_v41 }
  0x93   : > { %v521_v46 = vmul.f32 %v474_v44, %v4465_v40  ;;  %v432_v47 = vpop.permute.xlu0 %431  ;;  %v1484_v3 = vmul.f32 %v1436_v52, %v4465_v40 }
  0x94   : > { %896 = vperm.xlu0 %4065, %v4300_v9   ;;  %v1393_v48 = vpop.permute.xlu1 %1392  ;;  %v475_v50 = vrot.slane %v432_v47, 7  ;;  %v256_v9 = vrot.slane %v3551_v54, 7  ;;  %v3555_v54 = vunpack.c.h.bf16 %v3617_v63 }
  0x95   : > { %v1437_v53 = vrot.slane %v1393_v48, 7  ;;  %4053 = vset.pattern.permute.xlu1 %v4209_v2  ;;  %v537_v58 = vpack.c.bf16 %v521_v46, %v520_v51  ;;  %v258_v46 = vrot.slane %v3554_v35, 7 }
  0x96   : > { %372 = vperm.xlu1 %4053, %v4308_v10   ;;  %v476_v61 = vsel %vm250_vm0, %v473_v41, %v475_v50  ;;  %v4502_v31 = vsel %vm250_vm0, %v254_v59, %v256_v9 }
  0x97   : > { %v1438_v56 = vsel %vm250_vm0, %v1436_v52, %v1437_v53  ;;  %v4480_v57 = vpop.permute.xlu0 %440  ;;  %v522_v17 = vmul.f32 %v476_v61, %v4477_v55  ;;  %v550_v20 = vshll.u32 %v537_v58, 16  ;;  %v1440_v39 = vsel %vm250_vm0, %v1437_v53, %v1439_v16 }
  0x98   : > { %v1485_v60 = vmul.f32 %v1438_v56, %v4477_v55  ;;  %905 = vperm.xlu0 %4065, %v4321_v12   ;;  %v548_v49 = vshrl.u32 %v537_v58, 16  ;;  %v1486_v51 = vmul.f32 %v1440_v39, %v4493_v32  ;;  %v481_v53 = vrot.slane %v4480_v57, 7 }
  0x99   : > { %v435_v62 = vpop.permute.xlu1 %434  ;;  %v552_v43 = vrot.slane %v550_v20, 1  ;;  %v4517_v61 = vsel %vm250_vm0, %v256_v9, %v258_v46 }
  0x9a   : > { %v477_v5 = vrot.slane %v435_v62, 7  ;;  %377 = vperm.xlu1 %4053, %v4379_v23   ;;  %v1501_v36 = vpack.c.bf16 %v1485_v60, %v1484_v3 }
  0x9b   : > { %v4490_v19 = vpop.permute.xlu0 %443  ;;  %v553_v59 = vor.u32 %v552_v43, %v548_v49 }
  0x9c   : > { %v478_v33 = vsel %vm250_vm0, %v475_v50, %v477_v5  ;;  %911 = vperm.xlu0 %4065, %v4394_v25   ;;  %v1513_v47 = vshll.u32 %v1501_v36, 16  ;;  %v1511_v9 = vshrl.u32 %v1501_v36, 16  ;;  %v3618_v36 = vld [vmem:[%s4451_s6 + $0x18] sm:$0xff]  }
  0x9d   : > { %v523_v37 = vmul.f32 %v478_v33, %v4493_v32 }
  0x9e   : > { %4054 = vset.pattern.permute.xlu1 %v5550_v28  ;;  %v4499_v38 = vpop.permute.xlu1 %1398 }
  0x9f   : > { %v1441_v41 = vrot.slane %v4499_v38, 7  ;;  %2023 = vperm.xlu1 %4054, %v4291_v8   ;;  %v538_v42 = vpack.c.bf16 %v523_v37, %v522_v17  ;;  %v4507_v44 = vpop.permute.xlu0 %452  ;;  %v260_v37 = vrot.slane %v3555_v54, 7  ;;  %v483_v54 = vrot.slane %v4490_v19, 7 }
  0xa0   : > { %4069 = vset.pattern.permute.xlu0 %v4214_v45 }
  0xa1   : > { %v1442_v48 = vsel %vm250_vm0, %v1439_v16, %v1441_v41  ;;  %2243 = vperm.xlu0 %4069, %v4275_v6   ;;  %v555_v50 = vshll.u32 %v538_v42, 16  ;;  %v1515_v16 = vrot.slane %v1513_v47, 1 }
  0xa2   : > { %v1487_v52 = vmul.f32 %v1442_v48, %v4502_v31 }
  0xa3   : > { %4056 = vset.pattern.permute.xlu1 %v4209_v2  ;;  %v438_v56 = vpop.permute.xlu1 %437  ;;  %v557_v60 = vrot.slane %v555_v50, 1  ;;  %v4520_v58 = vpop.permute.xlu0 %455  ;;  %v1516_v39 = vor.u32 %v1515_v16, %v1511_v9  ;;  %v559_v50 = vshrl.u32 %v538_v42, 16  ;;  %v4558_v9 = vld [vmem:[%s4451_s6 + $0x20] sm:$0xff]  }
  0xa4   : > { %v479_v62 = vrot.slane %v438_v56, 7  ;;  %387 = vperm.xlu1 %4056, %v4387_v24   ;;  %v4522_v3 = vpack.c.bf16 %v1487_v52, %v1486_v51  ;;  %v4544_v52 = vsel %vm250_vm0, %v258_v46, %v260_v37  ;;  %v769_v46 = vsel %vm250_vm0, %v4328_v13, 0 }
  0xa5   : > { %2255 = vperm.xlu0 %4069, %v4286_v7   ;;  %v558_v57 = vsel %vm546_vm1, %v553_v59, %v557_v60  ;;  %v3558_v59 = vunpack.c.l.bf16 %v3618_v36 }
  0xa6   : > { %v480_v63 = vsel %vm250_vm0, %v477_v5, %v479_v62  ;;  %v482_v17 = vsel %vm250_vm0, %v479_v62, %v481_v53  ;;  %3713 = vmatprep.mubr.msk.bf16.mxu1 %vm619_vm2, %v558_v57  ;;  %v1518_v20 = vshll.u32 %v4522_v3, 16  ;;  %v561_v62 = vor.u32 %v559_v50, %v557_v60 }
  0xa7   : > { %v524_v33 = vmul.f32 %v480_v63, %v4502_v31  ;;  %v525_v35 = vmul.f32 %v482_v17, %v4517_v61  ;;  %v4539_v49 = vpop.permute.xlu0 %461  ;;  %v3559_v63 = vunpack.c.h.bf16 %v3618_v36  ;;  %v484_v60 = vsel %vm250_vm0, %v481_v53, %v483_v54 }
  0xa8   : > { %4057 = vset.pattern.permute.xlu1 %v5550_v28  ;;  %v1402_v38 = vpop.permute.xlu1 %1401  ;;  %v1520_v43 = vrot.slane %v1518_v20, 1  ;;  %v262_v20 = vrot.slane %v3558_v59, 7  ;;  %v3562_v36 = vunpack.c.l.bf16 %v4558_v9 }
  0xa9   : > { %v4533_v47 = vpack.c.bf16 %v525_v35, %v524_v33  ;;  %v1443_v5 = vrot.slane %v1402_v38, 7  ;;  %2261 = vperm.xlu0 %4069, %v4348_v18   ;;  %2027 = vperm.xlu1 %4057, %v4313_v11   ;;  %v264_v53 = vrot.slane %v3559_v63, 7  ;;  %v1895_v63 = vsel %vm250_vm0, %v1869_v27, 0 }
  0xaa   : > { %v1521_v48 = vsel %vm546_vm1, %v1516_v39, %v1520_v43  ;;  %v1447_v39 = vrot.slane %v4460_v34, 7  ;;  %v4573_v50 = vsel %vm250_vm0, %v260_v37, %v262_v20  ;;  %v489_v27 = vrot.slane %v4507_v44, 7 }
  0xab   : > { %3785 = vmatprep.mubr.msk.bf16.mxu0 %vm619_vm2, %v1521_v48  ;;  %v563_v51 = vshll.u32 %v4533_v47, 16  ;;  %v1444_v16 = vsel %vm250_vm0, %v1441_v41, %v1443_v5  ;;  %v4562_v33 = vpop.permute.xlu0 %470  ;;  %v1522_v48 = vshrl.u32 %v4522_v3, 16  ;;  %v4584_v3 = vsel %vm250_vm0, %v262_v20, %v264_v53 }
  0xac   : > { %v1405_v56 = vpop.permute.xlu1 %1404  ;;  %v1488_v41 = vmul.f32 %v1444_v16, %v4517_v61 }
  0xad   : > { %v1445_v57 = vrot.slane %v1405_v56, 7  ;;  %2273 = vperm.xlu0 %4069, %v4379_v23   ;;  %4058 = vset.pattern.permute.xlu1 %v4209_v2  ;;  %v565_v42 = vrot.slane %v563_v51, 1  ;;  %v1524_v16 = vor.u32 %v1522_v48, %v1520_v43 }
  0xae   : > { %392 = vperm.xlu1 %4058, %v4394_v25  }
  0xaf   : > { %v1446_v19 = vsel %vm250_vm0, %v1443_v5, %v1445_v57  ;;  %v566_v17 = vsel %vm546_vm1, %v561_v62, %v565_v42  ;;  %v526_v5 = vmul.f32 %v484_v60, %v4544_v52  ;;  %v5547_v62 = vmov 3  }
  0xb0   : > { %v1489_v2 = vmul.f32 %v1446_v19, %v4544_v52  ;;  %3714 = vmatmul.mubr.msk.bf16.vlgmr.msra.gmra.mrb[0].mxu1 %vm619_vm2, %v566_v17  ;;  %v4586_v37 = vpop.permute.xlu0 %1719  ;;  %v5551_v17 = vrot.slane %v4409_v26, 2  ;;  %v266_v60 = vrot.slane %v3562_v36, 7 }
  0xb1   : > { %2282 = vperm.xlu0 %4069, %v4394_v25   ;;  %v447_v13 = vpop.permute.xlu1 %446  ;;  %3730 = vmatpush3.bf16.msra.mxu1 %v769_v46  ;;  %v1448_v46 = vsel %vm250_vm0, %v1445_v57, %v1447_v39 }
  0xb2   : > { %v4565_v35 = vpack.c.bf16 %v1489_v2, %v1488_v41  ;;  %v485_v38 = vrot.slane %v447_v13, 7  ;;  %397 = vperm.xlu1 %4058, %v4334_v14   ;;  %v567_v2 = vshrl.u32 %v4533_v47, 16  ;;  %v1490_v57 = vmul.f32 %v1448_v46, %v4573_v50 }
  0xb3   : > { %v3563_v47 = vunpack.c.h.bf16 %v4558_v9 }
  0xb4   : > { %v486_v51 = vsel %vm250_vm0, %v483_v54, %v485_v38  ;;  %v1526_v56 = vshll.u32 %v4565_v35, 16  ;;  %v569_v48 = vor.u32 %v567_v2, %v565_v42  ;;  %v1530_v9 = vshrl.u32 %v4565_v35, 16 }
  0xb5   : > { %v527_v59 = vmul.f32 %v486_v51, %v4573_v50  ;;  %4072 = vset.pattern.permute.xlu0 %v5547_v62 }
  0xb6   : > { %1160 = vperm.xlu0 %4072, %v4267_v4   ;;  %4059 = vset.pattern.permute.xlu1 %v5550_v28  ;;  %v4581_v34 = vpop.permute.xlu1 %1410  ;;  %v1528_v54 = vrot.slane %v1526_v56, 1  ;;  %v4613_v56 = vsel %vm250_vm0, %v264_v53, %v266_v60 }
  0xb7   : > { %v540_v19 = vpack.c.bf16 %v527_v59, %v526_v5  ;;  %v1449_v43 = vrot.slane %v4581_v34, 7  ;;  %2039 = vperm.xlu1 %4059, %v4348_v18  }
  0xb8   : > { %v1529_v41 = vsel %vm546_vm1, %v1524_v16, %v1528_v54  ;;  %v1532_v2 = vor.u32 %v1530_v9, %v1528_v54 }
  0xb9   : > { %v1450_v20 = vsel %vm250_vm0, %v1447_v39, %v1449_v43  ;;  %3786 = vmatmul.mubr.msk.bf16.vlgmr.msra.gmra.mrb[0].mxu0 %vm619_vm2, %v1529_v41  ;;  %v571_v13 = vshll.u32 %v540_v19, 16  ;;  %v4610_v39 = vpop.permute.xlu0 %1728  ;;  %v3620_v41 = vld [vmem:[%s4451_s6 + $0x28] sm:$0xff]  }
  0xba   : > { %v1491_v5 = vmul.f32 %v1450_v20, %v4584_v3  ;;  %1172 = vperm.xlu0 %4072, %v4291_v8   ;;  %3802 = vmatpush3.bf16.msra.mxu0 %v1895_v63  ;;  %v268_v20 = vrot.slane %v3563_v47, 7  ;;  %v575_v47 = vshrl.u32 %v540_v19, 16 }
  0xbb   : > { %4060 = vset.pattern.permute.xlu1 %v5554_v29  ;;  %v450_v36 = vpop.permute.xlu1 %449  ;;  %v573_v51 = vrot.slane %v571_v13, 1  ;;  %4010 = vmatprep.subr.msk.bf16.mxu0 %vm250_vm0, %v5551_v17 }
  0xbc   : > { %v4608_v44 = vpack.c.bf16 %v1491_v5, %v1490_v57  ;;  %v487_v59 = vrot.slane %v450_v36, 7  ;;  %872 = vperm.xlu1 %4060, %v4275_v6   ;;  %v4630_v5 = vld [vmem:[%s4451_s6 + $0x30] sm:$0xff]   ;;  %v4639_v54 = vsel %vm250_vm0, %v266_v60, %v268_v20 }
  0xbd   : > { %v574_v42 = vsel %vm546_vm1, %v569_v48, %v573_v51  ;;  %v4632_v36 = vpop.permute.xlu0 %1734  ;;  %v3566_v48 = vunpack.c.l.bf16 %v3620_v41  ;;  %v3570_v9 = vunpack.c.l.bf16 %v4630_v5 }
  0xbe   : > { %v488_v16 = vsel %vm250_vm0, %v485_v38, %v487_v59  ;;  %v490_v34 = vsel %vm250_vm0, %v487_v59, %v489_v27  ;;  %1180 = vperm.xlu0 %4072, %v4286_v7   ;;  %3717 = vmatprep.mubr.msk.bf16.mxu1 %vm619_vm2, %v574_v42  ;;  %v1534_v63 = vshll.u32 %v4608_v44, 16  ;;  %v491_v42 = vrot.slane %v4520_v58, 7 }
  0xbf   : > { %v528_v53 = vmul.f32 %v488_v16, %v4584_v3  ;;  %v529_v46 = vmul.f32 %v490_v34, %v4613_v56  ;;  %v3567_v34 = vunpack.c.h.bf16 %v3620_v41 }
  0xc0   : > { %875 = vperm.xlu1 %4060, %v4253_v0   ;;  %v1414_v38 = vpop.permute.xlu1 %1413  ;;  %v1536_v13 = vrot.slane %v1534_v63, 1 }
  0xc1   : > { %v4627_v57 = vpack.c.bf16 %v529_v46, %v528_v53  ;;  %v1451_v7 = vrot.slane %v1414_v38, 7  ;;  %v577_v46 = vor.u32 %v575_v47, %v573_v51  ;;  %v270_v38 = vrot.slane %v3566_v48, 7 }
  0xc2   : > { %1188 = vperm.xlu0 %4072, %v4348_v18   ;;  %v1537_v35 = vsel %vm546_vm1, %v1532_v2, %v1536_v13  ;;  %v492_v2 = vsel %vm250_vm0, %v489_v27, %v491_v42  ;;  %v272_v48 = vrot.slane %v3567_v34, 7  ;;  %v4661_v47 = vrot.slane %v3570_v9, 7 }
  0xc3   : > { %3789 = vmatprep.mubr.msk.bf16.mxu0 %vm619_vm2, %v1537_v35  ;;  %v579_v59 = vshll.u32 %v4627_v57, 16  ;;  %v1452_v63 = vsel %vm250_vm0, %v1449_v43, %v1451_v7  ;;  %v4655_v35 = vpop.permute.xlu0 %1743  ;;  %v495_v27 = vrot.slane %v4539_v49, 7 }
  0xc4   : > { %881 = vperm.xlu1 %4060, %v4313_v11   ;;  %v4643_v16 = vpop.permute.xlu1 %1416  ;;  %v1492_v41 = vmul.f32 %v1452_v63, %v4613_v56  ;;  %v4666_v63 = vsel %vm250_vm0, %v268_v20, %v270_v38  ;;  %v4676_v49 = vsel %vm250_vm0, %v270_v38, %v272_v48 }
  0xc5   : > { %v5546_v53 = vrot.slane %v4643_v16, 7  ;;  %v581_v19 = vrot.slane %v579_v59, 1 }
  0xc6   : > { %1192 = vperm.xlu0 %4072, %v4371_v22  }
  0xc7   : > { %v1454_v58 = vsel %vm250_vm0, %v1451_v7, %v5546_v53  ;;  %v582_v60 = vsel %vm546_vm1, %v577_v46, %v581_v19  ;;  %v5549_v7 = vrot.slane %v4338_v15, 2 }
  0xc8   : > { %v1493_v43 = vmul.f32 %v1454_v58, %v4639_v54  ;;  %4061 = vset.pattern.permute.xlu1 %v5550_v28  ;;  %3718 = vmatmul.mubr.msk.bf16.gmra.mrb[4].mxu1 %vm619_vm2, %v582_v60  ;;  %v530_v58 = vmul.f32 %v492_v2, %v4639_v54  ;;  %v1538_v60 = vshrl.u32 %v4608_v44, 16  ;;  %v4684_v2 = vsel %vm250_vm0, %v272_v48, %v4661_v47 }
  0xc9   : > { %2043 = vperm.xlu1 %4061, %v4371_v22   ;;  %v459_v51 = vpop.permute.xlu1 %458  ;;  %4005 = vmatprep.subr.msk.bf16.mxu1 %vm250_vm0, %v5549_v7  ;;  %v1766_v28 = vrot.slane %v4586_v37, 6 }
  0xca   : > { %v1505_v59 = vpack.c.bf16 %v1493_v43, %v1492_v41  ;;  %v493_v46 = vrot.slane %v459_v51, 7  ;;  %1204 = vperm.xlu0 %4072, %v4379_v23   ;;  %v1540_v44 = vor.u32 %v1538_v60, %v1536_v13  ;;  %v3622_v43 = vld [vmem:[%s4451_s6 + $0x38] sm:$0xff]   ;;  %v4687_v51 = vpop.permute.xlu0 %1752 }
  0xcb   : > { %v3575_v62 = vunpack.c.h.bf16 %v3622_v43  ;;  %v3574_v37 = vunpack.c.l.bf16 %v3622_v43 }
  0xcc   : > { %v494_v34 = vsel %vm250_vm0, %v491_v42, %v493_v46  ;;  %v1542_v9 = vshll.u32 %v1505_v59, 16  ;;  %v496_v42 = vsel %vm250_vm0, %v493_v46, %v495_v27 }
  0xcd   : > { %v531_v20 = vmul.f32 %v494_v34, %v4666_v63  ;;  %2051 = vperm.xlu1 %4061, %v4308_v10   ;;  %v4680_v41 = vpop.permute.xlu1 %464  ;;  %v1546_v34 = vshrl.u32 %v1505_v59, 16  ;;  %v532_v46 = vmul.f32 %v496_v42, %v4676_v49  ;;  %v583_v59 = vshrl.u32 %v4627_v57, 16 }
  0xce   : > { %v497_v53 = vrot.slane %v4680_v41, 7  ;;  %1212 = vperm.xlu0 %4072, %v4387_v24   ;;  %v1544_v38 = vrot.slane %v1542_v9, 1  ;;  %v5552_v9 = vmov 8  }
  0xcf   : > { %v542_v7 = vpack.c.bf16 %v531_v20, %v530_v58  ;;  %v585_v42 = vor.u32 %v583_v59, %v581_v19 }
  0xd0   : > { %v498_v48 = vsel %vm250_vm0, %v495_v27, %v497_v53  ;;  %v1545_v13 = vsel %vm546_vm1, %v1540_v44, %v1544_v38  ;;  %v4697_v60 = vor.u32 %v1546_v34, %v1544_v38  ;;  %v4708_v34 = vrot.slane %v3575_v62, 7 }
  0xd1   : > { %v533_v17 = vmul.f32 %v498_v48, %v4684_v2  ;;  %2055 = vperm.xlu1 %4061, %v4379_v23   ;;  %3790 = vmatmul.mubr.msk.bf16.gmra.mrb[4].mxu0 %vm619_vm2, %v1545_v13  ;;  %v587_v58 = vshll.u32 %v542_v7, 16  ;;  %v1771_v48 = vrot.slane %v4610_v39, 6  ;;  %v4711_v13 = vpop.permute.xlu0 %1758  ;;  %v3571_v39 = vunpack.c.h.bf16 %v4630_v5 }
  0xd2   : > { %4079 = vset.pattern.permute.xlu0 %v5552_v9  ;;  %v1723_v27 = vpop.permute.xlu1 %1722  ;;  %v591_v9 = vshrl.u32 %v542_v7, 16  ;;  %v501_v5 = vrot.slane %v4562_v33, 7 }
  0xd3   : > { %v4705_v20 = vpack.c.bf16 %v533_v17, %v532_v46  ;;  %v1767_v44 = vrot.slane %v1723_v27, 6  ;;  %2574 = vperm.xlu0 %4079, %v4275_v6   ;;  %v589_v38 = vrot.slane %v587_v58, 1  ;;  %v278_v46 = vrot.slane %v3574_v37, 7 }
  0xd4   : > { %v1814_v6 = vmul.f32 %v1766_v28, %v4465_v40 }
  0xd5   : > { %v1768_v57 = vsel %vm916_vm3, %v1766_v28, %v1767_v44  ;;  %4062 = vset.pattern.permute.xlu1 %v5554_v29  ;;  %v590_v43 = vsel %vm546_vm1, %v585_v42, %v589_v38  ;;  %v595_v17 = vshll.u32 %v4705_v20, 16  ;;  %v593_v58 = vor.u32 %v591_v9, %v589_v38 }
  0xd6   : > { %v1815_v19 = vmul.f32 %v1768_v57, %v4477_v55  ;;  %890 = vperm.xlu1 %4062, %v4348_v18   ;;  %v1726_v62 = vpop.permute.xlu1 %1725  ;;  %3721 = vmatprep.mubr.msk.bf16.mxu1 %vm619_vm2, %v590_v43  ;;  %v4727_v7 = vsel %vm250_vm0, %v278_v46, %v4708_v34  ;;  %v1775_v28 = vrot.slane %v4632_v36, 6  ;;  %v4735_v43 = vpop.permute.xlu0 %1761 }
  0xd7   : > { %v1769_v59 = vrot.slane %v1726_v62, 6  ;;  %2583 = vperm.xlu0 %4079, %v4313_v11   ;;  %v4723_v27 = vrot.slane %v595_v17, 1 }
  0xd8   : > { %v1831_v62 = vpack.c.bf16 %v1815_v19, %v1814_v6 }
  0xd9   : > { %v1770_v37 = vsel %vm916_vm3, %v1767_v44, %v1769_v59  ;;  %v1772_v42 = vsel %vm916_vm3, %v1769_v59, %v1771_v48  ;;  %v598_v57 = vsel %vm546_vm1, %v593_v58, %v4723_v27  ;;  %v276_v44 = vrot.slane %v3571_v39, 7 }
  0xda   : > { %v1816_v9 = vmul.f32 %v1770_v37, %v4493_v32  ;;  %v1817_v38 = vmul.f32 %v1772_v42, %v4502_v31  ;;  %893 = vperm.xlu1 %4062, %v4371_v22   ;;  %v1732_v17 = vpop.permute.xlu1 %1731  ;;  %3722 = vmatmul.mubr.msk.bf16.gmra.mrb[8].mxu1 %vm619_vm2, %v598_v57  ;;  %v536_v59 = vmul.f32 %v501_v5, %v4727_v7  ;;  %v1849_v6 = vrot.slane %v1831_v62, 1  ;;  %v323_v57 = vpop.permute.xlu0 %322 }
  0xdb   : > { %v1773_v29 = vrot.slane %v1732_v17, 6  ;;  %2592 = vperm.xlu0 %4079, %v4348_v18   ;;  %v4751_v18 = vsel %vm250_vm0, %v276_v44, %v278_v46 }
  0xdc   : > { %v1832_v58 = vpack.c.bf16 %v1817_v38, %v1816_v9  ;;  %v545_v39 = vpack.c.bf16 %v536_v59, %v536_v59 }
  0xdd   : > { %v1774_v33 = vsel %vm916_vm3, %v1771_v48, %v1773_v29  ;;  %v1776_v37 = vsel %vm916_vm3, %v1773_v29, %v1775_v28  ;;  %v4757_v29 = vsel %vm250_vm0, %v4661_v47, %v276_v44  ;;  %v5556_v44 = vrot.slane %v4409_v26, 2 }
  0xde   : > { %v1818_v22 = vmul.f32 %v1774_v33, %v4517_v61  ;;  %v1819_v42 = vmul.f32 %v1776_v37, %v4544_v52  ;;  %4063 = vset.pattern.permute.xlu1 %v4214_v45  ;;  %v1850_v19 = vrot.slane %v1832_v58, 1  ;;  %v611_v33 = vshll.u32 %v545_v39, 16 }
  0xdf   : > { %2604 = vperm.xlu0 %4079, %v4379_v23   ;;  %2240 = vperm.xlu1 %4063, %v4267_v4   ;;  %v468_v48 = vpop.permute.xlu1 %467  ;;  %v2124_v59 = vsel %vm250_vm0, %v5556_v44, 0 }
  0xe0   : > { %v1833_v9 = vpack.c.bf16 %v1819_v42, %v1818_v22  ;;  %v499_v38 = vrot.slane %v468_v48, 7  ;;  %v1851_v17 = vsel %vm1000_vm4, %v1849_v6, %v1850_v19  ;;  %v328_v22 = vpop.permute.xlu0 %327  ;;  %v599_v42 = vshrl.u32 %v4705_v20, 16 }
  0xe1   : > { %3803 = vmatprep.mubr.msk.bf16.mxu0 %vm619_vm2, %v1851_v17  ;;  %v400_v6 = vmul.f32 0.0, %v323_v57  ;;  %v613_v39 = vrot.slane %v611_v33, 1  ;;  %v1787_v33 = vrot.slane %v4687_v51, 6  ;;  %v1791_v51 = vrot.slane %v4711_v13, 6 }
  0xe2   : > { %v1852_v62 = vrot.slane %v1833_v9, 1  ;;  %v500_v46 = vsel %vm250_vm0, %v497_v53, %v499_v38  ;;  %v502_v4 = vsel %vm250_vm0, %v499_v38, %v501_v5 }
  0xe3   : > { %v534_v58 = vmul.f32 %v500_v46, %v4757_v29  ;;  %v535_v47 = vmul.f32 %v502_v4, %v4751_v18  ;;  %4082 = vset.pattern.permute.xlu0 %v4208_v1  ;;  %2246 = vperm.xlu1 %4063, %v4253_v0   ;;  %v401_v0 = vmul.f32 %v328_v22, %v4465_v40 }
  0xe4   : > { %1419 = vperm.xlu0 %4082, %v4308_v10   ;;  %v1738_v41 = vpop.permute.xlu1 %1737  ;;  %v1853_v53 = vsel %vm1000_vm4, %v1850_v19, %v1852_v62  ;;  %v1781_v10 = vrot.slane %v4655_v35, 6  ;;  %v601_v19 = vor.u32 %v599_v42, %v4723_v27 }
  0xe5   : > { %v544_v37 = vpack.c.bf16 %v535_v47, %v534_v58  ;;  %v1777_v5 = vrot.slane %v1738_v41, 6  ;;  %3804 = vmatmul.mubr.msk.bf16.vlgmr.msra.gmra.mrb[0].mxu0 %vm619_vm2, %v1853_v53  ;;  %v416_v46 = vpack.c.bf16 %v401_v0, %v400_v6  ;;  %v343_v53 = vpop.permute.xlu0 %342  ;;  %v5558_v0 = vmov 8  }
  0xe6   : > { %3820 = vmatpush3.bf16.msra.mxu0 %v2124_v59 }
  0xe7   : > { %2249 = vperm.xlu1 %4063, %v4291_v8   ;;  %v603_v48 = vshll.u32 %v544_v37, 16  ;;  %v1778_v38 = vsel %vm916_vm3, %v1775_v28, %v1777_v5  ;;  %v607_v57 = vshrl.u32 %v544_v37, 16  ;;  %v5557_v8 = vmov 6  }
  0xe8   : > { %v1741_v9 = vpop.permute.xlu1 %1740  ;;  %1425 = vperm.xlu0 %4082, %v4321_v12   ;;  %v1820_v47 = vmul.f32 %v1778_v38, %v4573_v50 }
  0xe9   : > { %v1779_v20 = vrot.slane %v1741_v9, 6  ;;  %v605_v17 = vrot.slane %v603_v48, 1 }
  0xeb   : > { %v1780_v4 = vsel %vm916_vm3, %v1777_v5, %v1779_v20  ;;  %4064 = vset.pattern.permute.xlu1 %v5557_v8  ;;  %v606_v58 = vsel %vm546_vm1, %v601_v19, %v605_v17  ;;  %v609_v35 = vor.u32 %v607_v57, %v605_v17  ;;  %v1782_v36 = vsel %vm916_vm3, %v1779_v20, %v1781_v10 }
  0xec   : > { %v1821_v27 = vmul.f32 %v1780_v4, %v4584_v3  ;;  %2063 = vperm.xlu1 %4064, %v4387_v24   ;;  %v1747_v12 = vpop.permute.xlu1 %1746  ;;  %3725 = vmatprep.mubr.msk.bf16.mxu1 %vm619_vm2, %v606_v58  ;;  %v1822_v37 = vmul.f32 %v1782_v36, %v4613_v56  ;;  %v4826_v36 = vld [vmem:[%s5543_s2 + $0x50] sm:$0xff] }
  0xed   : > { %v1783_v28 = vrot.slane %v1747_v12, 6  ;;  %v614_v44 = vsel %vm546_vm1, %v609_v35, %v613_v39  ;;  %1431 = vperm.xlu0 %4082, %v4394_v25   ;;  %v1793_v35 = vrot.slane %v4735_v43, 6 }
  0xee   : > { %3726 = vmatmul.mubr.msk.bf16.gmra.mrb[12].mxu1 %vm619_vm2, %v614_v44  ;;  %v1834_v59 = vpack.c.bf16 %v1821_v27, %v1820_v47  ;;  %v5559_v47 = vmov 2   ;;  %v402_v27 = vmul.f32 %v4453_v30, %v4477_v55 }
  0xef   : > { %v1784_v41 = vsel %vm916_vm3, %v1781_v10, %v1783_v28  ;;  %3731 = vmatprep.mubr.msk.bf16.mxu1 %vm619_vm2, %v416_v46 }
  0xf0   : > { %v1823_v5 = vmul.f32 %v1784_v41, %v4639_v54  ;;  %2067 = vperm.xlu1 %4064, %v4394_v25   ;;  %v1750_v22 = vpop.permute.xlu1 %1749  ;;  %v1854_v42 = vrot.slane %v1834_v59, 1  ;;  %v5560_v41 = vrot.slane %v4338_v15, 2 }
  0xf1   : > { %v1785_v6 = vrot.slane %v1750_v22, 6  ;;  %4085 = vset.pattern.permute.xlu0 %v5558_v0 }
  0xf2   : > { %v1855_v48 = vsel %vm1000_vm4, %v1852_v62, %v1854_v42  ;;  %v1835_v39 = vpack.c.bf16 %v1823_v5, %v1822_v37  ;;  %2616 = vperm.xlu0 %4085, %v4334_v14   ;;  %v358_v14 = vpop.permute.xlu0 %357  ;;  %v1044_v30 = vsel %vm250_vm0, %v5560_v41, 0  ;;  %v2429_v37 = vrot.slane %v4409_v26, 3 }
  0xf3   : > { %v1786_v10 = vsel %vm916_vm3, %v1783_v28, %v1785_v6  ;;  %v1788_v9 = vsel %vm916_vm3, %v1785_v6, %v1787_v33  ;;  %3807 = vmatprep.mubr.msk.bf16.mxu0 %vm619_vm2, %v1855_v48  ;;  %v1794_v5 = vsel %vm916_vm3, %v1791_v51, %v1793_v35 }
  0xf4   : > { %v1824_v25 = vmul.f32 %v1786_v10, %v4666_v63  ;;  %v1825_v19 = vmul.f32 %v1788_v9, %v4676_v49  ;;  %4066 = vset.pattern.permute.xlu1 %v4214_v45  ;;  %v1756_v38 = vpop.permute.xlu1 %1755  ;;  %v1856_v20 = vrot.slane %v1835_v39, 1  ;;  %v1828_v39 = vmul.f32 %v1794_v5, %v4751_v18  ;;  %4011 = vmatprep.subr.msk.bf16.mxu0 %vm250_vm0, %v2429_v37 }
  0xf5   : > { %v1789_v62 = vrot.slane %v1756_v38, 6  ;;  %2252 = vperm.xlu1 %4066, %v4313_v11  }
  0xf6   : > { %v1857_v13 = vsel %vm1000_vm4, %v1854_v42, %v1856_v20  ;;  %v1836_v17 = vpack.c.bf16 %v1825_v19, %v1824_v25  ;;  %v368_v43 = vpop.permute.xlu0 %367  ;;  %v4839_v42 = vsel %vm250_vm0, %v4708_v34, 0.0  ;;  %v404_v34 = vmul.f32 %v343_v53, %v4502_v31  ;;  %v4859_v53 = vld [vmem:[%s5543_s2 + $0x30] sm:$0xff] }
  0xf7   : > { %v1790_v57 = vsel %vm916_vm3, %v1787_v33, %v1789_v62  ;;  %v1792_v46 = vsel %vm916_vm3, %v1789_v62, %v1791_v51  ;;  %3808 = vmatmul.mubr.msk.bf16.gmra.mrb[4].mxu0 %vm619_vm2, %v1857_v13  ;;  %v407_v13 = vmul.f32 %v358_v14, %v4573_v50 }
  0xf8   : > { %v1826_v4 = vmul.f32 %v1790_v57, %v4684_v2  ;;  %v1827_v8 = vmul.f32 %v1792_v46, %v4757_v29  ;;  %v1858_v58 = vrot.slane %v1836_v17, 1 }
  0xf9   : > { %4067 = vset.pattern.permute.xlu1 %v5559_v47  ;;  %v338_v11 = vpop.permute.xlu1 %337 }
  0xfa   : > { %v403_v12 = vmul.f32 %v338_v11, %v4493_v32  ;;  %899 = vperm.xlu1 %4067, %v4826_v36   ;;  %v1859_v28 = vsel %vm1000_vm4, %v1856_v20, %v1858_v58  ;;  %v1837_v44 = vpack.c.bf16 %v1827_v8, %v1826_v4  ;;  %v383_v10 = vpop.permute.xlu0 %382  ;;  %v4872_v11 = vld [vmem:[%s5543_s2 + $0x40] sm:$0xff] }
  0xfb   : > { %3811 = vmatprep.mubr.msk.bf16.mxu0 %vm619_vm2, %v1859_v28 }
  0xfc   : > { %v417_v59 = vpack.c.bf16 %v403_v12, %v402_v27  ;;  %v1860_v33 = vrot.slane %v1837_v44, 1 }
  0xfe   : > { %902 = vperm.xlu1 %4067, %v4379_v23   ;;  %v1765_v22 = vpop.permute.xlu1 %1764  ;;  %3732 = vmatmul.mubr.msk.bf16.vlgmr.msra.gmra.mrb[0].mxu1 %vm619_vm2, %v417_v59  ;;  %v1861_v6 = vsel %vm1000_vm4, %v1858_v58, %v1860_v33  ;;  %v2016_v46 = vpop.permute.xlu0 %2015  ;;  %v409_v58 = vmul.f32 %v368_v43, %v4613_v56  ;;  %v4881_v43 = vld [vmem:[%s5543_s2 + $0x48] sm:$0xff] }
  0xff   : > { %v1795_v48 = vrot.slane %v1765_v22, 6  ;;  %3812 = vmatmul.mubr.msk.bf16.gmra.mrb[8].mxu0 %vm619_vm2, %v1861_v6  ;;  %3748 = vmatpush3.bf16.msra.mxu1 %v1044_v30  ;;  %v2075_v59 = vmul.f32 %v2016_v46, %v4493_v32  ;;  %v4890_v22 = vld [vmem:[%s5543_s2 + $0x78] sm:$0xff] }
 0x101   : > { %v1796_v23 = vsel %vm916_vm3, %v1793_v35, %v1795_v48  ;;  %v1830_v51 = vmul.f32 %v1795_v48, %v4839_v42 }
 0x102   : > { %v1829_v9 = vmul.f32 %v1796_v23, %v4727_v7  ;;  %908 = vperm.xlu1 %4067, %v4387_v24   ;;  %v2020_v28 = vpop.permute.xlu0 %2019 }
 0x103   : > { %v1839_v25 = vpack.c.bf16 %v1830_v51, %v1830_v51  ;;  %v348_v19 = vpop.permute.xlu1 %347 }
 0x104   : > { %v405_v38 = vmul.f32 %v348_v19, %v4517_v61  ;;  %v1838_v20 = vpack.c.bf16 %v1829_v9, %v1828_v39  ;;  %v4902_v9 = vld [vmem:[%s5543_s2 + $0x60] sm:$0xff] }
 0x105   : > { %v1864_v62 = vrot.slane %v1839_v25, 1 }
 0x106   : > { %v418_v17 = vpack.c.bf16 %v405_v38, %v404_v34  ;;  %4068 = vset.pattern.permute.xlu1 %v4214_v45  ;;  %v1862_v57 = vrot.slane %v1838_v20, 1  ;;  %v2032_v5 = vpop.permute.xlu0 %2031  ;;  %v2076_v34 = vmul.f32 %v2020_v28, %v4502_v31  ;;  %v4912_v20 = vld [vmem:[%s5543_s2 + $0x68] sm:$0xff] }
 0x107   : > { %2258 = vperm.xlu1 %4068, %v4859_v53   ;;  %v353_v24 = vpop.permute.xlu1 %352 }
 0x108   : > { %v406_v4 = vmul.f32 %v353_v24, %v4544_v52  ;;  %3735 = vmatprep.mubr.msk.bf16.mxu1 %vm619_vm2, %v418_v17  ;;  %v1863_v8 = vsel %vm1000_vm4, %v1860_v33, %v1862_v57  ;;  %v1865_v14 = vsel %vm1000_vm4, %v1862_v57, %v1864_v62  ;;  %v2455_v62 = vsel %vm250_vm0, %v2429_v37, 0 }
 0x109   : > { %3815 = vmatprep.mubr.msk.bf16.mxu0 %vm619_vm2, %v1863_v8  ;;  %v5561_v37 = vmov 3  }
 0x10a   : > { %v419_v35 = vpack.c.bf16 %v407_v13, %v406_v4  ;;  %3816 = vmatmul.mubr.msk.bf16.gmra.mrb[12].mxu0 %vm619_vm2, %v1865_v14  ;;  %v2036_v39 = vpop.permute.xlu0 %2035  ;;  %v412_v13 = vmul.f32 %v383_v10, %v4676_v49  ;;  %v2079_v4 = vmul.f32 %v2032_v5, %v4573_v50  ;;  %v4191_v10 = vld [vmem:[%s5543_s2 + $0x8] sm:$0xff] }
 0x10b   : > { %2264 = vperm.xlu1 %4068, %v4872_v11   ;;  %v363_v27 = vpop.permute.xlu1 %362  ;;  %v2080_v5 = vmul.f32 %v2036_v39, %v4584_v3 }
 0x10c   : > { %v408_v12 = vmul.f32 %v363_v27, %v4584_v3  ;;  %3736 = vmatmul.mubr.msk.bf16.gmra.mrb[4].mxu1 %vm619_vm2, %v419_v35  ;;  %v1247_v27 = vrot.slane %v4338_v15, 3 }
 0x10e   : > { %v420_v44 = vpack.c.bf16 %v409_v58, %v408_v12  ;;  %v4907_v19 = vpop.permute.xlu0 %2047  ;;  %v4192_v12 = vld [vmem:[%s5543_s2 + $0x10] sm:$0xff]  ;;  %4006 = vmatprep.subr.msk.bf16.mxu1 %vm250_vm0, %v1247_v27 }
 0x10f   : > { %2267 = vperm.xlu1 %4068, %v4881_v43  }
 0x110   : > { %v2012_v33 = vpop.permute.xlu1 %2011  ;;  %3739 = vmatprep.mubr.msk.bf16.mxu1 %vm619_vm2, %v420_v44 }
 0x111   : > { %v2074_v41 = vmul.f32 %v2012_v33, %v4477_v55 }
 0x112   : > { %v4922_v24 = vpop.permute.xlu0 %2059 }
 0x113   : > { %v2090_v30 = vpack.c.bf16 %v2075_v59, %v2074_v41  ;;  %4070 = vset.pattern.permute.xlu1 %v5559_v47  ;;  %v4193_v41 = vld [vmem:[%s5543_s2 + $0x20] sm:$0xff] }
 0x114   : > { %914 = vperm.xlu1 %4070, %v4890_v22  }
 0x115   : > { %v373_v6 = vpop.permute.xlu1 %372  ;;  %3821 = vmatprep.mubr.msk.bf16.mxu0 %vm619_vm2, %v2090_v30 }
 0x116   : > { %v410_v23 = vmul.f32 %v373_v6, %v4639_v54  ;;  %v4931_v58 = vpop.permute.xlu0 %2071 }
 0x118   : > { %4071 = vset.pattern.permute.xlu1 %v4214_v45 }
 0x119   : > { %2270 = vperm.xlu1 %4071, %v4826_v36   ;;  %v378_v48 = vpop.permute.xlu1 %377 }
 0x11a   : > { %v411_v47 = vmul.f32 %v378_v48, %v4666_v63  ;;  %v870_v44 = vpop.permute.xlu0 %869 }
 0x11c   : > { %v421_v51 = vpack.c.bf16 %v411_v47, %v410_v23 }
 0x11d   : > { %2276 = vperm.xlu1 %4071, %v4902_v9  }
 0x11e   : > { %v2024_v25 = vpop.permute.xlu1 %2023  ;;  %3740 = vmatmul.mubr.msk.bf16.gmra.mrb[8].mxu1 %vm619_vm2, %v421_v51  ;;  %v879_v23 = vpop.permute.xlu0 %878  ;;  %v917_v51 = vrot.slane %v870_v44, 6 }
 0x11f   : > { %v2077_v45 = vmul.f32 %v2024_v25, %v4517_v61 }
 0x121   : > { %v2091_v38 = vpack.c.bf16 %v2077_v45, %v2076_v34  ;;  %2279 = vperm.xlu1 %4071, %v4912_v20   ;;  %v4194_v34 = vld [vmem:[%s5543_s2] sm:$0xff]  ;;  %v922_v45 = vrot.slane %v879_v23, 6  ;;  %v4196_v23 = vld [vmem:[%s5543_s2 + $0x28] sm:$0xff] }
 0x123   : > { %v388_v17 = vpop.permute.xlu1 %387  ;;  %3822 = vmatmul.mubr.msk.bf16.vlgmr.msra.gmra.mrb[0].mxu0 %vm619_vm2, %v2091_v38  ;;  %v885_v38 = vpop.permute.xlu0 %884 }
 0x124   : > { %v413_v57 = vmul.f32 %v388_v17, %v4684_v2  ;;  %3838 = vmatpush3.bf16.msra.mxu0 %v2455_v62 }
 0x125   : > { %2285 = vperm.xlu1 %4071, %v4890_v22  }
 0x126   : > { %v422_v46 = vpack.c.bf16 %v413_v57, %v412_v13  ;;  %v965_v13 = vmul.f32 0.0, %v917_v51 }
 0x128   : > { %v2028_v8 = vpop.permute.xlu1 %2027  ;;  %3743 = vmatprep.mubr.msk.bf16.mxu1 %vm619_vm2, %v422_v46 }
 0x129   : > { %v2078_v26 = vmul.f32 %v2028_v8, %v4544_v52  ;;  %4073 = vset.pattern.permute.xlu1 %v5561_v37 }
 0x12a   : > { %1164 = vperm.xlu1 %4073, %v4191_v10  }
 0x12b   : > { %v2092_v14 = vpack.c.bf16 %v2079_v4, %v2078_v26  ;;  %v926_v4 = vrot.slane %v885_v38, 6 }
 0x12d   : > { %v393_v35 = vpop.permute.xlu1 %392  ;;  %3825 = vmatprep.mubr.msk.bf16.mxu0 %vm619_vm2, %v2092_v14 }
 0x12e   : > { %1168 = vperm.xlu1 %4073, %v4192_v12   ;;  %v414_v59 = vmul.f32 %v393_v35, %v4757_v29  ;;  %v4195_v35 = vld [vmem:[%s5543_s2 + $0x18] sm:$0xff] }
 0x131   : > { %v398_v28 = vpop.permute.xlu1 %397 }
 0x132   : > { %v415_v33 = vmul.f32 %v398_v28, %v4751_v18  ;;  %1176 = vperm.xlu1 %4073, %v4193_v41   ;;  %v2083_v41 = vmul.f32 %v4907_v19, %v4666_v63 }
 0x134   : > { %v423_v30 = vpack.c.bf16 %v415_v33, %v414_v59  ;;  %v888_v59 = vpop.permute.xlu0 %887 }
 0x136   : > { %1184 = vperm.xlu1 %4073, %v4859_v53   ;;  %v2040_v6 = vpop.permute.xlu1 %2039  ;;  %3744 = vmatmul.mubr.msk.bf16.gmra.mrb[12].mxu1 %vm619_vm2, %v423_v30 }
 0x137   : > { %v2081_v48 = vmul.f32 %v2040_v6, %v4613_v56 }
 0x139   : > { %v2093_v47 = vpack.c.bf16 %v2081_v48, %v2080_v5 }
 0x13a   : > { %4074 = vset.pattern.permute.xlu1 %v5558_v0 }
 0x13b   : > { %2571 = vperm.xlu1 %4074, %v4194_v34   ;;  %v873_v25 = vpop.permute.xlu1 %872  ;;  %3826 = vmatmul.mubr.msk.bf16.gmra.mrb[4].mxu0 %vm619_vm2, %v2093_v47 }
 0x13c   : > { %v918_v39 = vrot.slane %v873_v25, 6 }
 0x13e   : > { %v919_v62 = vsel %vm916_vm3, %v917_v51, %v918_v39 }
 0x13f   : > { %v966_v17 = vmul.f32 %v919_v62, %v4465_v40  ;;  %2577 = vperm.xlu1 %4074, %v4192_v12   ;;  %v876_v57 = vpop.permute.xlu1 %875 }
 0x140   : > { %v920_v46 = vrot.slane %v876_v57, 6 }
 0x141   : > { %v982_v44 = vpack.c.bf16 %v966_v17, %v965_v13  ;;  %v1273_v17 = vsel %vm250_vm0, %v1247_v27, 0  ;;  %v4197_v27 = vld [vmem:[%s5542_s1 + $0x4] sm:$0xf] }
 0x142   : > { %v921_v8 = vsel %vm916_vm3, %v918_v39, %v920_v46  ;;  %v923_v26 = vsel %vm916_vm3, %v920_v46, %v922_v45  ;;  %v4988_v46 = vld [vmem:[%s5542_s1 + $0x8] sm:$0x1] }
 0x143   : > { %v967_v10 = vmul.f32 %v921_v8, %v4477_v55  ;;  %v968_v14 = vmul.f32 %v923_v26, %v4493_v32  ;;  %2580 = vperm.xlu1 %4074, %v4195_v35   ;;  %v882_v28 = vpop.permute.xlu1 %881  ;;  %v1001_v47 = vrot.slane %v982_v44, 1  ;;  %4012 = vmatprep.subr.msk.bf16.mxu0 %vm250_vm0, %v4988_v46  ;;  %v928_v8 = vrot.slane %v888_v59, 6 }
 0x144   : > { %v924_v12 = vrot.slane %v882_v28, 6 }
 0x145   : > { %v983_v33 = vpack.c.bf16 %v968_v14, %v967_v10  ;;  %v929_v28 = vsel %vm916_vm3, %v926_v4, %v928_v8 }
 0x146   : > { %v925_v30 = vsel %vm916_vm3, %v922_v45, %v924_v12  ;;  %v927_v5 = vsel %vm916_vm3, %v924_v12, %v926_v4  ;;  %v4975_v45 = vpop.permute.xlu0 %896 }
 0x147   : > { %v969_v6 = vmul.f32 %v925_v30, %v4502_v31  ;;  %v970_v48 = vmul.f32 %v927_v5, %v4517_v61  ;;  %2586 = vperm.xlu1 %4074, %v4196_v23   ;;  %v1002_v51 = vrot.slane %v983_v33, 1  ;;  %v971_v33 = vmul.f32 %v929_v28, %v4544_v52 }
 0x148   : > { %v2044_v34 = vpop.permute.xlu1 %2043 }
 0x149   : > { %v984_v25 = vpack.c.bf16 %v970_v48, %v969_v6  ;;  %v2082_v39 = vmul.f32 %v2044_v34, %v4639_v54  ;;  %v1003_v19 = vsel %vm1000_vm4, %v1001_v47, %v1002_v51 }
 0x14a   : > { %3749 = vmatprep.mubr.msk.bf16.mxu1 %vm619_vm2, %v1003_v19  ;;  %v4993_v26 = vpop.permute.xlu0 %905 }
 0x14b   : > { %v1004_v38 = vrot.slane %v984_v25, 1  ;;  %v2094_v62 = vpack.c.bf16 %v2083_v41, %v2082_v39  ;;  %4075 = vset.pattern.permute.xlu1 %v5561_v37  ;;  %v934_v41 = vrot.slane %v4975_v45, 6 }
 0x14c   : > { %1196 = vperm.xlu1 %4075, %v4881_v43   ;;  %v2052_v13 = vpop.permute.xlu1 %2051 }
 0x14d   : > { %3829 = vmatprep.mubr.msk.bf16.mxu0 %vm619_vm2, %v2094_v62  ;;  %v1005_v57 = vsel %vm1000_vm4, %v1002_v51, %v1004_v38  ;;  %v2084_v10 = vmul.f32 %v2052_v13, %v4676_v49 }
 0x14e   : > { %3750 = vmatmul.mubr.msk.bf16.vlgmr.msra.gmra.mrb[0].mxu1 %vm619_vm2, %v1005_v57  ;;  %v5006_v59 = vpop.permute.xlu0 %911 }
 0x14f   : > { %3766 = vmatpush3.bf16.msra.mxu1 %v1273_v17 }
 0x150   : > { %1200 = vperm.xlu1 %4075, %v4826_v36   ;;  %v2056_v15 = vpop.permute.xlu1 %2055  ;;  %4008 = vmatprep.subr.msk.bf16.mxu1 %vm250_vm0, %v4197_v27 }
 0x151   : > { %v2085_v14 = vmul.f32 %v2056_v15, %v4684_v2 }
 0x153   : > { %v2095_v35 = vpack.c.bf16 %v2085_v14, %v2084_v10 }
 0x154   : > { %4076 = vset.pattern.permute.xlu1 %v5558_v0 }
 0x155   : > { %2589 = vperm.xlu1 %4076, %v4859_v53   ;;  %v891_v44 = vpop.permute.xlu1 %890  ;;  %3830 = vmatmul.mubr.msk.bf16.gmra.mrb[8].mxu0 %vm619_vm2, %v2095_v35  ;;  %v2244_v53 = vpop.permute.xlu0 %2243 }
 0x156   : > { %v930_v12 = vrot.slane %v891_v44, 6  ;;  %v2288_v51 = vrot.slane %v2244_v53, 7 }
 0x158   : > { %v931_v30 = vsel %vm916_vm3, %v928_v8, %v930_v12 }
 0x159   : > { %v972_v5 = vmul.f32 %v931_v30, %v4573_v50  ;;  %2595 = vperm.xlu1 %4076, %v4872_v11   ;;  %v894_v4 = vpop.permute.xlu1 %893 }
 0x15a   : > { %v932_v6 = vrot.slane %v894_v4, 6 }
 0x15b   : > { %v985_v48 = vpack.c.bf16 %v972_v5, %v971_v33  ;;  %v2086_v33 = vmul.f32 %v4922_v24, %v4757_v29 }
 0x15c   : > { %v933_v23 = vsel %vm916_vm3, %v930_v12, %v932_v6  ;;  %v935_v47 = vsel %vm916_vm3, %v932_v6, %v934_v41 }
 0x15d   : > { %v973_v34 = vmul.f32 %v933_v23, %v4584_v3  ;;  %v974_v25 = vmul.f32 %v935_v47, %v4613_v56  ;;  %2598 = vperm.xlu1 %4076, %v4881_v43   ;;  %v1006_v39 = vrot.slane %v985_v48, 1  ;;  %v4198_v43 = vld [vmem:[%s5543_s2 + $0x58] sm:$0xff]  ;;  %v2089_v23 = vmul.f32 %v4931_v58, %v4839_v42 }
 0x15e   : > { %v2241_v19 = vpop.permute.xlu1 %2240 }
 0x15f   : > { %v2287_v11 = vrot.slane %v2241_v19, 7  ;;  %v1007_v62 = vsel %vm1000_vm4, %v1004_v38, %v1006_v39  ;;  %v986_v13 = vpack.c.bf16 %v974_v25, %v973_v34 }
 0x160   : > { %3753 = vmatprep.mubr.msk.bf16.mxu1 %vm619_vm2, %v1007_v62 }
 0x161   : > { %v2289_v17 = vsel %vm250_vm0, %v2287_v11, %v2288_v51  ;;  %4077 = vset.pattern.permute.xlu1 %v4208_v1  ;;  %v5024_v57 = vrot.slane %v986_v13, 1  ;;  %v2335_v8 = vmul.f32 %v2287_v11, %v4477_v55  ;;  %v2256_v11 = vpop.permute.xlu0 %2255 }
 0x162   : > { %v2336_v15 = vmul.f32 %v2289_v17, %v4493_v32  ;;  %1422 = vperm.xlu1 %4077, %v4198_v43   ;;  %v2247_v27 = vpop.permute.xlu1 %2246  ;;  %v2296_v17 = vrot.slane %v2256_v11, 7 }
 0x163   : > { %v2290_v38 = vrot.slane %v2247_v27, 7  ;;  %v1009_v10 = vsel %vm1000_vm4, %v1006_v39, %v5024_v57 }
 0x164   : > { %3754 = vmatmul.mubr.msk.bf16.gmra.mrb[4].mxu1 %vm619_vm2, %v1009_v10  ;;  %v2352_v14 = vpack.c.bf16 %v2336_v15, %v2335_v8 }
 0x165   : > { %v2291_v28 = vsel %vm250_vm0, %v2288_v51, %v2290_v38 }
 0x166   : > { %4078 = vset.pattern.permute.xlu1 %v5561_v37  ;;  %v2250_v35 = vpop.permute.xlu1 %2249  ;;  %v2364_v30 = vshll.u32 %v2352_v14, 16  ;;  %v2337_v5 = vmul.f32 %v2291_v28, %v4502_v31  ;;  %v5045_v37 = vld [vmem:[%s5543_s2 + $0x70] sm:$0xff]  ;;  %v2362_v25 = vshrl.u32 %v2352_v14, 16 }
 0x167   : > { %v2292_v44 = vrot.slane %v2250_v35, 7  ;;  %1208 = vperm.xlu1 %4078, %v4902_v9  }
 0x168   : > { %v2366_v24 = vrot.slane %v2364_v30, 1  ;;  %v940_v30 = vrot.slane %v4993_v26, 6 }
 0x169   : > { %v2293_v12 = vsel %vm250_vm0, %v2290_v38, %v2292_v44 }
 0x16a   : > { %v2338_v4 = vmul.f32 %v2293_v12, %v4517_v61  ;;  %v2367_v13 = vor.u32 %v2366_v24, %v2362_v25 }
 0x16b   : > { %1216 = vperm.xlu1 %4078, %v5045_v37   ;;  %v2064_v6 = vpop.permute.xlu1 %2063 }
 0x16c   : > { %v2353_v48 = vpack.c.bf16 %v2338_v4, %v2337_v5  ;;  %v2087_v53 = vmul.f32 %v2064_v6, %v4751_v18  ;;  %v2262_v5 = vpop.permute.xlu0 %2261 }
 0x16d   : > { %v2300_v25 = vrot.slane %v2262_v5, 7 }
 0x16e   : > { %v2096_v47 = vpack.c.bf16 %v2087_v53, %v2086_v33  ;;  %v2369_v51 = vshll.u32 %v2353_v48, 16  ;;  %v2373_v12 = vshrl.u32 %v2353_v48, 16 }
 0x16f   : > { %1220 = vperm.xlu1 %4078, %v4890_v22   ;;  %v2068_v34 = vpop.permute.xlu1 %2067 }
 0x170   : > { %v2088_v39 = vmul.f32 %v2068_v34, %v4727_v7  ;;  %3833 = vmatprep.mubr.msk.bf16.mxu0 %vm619_vm2, %v2096_v47  ;;  %v2371_v19 = vrot.slane %v2369_v51, 1  ;;  %v5079_v34 = vpop.permute.xlu0 %2273 }
 0x172   : > { %v2097_v62 = vpack.c.bf16 %v2089_v23, %v2088_v39  ;;  %v2372_v8 = vsel %vm546_vm1, %v2367_v13, %v2371_v19  ;;  %v2375_v6 = vor.u32 %v2373_v12, %v2371_v19 }
 0x173   : > { %4080 = vset.pattern.permute.xlu1 %v4208_v1 }
 0x174   : > { %1428 = vperm.xlu1 %4080, %v4912_v20   ;;  %v2253_v58 = vpop.permute.xlu1 %2252  ;;  %3834 = vmatmul.mubr.msk.bf16.gmra.mrb[12].mxu0 %vm619_vm2, %v2097_v62 }
 0x175   : > { %v2294_v15 = vrot.slane %v2253_v58, 7  ;;  %3839 = vmatprep.mubr.msk.bf16.mxu0 %vm619_vm2, %v2372_v8 }
 0x177   : > { %v2295_v43 = vsel %vm250_vm0, %v2292_v44, %v2294_v15  ;;  %v2297_v27 = vsel %vm250_vm0, %v2294_v15, %v2296_v17 }
 0x178   : > { %v2339_v38 = vmul.f32 %v2295_v43, %v4544_v52  ;;  %v2340_v10 = vmul.f32 %v2297_v27, %v4573_v50  ;;  %4081 = vset.pattern.permute.xlu1 %v5558_v0  ;;  %v5091_v27 = vpop.permute.xlu0 %2282 }
 0x179   : > { %2601 = vperm.xlu1 %4081, %v4826_v36   ;;  %v900_v14 = vpop.permute.xlu1 %899  ;;  %v2743_v36 = vsel %vm250_vm0, %v4988_v46, 0 }
 0x17a   : > { %v2354_v35 = vpack.c.bf16 %v2340_v10, %v2339_v38  ;;  %v936_v28 = vrot.slane %v900_v14, 6 }
 0x17c   : > { %v2377_v33 = vshll.u32 %v2354_v35, 16  ;;  %v937_v53 = vsel %vm916_vm3, %v934_v41, %v936_v28  ;;  %v1161_v5 = vpop.permute.xlu0 %1160 }
 0x17d   : > { %2607 = vperm.xlu1 %4081, %v4902_v9   ;;  %v903_v44 = vpop.permute.xlu1 %902  ;;  %v975_v26 = vmul.f32 %v937_v53, %v4639_v54 }
 0x17e   : > { %v2379_v4 = vrot.slane %v2377_v33, 1  ;;  %v938_v23 = vrot.slane %v903_v44, 6  ;;  %v944_v44 = vrot.slane %v5006_v59, 6 }
 0x180   : > { %v939_v24 = vsel %vm916_vm3, %v936_v28, %v938_v23  ;;  %v2380_v48 = vsel %vm546_vm1, %v2375_v6, %v2379_v4  ;;  %v941_v45 = vsel %vm916_vm3, %v938_v23, %v940_v30  ;;  %v2381_v28 = vshrl.u32 %v2354_v35, 16 }
 0x181   : > { %v976_v9 = vmul.f32 %v939_v24, %v4666_v63  ;;  %2610 = vperm.xlu1 %4081, %v4912_v20   ;;  %v909_v47 = vpop.permute.xlu1 %908  ;;  %3840 = vmatmul.mubr.msk.bf16.vlgmr.msra.gmra.mrb[0].mxu0 %vm619_vm2, %v2380_v48  ;;  %v977_v39 = vmul.f32 %v941_v45, %v4676_v49 }
 0x182   : > { %v942_v41 = vrot.slane %v909_v47, 6  ;;  %3856 = vmatpush3.bf16.msra.mxu0 %v2743_v36  ;;  %v2383_v6 = vor.u32 %v2381_v28, %v2379_v4 }
 0x183   : > { %v987_v51 = vpack.c.bf16 %v976_v9, %v975_v26  ;;  %v1173_v9 = vpop.permute.xlu0 %1172 }
 0x184   : > { %v943_v46 = vsel %vm916_vm3, %v940_v30, %v942_v41  ;;  %v945_v35 = vsel %vm916_vm3, %v942_v41, %v944_v44 }
 0x185   : > { %v978_v19 = vmul.f32 %v943_v46, %v4684_v2  ;;  %4083 = vset.pattern.permute.xlu1 %v4208_v1  ;;  %v1010_v20 = vrot.slane %v987_v51, 1  ;;  %v2308_v51 = vrot.slane %v5079_v34, 7  ;;  %v979_v46 = vmul.f32 %v945_v35, %v4757_v29 }
 0x186   : > { %1434 = vperm.xlu1 %4083, %v4890_v22   ;;  %v2259_v11 = vpop.permute.xlu1 %2258 }
 0x187   : > { %v988_v62 = vpack.c.bf16 %v978_v19, %v977_v39  ;;  %v2298_v13 = vrot.slane %v2259_v11, 7  ;;  %v1011_v58 = vsel %vm1000_vm4, %v5024_v57, %v1010_v20 }
 0x188   : > { %3757 = vmatprep.mubr.msk.bf16.mxu1 %vm619_vm2, %v1011_v58 }
 0x189   : > { %v2299_v8 = vsel %vm250_vm0, %v2296_v17, %v2298_v13  ;;  %v2301_v15 = vsel %vm250_vm0, %v2298_v13, %v2300_v25  ;;  %v1012_v43 = vrot.slane %v988_v62, 1 }
 0x18a   : > { %v2341_v1 = vmul.f32 %v2299_v8, %v4584_v3  ;;  %v2342_v38 = vmul.f32 %v2301_v15, %v4613_v56  ;;  %4084 = vset.pattern.permute.xlu1 %v5558_v0  ;;  %v2265_v22 = vpop.permute.xlu1 %2264 }
 0x18b   : > { %v2302_v10 = vrot.slane %v2265_v22, 7  ;;  %2613 = vperm.xlu1 %4084, %v5045_v37   ;;  %v1013_v57 = vsel %vm1000_vm4, %v1010_v20, %v1012_v43 }
 0x18c   : > { %v2355_v14 = vpack.c.bf16 %v2342_v38, %v2341_v1  ;;  %3758 = vmatmul.mubr.msk.bf16.gmra.mrb[8].mxu1 %vm619_vm2, %v1013_v57  ;;  %v1181_v1 = vpop.permute.xlu0 %1180 }
 0x18d   : > { %v2303_v33 = vsel %vm250_vm0, %v2300_v25, %v2302_v10 }
 0x18e   : > { %v2268_v17 = vpop.permute.xlu1 %2267  ;;  %v2385_v12 = vshll.u32 %v2355_v14, 16  ;;  %v2343_v37 = vmul.f32 %v2303_v33, %v4639_v54  ;;  %v2389_v47 = vshrl.u32 %v2355_v14, 16 }
 0x18f   : > { %v2304_v30 = vrot.slane %v2268_v17, 7 }
 0x190   : > { %v2387_v0 = vrot.slane %v2385_v12, 1 }
 0x191   : > { %v2305_v53 = vsel %vm250_vm0, %v2302_v10, %v2304_v30 }
 0x192   : > { %v2344_v23 = vmul.f32 %v2305_v53, %v4666_v63  ;;  %v2388_v36 = vsel %vm546_vm1, %v2383_v6, %v2387_v0  ;;  %v2391_v20 = vor.u32 %v2389_v47, %v2387_v0  ;;  %v1189_v53 = vpop.permute.xlu0 %1188 }
 0x193   : > { %v915_v24 = vpop.permute.xlu1 %914  ;;  %3843 = vmatprep.mubr.msk.bf16.mxu0 %vm619_vm2, %v2388_v36 }
 0x194   : > { %v2356_v48 = vpack.c.bf16 %v2344_v23, %v2343_v37  ;;  %v946_v26 = vrot.slane %v915_v24, 6 }
 0x196   : > { %v947_v59 = vsel %vm916_vm3, %v944_v44, %v946_v26  ;;  %v981_v4 = vmul.f32 %v946_v26, %v4727_v7  ;;  %v2393_v45 = vshll.u32 %v2356_v48, 16  ;;  %v2397_v33 = vshrl.u32 %v2356_v48, 16 }
 0x197   : > { %v980_v25 = vmul.f32 %v947_v59, %v4751_v18  ;;  %v2314_v44 = vrot.slane %v5091_v27, 7 }
 0x198   : > { %v990_v39 = vpack.c.bf16 %v981_v4, %v981_v4  ;;  %v2271_v19 = vpop.permute.xlu1 %2270  ;;  %v2395_v11 = vrot.slane %v2393_v45, 1  ;;  %v1223_v4 = vmul.f32 %v1161_v5, %v4465_v40  ;;  %v1226_v40 = vmul.f32 %v1173_v9, %v4502_v31 }
 0x199   : > { %v989_v41 = vpack.c.bf16 %v980_v25, %v979_v46  ;;  %v2306_v62 = vrot.slane %v2271_v19, 7 }
 0x19a   : > { %v1016_v13 = vrot.slane %v990_v39, 1  ;;  %v2396_v58 = vsel %vm546_vm1, %v2391_v20, %v2395_v11  ;;  %v2399_v37 = vor.u32 %v2397_v33, %v2395_v11 }
 0x19b   : > { %v2307_v8 = vsel %vm250_vm0, %v2304_v30, %v2306_v62  ;;  %v2309_v15 = vsel %vm250_vm0, %v2306_v62, %v2308_v51  ;;  %3844 = vmatmul.mubr.msk.bf16.gmra.mrb[4].mxu0 %vm619_vm2, %v2396_v58  ;;  %v1014_v34 = vrot.slane %v989_v41, 1 }
 0x19c   : > { %v2345_v38 = vmul.f32 %v2307_v8, %v4676_v49  ;;  %v2346_v22 = vmul.f32 %v2309_v15, %v4684_v2  ;;  %v2277_v10 = vpop.permute.xlu1 %2276 }
 0x19d   : > { %v2310_v57 = vrot.slane %v2277_v10, 7  ;;  %v1015_v14 = vsel %vm1000_vm4, %v1012_v43, %v1014_v34  ;;  %v1017_v17 = vsel %vm1000_vm4, %v1014_v34, %v1016_v13 }
 0x19e   : > { %v2357_v28 = vpack.c.bf16 %v2346_v22, %v2345_v38  ;;  %3761 = vmatprep.mubr.msk.bf16.mxu1 %vm619_vm2, %v1015_v14 }
 0x19f   : > { %3762 = vmatmul.mubr.msk.bf16.gmra.mrb[12].mxu1 %vm619_vm2, %v1017_v17  ;;  %v2311_v6 = vsel %vm250_vm0, %v2308_v51, %v2310_v57  ;;  %v5132_v51 = vpop.permute.xlu0 %1192 }
 0x1a0   : > { %v2280_v12 = vpop.permute.xlu1 %2279  ;;  %v2401_v30 = vshll.u32 %v2357_v28, 16  ;;  %v2347_v36 = vmul.f32 %v2311_v6, %v4757_v29  ;;  %v2405_v39 = vshrl.u32 %v2357_v28, 16 }
 0x1a1   : > { %v2312_v0 = vrot.slane %v2280_v12, 7  ;;  %v1228_v12 = vmul.f32 %v1181_v1, %v4544_v52 }
 0x1a2   : > { %v2403_v23 = vrot.slane %v2401_v30, 1 }
 0x1a3   : > { %v2313_v43 = vsel %vm250_vm0, %v2310_v57, %v2312_v0  ;;  %v2315_v48 = vsel %vm250_vm0, %v2312_v0, %v2314_v44  ;;  %v1205_v10 = vpop.permute.xlu0 %1204 }
 0x1a4   : > { %v2348_v24 = vmul.f32 %v2313_v43, %v4751_v18  ;;  %v2286_v35 = vpop.permute.xlu1 %2285  ;;  %v2404_v26 = vsel %vm546_vm1, %v2399_v37, %v2403_v23  ;;  %v2349_v46 = vmul.f32 %v2315_v48, %v4727_v7  ;;  %v2407_v13 = vor.u32 %v2405_v39, %v2403_v23 }
 0x1a5   : > { %v2316_v59 = vrot.slane %v2286_v35, 7  ;;  %3847 = vmatprep.mubr.msk.bf16.mxu0 %vm619_vm2, %v2404_v26  ;;  %v1230_v37 = vmul.f32 %v1189_v53, %v4584_v3 }
 0x1a6   : > { %v2358_v27 = vpack.c.bf16 %v2348_v24, %v2347_v36 }
 0x1a7   : > { %v2317_v47 = vsel %vm250_vm0, %v2314_v44, %v2316_v59  ;;  %v2351_v45 = vmul.f32 0.0, %v2316_v59  ;;  %v5149_v23 = vpop.permute.xlu0 %1212 }
 0x1a8   : > { %v2350_v25 = vmul.f32 %v2317_v47, %v4839_v42  ;;  %v2409_v19 = vshll.u32 %v2358_v27, 16  ;;  %v2413_v15 = vshrl.u32 %v2358_v27, 16 }
 0x1a9   : > { %v2360_v20 = vpack.c.bf16 %v2351_v45, %v2351_v45  ;;  %v1165_v11 = vpop.permute.xlu1 %1164 }
 0x1aa   : > { %v2359_v41 = vpack.c.bf16 %v2350_v25, %v2349_v46  ;;  %v1224_v62 = vmul.f32 %v1165_v11, %v4477_v55  ;;  %v2411_v58 = vrot.slane %v2409_v19, 1 }
 0x1ab   : > { %v2425_v38 = vshll.u32 %v2360_v20, 16  ;;  %v2575_v26 = vpop.permute.xlu0 %2574 }
 0x1ac   : > { %v1239_v5 = vpack.c.bf16 %v1224_v62, %v1223_v4  ;;  %v2412_v8 = vsel %vm546_vm1, %v2407_v13, %v2411_v58  ;;  %v2417_v34 = vshll.u32 %v2359_v41, 16  ;;  %v2415_v14 = vor.u32 %v2413_v15, %v2411_v58 }
 0x1ad   : > { %v1169_v22 = vpop.permute.xlu1 %1168  ;;  %3848 = vmatmul.mubr.msk.bf16.gmra.mrb[8].mxu0 %vm619_vm2, %v2412_v8  ;;  %v2421_v28 = vshrl.u32 %v2359_v41, 16  ;;  %v2427_v6 = vrot.slane %v2425_v38, 1 }
 0x1ae   : > { %v1225_v57 = vmul.f32 %v1169_v22, %v4493_v32  ;;  %3767 = vmatprep.mubr.msk.bf16.mxu1 %vm619_vm2, %v1239_v5  ;;  %v2419_v17 = vrot.slane %v2417_v34, 1 }
 0x1af   : > { %v2584_v47 = vpop.permute.xlu0 %2583 }
 0x1b0   : > { %v1240_v9 = vpack.c.bf16 %v1226_v40, %v1225_v57  ;;  %v2420_v33 = vsel %vm546_vm1, %v2415_v14, %v2419_v17  ;;  %v2423_v30 = vor.u32 %v2421_v28, %v2419_v17  ;;  %v2625_v39 = vrot.slane %v2584_v47, 6 }
 0x1b1   : > { %v1177_v44 = vpop.permute.xlu1 %1176  ;;  %3851 = vmatprep.mubr.msk.bf16.mxu0 %vm619_vm2, %v2420_v33  ;;  %v1234_v17 = vmul.f32 %v1205_v10, %v4676_v49 }
 0x1b2   : > { %v1227_v0 = vmul.f32 %v1177_v44, %v4517_v61  ;;  %3768 = vmatmul.mubr.msk.bf16.vlgmr.msra.gmra.mrb[0].mxu1 %vm619_vm2, %v1240_v9  ;;  %v2428_v1 = vsel %vm546_vm1, %v2423_v30, %v2427_v6 }
 0x1b3   : > { %3874 = vmatpush3.bf16.msra.mxu1 %v4363_v21  ;;  %v2619_v21 = vrot.slane %v2575_v26, 6 }
 0x1b4   : > { %v1241_v43 = vpack.c.bf16 %v1228_v12, %v1227_v0  ;;  %v2593_v12 = vpop.permute.xlu0 %2592 }
 0x1b5   : > { %v1185_v36 = vpop.permute.xlu1 %1184  ;;  %3852 = vmatmul.mubr.msk.bf16.gmra.mrb[12].mxu0 %vm619_vm2, %v2428_v1  ;;  %v2631_v30 = vrot.slane %v2593_v12, 6 }
 0x1b6   : > { %v1229_v24 = vmul.f32 %v1185_v36, %v4573_v50  ;;  %3771 = vmatprep.mubr.msk.bf16.mxu1 %vm619_vm2, %v1241_v43 }
 0x1b8   : > { %v1242_v35 = vpack.c.bf16 %v1230_v37, %v1229_v24  ;;  %v5178_v6 = vpop.permute.xlu0 %2604 }
 0x1ba   : > { %v2572_v48 = vpop.permute.xlu1 %2571  ;;  %3772 = vmatmul.mubr.msk.bf16.gmra.mrb[4].mxu1 %vm619_vm2, %v1242_v35 }
 0x1bb   : > { %v2618_v59 = vrot.slane %v2572_v48, 6 }
 0x1bc   : > { %v1420_v26 = vpop.permute.xlu0 %1419 }
 0x1bd   : > { %v2620_v27 = vsel %vm916_vm3, %v2618_v59, %v2619_v21  ;;  %v2666_v45 = vmul.f32 %v2618_v59, %v4477_v55  ;;  %v1231_v55 = vmul.f32 %v5132_v51, %v4613_v56 }
 0x1be   : > { %v2578_v53 = vpop.permute.xlu1 %2577  ;;  %v2667_v46 = vmul.f32 %v2620_v27, %v4493_v32  ;;  %v1455_v27 = vrot.slane %v1420_v26, 7 }
 0x1bf   : > { %v2621_v4 = vrot.slane %v2578_v53, 6 }
 0x1c0   : > { %v2683_v41 = vpack.c.bf16 %v2667_v46, %v2666_v45  ;;  %v5562_v46 = vrot.slane %v4643_v16, 7 }
 0x1c1   : > { %v2622_v19 = vsel %vm916_vm3, %v2619_v21, %v2621_v4 }
 0x1c2   : > { %v2581_v25 = vpop.permute.xlu1 %2580  ;;  %v2668_v62 = vmul.f32 %v2622_v19, %v4502_v31  ;;  %v2701_v15 = vrot.slane %v2683_v41, 1 }
 0x1c3   : > { %v2623_v20 = vrot.slane %v2581_v25, 6  ;;  %v1456_v25 = vsel %vm250_vm0, %v5562_v46, %v1455_v27 }
 0x1c4   : > { %v1494_v41 = vmul.f32 %v1456_v25, %v4666_v63 }
 0x1c5   : > { %v2624_v11 = vsel %vm916_vm3, %v2621_v4, %v2623_v20  ;;  %v2626_v40 = vsel %vm916_vm3, %v2623_v20, %v2625_v39 }
 0x1c6   : > { %v2669_v13 = vmul.f32 %v2624_v11, %v4517_v61  ;;  %v2587_v58 = vpop.permute.xlu1 %2586  ;;  %v2670_v34 = vmul.f32 %v2626_v40, %v4544_v52 }
 0x1c7   : > { %v2627_v5 = vrot.slane %v2587_v58, 6 }
 0x1c8   : > { %v2684_v8 = vpack.c.bf16 %v2669_v13, %v2668_v62 }
 0x1c9   : > { %v2628_v32 = vsel %vm916_vm3, %v2625_v39, %v2627_v5 }
 0x1ca   : > { %v2671_v38 = vmul.f32 %v2628_v32, %v4573_v50  ;;  %v2702_v22 = vrot.slane %v2684_v8, 1  ;;  %v1426_v32 = vpop.permute.xlu0 %1425 }
 0x1cb   : > { %v1197_v57 = vpop.permute.xlu1 %1196 }
 0x1cc   : > { %v2685_v31 = vpack.c.bf16 %v2671_v38, %v2670_v34  ;;  %v1232_v61 = vmul.f32 %v1197_v57, %v4639_v54  ;;  %v2703_v14 = vsel %vm1000_vm4, %v2701_v15, %v2702_v22 }
 0x1cd   : > { %3857 = vmatprep.mubr.msk.bf16.mxu0 %vm619_vm2, %v2703_v14 }
 0x1ce   : > { %v2704_v28 = vrot.slane %v2685_v31, 1  ;;  %v1243_v51 = vpack.c.bf16 %v1232_v61, %v1231_v55 }
 0x1cf   : > { %v1201_v9 = vpop.permute.xlu1 %1200 }
 0x1d0   : > { %v1233_v33 = vmul.f32 %v1201_v9, %v4666_v63  ;;  %3775 = vmatprep.mubr.msk.bf16.mxu1 %vm619_vm2, %v1243_v51  ;;  %v2705_v52 = vsel %vm1000_vm4, %v2702_v22, %v2704_v28  ;;  %v1459_v22 = vrot.slane %v1426_v32, 7  ;;  %v2639_v9 = vrot.slane %v5178_v6, 6 }
 0x1d1   : > { %3858 = vmatmul.mubr.msk.bf16.vlgmr.msra.gmra.mrb[0].mxu0 %vm619_vm2, %v2705_v52 }
 0x1d2   : > { %v1244_v50 = vpack.c.bf16 %v1234_v17, %v1233_v33 }
 0x1d4   : > { %v2590_v44 = vpop.permute.xlu1 %2589  ;;  %3776 = vmatmul.mubr.msk.bf16.gmra.mrb[8].mxu1 %vm619_vm2, %v1244_v50 }
 0x1d5   : > { %v2629_v10 = vrot.slane %v2590_v44, 6 }
 0x1d7   : > { %v2630_v0 = vsel %vm916_vm3, %v2627_v5, %v2629_v10  ;;  %v2632_v37 = vsel %vm916_vm3, %v2629_v10, %v2631_v30 }
 0x1d8   : > { %v2672_v43 = vmul.f32 %v2630_v0, %v4584_v3  ;;  %v2673_v1 = vmul.f32 %v2632_v37, %v4613_v56  ;;  %v2596_v36 = vpop.permute.xlu1 %2595 }
 0x1d9   : > { %v2633_v24 = vrot.slane %v2596_v36, 6 }
 0x1da   : > { %v2686_v35 = vpack.c.bf16 %v2673_v1, %v2672_v43  ;;  %v1432_v43 = vpop.permute.xlu0 %1431 }
 0x1db   : > { %v2634_v59 = vsel %vm916_vm3, %v2631_v30, %v2633_v24 }
 0x1dc   : > { %v2599_v48 = vpop.permute.xlu1 %2598  ;;  %v2706_v21 = vrot.slane %v2686_v35, 1  ;;  %v2674_v3 = vmul.f32 %v2634_v59, %v4639_v54  ;;  %v1236_v54 = vmul.f32 %v5149_v23, %v4757_v29 }
 0x1dd   : > { %v2635_v53 = vrot.slane %v2599_v48, 6 }
 0x1de   : > { %v2707_v4 = vsel %vm1000_vm4, %v2704_v28, %v2706_v21 }
 0x1df   : > { %v2636_v47 = vsel %vm916_vm3, %v2633_v24, %v2635_v53  ;;  %3861 = vmatprep.mubr.msk.bf16.mxu0 %vm619_vm2, %v2707_v4 }
 0x1e0   : > { %v2675_v56 = vmul.f32 %v2636_v47, %v4666_v63 }
 0x1e1   : > { %v1423_v45 = vpop.permute.xlu1 %1422 }
 0x1e2   : > { %v2687_v39 = vpack.c.bf16 %v2675_v56, %v2674_v3  ;;  %v1457_v19 = vrot.slane %v1423_v45, 7 }
 0x1e4   : > { %v1458_v20 = vsel %vm250_vm0, %v1455_v27, %v1457_v19  ;;  %v2708_v11 = vrot.slane %v2687_v39, 1  ;;  %v1460_v61 = vsel %vm250_vm0, %v1457_v19, %v1459_v22  ;;  %v1463_v27 = vrot.slane %v1432_v43, 7 }
 0x1e5   : > { %v1495_v62 = vmul.f32 %v1458_v20, %v4676_v49  ;;  %v1496_v28 = vmul.f32 %v1460_v61, %v4684_v2 }
 0x1e6   : > { %v1209_v13 = vpop.permute.xlu1 %1208  ;;  %v2709_v58 = vsel %vm1000_vm4, %v2706_v21, %v2708_v11 }
 0x1e7   : > { %v1506_v40 = vpack.c.bf16 %v1495_v62, %v1494_v41  ;;  %v1235_v16 = vmul.f32 %v1209_v13, %v4684_v2  ;;  %3862 = vmatmul.mubr.msk.bf16.gmra.mrb[4].mxu0 %vm619_vm2, %v2709_v58 }
 0x1e9   : > { %v1245_v5 = vpack.c.bf16 %v1236_v54, %v1235_v16  ;;  %v1550_v55 = vshll.u32 %v1506_v40, 16  ;;  %v1554_v50 = vshrl.u32 %v1506_v40, 16 }
 0x1ea   : > { %v1217_v8 = vpop.permute.xlu1 %1216 }
 0x1eb   : > { %3779 = vmatprep.mubr.msk.bf16.mxu1 %vm619_vm2, %v1245_v5  ;;  %v1237_v15 = vmul.f32 %v1217_v8, %v4751_v18  ;;  %v1552_v38 = vrot.slane %v1550_v55, 1 }
 0x1ed   : > { %v1553_v31 = vsel %vm546_vm1, %v4697_v60, %v1552_v38  ;;  %v1556_v36 = vor.u32 %v1554_v50, %v1552_v38 }
 0x1ee   : > { %v1221_v63 = vpop.permute.xlu1 %1220 }
 0x1ef   : > { %v1238_v34 = vmul.f32 %v1221_v63, %v4727_v7 }
 0x1f1   : > { %v1246_v57 = vpack.c.bf16 %v1238_v34, %v1237_v15 }
 0x1f3   : > { %v1429_v23 = vpop.permute.xlu1 %1428  ;;  %3780 = vmatmul.mubr.msk.bf16.gmra.mrb[12].mxu1 %vm619_vm2, %v1246_v57 }
 0x1f4   : > { %v1461_v14 = vrot.slane %v1429_v23, 7  ;;  %3793 = vmatprep.mubr.msk.bf16.mxu1 %vm619_vm2, %v1553_v31 }
 0x1f6   : > { %v1462_v17 = vsel %vm250_vm0, %v1459_v22, %v1461_v14  ;;  %v1464_v45 = vsel %vm250_vm0, %v1461_v14, %v1463_v27 }
 0x1f7   : > { %v1497_v51 = vmul.f32 %v1462_v17, %v4757_v29  ;;  %v1498_v41 = vmul.f32 %v1464_v45, %v4751_v18 }
 0x1f8   : > { %v2602_v12 = vpop.permute.xlu1 %2601 }
 0x1f9   : > { %v1507_v33 = vpack.c.bf16 %v1497_v51, %v1496_v28  ;;  %v2637_v52 = vrot.slane %v2602_v12, 6 }
 0x1fb   : > { %v1558_v30 = vshll.u32 %v1507_v33, 16  ;;  %v2638_v60 = vsel %vm916_vm3, %v2635_v53, %v2637_v52  ;;  %v2640_v44 = vsel %vm916_vm3, %v2637_v52, %v2639_v9  ;;  %v2617_v53 = vpop.permute.xlu0 %2616  ;;  %v1562_v5 = vshrl.u32 %v1507_v33, 16 }
 0x1fc   : > { %v2676_v10 = vmul.f32 %v2638_v60, %v4676_v49  ;;  %v2677_v0 = vmul.f32 %v2640_v44, %v4684_v2  ;;  %v2608_v37 = vpop.permute.xlu1 %2607  ;;  %v2647_v3 = vrot.slane %v2617_v53, 6  ;;  %v2859_v44 = vlaneseq }
 0x1fd   : > { %v1560_v1 = vrot.slane %v1558_v30, 1  ;;  %v2641_v24 = vrot.slane %v2608_v37, 6  ;;  %v5250_v37 = vld [vmem:[%s5544_s3] sm:$0xf] }
 0x1fe   : > { %v2688_v35 = vpack.c.bf16 %v2677_v0, %v2676_v10  ;;  %v2682_v20 = vmul.f32 0.0, %v2647_v3  ;;  %v5244_v10 = vshrl.u32 %v2859_v44, 7 }
 0x1ff   : > { %v1561_v6 = vsel %vm546_vm1, %v1556_v36, %v1560_v1  ;;  %v2642_v21 = vsel %vm916_vm3, %v2639_v9, %v2641_v24  ;;  %v1564_v34 = vor.u32 %v1562_v5, %v1560_v1 }
 0x200   : > { %v2611_v26 = vpop.permute.xlu1 %2610  ;;  %3794 = vmatmul.mubr.msk.bf16.vlgmr.msra.gmra.mrb[8].mxu1 %vm619_vm2, %v1561_v6  ;;  %v2710_v48 = vrot.slane %v2688_v35, 1  ;;  %v2678_v4 = vmul.f32 %v2642_v21, %v4757_v29  ;;  %v2691_v16 = vpack.c.bf16 %v2682_v20, %v2682_v20  ;;  %v2861_v0 = vsub.s32 0, %v5244_v10 }
 0x201   : > { %v2643_v59 = vrot.slane %v2611_v26, 6 }
 0x202   : > { %v2711_v49 = vsel %vm1000_vm4, %v2708_v11, %v2710_v48  ;;  %v2716_v57 = vrot.slane %v2691_v16, 1  ;;  %v5253_v43 = vrot.slane %v5250_v37, %v2861_v0 }
 0x203   : > { %v2644_v2 = vsel %vm916_vm3, %v2641_v24, %v2643_v59  ;;  %3865 = vmatprep.mubr.msk.bf16.mxu0 %vm619_vm2, %v2711_v49 }
 0x204   : > { %v2679_v47 = vmul.f32 %v2644_v2, %v4751_v18 }
 0x205   : > { %v1435_v56 = vpop.permute.xlu1 %1434 }
 0x206   : > { %v2689_v46 = vpack.c.bf16 %v2679_v47, %v2678_v4  ;;  %v1465_v25 = vrot.slane %v1435_v56, 7 }
 0x208   : > { %v1466_v39 = vsel %vm250_vm0, %v1463_v27, %v1465_v25  ;;  %v1500_v19 = vmul.f32 %v1465_v25, %v4839_v42  ;;  %v2712_v11 = vrot.slane %v2689_v46, 1 }
 0x209   : > { %v1499_v62 = vmul.f32 %v1466_v39, %v4727_v7 }
 0x20a   : > { %v1509_v13 = vpack.c.bf16 %v1500_v19, %v1500_v19  ;;  %v2614_v29 = vpop.permute.xlu1 %2613  ;;  %v2713_v58 = vsel %vm1000_vm4, %v2710_v48, %v2712_v11 }
 0x20b   : > { %v1508_v54 = vpack.c.bf16 %v1499_v62, %v1498_v41  ;;  %v2645_v40 = vrot.slane %v2614_v29, 6  ;;  %3866 = vmatmul.mubr.msk.bf16.gmra.mrb[8].mxu0 %vm619_vm2, %v2713_v58 }
 0x20c   : > { %v1574_v8 = vshll.u32 %v1509_v13, 16 }
 0x20d   : > { %v2646_v55 = vsel %vm916_vm3, %v2643_v59, %v2645_v40  ;;  %v2648_v32 = vsel %vm916_vm3, %v2645_v40, %v2647_v3  ;;  %v1566_v63 = vshll.u32 %v1508_v54, 16  ;;  %v1570_v22 = vshrl.u32 %v1508_v54, 16 }
 0x20e   : > { %v2680_v18 = vmul.f32 %v2646_v55, %v4727_v7  ;;  %v2681_v15 = vmul.f32 %v2648_v32, %v4839_v42  ;;  %v1576_v31 = vrot.slane %v1574_v8, 1 }
 0x20f   : > { %v1568_v38 = vrot.slane %v1566_v63, 1 }
 0x210   : > { %v2690_v23 = vpack.c.bf16 %v2681_v15, %v2680_v18 }
 0x211   : > { %v1569_v61 = vsel %vm546_vm1, %v1564_v34, %v1568_v38  ;;  %v1572_v14 = vor.u32 %v1570_v22, %v1568_v38 }
 0x212   : > { %3797 = vmatprep.mubr.msk.bf16.mxu1 %vm619_vm2, %v1569_v61  ;;  %v2714_v17 = vrot.slane %v2690_v23, 1 }
 0x213   : > { %v1577_v28 = vsel %vm546_vm1, %v1572_v14, %v1576_v31 }
 0x214   : > { %3798 = vmatmul.mubr.msk.bf16.gmra.mrb[12].mxu1 %vm619_vm2, %v1577_v28  ;;  %v2715_v7 = vsel %vm1000_vm4, %v2712_v11, %v2714_v17  ;;  %v2717_v42 = vsel %vm1000_vm4, %v2714_v17, %v2716_v57 }
 0x215   : > { %3869 = vmatprep.mubr.msk.bf16.mxu0 %vm619_vm2, %v2715_v7 }
 0x216   : > { %3870 = vmatmul.mubr.msk.bf16.gmra.mrb[12].mxu0 %vm619_vm2, %v2717_v42 }
 0x285   : > { %v3769_v51 = vpop.f32.mrb[0].mxu1 }
 0x286   : > { %v1309_v12 = vpop.f32.mrb[1].mxu1 }
 0x287   : > { %v3770_v9 = vpop.f32.mrb[2].mxu1 }
 0x288   : > { %v1312_v33 = vpop.f32.mrb[3].mxu1 }
 0x28d   : > { %v3773_v52 = vpop.f32.mrb[4].mxu1 }
 0x28e   : > { %v1325_v50 = vpop.f32.mrb[5].mxu1 }
 0x28f   : > { %v3774_v30 = vpop.f32.mrb[6].mxu1 }
 0x290   : > { %v1328_v60 = vpop.f32.mrb[7].mxu1 }
 0x2a4   : > { %v3859_v1 = vpop.f32.mrb[0].mxu0 }
 0x2a5   : > { %v3875_v36 = vadd.f32 %v3859_v1, %v3769_v51  ;;  %v2779_v24 = vpop.f32.mrb[1].mxu0 }
 0x2a6   : > { %v3876_v35 = vadd.f32 %v2779_v24, %v1309_v12  ;;  %v3860_v6 = vpop.f32.mrb[2].mxu0 }
 0x2a7   : > { %v5256_v26 = vadd.f32 %v3875_v36, %v5253_v43  ;;  %v3877_v48 = vadd.f32 %v3860_v6, %v3770_v9  ;;  %v2782_v21 = vpop.f32.mrb[3].mxu0 }
 0x2a8   : > { %v3878_v59 = vadd.f32 %v2782_v21, %v1312_v33  ;;  %v5263_v27 = vadd.f32 %v3876_v35, %v5253_v43 }
 0x2a9   : > { %v5259_v53 = vadd.f32 %v3877_v48, %v5253_v43  ;;  %2883 = vadd.xlane.f32.xlu1 %v5256_v26 }
 0x2aa   : > { %v5267_v49 = vadd.f32 %v3878_v59, %v5253_v43 }
 0x2ab   : > { %2885 = vadd.xlane.f32.xlu0 %v5259_v53 }
 0x2ad   : > { %2879 = vadd.xlane.f32.xlu1 %v5263_v27 }
 0x2af   : > { %2881 = vadd.xlane.f32.xlu0 %v5267_v49 }
 0x2ba   : > { %v3863_v2 = vpop.f32.mrb[4].mxu0 }
 0x2bb   : > { %v3879_v4 = vadd.f32 %v3863_v2, %v3773_v52  ;;  %v2795_v47 = vpop.f32.mrb[5].mxu0 }
 0x2bc   : > { %v3880_v3 = vadd.f32 %v2795_v47, %v1325_v50  ;;  %v3864_v56 = vpop.f32.mrb[6].mxu0  ;;  %v2945_v50 = vsub.s32 3, %v5244_v10 }
 0x2bd   : > { %v5272_v45 = vadd.f32 %v3879_v4, %v5253_v43  ;;  %v3881_v46 = vadd.f32 %v3864_v56, %v3774_v30  ;;  %v2798_v25 = vpop.f32.mrb[7].mxu0 }
 0x2be   : > { %v3882_v39 = vadd.f32 %v2798_v25, %v1328_v60  ;;  %v5279_v20 = vadd.f32 %v3880_v3, %v5253_v43  ;;  %v5321_v44 = vrot.slane %v5250_v37, %v2945_v50 }
 0x2bf   : > { %v5275_v19 = vadd.f32 %v3881_v46, %v5253_v43  ;;  %2891 = vadd.xlane.f32.xlu1 %v5272_v45 }
 0x2c0   : > { %v5283_v11 = vadd.f32 %v3882_v39, %v5253_v43 }
 0x2c1   : > { %2893 = vadd.xlane.f32.xlu0 %v5275_v19 }
 0x2c3   : > { %2887 = vadd.xlane.f32.xlu1 %v5279_v20 }
 0x2c5   : > { %2889 = vadd.xlane.f32.xlu0 %v5283_v11 }
 0x2d3   : > { %v3795_v41 = vpop.f32.mrb[8].mxu1 }
 0x2d4   : > { %v1671_v62 = vpop.f32.mrb[9].mxu1 }
 0x2d5   : > { %v3796_v13 = vpop.f32.mrb[10].mxu1 }
 0x2d6   : > { %v1674_v29 = vpop.f32.mrb[11].mxu1 }
 0x2de   : > { %v3867_v58 = vpop.f32.mrb[8].mxu0 }
 0x2df   : > { %v3883_v54 = vadd.f32 %v3867_v58, %v3795_v41  ;;  %v2811_v40 = vpop.f32.mrb[9].mxu0 }
 0x2e0   : > { %v3884_v16 = vadd.f32 %v2811_v40, %v1671_v62  ;;  %v3868_v5 = vpop.f32.mrb[10].mxu0 }
 0x2e1   : > { %v5288_v8 = vadd.f32 %v3883_v54, %v5253_v43  ;;  %v3885_v55 = vadd.f32 %v3868_v5, %v3796_v13  ;;  %v2814_v32 = vpop.f32.mrb[11].mxu0 }
 0x2e2   : > { %v3886_v63 = vadd.f32 %v2814_v32, %v1674_v29  ;;  %v5295_v15 = vadd.f32 %v3884_v16, %v5253_v43 }
 0x2e3   : > { %v5291_v18 = vadd.f32 %v3885_v55, %v5253_v43  ;;  %2899 = vadd.xlane.f32.xlu1 %v5288_v8 }
 0x2e4   : > { %v5299_v34 = vadd.f32 %v3886_v63, %v5253_v43 }
 0x2e5   : > { %2901 = vadd.xlane.f32.xlu0 %v5291_v18 }
 0x2e7   : > { %2895 = vadd.xlane.f32.xlu1 %v5295_v15  ;;  %v3799_v38 = vpop.f32.mrb[12].mxu1 }
 0x2e8   : > { %v1687_v22 = vpop.f32.mrb[13].mxu1 }
 0x2e9   : > { %v3871_v57 = vpop.f32.mrb[12].mxu0  ;;  %2897 = vadd.xlane.f32.xlu0 %v5299_v34  ;;  %v3800_v23 = vpop.f32.mrb[14].mxu1 }
 0x2ea   : > { %v3887_v31 = vadd.f32 %v3871_v57, %v3799_v38  ;;  %v1690_v61 = vpop.f32.mrb[15].mxu1  ;;  %v2827_v14 = vpop.f32.mrb[13].mxu0 }
 0x2eb   : > { %v3888_v17 = vadd.f32 %v2827_v14, %v1687_v22  ;;  %v3872_v28 = vpop.f32.mrb[14].mxu0 }
 0x2ec   : > { %v3889_v7 = vadd.f32 %v3872_v28, %v3800_v23  ;;  %v2830_v42 = vpop.f32.mrb[15].mxu0  ;;  %v5311_v33 = vadd.f32 %v3887_v31, %v5253_v43 }
 0x2ed   : > { %v5304_v51 = vadd.f32 %v3888_v17, %v5253_v43  ;;  %v3890_v12 = vadd.f32 %v2830_v42, %v1690_v61 }
 0x2ee   : > { %v5315_v52 = vadd.f32 %v3889_v7, %v5253_v43 }
 0x2ef   : > { %v5307_v9 = vadd.f32 %v3890_v12, %v5253_v43  ;;  %2903 = vadd.xlane.f32.xlu1 %v5304_v51 }
 0x2f1   : > { %2905 = vadd.xlane.f32.xlu0 %v5307_v9 }
 0x2f3   : > { %2907 = vadd.xlane.f32.xlu1 %v5311_v33 }
 0x2f5   : > { %2909 = vadd.xlane.f32.xlu0 %v5315_v52 }
 0x336   : > { %v2884_v30 = vpop.xlane.xlu1 %2883 }
 0x337   : > { %v2913_v60 = vmul.f32 0.125, %v2884_v30 }
 0x338   : > { %v2886_v0 = vpop.xlane.xlu0 %2885 }
 0x339   : > { %v5324_v1 = vsub.f32 %v5256_v26, %v2913_v60  ;;  %v2914_v36 = vmul.f32 0.125, %v2886_v0 }
 0x33a   : > { %v2880_v24 = vpop.xlane.xlu1 %2879 }
 0x33b   : > { %v5327_v43 = vsub.f32 %v5259_v53, %v2914_v36  ;;  %v2911_v35 = vmul.f32 0.125, %v2880_v24  ;;  %v2949_v6 = vmul.f32 %v5321_v44, %v5324_v1 }
 0x33c   : > { %v2882_v48 = vpop.xlane.xlu0 %2881 }
 0x33d   : > { %v5332_v21 = vsub.f32 %v5263_v27, %v2911_v35  ;;  %v2912_v59 = vmul.f32 0.125, %v2882_v48  ;;  %v2965_v2 = vmul.f32 %v2949_v6, %v2949_v6  ;;  %v2950_v4 = vmul.f32 %v5321_v44, %v5327_v43 }
 0x33f   : > { %v5337_v26 = vsub.f32 %v5267_v49, %v2912_v59  ;;  %2983 = vadd.xlane.f32.xlu1 %v2965_v2  ;;  %v2966_v47 = vmul.f32 %v2950_v4, %v2950_v4  ;;  %v2947_v53 = vmul.f32 %v5321_v44, %v5332_v21 }
 0x341   : > { %2985 = vadd.xlane.f32.xlu0 %v2966_v47  ;;  %v2963_v3 = vmul.f32 %v2947_v53, %v2947_v53  ;;  %v2948_v56 = vmul.f32 %v5321_v44, %v5337_v26 }
 0x343   : > { %2979 = vadd.xlane.f32.xlu1 %v2963_v3  ;;  %v2964_v27 = vmul.f32 %v2948_v56, %v2948_v56 }
 0x345   : > { %2981 = vadd.xlane.f32.xlu0 %v2964_v27 }
 0x34c   : > { %v2892_v46 = vpop.xlane.xlu1 %2891 }
 0x34d   : > { %v2917_v25 = vmul.f32 0.125, %v2892_v46 }
 0x34e   : > { %v2894_v39 = vpop.xlane.xlu0 %2893 }
 0x34f   : > { %v5344_v41 = vsub.f32 %v5272_v45, %v2917_v25  ;;  %v2918_v49 = vmul.f32 0.125, %v2894_v39 }
 0x350   : > { %v2888_v62 = vpop.xlane.xlu1 %2887 }
 0x351   : > { %v5347_v13 = vsub.f32 %v5275_v19, %v2918_v49  ;;  %v2915_v29 = vmul.f32 0.125, %v2888_v62  ;;  %v2953_v58 = vmul.f32 %v5321_v44, %v5344_v41 }
 0x352   : > { %v2890_v54 = vpop.xlane.xlu0 %2889 }
 0x353   : > { %v5352_v40 = vsub.f32 %v5279_v20, %v2915_v29  ;;  %v2916_v16 = vmul.f32 0.125, %v2890_v54  ;;  %v2969_v5 = vmul.f32 %v2953_v58, %v2953_v58  ;;  %v2954_v55 = vmul.f32 %v5321_v44, %v5347_v13 }
 0x355   : > { %v5357_v45 = vsub.f32 %v5283_v11, %v2916_v16  ;;  %2991 = vadd.xlane.f32.xlu1 %v2969_v5  ;;  %v2970_v32 = vmul.f32 %v2954_v55, %v2954_v55  ;;  %v2951_v19 = vmul.f32 %v5321_v44, %v5352_v40 }
 0x357   : > { %2993 = vadd.xlane.f32.xlu0 %v2970_v32  ;;  %v2967_v63 = vmul.f32 %v2951_v19, %v2951_v19  ;;  %v2952_v38 = vmul.f32 %v5321_v44, %v5357_v45 }
 0x359   : > { %2987 = vadd.xlane.f32.xlu1 %v2967_v63  ;;  %v2968_v20 = vmul.f32 %v2952_v38, %v2952_v38 }
 0x35b   : > { %2989 = vadd.xlane.f32.xlu0 %v2968_v20  ;;  %v3097_v20 = vsub.s32 2, %v5244_v10 }
 0x370   : > { %v2900_v22 = vpop.xlane.xlu1 %2899 }
 0x371   : > { %v2921_v57 = vmul.f32 0.125, %v2900_v22 }
 0x372   : > { %v2902_v23 = vpop.xlane.xlu0 %2901 }
 0x373   : > { %v5364_v31 = vsub.f32 %v5288_v8, %v2921_v57  ;;  %v2922_v11 = vmul.f32 0.125, %v2902_v23  ;;  %v5409_v23 = vrot.slane %v5250_v37, %v3097_v20 }
 0x374   : > { %v2896_v61 = vpop.xlane.xlu1 %2895 }
 0x375   : > { %v5367_v14 = vsub.f32 %v5291_v18, %v2922_v11  ;;  %v2919_v17 = vmul.f32 0.125, %v2896_v61  ;;  %v2957_v28 = vmul.f32 %v5321_v44, %v5364_v31 }
 0x376   : > { %v2898_v7 = vpop.xlane.xlu0 %2897 }
 0x377   : > { %v5372_v42 = vsub.f32 %v5295_v15, %v2919_v17  ;;  %v2920_v12 = vmul.f32 0.125, %v2898_v7  ;;  %v2973_v50 = vmul.f32 %v2957_v28, %v2957_v28  ;;  %v2958_v30 = vmul.f32 %v5321_v44, %v5367_v14 }
 0x379   : > { %v5377_v8 = vsub.f32 %v5299_v34, %v2920_v12  ;;  %2999 = vadd.xlane.f32.xlu1 %v2973_v50  ;;  %v2974_v60 = vmul.f32 %v2958_v30, %v2958_v30  ;;  %v2955_v18 = vmul.f32 %v5321_v44, %v5372_v42 }
 0x37b   : > { %3001 = vadd.xlane.f32.xlu0 %v2974_v60  ;;  %v2971_v0 = vmul.f32 %v2955_v18, %v2955_v18  ;;  %v2956_v36 = vmul.f32 %v5321_v44, %v5377_v8 }
 0x37c   : > { %v2904_v15 = vpop.xlane.xlu1 %2903 }
 0x37d   : > { %v2923_v24 = vmul.f32 0.125, %v2904_v15  ;;  %2995 = vadd.xlane.f32.xlu1 %v2971_v0  ;;  %v2972_v35 = vmul.f32 %v2956_v36, %v2956_v36 }
 0x37e   : > { %v2906_v6 = vpop.xlane.xlu0 %2905 }
 0x37f   : > { %v5384_v48 = vsub.f32 %v5304_v51, %v2923_v24  ;;  %v2924_v34 = vmul.f32 0.125, %v2906_v6  ;;  %2997 = vadd.xlane.f32.xlu0 %v2972_v35 }
 0x380   : > { %v2908_v59 = vpop.xlane.xlu1 %2907 }
 0x381   : > { %v5387_v2 = vsub.f32 %v5307_v9, %v2924_v34  ;;  %v2925_v4 = vmul.f32 0.125, %v2908_v59  ;;  %v2959_v47 = vmul.f32 %v5321_v44, %v5384_v48 }
 0x382   : > { %v2910_v53 = vpop.xlane.xlu0 %2909 }
 0x383   : > { %v5392_v3 = vsub.f32 %v5311_v33, %v2925_v4  ;;  %v2926_v56 = vmul.f32 0.125, %v2910_v53  ;;  %v2975_v27 = vmul.f32 %v2959_v47, %v2959_v47  ;;  %v2960_v51 = vmul.f32 %v5321_v44, %v5387_v2 }
 0x385   : > { %v5397_v46 = vsub.f32 %v5315_v52, %v2926_v56  ;;  %3003 = vadd.xlane.f32.xlu1 %v2975_v27  ;;  %v2976_v25 = vmul.f32 %v2960_v51, %v2960_v51  ;;  %v2961_v9 = vmul.f32 %v5321_v44, %v5392_v3 }
 0x387   : > { %3005 = vadd.xlane.f32.xlu0 %v2976_v25  ;;  %v2977_v39 = vmul.f32 %v2961_v9, %v2961_v9  ;;  %v2962_v49 = vmul.f32 %v5321_v44, %v5397_v46  ;;  %v3077_v44 = vsub.s32 1, %v5244_v10 }
 0x389   : > { %3007 = vadd.xlane.f32.xlu1 %v2977_v39  ;;  %v2978_v33 = vmul.f32 %v2962_v49, %v2962_v49  ;;  %v5406_v22 = vrot.slane %v5250_v37, %v3077_v44 }
 0x38b   : > { %3009 = vadd.xlane.f32.xlu0 %v2978_v33 }
 0x3cc   : > { %v2984_v62 = vpop.xlane.xlu1 %2983 }
 0x3cd   : > { %v3013_v29 = vmul.f32 0.125, %v2984_v62 }
 0x3ce   : > { %v2986_v58 = vpop.xlane.xlu0 %2985 }
 0x3cf   : > { %v3029_v54 = vadd.f32 1e-05, %v3013_v29  ;;  %v3014_v16 = vmul.f32 0.125, %v2986_v58 }
 0x3d0   : > { %v2980_v52 = vpop.xlane.xlu1 %2979 }
 0x3d1   : > { %4088 = vrsqrt.f32 %v3029_v54  ;;  %v3030_v5 = vadd.f32 1e-05, %v3014_v16  ;;  %v3011_v55 = vmul.f32 0.125, %v2980_v52 }
 0x3d2   : > { %v2982_v32 = vpop.xlane.xlu0 %2981 }
 0x3d3   : > { %4090 = vrsqrt.f32 %v3030_v5  ;;  %v3027_v19 = vadd.f32 1e-05, %v3011_v55  ;;  %v3012_v63 = vmul.f32 0.125, %v2982_v32 }
 0x3d5   : > { %4092 = vrsqrt.f32 %v3027_v19  ;;  %v3028_v38 = vadd.f32 1e-05, %v3012_v63 }
 0x3d7   : > { %4094 = vrsqrt.f32 %v3028_v38 }
 0x3db   : > { %v4089_v57 = vpop.eup %4088 }
 0x3dc   : > { %v3061_v11 = vmul.f32 %v4089_v57, %v5324_v1 }
 0x3dd   : > { %v4091_v61 = vpop.eup %4090 }
 0x3de   : > { %v3081_v17 = vmul.f32 %v5406_v22, %v3061_v11  ;;  %v3062_v28 = vmul.f32 %v4091_v61, %v5327_v43 }
 0x3df   : > { %v4093_v7 = vpop.eup %4092 }
 0x3e0   : > { %v5415_v12 = vadd.f32 %v5409_v23, %v3081_v17  ;;  %v3082_v10 = vmul.f32 %v5406_v22, %v3062_v28  ;;  %v3059_v50 = vmul.f32 %v4093_v7, %v5332_v21 }
 0x3e1   : > { %v4095_v30 = vpop.eup %4094 }
 0x3e2   : > { %v3117_v60 = vmin.f32 %v5415_v12, 20.0  ;;  %v5421_v37 = vadd.f32 %v5409_v23, %v3082_v10  ;;  %v3079_v1 = vmul.f32 %v5406_v22, %v3059_v50  ;;  %v3060_v18 = vmul.f32 %v4095_v30, %v5337_v26  ;;  %v2992_v0 = vpop.xlane.xlu1 %2991 }
 0x3e3   : > { %v3017_v43 = vmul.f32 0.125, %v2992_v0 }
 0x3e4   : > { %v3135_v36 = vmul.f32 1.442695, %v3117_v60  ;;  %v3118_v15 = vmin.f32 %v5421_v37, 20.0  ;;  %v5427_v24 = vadd.f32 %v5409_v23, %v3079_v1  ;;  %v3080_v21 = vmul.f32 %v5406_v22, %v3060_v18  ;;  %v2994_v35 = vpop.xlane.xlu0 %2993 }
 0x3e5   : > { %v3033_v6 = vadd.f32 1e-05, %v3017_v43  ;;  %v3018_v34 = vmul.f32 0.125, %v2994_v35 }
 0x3e6   : > { %4096 = vpow2.f32 %v3135_v36  ;;  %v3137_v59 = vmul.f32 1.442695, %v3118_v15  ;;  %v3115_v4 = vmin.f32 %v5427_v24, 20.0  ;;  %v5432_v47 = vadd.f32 %v5409_v23, %v3080_v21  ;;  %v2988_v26 = vpop.xlane.xlu1 %2987 }
 0x3e7   : > { %4098 = vrsqrt.f32 %v3033_v6  ;;  %v3034_v53 = vadd.f32 1e-05, %v3018_v34  ;;  %v3015_v56 = vmul.f32 0.125, %v2988_v26 }
 0x3e8   : > { %4100 = vpow2.f32 %v3137_v59  ;;  %v3131_v27 = vmul.f32 1.442695, %v3115_v4  ;;  %v3116_v51 = vmin.f32 %v5432_v47, 20.0  ;;  %v2990_v25 = vpop.xlane.xlu0 %2989 }
 0x3e9   : > { %4102 = vrsqrt.f32 %v3034_v53  ;;  %v3031_v9 = vadd.f32 1e-05, %v3015_v56  ;;  %v3016_v39 = vmul.f32 0.125, %v2990_v25 }
 0x3ea   : > { %4104 = vpow2.f32 %v3131_v27  ;;  %v3133_v49 = vmul.f32 1.442695, %v3116_v51 }
 0x3eb   : > { %4106 = vrsqrt.f32 %v3031_v9  ;;  %v3032_v33 = vadd.f32 1e-05, %v3016_v39 }
 0x3ec   : > { %4108 = vpow2.f32 %v3133_v49 }
 0x3ed   : > { %4110 = vrsqrt.f32 %v3032_v33 }
 0x3f0   : > { %v4097_v62 = vpop.eup %4096 }
 0x3f1   : > { %v4099_v29 = vpop.eup %4098  ;;  %v3165_v58 = vadd.f32 1.0, %v4097_v62 }
 0x3f2   : > { %v4101_v54 = vpop.eup %4100  ;;  %v3065_v16 = vmul.f32 %v4099_v29, %v5344_v41 }
 0x3f3   : > { %v4103_v52 = vpop.eup %4102  ;;  %v3181_v5 = vmul.f32 %v3165_v58, %v3165_v58  ;;  %v3166_v55 = vadd.f32 1.0, %v4101_v54 }
 0x3f4   : > { %v4105_v32 = vpop.eup %4104  ;;  %v3085_v19 = vmul.f32 %v5406_v22, %v3065_v16  ;;  %v3066_v63 = vmul.f32 %v4103_v52, %v5347_v13 }
 0x3f5   : > { %v4107_v38 = vpop.eup %4106  ;;  %v3229_v44 = vadd.f32 1.0, %v3181_v5  ;;  %v3182_v20 = vmul.f32 %v3166_v55, %v3166_v55  ;;  %v3163_v57 = vadd.f32 1.0, %v4105_v32 }
 0x3f6   : > { %v4109_v11 = vpop.eup %4108  ;;  %v5439_v61 = vadd.f32 %v5409_v23, %v3085_v19  ;;  %v3086_v17 = vmul.f32 %v5406_v22, %v3066_v63  ;;  %v3063_v41 = vmul.f32 %v4107_v38, %v5352_v40 }
 0x3f7   : > { %v4111_v28 = vpop.eup %4110  ;;  %4112 = vrcp.f32 %v3229_v44  ;;  %v3230_v7 = vadd.f32 1.0, %v3182_v20  ;;  %v3179_v10 = vmul.f32 %v3163_v57, %v3163_v57  ;;  %v3164_v50 = vadd.f32 1.0, %v4109_v11 }
 0x3f8   : > { %v3121_v30 = vmin.f32 %v5439_v61, 20.0  ;;  %v5445_v13 = vadd.f32 %v5409_v23, %v3086_v17  ;;  %v3083_v60 = vmul.f32 %v5406_v22, %v3063_v41  ;;  %v3064_v1 = vmul.f32 %v4111_v28, %v5357_v45 }
 0x3f9   : > { %4114 = vrcp.f32 %v3230_v7  ;;  %v3227_v18 = vadd.f32 1.0, %v3179_v10  ;;  %v3180_v0 = vmul.f32 %v3164_v50, %v3164_v50  ;;  %v3496_v45 = vadd.f32 -1.0, %v3181_v5 }
 0x3fa   : > { %v3143_v43 = vmul.f32 1.442695, %v3121_v30  ;;  %v3122_v40 = vmin.f32 %v5445_v13, 20.0  ;;  %v5451_v36 = vadd.f32 %v5409_v23, %v3083_v60  ;;  %v3084_v15 = vmul.f32 %v5406_v22, %v3064_v1 }
 0x3fb   : > { %4116 = vrcp.f32 %v3227_v18  ;;  %v3228_v21 = vadd.f32 1.0, %v3180_v0  ;;  %v3497_v59 = vadd.f32 -1.0, %v3182_v20  ;;  %v3213_v27 = vmul.f32 %v3496_v45, %v5415_v12 }
 0x3fc   : > { %4118 = vpow2.f32 %v3143_v43  ;;  %v3145_v35 = vmul.f32 1.442695, %v3122_v40  ;;  %v3119_v6 = vmin.f32 %v5451_v36, 20.0  ;;  %v5456_v34 = vadd.f32 %v5409_v23, %v3084_v15 }
 0x3fd   : > { %4120 = vrcp.f32 %v3228_v21  ;;  %v3214_v51 = vmul.f32 %v3497_v59, %v5421_v37  ;;  %v3494_v9 = vadd.f32 -1.0, %v3179_v10  ;;  %v3495_v39 = vadd.f32 -1.0, %v3180_v0 }
 0x3fe   : > { %4122 = vpow2.f32 %v3145_v35  ;;  %v3139_v4 = vmul.f32 1.442695, %v3119_v6  ;;  %v3120_v26 = vmin.f32 %v5456_v34, 20.0 }
 0x3ff   : > { %v3211_v12 = vmul.f32 %v3494_v9, %v5427_v24  ;;  %v3212_v37 = vmul.f32 %v3495_v39, %v5432_v47 }
 0x400   : > { %4124 = vpow2.f32 %v3139_v4  ;;  %v3141_v56 = vmul.f32 1.442695, %v3120_v26 }
 0x401   : > { %v4113_v53 = vpop.eup %4112 }
 0x402   : > { %4126 = vpow2.f32 %v3141_v56  ;;  %v3261_v49 = vmul.f32 %v4113_v53, %v3213_v27 }
 0x403   : > { %v4115_v25 = vpop.eup %4114 }
 0x404   : > { %v3262_v33 = vmul.f32 %v4115_v25, %v3214_v51 }
 0x405   : > { %v4117_v62 = vpop.eup %4116 }
 0x406   : > { %v3584_v29 = vpack.c.bf16 %v3262_v33, %v3261_v49  ;;  %v3000_v58 = vpop.xlane.xlu1 %2999  ;;  %v4119_v54 = vpop.eup %4118  ;;  %v3259_v19 = vmul.f32 %v4117_v62, %v3211_v12 }
 0x407   : > { %v3021_v16 = vmul.f32 0.125, %v3000_v58  ;;  %v4121_v52 = vpop.eup %4120  ;;  %v3169_v5 = vadd.f32 1.0, %v4119_v54 }
 0x408   : > { %3623 = vst [vmem:[%s5466_s24 + $0x8] sm:$0xff] %v3584_v29   ;;  %v3002_v55 = vpop.xlane.xlu0 %3001  ;;  %v4123_v32 = vpop.eup %4122  ;;  %v3260_v63 = vmul.f32 %v4121_v52, %v3212_v37 }
 0x409   : > { %v3037_v38 = vadd.f32 1e-05, %v3021_v16  ;;  %v3022_v44 = vmul.f32 0.125, %v3002_v55  ;;  %v3185_v20 = vmul.f32 %v3169_v5, %v3169_v5  ;;  %v3170_v57 = vadd.f32 1.0, %v4123_v32 }
 0x40a   : > { %v2996_v11 = vpop.xlane.xlu1 %2995  ;;  %v4125_v17 = vpop.eup %4124  ;;  %v3579_v41 = vpack.c.bf16 %v3260_v63, %v3259_v19 }
 0x40b   : > { %4128 = vrsqrt.f32 %v3037_v38  ;;  %v3038_v24 = vadd.f32 1e-05, %v3022_v44  ;;  %v3019_v28 = vmul.f32 0.125, %v2996_v11  ;;  %v3233_v47 = vadd.f32 1.0, %v3185_v20 }
 0x40c   : > { %v3186_v7 = vmul.f32 %v3170_v57, %v3170_v57  ;;  %v3167_v10 = vadd.f32 1.0, %v4125_v17  ;;  %v2998_v50 = vpop.xlane.xlu0 %2997  ;;  %v4127_v30 = vpop.eup %4126  ;;  %3580 = vst [vmem:[%s5466_s24] sm:$0xff] %v3579_v41   ;;  %v3500_v6 = vadd.f32 -1.0, %v3185_v20 }
 0x40d   : > { %4130 = vrsqrt.f32 %v3038_v24  ;;  %v3035_v60 = vadd.f32 1e-05, %v3019_v28  ;;  %v3020_v1 = vmul.f32 0.125, %v2998_v50  ;;  %v3168_v43 = vadd.f32 1.0, %v4127_v30 }
 0x40e   : > { %4132 = vrcp.f32 %v3233_v47  ;;  %v3234_v18 = vadd.f32 1.0, %v3186_v7  ;;  %v3183_v0 = vmul.f32 %v3167_v10, %v3167_v10  ;;  %v3501_v59 = vadd.f32 -1.0, %v3186_v7 }
 0x40f   : > { %4134 = vrsqrt.f32 %v3035_v60  ;;  %v3036_v40 = vadd.f32 1e-05, %v3020_v1  ;;  %v3184_v21 = vmul.f32 %v3168_v43, %v3168_v43  ;;  %v3217_v39 = vmul.f32 %v3500_v6, %v5439_v61 }
 0x410   : > { %4136 = vrcp.f32 %v3234_v18  ;;  %v3231_v15 = vadd.f32 1.0, %v3183_v0  ;;  %v3218_v29 = vmul.f32 %v3501_v59, %v5445_v13  ;;  %v3498_v16 = vadd.f32 -1.0, %v3183_v0 }
 0x411   : > { %4138 = vrsqrt.f32 %v3036_v40  ;;  %v3232_v45 = vadd.f32 1.0, %v3184_v21  ;;  %v3499_v55 = vadd.f32 -1.0, %v3184_v21 }
 0x412   : > { %v3004_v35 = vpop.xlane.xlu1 %3003  ;;  %4140 = vrcp.f32 %v3231_v15  ;;  %v3215_v24 = vmul.f32 %v3498_v16, %v5451_v36 }
 0x413   : > { %v3023_v4 = vmul.f32 0.125, %v3004_v35  ;;  %4142 = vrcp.f32 %v3232_v45 }
 0x414   : > { %v3006_v26 = vpop.xlane.xlu0 %3005 }
 0x415   : > { %v4129_v53 = vpop.eup %4128  ;;  %v3024_v56 = vmul.f32 0.125, %v3006_v26  ;;  %v3039_v51 = vadd.f32 1e-05, %v3023_v4 }
 0x416   : > { %v3069_v27 = vmul.f32 %v4129_v53, %v5364_v31  ;;  %v3008_v25 = vpop.xlane.xlu1 %3007 }
 0x417   : > { %v4131_v9 = vpop.eup %4130  ;;  %v3040_v49 = vadd.f32 1e-05, %v3024_v56  ;;  %v3025_v33 = vmul.f32 0.125, %v3008_v25  ;;  %4144 = vrsqrt.f32 %v3039_v51 }
 0x418   : > { %v4133_v62 = vpop.eup %4132  ;;  %v3089_v58 = vmul.f32 %v5406_v22, %v3069_v27  ;;  %v3070_v54 = vmul.f32 %v4131_v9, %v5367_v14  ;;  %v3010_v12 = vpop.xlane.xlu0 %3009 }
 0x419   : > { %v4135_v37 = vpop.eup %4134  ;;  %4146 = vrsqrt.f32 %v3040_v49  ;;  %v3041_v31 = vadd.f32 1e-05, %v3025_v33  ;;  %v3026_v52 = vmul.f32 0.125, %v3010_v12  ;;  %v3265_v63 = vmul.f32 %v4133_v62, %v3217_v39 }
 0x41a   : > { %v4137_v5 = vpop.eup %4136  ;;  %v5478_v61 = vadd.f32 %v5409_v23, %v3089_v58  ;;  %v3090_v32 = vmul.f32 %v5406_v22, %v3070_v54  ;;  %v3067_v13 = vmul.f32 %v4135_v37, %v5372_v42  ;;  %v3216_v42 = vmul.f32 %v3499_v55, %v5456_v34 }
 0x41b   : > { %v4139_v19 = vpop.eup %4138  ;;  %v3266_v38 = vmul.f32 %v4137_v5, %v3218_v29  ;;  %4148 = vrsqrt.f32 %v3041_v31  ;;  %v3042_v14 = vadd.f32 1e-05, %v3026_v52 }
 0x41c   : > { %v3125_v44 = vmin.f32 %v5478_v61, 20.0  ;;  %v5484_v20 = vadd.f32 %v5409_v23, %v3090_v32  ;;  %v3087_v57 = vmul.f32 %v5406_v22, %v3067_v13  ;;  %v3068_v11 = vmul.f32 %v4139_v19, %v5377_v8  ;;  %v4141_v17 = vpop.eup %4140 }
 0x41d   : > { %v3594_v41 = vpack.c.bf16 %v3266_v38, %v3265_v63  ;;  %4150 = vrsqrt.f32 %v3042_v14  ;;  %v4143_v10 = vpop.eup %4142  ;;  %v3263_v50 = vmul.f32 %v4141_v17, %v3215_v24 }
 0x41e   : > { %v3151_v28 = vmul.f32 1.442695, %v3125_v44  ;;  %v3126_v47 = vmin.f32 %v5484_v20, 20.0  ;;  %v5492_v7 = vadd.f32 %v5409_v23, %v3087_v57  ;;  %v3088_v30 = vmul.f32 %v5406_v22, %v3068_v11 }
 0x41f   : > { %3625 = vst [vmem:[%s5466_s24 + $0x18] sm:$0xff] %v3594_v41   ;;  %v3264_v8 = vmul.f32 %v4143_v10, %v3216_v42 }
 0x420   : > { %4152 = vpow2.f32 %v3151_v28  ;;  %v3153_v60 = vmul.f32 1.442695, %v3126_v47  ;;  %v3123_v36 = vmin.f32 %v5492_v7, 20.0  ;;  %v5498_v1 = vadd.f32 %v5409_v23, %v3088_v30 }
 0x421   : > { %v4145_v34 = vpop.eup %4144  ;;  %v3589_v18 = vpack.c.bf16 %v3264_v8, %v3263_v50 }
 0x422   : > { %4154 = vpow2.f32 %v3153_v60  ;;  %v3147_v0 = vmul.f32 1.442695, %v3123_v36  ;;  %v3124_v40 = vmin.f32 %v5498_v1, 20.0  ;;  %v3071_v15 = vmul.f32 %v4145_v34, %v5384_v48 }
 0x423   : > { %v4147_v43 = vpop.eup %4146  ;;  %3624 = vst [vmem:[%s5466_s24 + $0x10] sm:$0xff] %v3589_v18  }
 0x424   : > { %4156 = vpow2.f32 %v3147_v0  ;;  %v3072_v21 = vmul.f32 %v4147_v43, %v5387_v2  ;;  %v3149_v6 = vmul.f32 1.442695, %v3124_v40  ;;  %v3091_v45 = vmul.f32 %v5406_v22, %v3071_v15 }
 0x425   : > { %v4149_v35 = vpop.eup %4148 }
 0x426   : > { %v3092_v59 = vmul.f32 %v5406_v22, %v3072_v21  ;;  %v3073_v4 = vmul.f32 %v4149_v35, %v5392_v3  ;;  %4158 = vpow2.f32 %v3149_v6  ;;  %v5508_v53 = vadd.f32 %v5409_v23, %v3091_v45 }
 0x427   : > { %v4151_v26 = vpop.eup %4150 }
 0x428   : > { %v5511_v56 = vadd.f32 %v5409_v23, %v3092_v59  ;;  %v3093_v48 = vmul.f32 %v5406_v22, %v3073_v4  ;;  %v3074_v2 = vmul.f32 %v4151_v26, %v5397_v46  ;;  %v3127_v27 = vmin.f32 %v5508_v53, 20.0 }
 0x42a   : > { %v4153_v51 = vpop.eup %4152  ;;  %v3128_v25 = vmin.f32 %v5511_v56, 20.0  ;;  %v5518_v9 = vadd.f32 %v5409_v23, %v3093_v48  ;;  %v3094_v3 = vmul.f32 %v5406_v22, %v3074_v2  ;;  %v3155_v49 = vmul.f32 1.442695, %v3127_v27 }
 0x42b   : > { %v3173_v39 = vadd.f32 1.0, %v4153_v51 }
 0x42c   : > { %v4155_v33 = vpop.eup %4154  ;;  %v3157_v62 = vmul.f32 1.442695, %v3128_v25  ;;  %v3129_v29 = vmin.f32 %v5518_v9, 20.0  ;;  %v5523_v58 = vadd.f32 %v5409_v23, %v3094_v3  ;;  %4160 = vpow2.f32 %v3155_v49 }
 0x42d   : > { %v3189_v46 = vmul.f32 %v3173_v39, %v3173_v39  ;;  %v3174_v54 = vadd.f32 1.0, %v4155_v33 }
 0x42e   : > { %v4157_v12 = vpop.eup %4156  ;;  %4162 = vpow2.f32 %v3157_v62  ;;  %v3159_v37 = vmul.f32 1.442695, %v3129_v29  ;;  %v3130_v16 = vmin.f32 %v5523_v58, 20.0 }
 0x42f   : > { %v3237_v31 = vadd.f32 1.0, %v3189_v46  ;;  %v3190_v52 = vmul.f32 %v3174_v54, %v3174_v54  ;;  %v3171_v22 = vadd.f32 1.0, %v4157_v12  ;;  %v3504_v57 = vadd.f32 -1.0, %v3189_v46 }
 0x430   : > { %4164 = vpow2.f32 %v3159_v37  ;;  %v3161_v5 = vmul.f32 1.442695, %v3130_v16  ;;  %v4159_v55 = vpop.eup %4158 }
 0x431   : > { %4166 = vrcp.f32 %v3237_v31  ;;  %v3238_v32 = vadd.f32 1.0, %v3190_v52  ;;  %v3187_v13 = vmul.f32 %v3171_v22, %v3171_v22  ;;  %v3172_v19 = vadd.f32 1.0, %v4159_v55 }
 0x432   : > { %4168 = vpow2.f32 %v3161_v5  ;;  %v3505_v11 = vadd.f32 -1.0, %v3190_v52  ;;  %v3221_v30 = vmul.f32 %v3504_v57, %v5478_v61 }
 0x433   : > { %4170 = vrcp.f32 %v3238_v32  ;;  %v3235_v23 = vadd.f32 1.0, %v3187_v13  ;;  %v3188_v63 = vmul.f32 %v3172_v19, %v3172_v19  ;;  %v3502_v60 = vadd.f32 -1.0, %v3187_v13 }
 0x434   : > { %v3222_v8 = vmul.f32 %v3505_v11, %v5484_v20 }
 0x435   : > { %4172 = vrcp.f32 %v3235_v23  ;;  %v3236_v38 = vadd.f32 1.0, %v3188_v63  ;;  %v3503_v18 = vadd.f32 -1.0, %v3188_v63  ;;  %v3219_v61 = vmul.f32 %v3502_v60, %v5492_v7 }
 0x436   : > { %v4161_v14 = vpop.eup %4160 }
 0x437   : > { %4174 = vrcp.f32 %v3236_v38  ;;  %v3175_v17 = vadd.f32 1.0, %v4161_v14  ;;  %v3220_v20 = vmul.f32 %v3503_v18, %v5498_v1 }
 0x438   : > { %v4163_v44 = vpop.eup %4162 }
 0x439   : > { %v3176_v41 = vadd.f32 1.0, %v4163_v44  ;;  %v3191_v42 = vmul.f32 %v3175_v17, %v3175_v17 }
 0x43a   : > { %v4165_v24 = vpop.eup %4164 }
 0x43b   : > { %v4167_v28 = vpop.eup %4166  ;;  %v3192_v47 = vmul.f32 %v3176_v41, %v3176_v41  ;;  %v3177_v10 = vadd.f32 1.0, %v4165_v24  ;;  %v3239_v36 = vadd.f32 1.0, %v3191_v42  ;;  %v3506_v27 = vadd.f32 -1.0, %v3191_v42 }
 0x43c   : > { %v4169_v50 = vpop.eup %4168  ;;  %v3269_v15 = vmul.f32 %v4167_v28, %v3221_v30 }
 0x43d   : > { %v4171_v34 = vpop.eup %4170  ;;  %v3240_v0 = vadd.f32 1.0, %v3192_v47  ;;  %v3193_v43 = vmul.f32 %v3177_v10, %v3177_v10  ;;  %v3178_v40 = vadd.f32 1.0, %v4169_v50  ;;  %4176 = vrcp.f32 %v3239_v36 }
 0x43e   : > { %v3270_v21 = vmul.f32 %v4171_v34, %v3222_v8  ;;  %v3507_v51 = vadd.f32 -1.0, %v3192_v47  ;;  %v3223_v39 = vmul.f32 %v3506_v27, %v5508_v53 }
 0x43f   : > { %4178 = vrcp.f32 %v3240_v0  ;;  %v3241_v35 = vadd.f32 1.0, %v3193_v43  ;;  %v4173_v6 = vpop.eup %4172  ;;  %v3194_v59 = vmul.f32 %v3178_v40, %v3178_v40  ;;  %v3508_v1 = vadd.f32 -1.0, %v3193_v43 }
 0x440   : > { %v3604_v45 = vpack.c.bf16 %v3270_v21, %v3269_v15  ;;  %v3267_v48 = vmul.f32 %v4173_v6, %v3219_v61  ;;  %v3224_v7 = vmul.f32 %v3507_v51, %v5511_v56 }
 0x441   : > { %v4175_v4 = vpop.eup %4174  ;;  %4180 = vrcp.f32 %v3241_v35  ;;  %v3242_v26 = vadd.f32 1.0, %v3194_v59  ;;  %v3509_v33 = vadd.f32 -1.0, %v3194_v59  ;;  %v3225_v12 = vmul.f32 %v3508_v1, %v5518_v9 }
 0x442   : > { %3627 = vst [vmem:[%s5466_s24 + $0x28] sm:$0xff] %v3604_v45   ;;  %v3268_v2 = vmul.f32 %v4175_v4, %v3220_v20 }
 0x443   : > { %4182 = vrcp.f32 %v3242_v26  ;;  %v3226_v37 = vmul.f32 %v3509_v33, %v5523_v58 }
 0x444   : > { %v3599_v25 = vpack.c.bf16 %v3268_v2, %v3267_v48 }
 0x446   : > { %3626 = vst [vmem:[%s5466_s24 + $0x20] sm:$0xff] %v3599_v25  }
 0x447   : > { %v4177_v3 = vpop.eup %4176 }
 0x448   : > { %v3271_v62 = vmul.f32 %v4177_v3, %v3223_v39 }
 0x449   : > { %v4179_v49 = vpop.eup %4178 }
 0x44a   : > { %v3272_v29 = vmul.f32 %v4179_v49, %v3224_v7 }
 0x44b   : > { %v4181_v46 = vpop.eup %4180 }
 0x44c   : > { %v3609_v54 = vpack.c.bf16 %v3272_v29, %v3271_v62  ;;  %v3273_v31 = vmul.f32 %v4181_v46, %v3225_v12 }
 0x44d   : > { %v4183_v16 = vpop.eup %4182 }
 0x44e   : > { %3628 = vst [vmem:[%s5466_s24 + $0x30] sm:$0xff] %v3609_v54   ;;  %v3274_v52 = vmul.f32 %v4183_v16, %v3226_v37 }
 0x450   : > { %v3614_v22 = vpack.c.bf16 %v3274_v52, %v3273_v31 }
 0x452   : > { %3629 = vst [vmem:[%s5466_s24 + $0x38] sm:$0xff] %v3614_v22  }
 0x453 PF: > { %s14_s15 = sadd.s32 1, %s4206_s15  }
 0x454   : > { %p11_p4 = scmp.ge.s32.totalorder %s14_s15, 4  }
 0x456   :  { %13 = sbr.rel (!%p11_p4) target bundleno = 1 (0x1), region = 66 }

// kernel: ffcnet_forward.14
= control target key start
LH: loop header
LB: loop body
LE: loop exit
PB: predicated region body
PF: predicated region fallthrough
CT: control target
= control target key end

     0   :  { %s678_s12 = smov 0   ;;  %s762_s0 = inlined_call_operand.vmem [shape: f32[160,4], index: 0, kind: input, shape index: {}]   ;;  %s763_s1 = inlined_call_operand.vmem [shape: bf16[4,128], index: 1, kind: input, shape index: {}]   ;;  %s764_s2 = inlined_call_operand.vmem [shape: f32[4,128], index: 2, kind: input, shape index: {}]   ;;  %s765_s3 = inlined_call_operand.vmem [shape: bf16[160,128], index: 3, kind: output, shape index: {}]  }
   0x1 LB: > { %s495_s13 = sadd.s32 4294967295, %s654_s12   ;;  %p499_p0 = scmp.ge.s32.totalorder %s654_s12, 1  ;;  %s654_s12 = sphi %s678_s12, %s13_s12  }
   0x2   : > { %p138_p1 = scmp.lt.s32.totalorder %s654_s12, 3 }
   0x4   : > { %p139_p2 = pnand %p499_p0, %p138_p1 }
   0x5   : > { %v190_v0 = vld [vmem:[%s763_s1] sm:$0x3] (!%p139_p2)  ;;  %vm212_vm0 = vcmask (!%p139_p2), 1041408   ;;  %s162_s16 = smul.u32 (!%p139_p2), 10, %s495_s13  ;;  %v656_v1 = vmov (!%p139_p2), 0.0   ;;  %vm657_vm1 = vmmov (!%p139_p2), 0   ;;  %v192_v18 = vlaneseq (!%p139_p2) }
   0x6   : > { %142 = sbr.rel (%p139_p2) target bundleno = 291 (0x123), region = 32  ;;  %574 = vmatprep.subr.bf16.mxu0 (!%p139_p2), %v656_v1  ;;  %596 = vmatprep.subr.bf16.mxu1 (!%p139_p2), %v656_v1  ;;  %v214_v2 = vsel (!%p139_p2), %vm212_vm0, %v190_v0, 0  ;;  %vm196_vm2 = vcmask (!%p139_p2), 31744   ;;  %v191_v21 = vld [vmem:[%s764_s2] sm:$0xf] (!%p139_p2) }
   0x7   : > { %575 = vmatpush3.bf16.msra.mxu0 (!%p139_p2), %v214_v2  ;;  %597 = vmatpush3.bf16.msra.mxu1 (!%p139_p2), %v214_v2  ;;  %p163_p3 = scmp.lt.s32.totalorder (!%p139_p2), %s162_s16, 19  ;;  %v193_v19 = vshrl.u32 (!%p139_p2), %v192_v18, 7 }
   0x8   : > { %576 = vmatprep.mubr.msk.bf16.mxu0 (!%p139_p2), %vm657_vm1, %v656_v1  ;;  %588 = vmatprep.mubr.msk.bf16.mxu1 (!%p139_p2), %vm657_vm1, %v656_v1 }
   0x9   : > { %v194_v20 = vsub.s32 (!%p139_p2), 0, %v193_v19 }
   0xb   : > { %v195_v22 = vrot.slane (!%p139_p2), %v191_v21, %v194_v20 }
   0xd   : > { %s767_s16 = smov (!%p163_p3, %s162_s16), 19 }
   0xe   : > { %s500_s17 = sshll.u32 %s767_s16, 3  ;;  %s501_s23 = sshll.u32 %s767_s16, 2 }
   0xf   : > { %s166_s20 = scalar_lea.vmem %s762_s0, %s500_s17  ;;  %s746_s26 = scalar_lea.vmem %s765_s3, %s501_s23 }
  0x10   : > { %v175_v3 = vld [vmem:[%s166_s20] sm:$0xff]  ;;  %v176_v4 = vld [vmem:[%s166_s20 + $0x8] sm:$0xff]  ;;  %v181_v5 = vld [vmem:[%s166_s20 + $0x30] sm:$0xff] }
  0x11   : > { %v185_v6 = vpack.c.bf16 %v176_v4, %v175_v3  ;;  %v182_v7 = vld [vmem:[%s166_s20 + $0x38] sm:$0xff]  ;;  %v177_v9 = vld [vmem:[%s166_s20 + $0x10] sm:$0xff]  ;;  %v183_v11 = vld [vmem:[%s166_s20 + $0x40] sm:$0xff] }
  0x12   : > { %v188_v8 = vpack.c.bf16 %v182_v7, %v181_v5  ;;  %v178_v10 = vld [vmem:[%s166_s20 + $0x18] sm:$0xff]  ;;  %v184_v12 = vld [vmem:[%s166_s20 + $0x48] sm:$0xff]  ;;  %v179_v15 = vld [vmem:[%s166_s20 + $0x20] sm:$0xff] }
  0x13   : > { %577 = vmatmul.mubr.msk.bf16.vlgmr.msra.gmra.mrb[0].mxu0 %vm196_vm2, %v185_v6  ;;  %v186_v13 = vpack.c.bf16 %v178_v10, %v177_v9  ;;  %v189_v14 = vpack.c.bf16 %v184_v12, %v183_v11  ;;  %v180_v16 = vld [vmem:[%s166_s20 + $0x28] sm:$0xff] }
  0x14   : > { %589 = vmatmul.mubr.msk.bf16.vlgmr.msra.gmra.mrb[0].mxu1 %vm196_vm2, %v188_v8  ;;  %580 = vmatprep.mubr.msk.bf16.mxu0 %vm657_vm1, %v656_v1  ;;  %v187_v17 = vpack.c.bf16 %v180_v16, %v179_v15 }
  0x15   : > { %592 = vmatprep.mubr.msk.bf16.mxu1 %vm657_vm1, %v656_v1 }
  0x1b   : > { %581 = vmatmul.mubr.msk.bf16.gmra.mrb[4].mxu0 %vm196_vm2, %v186_v13 }
  0x1c   : > { %593 = vmatmul.mubr.msk.bf16.gmra.mrb[4].mxu1 %vm196_vm2, %v189_v14  ;;  %584 = vmatprep.mubr.msk.bf16.mxu0 %vm657_vm1, %v656_v1 }
  0x23   : > { %585 = vmatmul.mubr.msk.bf16.gmra.mrb[8].mxu0 %vm196_vm2, %v187_v17 }
  0xe6   : > { %v250_v23 = vpop.f32.mrb[0].mxu0 }
  0xe7   : > { %v708_v24 = vadd.f32 %v250_v23, %v195_v22  ;;  %v274_v25 = vpop.f32.mrb[0].mxu1  ;;  %v578_v26 = vpop.f32.mrb[1].mxu0 }
  0xe8   : > { %v710_v27 = vadd.f32 %v274_v25, %v195_v22  ;;  %v590_v28 = vpop.f32.mrb[1].mxu1  ;;  %v253_v29 = vpop.f32.mrb[2].mxu0 }
  0xe9   : > { %v289_v30 = vmin.f32 %v708_v24, 20.0  ;;  %v713_v31 = vadd.f32 %v253_v29, %v195_v22  ;;  %v277_v32 = vpop.f32.mrb[2].mxu1  ;;  %v579_v33 = vpop.f32.mrb[3].mxu0 }
  0xea   : > { %v295_v34 = vmin.f32 %v710_v27, 20.0  ;;  %v716_v35 = vadd.f32 %v277_v32, %v195_v22  ;;  %v591_v36 = vpop.f32.mrb[3].mxu1 }
  0xeb   : > { %v299_v37 = vmul.f32 1.442695, %v289_v30  ;;  %v290_v38 = vmin.f32 %v713_v31, 20.0 }
  0xec   : > { %v311_v39 = vmul.f32 1.442695, %v295_v34  ;;  %v296_v40 = vmin.f32 %v716_v35, 20.0 }
  0xed   : > { %608 = vpow2.f32 %v299_v37  ;;  %v301_v41 = vmul.f32 1.442695, %v290_v38 }
  0xee   : > { %610 = vpow2.f32 %v311_v39  ;;  %v313_v42 = vmul.f32 1.442695, %v296_v40  ;;  %v258_v43 = vpop.f32.mrb[4].mxu0 }
  0xef   : > { %612 = vpow2.f32 %v301_v41  ;;  %v720_v44 = vadd.f32 %v258_v43, %v195_v22  ;;  %v282_v45 = vpop.f32.mrb[4].mxu1  ;;  %v582_v46 = vpop.f32.mrb[5].mxu0 }
  0xf0   : > { %614 = vpow2.f32 %v313_v42  ;;  %v722_v47 = vadd.f32 %v282_v45, %v195_v22  ;;  %v594_v48 = vpop.f32.mrb[5].mxu1  ;;  %v261_v49 = vpop.f32.mrb[6].mxu0 }
  0xf1   : > { %v291_v50 = vmin.f32 %v720_v44, 20.0  ;;  %v725_v51 = vadd.f32 %v261_v49, %v195_v22  ;;  %v285_v52 = vpop.f32.mrb[6].mxu1  ;;  %v583_v53 = vpop.f32.mrb[7].mxu0 }
  0xf2   : > { %v297_v54 = vmin.f32 %v722_v47, 20.0  ;;  %v728_v55 = vadd.f32 %v285_v52, %v195_v22  ;;  %v595_v56 = vpop.f32.mrb[7].mxu1 }
  0xf3   : > { %v303_v57 = vmul.f32 1.442695, %v291_v50  ;;  %v292_v58 = vmin.f32 %v725_v51, 20.0 }
  0xf4   : > { %v315_v59 = vmul.f32 1.442695, %v297_v54  ;;  %v298_v60 = vmin.f32 %v728_v55, 20.0 }
  0xf5   : > { %616 = vpow2.f32 %v303_v57  ;;  %v305_v61 = vmul.f32 1.442695, %v292_v58 }
  0xf6   : > { %618 = vpow2.f32 %v315_v59  ;;  %v317_v62 = vmul.f32 1.442695, %v298_v60  ;;  %v266_v63 = vpop.f32.mrb[8].mxu0 }
  0xf7   : > { %v609_v0 = vpop.eup %608  ;;  %620 = vpow2.f32 %v305_v61  ;;  %v732_v1 = vadd.f32 %v266_v63, %v195_v22  ;;  %v586_v2 = vpop.f32.mrb[9].mxu0 }
  0xf8   : > { %v611_v3 = vpop.eup %610  ;;  %v319_v4 = vadd.f32 1.0, %v609_v0  ;;  %622 = vpow2.f32 %v317_v62  ;;  %v269_v5 = vpop.f32.mrb[10].mxu0 }
  0xf9   : > { %v613_v6 = vpop.eup %612  ;;  %v325_v7 = vadd.f32 1.0, %v611_v3  ;;  %v293_v8 = vmin.f32 %v732_v1, 20.0  ;;  %v735_v9 = vadd.f32 %v269_v5, %v195_v22  ;;  %v587_v10 = vpop.f32.mrb[11].mxu0 }
  0xfa   : > { %v615_v11 = vpop.eup %614  ;;  %v329_v12 = vmul.f32 %v319_v4, %v319_v4  ;;  %v320_v13 = vadd.f32 1.0, %v613_v6 }
  0xfb   : > { %v335_v14 = vmul.f32 %v325_v7, %v325_v7  ;;  %v326_v15 = vadd.f32 1.0, %v615_v11  ;;  %v307_v16 = vmul.f32 1.442695, %v293_v8  ;;  %v294_v19 = vmin.f32 %v735_v9, 20.0 }
  0xfc   : > { %v359_v17 = vadd.f32 1.0, %v329_v12  ;;  %v330_v18 = vmul.f32 %v320_v13, %v320_v13  ;;  %v507_v41 = vadd.f32 -1.0, %v329_v12 }
  0xfd   : > { %v365_v20 = vadd.f32 1.0, %v335_v14  ;;  %v336_v21 = vmul.f32 %v326_v15, %v326_v15  ;;  %624 = vpow2.f32 %v307_v16  ;;  %v309_v29 = vmul.f32 1.442695, %v294_v19 }
  0xfe   : > { %626 = vrcp.f32 %v359_v17  ;;  %v360_v23 = vadd.f32 1.0, %v330_v18  ;;  %v508_v42 = vadd.f32 -1.0, %v330_v18  ;;  %v513_v46 = vadd.f32 -1.0, %v335_v14 }
  0xff   : > { %v617_v25 = vpop.eup %616  ;;  %628 = vrcp.f32 %v365_v20  ;;  %v366_v22 = vadd.f32 1.0, %v336_v21  ;;  %v514_v48 = vadd.f32 -1.0, %v336_v21  ;;  %v349_v57 = vmul.f32 %v507_v41, %v708_v24 }
 0x100   : > { %v619_v26 = vpop.eup %618  ;;  %630 = vrcp.f32 %v360_v23  ;;  %v321_v28 = vadd.f32 1.0, %v617_v25  ;;  %v350_v58 = vmul.f32 %v508_v42, %v713_v31  ;;  %v355_v60 = vmul.f32 %v513_v46, %v710_v27 }
 0x101   : > { %v621_v30 = vpop.eup %620  ;;  %632 = vrcp.f32 %v366_v22  ;;  %v327_v32 = vadd.f32 1.0, %v619_v26  ;;  %v356_v61 = vmul.f32 %v514_v48, %v716_v35 }
 0x102   : > { %v623_v33 = vpop.eup %622  ;;  %v331_v34 = vmul.f32 %v321_v28, %v321_v28  ;;  %v322_v36 = vadd.f32 1.0, %v621_v30  ;;  %634 = vpow2.f32 %v309_v29 }
 0x103   : > { %v337_v37 = vmul.f32 %v327_v32, %v327_v32  ;;  %v328_v38 = vadd.f32 1.0, %v623_v33 }
 0x104   : > { %v361_v39 = vadd.f32 1.0, %v331_v34  ;;  %v332_v40 = vmul.f32 %v322_v36, %v322_v36  ;;  %v509_v31 = vadd.f32 -1.0, %v331_v34 }
 0x105   : > { %v367_v43 = vadd.f32 1.0, %v337_v37  ;;  %v338_v45 = vmul.f32 %v328_v38, %v328_v38  ;;  %v515_v8 = vadd.f32 -1.0, %v337_v37 }
 0x106   : > { %636 = vrcp.f32 %v361_v39  ;;  %v362_v49 = vadd.f32 1.0, %v332_v40  ;;  %v510_v6 = vadd.f32 -1.0, %v332_v40  ;;  %v351_v14 = vmul.f32 %v509_v31, %v720_v44 }
 0x107   : > { %v625_v50 = vpop.eup %624  ;;  %638 = vrcp.f32 %v367_v43  ;;  %v368_v52 = vadd.f32 1.0, %v338_v45  ;;  %v516_v10 = vadd.f32 -1.0, %v338_v45  ;;  %v357_v18 = vmul.f32 %v515_v8, %v722_v47 }
 0x108   : > { %v627_v53 = vpop.eup %626  ;;  %640 = vrcp.f32 %v362_v49  ;;  %v323_v54 = vadd.f32 1.0, %v625_v50  ;;  %v352_v15 = vmul.f32 %v510_v6, %v725_v51 }
 0x109   : > { %v629_v56 = vpop.eup %628  ;;  %642 = vrcp.f32 %v368_v52  ;;  %v379_v0 = vmul.f32 %v627_v53, %v349_v57  ;;  %v358_v19 = vmul.f32 %v516_v10, %v728_v55 }
 0x10a   : > { %v631_v59 = vpop.eup %630  ;;  %v333_v62 = vmul.f32 %v323_v54, %v323_v54  ;;  %v385_v4 = vmul.f32 %v629_v56, %v355_v60 }
 0x10b   : > { %v633_v63 = vpop.eup %632  ;;  %v380_v2 = vmul.f32 %v631_v59, %v350_v58 }
 0x10c   : > { %v635_v3 = vpop.eup %634  ;;  %v386_v24 = vmul.f32 %v633_v63, %v356_v61  ;;  %v363_v27 = vadd.f32 1.0, %v333_v62  ;;  %v511_v44 = vadd.f32 -1.0, %v333_v62 }
 0x10d   : > { %v542_v5 = vpack.c.bf16 %v380_v2, %v379_v0  ;;  %v324_v7 = vadd.f32 1.0, %v635_v3 }
 0x10e   : > { %v557_v35 = vpack.c.bf16 %v386_v24, %v385_v4  ;;  %644 = vrcp.f32 %v363_v27  ;;  %v353_v30 = vmul.f32 %v511_v44, %v732_v1 }
 0x10f   : > { %543 = vst [vmem:[%s746_s26] sm:$0xff] %v542_v5   ;;  %v334_v11 = vmul.f32 %v324_v7, %v324_v7 }
 0x110   : > { %v637_v12 = vpop.eup %636  ;;  %566 = vst [vmem:[%s746_s26 + $0x18] sm:$0xff] %v557_v35  }
 0x111   : > { %v639_v13 = vpop.eup %638  ;;  %v364_v16 = vadd.f32 1.0, %v334_v11  ;;  %v381_v21 = vmul.f32 %v637_v12, %v351_v14  ;;  %v512_v51 = vadd.f32 -1.0, %v334_v11 }
 0x112   : > { %v641_v17 = vpop.eup %640  ;;  %v387_v25 = vmul.f32 %v639_v13, %v357_v18 }
 0x113   : > { %v643_v20 = vpop.eup %642  ;;  %v382_v23 = vmul.f32 %v641_v17, %v352_v15  ;;  %646 = vrcp.f32 %v364_v16  ;;  %v354_v47 = vmul.f32 %v512_v51, %v735_v9 }
 0x114   : > { %v388_v22 = vmul.f32 %v643_v20, %v358_v19 }
 0x115   : > { %v547_v26 = vpack.c.bf16 %v382_v23, %v381_v21 }
 0x116   : > { %v562_v28 = vpack.c.bf16 %v388_v22, %v387_v25 }
 0x117   : > { %564 = vst [vmem:[%s746_s26 + $0x8] sm:$0xff] %v547_v26  }
 0x118   : > { %567 = vst [vmem:[%s746_s26 + $0x20] sm:$0xff] %v562_v28   ;;  %v645_v29 = vpop.eup %644 }
 0x119   : > { %v383_v55 = vmul.f32 %v645_v29, %v353_v30 }
 0x11d   : > { %v647_v32 = vpop.eup %646 }
 0x11e   : > { %v384_v33 = vmul.f32 %v647_v32, %v354_v47 }
 0x120   : > { %v552_v34 = vpack.c.bf16 %v384_v33, %v383_v55 }
 0x122   : > { %565 = vst [vmem:[%s746_s26 + $0x10] sm:$0xff] %v552_v34  }
 0x123 PF: > { %s13_s12 = sadd.s32 1, %s654_s12  }
 0x124   : > { %p10_p4 = scmp.ge.s32.totalorder %s13_s12, 4  }
 0x126   :  { %12 = sbr.rel (!%p10_p4) target bundleno = 1 (0x1), region = 62 }

// kernel: reverse.5
= control target key start
LH: loop header
LB: loop body
LE: loop exit
PB: predicated region body
PF: predicated region fallthrough
CT: control target
= control target key end

     0   :  { %v63_v4 = vld [vmem:[#allocation1 + $0x18] sm:$0xf]  ;;  %v73_v5 = vld [vmem:[#allocation1 + $0x10] sm:$0xf]  ;;  %v83_v6 = vld [vmem:[#allocation1 + $0x8] sm:$0xf]  ;;  %v100_v8 = vlaneseq  ;;  %s274_s0 = inlined_call_operand.vmem [shape: f32[2,2,16,3], index: 0, kind: input, shape index: {}]   ;;  %s275_s1 = inlined_call_operand.vmem [shape: f32[2,2,16,3], index: 1, kind: output, shape index: {}]  }
   0x1   :  { %v18_v0 = vld [vmem:[%s274_s0] sm:$0xf]  ;;  %v20_v1 = vld [vmem:[%s274_s0 + $0x4] sm:$0xf]  ;;  %v22_v2 = vld [vmem:[%s274_s0 + $0x8] sm:$0xf] }
   0x2   :  { %19 = vst [vmem:[#allocation1 + $0x4] sm:$0xf] %v18_v0  ;;  %21 = vst [vmem:[#allocation1 + $0xc] sm:$0xf] %v20_v1  ;;  %v24_v3 = vld [vmem:[%s274_s0 + $0xc] sm:$0xf] }
   0x3   :  { %23 = vst [vmem:[#allocation1 + $0x14] sm:$0xf] %v22_v2  ;;  %25 = vst [vmem:[#allocation1 + $0x1c] sm:$0xf] %v24_v3  ;;  %v90_v7 = vld [vmem:[#allocation1] sm:$0xf] }
   0x4   :  { %65 = vst [vmem:[#allocation0 + $0x30] sm:$0xf] %v63_v4  ;;  %75 = vst [vmem:[#allocation0 + $0x20] sm:$0xf] %v73_v5  ;;  %v101_v20 = vshrl.u32 %v100_v8, 7 }
   0x5   :  { %85 = vst [vmem:[#allocation0 + $0x10] sm:$0xf] %v83_v6  ;;  %91 = vst [vmem:[#allocation0] sm:$0xf] %v90_v7 }
   0x6   :  { %vm102_vm0 = vcmp.lt.s32.totalorder %v101_v20, 3 }
   0x9   :  { %v78_v10 = vld [vmem:[#allocation1 + $0xc] sm:$0xf]  ;;  %v87_v11 = vld [vmem:[#allocation1 + $0x4] sm:$0xf] }
   0xa   :  { %v68_v9 = vld [vmem:[#allocation1 + $0x14] sm:$0xf]  ;;  %v58_v12 = vld [vmem:[#allocation1 + $0x1c] sm:$0xf]  ;;  %80 = vst [vmem:[#allocation0 + $0x18] sm:$0xf] %v78_v10 }
   0xb   :  { %70 = vst [vmem:[#allocation0 + $0x28] sm:$0xf] %v68_v9  ;;  %89 = vst [vmem:[#allocation0 + $0x8] sm:$0xf] %v87_v11  ;;  %v121_v13 = vld [vmem:[#allocation0 + $0x27] ss:$-1 sm:$0xff] }
   0xc   :  { %v135_v14 = vld [vmem:[#allocation0 + $0x37] ss:$-1 sm:$0xff]  ;;  %60 = vst [vmem:[#allocation0 + $0x38] sm:$0xf] %v58_v12  ;;  %v93_v15 = vld [vmem:[#allocation0 + $0x7] ss:$-1 sm:$0xff] }
   0xd   :  { %v107_v16 = vld [vmem:[#allocation0 + $0x17] ss:$-1 sm:$0xff]  ;;  %v122_v17 = vrot.slane %v121_v13, 5  ;;  %v136_v18 = vrot.slane %v135_v14, 5  ;;  %v94_v19 = vrot.slane %v93_v15, 5 }
   0xe   :  { %v108_v21 = vrot.slane %v107_v16, 5 }
   0xf   :  { %123 = vst [vmem:[#allocation2 + $0x10] sm:$0xff] %v122_v17  ;;  %137 = vst [vmem:[#allocation2 + $0x18] sm:$0xff] %v136_v18 }
  0x10   :  { %95 = vst [vmem:[#allocation2] sm:$0xff] %v94_v19  ;;  %109 = vst [vmem:[#allocation2 + $0x8] sm:$0xff] %v108_v21 }
  0x11   :  { %v112_v23 = vld [vmem:[#allocation0 + $0x1f] ss:$-1 sm:$0xff] }
  0x12   :  { %v98_v22 = vld [vmem:[#allocation0 + $0xf] ss:$-1 sm:$0xff]  ;;  %v113_v26 = vrot.slane %v112_v23, 5 }
  0x13   :  { %v126_v24 = vld [vmem:[#allocation0 + $0x2f] ss:$-1 sm:$0xff]  ;;  %v99_v25 = vrot.slane %v98_v22, 5  ;;  %v140_v28 = vld [vmem:[#allocation0 + $0x3f] ss:$-1 sm:$0xff] }
  0x14   :  { %v127_v27 = vrot.slane %v126_v24, 5  ;;  %v141_v29 = vrot.slane %v140_v28, 5  ;;  %117 = vst.msk [vmem:[#allocation2 + $0x8] sm:$0xff] %vm102_vm0, %v113_v26 }
  0x15   :  { %103 = vst.msk [vmem:[#allocation2] sm:$0xff] %vm102_vm0, %v99_v25 }
  0x16   :  { %131 = vst.msk [vmem:[#allocation2 + $0x10] sm:$0xff] %vm102_vm0, %v127_v27  ;;  %145 = vst.msk [vmem:[#allocation2 + $0x18] sm:$0xff] %vm102_vm0, %v141_v29 }
  0x1b   :  { %v153_v31 = vld [vmem:[#allocation2 + $0x8] sm:$0xf] }
  0x1c   :  { %v149_v30 = vld [vmem:[#allocation2] sm:$0xf]  ;;  %156 = vst [vmem:[#allocation3 + $0x4] sm:$0xf] %v153_v31 }
  0x1d   :  { %v158_v32 = vld [vmem:[#allocation2 + $0x10] sm:$0xf]  ;;  %151 = vst [vmem:[#allocation3] sm:$0xf] %v149_v30  ;;  %v164_v33 = vld [vmem:[#allocation2 + $0x18] sm:$0xf] }
  0x1e   :  { %162 = vst [vmem:[#allocation3 + $0x8] sm:$0xf] %v158_v32  ;;  %168 = vst [vmem:[#allocation3 + $0xc] sm:$0xf] %v164_v33 }
  0x24   :  { %v184_v34 = vld [vmem:[#allocation3] sm:$0xff]  }
  0x25   :  { %185 = vst [vmem:[%s275_s1] sm:$0xff] %v184_v34   ;;  %v188_v35 = vld [vmem:[#allocation3 + $0x8] sm:$0xff]  }
  0x26   :  { %189 = vst [vmem:[%s275_s1 + $0x8] sm:$0xff] %v188_v35  }

// kernel: ffcnet_forward.12
= control target key start
LH: loop header
LB: loop body
LE: loop exit
PB: predicated region body
PF: predicated region fallthrough
CT: control target
= control target key end

     0   :  { %s3707_s15 = smov 0   ;;  %s4752_s0 = inlined_call_operand.vmem [shape: bf16[256,128], index: 0, kind: input, shape index: {}]   ;;  %s4753_s1 = inlined_call_operand.vmem [shape: bf16[72,128], index: 1, kind: input, shape index: {}]   ;;  %s4754_s2 = inlined_call_operand.vmem [shape: f32[128,9], index: 2, kind: input, shape index: {}]   ;;  %s4755_s3 = inlined_call_operand.vmem [shape: f32[4,128], index: 3, kind: input, shape index: {}]   ;;  %s4756_s4 = inlined_call_operand.vmem [shape: bf16[256,128], index: 4, kind: output, shape index: {}]  }
   0x1 LB: > { %s3010_s16 = sadd.s32 4294967295, %s3671_s15   ;;  %p3014_p0 = scmp.ge.s32.totalorder %s3671_s15, 1  ;;  %s3671_s15 = sphi %s3707_s15, %s14_s15  }
   0x2   : > { %p163_p1 = scmp.lt.s32.totalorder %s3671_s15, 3 }
   0x4   : > { %p164_p2 = pnand %p3014_p0, %p163_p1 }
   0x6   : > { %167 = sbr.rel (%p164_p2) target bundleno = 733 (0x2dd), region = 36 }
   0xd   : > { %v3718_v0 = vld [vmem:[%s4754_s2 + $0x10] sm:$0xff]  ;;  %v3723_v1 = vld [vmem:[%s4754_s2] sm:$0xff]  ;;  %v3673_v2 = vmov 0   ;;  %v3730_v3 = vld [vmem:[%s4754_s2 + $0x18] sm:$0xff]  ;;  %v3674_v17 = vmov 1   ;;  %vm646_vm0 = vcmask 1043456  }
   0xe   : > { %4771 = vst [vmem:[#allocation2_spill] sm:$0xff] %v3723_v1  ;;  %3612 = vset.pattern.permute.xlu1 %v3673_v2  ;;  %3611 = vset.pattern.permute.xlu0 %v3673_v2  ;;  %4772 = vst [vmem:[#allocation3_spill] sm:$0xff] %v3730_v3  ;;  %v3735_v4 = vld [vmem:[%s4754_s2 + $0x8] sm:$0xff]  ;;  %v3747_v6 = vld [vmem:[%s4754_s2 + $0x20] sm:$0xff]  ;;  %v4762_v20 = vmov 2   ;;  %v4757_v21 = vmov 4  }
   0xf   : > { %338 = vperm.xlu1 %3612, %v3718_v0   ;;  %328 = vperm.xlu0 %3611, %v3723_v1   ;;  %v3742_v5 = vld [vmem:[%s4754_s2 + $0x28] sm:$0xff]  ;;  %v3754_v7 = vld [vmem:[%s4754_s2 + $0x38] sm:$0xff]  ;;  %v3759_v8 = vld [vmem:[%s4754_s2 + $0x30] sm:$0xff]  ;;  %v3677_v23 = vmov 5   ;;  %v4759_v27 = vmov 6   ;;  %s3015_s7 = sshll.u32 %s3010_s16, 4 }
  0x10   : > { %4773 = vst [vmem:[#allocation4_spill] sm:$0xff] %v3754_v7  ;;  %v3766_v9 = vld [vmem:[%s4754_s2 + $0x48] sm:$0xff]  ;;  %v3771_v10 = vld [vmem:[%s4754_s2 + $0x40] sm:$0xff]  ;;  %v3778_v11 = vld [vmem:[%s4754_s2 + $0x58] sm:$0xff]  ;;  %p190_p3 = scmp.lt.s32.totalorder %s3015_s7, 31  ;;  %vm250_vm1 = vcmask 1040384  }
  0x11   : > { %4774 = vst [vmem:[#allocation5_spill] sm:$0xff] %v3771_v10  ;;  %v3783_v12 = vld [vmem:[%s4754_s2 + $0x50] sm:$0xff]  ;;  %v3790_v13 = vld [vmem:[%s4754_s2 + $0x68] sm:$0xff]  ;;  %v3795_v14 = vld [vmem:[%s4754_s2 + $0x60] sm:$0xff]  ;;  %v4760_v2 = vmov 7   ;;  %vm621_vm3 = vcmask 64512  }
  0x12   : > { %v3802_v15 = vld [vmem:[%s4754_s2 + $0x78] sm:$0xff]  ;;  %v3807_v16 = vld [vmem:[%s4754_s2 + $0x70] sm:$0xff]  ;;  %v302_v18 = vld [vmem:[%s4753_s1 + $0x4] sm:$0xf]  ;;  %s4800_s7 = smov (!%p190_p3, %s3015_s7), 31  ;;  %vm919_vm4 = vcmask 1041408  }
  0x13   : > { %343 = vperm.xlu1 %3612, %v3730_v3   ;;  %333 = vperm.xlu0 %3611, %v3735_v4   ;;  %v648_v19 = vsel %vm646_vm0, %v302_v18, 0  ;;  %v3846_v22 = vld [vmem:[%s4753_s1] sm:$0xf]  ;;  %v305_v24 = vld [vmem:[%s4753_s1 + $0x10] sm:$0xf]  ;;  %s3016_s16 = sshll.u32 %s4800_s7, 2 }
  0x14   : > { %3584 = vmatprep.subr.msk.bf16.mxu1 %vm646_vm0, %v302_v18  ;;  %3588 = vmatprep.subr.msk.bf16.mxu0 %vm646_vm0, %v305_v24  ;;  %v3863_v25 = vsel %vm646_vm0, %v305_v24, 0  ;;  %v3877_v26 = vld [vmem:[%s4753_s1 + $0x14] sm:$0xf]  ;;  %s3934_s10 = scalar_lea.vmem %s4752_s0, %s3016_s16  ;;  %vm552_vm2 = vsmask.f32 7424  ;;  %vm1003_vm5 = vcmask 1046528   ;;  %s4726_s11 = scalar_lea.vmem %s4756_s4, %s3016_s16 }
  0x15   : > { %3293 = vmatpush3.bf16.msra.mxu1 %v648_v19  ;;  %4775 = vst [vmem:[#allocation6_spill] sm:$0xff] %v3863_v25  ;;  %3365 = vmatpush3.bf16.msra.mxu0 %v3863_v25  ;;  %4776 = vst [vmem:[#allocation7_spill] sm:$0xff] %v3877_v26  ;;  %v3126_v42 = vld [vmem:[%s3934_s10] sm:$0xff]   ;;  %v3197_v43 = vld [vmem:[%s3934_s10 + $0x8] sm:$0xff]  }
  0x16   : > { %3585 = vmatprep.subr.msk.bf16.mxu1 %vm646_vm0, %v3846_v22  ;;  %3590 = vmatprep.subr.msk.bf16.mxu0 %vm646_vm0, %v3877_v26  ;;  %v3127_v44 = vunpack.c.l.bf16 %v3126_v42  ;;  %v3198_v45 = vld [vmem:[%s3934_s10 + $0x10] sm:$0xff]   ;;  %v3128_v48 = vunpack.c.h.bf16 %v3126_v42  ;;  %v3131_v49 = vunpack.c.l.bf16 %v3197_v43  ;;  %v3199_v50 = vld [vmem:[%s3934_s10 + $0x18] sm:$0xff]   ;;  %v3132_v51 = vunpack.c.h.bf16 %v3197_v43  ;;  %v3200_v56 = vld [vmem:[%s3934_s10 + $0x20] sm:$0xff]  }
  0x17   : > { %353 = vperm.xlu1 %3612, %v3742_v5   ;;  %348 = vperm.xlu0 %3611, %v3747_v6   ;;  %v3135_v52 = vunpack.c.l.bf16 %v3198_v45  ;;  %v3136_v54 = vunpack.c.h.bf16 %v3198_v45  ;;  %v3139_v55 = vunpack.c.l.bf16 %v3199_v50  ;;  %v3140_v19 = vunpack.c.h.bf16 %v3199_v50  ;;  %v3961_v24 = vld [vmem:[%s3934_s10 + $0x28] sm:$0xff]  }
  0x18   : > { %v251_v53 = vrot.slane %v3127_v44, 7  ;;  %v252_v57 = vrot.slane %v3128_v48, 7  ;;  %v254_v58 = vrot.slane %v3131_v49, 7 }
  0x19   : > { %v258_v18 = vrot.slane %v3135_v52, 7  ;;  %v260_v42 = vrot.slane %v3136_v54, 7  ;;  %v262_v43 = vrot.slane %v3139_v55, 7  ;;  %v3147_v54 = vunpack.c.l.bf16 %v3961_v24 }
  0x1a   : > { %v3957_v61 = vsel %vm250_vm1, 0.0, %v251_v53  ;;  %v3968_v48 = vsel %vm250_vm1, %v251_v53, %v252_v57  ;;  %v3971_v49 = vsel %vm250_vm1, %v252_v57, %v254_v58 }
  0x1b   : > { %363 = vperm.xlu1 %3612, %v3754_v7   ;;  %358 = vperm.xlu0 %3611, %v3759_v8  }
  0x1f   : > { %373 = vperm.xlu1 %3612, %v3766_v9   ;;  %368 = vperm.xlu0 %3611, %v3771_v10  }
  0x23   : > { %383 = vperm.xlu1 %3612, %v3778_v11   ;;  %378 = vperm.xlu0 %3611, %v3783_v12  }
  0x27   : > { %393 = vperm.xlu1 %3612, %v3790_v13   ;;  %388 = vperm.xlu0 %3611, %v3795_v14  }
  0x2b   : > { %403 = vperm.xlu1 %3612, %v3802_v15   ;;  %398 = vperm.xlu0 %3611, %v3807_v16  }
  0x2f   : > { %3614 = vset.pattern.permute.xlu1 %v3674_v17  ;;  %3613 = vset.pattern.permute.xlu0 %v3674_v17  ;;  %v256_v17 = vrot.slane %v3132_v51, 7 }
  0x30   : > { %434 = vperm.xlu1 %3614, %v3735_v4   ;;  %431 = vperm.xlu0 %3613, %v3723_v1  }
  0x31   : > { %v3980_v57 = vsel %vm250_vm1, %v256_v17, %v258_v18 }
  0x34   : > { %437 = vperm.xlu1 %3614, %v3718_v0   ;;  %440 = vperm.xlu0 %3613, %v3730_v3  }
  0x38   : > { %443 = vperm.xlu1 %3614, %v3747_v6   ;;  %446 = vperm.xlu0 %3613, %v3742_v5  }
  0x3c   : > { %449 = vperm.xlu1 %3614, %v3759_v8   ;;  %452 = vperm.xlu0 %3613, %v3754_v7  }
  0x40   : > { %455 = vperm.xlu1 %3614, %v3771_v10   ;;  %458 = vperm.xlu0 %3613, %v3766_v9  }
  0x44   : > { %461 = vperm.xlu1 %3614, %v3783_v12   ;;  %464 = vperm.xlu0 %3613, %v3778_v11  }
  0x48   : > { %467 = vperm.xlu1 %3614, %v3795_v14   ;;  %470 = vperm.xlu0 %3613, %v3790_v13  }
  0x4c   : > { %473 = vperm.xlu1 %3614, %v3807_v16   ;;  %476 = vperm.xlu0 %3613, %v3802_v15  }
  0x50   : > { %3615 = vset.pattern.permute.xlu1 %v4762_v20  ;;  %3617 = vset.pattern.permute.xlu0 %v4757_v21 }
  0x51   : > { %872 = vperm.xlu1 %3615, %v3723_v1   ;;  %1393 = vperm.xlu0 %3617, %v3735_v4  }
  0x55   : > { %878 = vperm.xlu1 %3615, %v3718_v0   ;;  %1402 = vperm.xlu0 %3617, %v3747_v6  }
  0x59   : > { %3616 = vset.pattern.permute.xlu1 %v4757_v21  ;;  %1408 = vperm.xlu0 %3617, %v3759_v8   ;;  %v264_v21 = vrot.slane %v3140_v19, 7  ;;  %v3992_v19 = vld [vmem:[%s3934_s10 + $0x30] sm:$0xff]  }
  0x5a   : > { %1390 = vperm.xlu1 %3616, %v3723_v1  }
  0x5d   : > { %1414 = vperm.xlu0 %3617, %v3771_v10  }
  0x5e   : > { %1396 = vperm.xlu1 %3616, %v3718_v0  }
  0x61   : > { %3618 = vset.pattern.permute.xlu0 %v3677_v23 }
  0x62   : > { %1399 = vperm.xlu1 %3616, %v3730_v3   ;;  %1720 = vperm.xlu0 %3618, %v3723_v1  }
  0x66   : > { %1405 = vperm.xlu1 %3616, %v3742_v5   ;;  %1729 = vperm.xlu0 %3618, %v3730_v3  }
  0x6a   : > { %1411 = vperm.xlu1 %3616, %v3754_v7   ;;  %1735 = vperm.xlu0 %3618, %v3742_v5  }
  0x6e   : > { %1417 = vperm.xlu1 %3616, %v3766_v9   ;;  %1741 = vperm.xlu0 %3618, %v3754_v7  }
  0x72   : > { %3619 = vset.pattern.permute.xlu1 %v3677_v23  ;;  %1747 = vperm.xlu0 %3618, %v3766_v9   ;;  %v3143_v23 = vunpack.c.l.bf16 %v3200_v56 }
  0x73   : > { %1723 = vperm.xlu1 %3619, %v3735_v4  }
  0x76   : > { %1753 = vperm.xlu0 %3618, %v3778_v11  }
  0x77   : > { %1726 = vperm.xlu1 %3619, %v3718_v0  }
  0x7a   : > { %1759 = vperm.xlu0 %3618, %v3790_v13  }
  0x7b   : > { %1732 = vperm.xlu1 %3619, %v3747_v6  }
  0x7e   : > { %1765 = vperm.xlu0 %3618, %v3802_v15  }
  0x7f   : > { %1738 = vperm.xlu1 %3619, %v3759_v8  }
  0x82   : > { %3621 = vset.pattern.permute.xlu0 %v4759_v27 }
  0x83   : > { %1744 = vperm.xlu1 %3619, %v3771_v10   ;;  %2012 = vperm.xlu0 %3621, %v3735_v4  }
  0x87   : > { %1750 = vperm.xlu1 %3619, %v3783_v12   ;;  %2024 = vperm.xlu0 %3621, %v3747_v6  }
  0x8b   : > { %1756 = vperm.xlu1 %3619, %v3795_v14   ;;  %2032 = vperm.xlu0 %3621, %v3759_v8  }
  0x8e   : > { %v3888_v28 = vpop.permute.xlu1 %338  ;;  %v3890_v29 = vpop.permute.xlu0 %328 }
  0x8f   : > { %1762 = vperm.xlu1 %3619, %v3807_v16   ;;  %2040 = vperm.xlu0 %3621, %v3771_v10  }
  0x92   : > { %v3894_v30 = vpop.permute.xlu1 %343  ;;  %v3896_v31 = vpop.permute.xlu0 %333 }
  0x93   : > { %3620 = vset.pattern.permute.xlu1 %v4759_v27  ;;  %2052 = vperm.xlu0 %3621, %v3778_v11  }
  0x94   : > { %2008 = vperm.xlu1 %3620, %v3723_v1  }
  0x96   : > { %v3903_v32 = vpop.permute.xlu1 %353  ;;  %v3905_v33 = vpop.permute.xlu0 %348 }
  0x97   : > { %2060 = vperm.xlu0 %3621, %v3790_v13  }
  0x98   : > { %2016 = vperm.xlu1 %3620, %v3718_v0  }
  0x9a   : > { %v3909_v34 = vpop.permute.xlu1 %363  ;;  %v3911_v35 = vpop.permute.xlu0 %358 }
  0x9b   : > { %3627 = vset.pattern.permute.xlu0 %v4762_v20 }
  0x9c   : > { %2020 = vperm.xlu1 %3620, %v3730_v3   ;;  %875 = vperm.xlu0 %3627, %v3735_v4  }
  0x9e   : > { %v3918_v36 = vpop.permute.xlu1 %373  ;;  %v3920_v37 = vpop.permute.xlu0 %368 }
  0xa0   : > { %2028 = vperm.xlu1 %3620, %v3742_v5   ;;  %881 = vperm.xlu0 %3627, %v3730_v3  }
  0xa2   : > { %v3925_v38 = vpop.permute.xlu1 %383  ;;  %v3927_v39 = vpop.permute.xlu0 %378 }
  0xa3   : > { %4777 = vst [vmem:[#allocation8_spill] sm:$0xff] %v3927_v39 }
  0xa4   : > { %2036 = vperm.xlu1 %3620, %v3754_v7   ;;  %893 = vperm.xlu0 %3627, %v3754_v7  }
  0xa6   : > { %v3938_v40 = vpop.permute.xlu1 %393  ;;  %v3940_v41 = vpop.permute.xlu0 %388 }
  0xa7   : > { %4778 = vst [vmem:[#allocation9_spill] sm:$0xff] %v3938_v40  ;;  %4779 = vst [vmem:[#allocation10_spill] sm:$0xff] %v3940_v41 }
  0xa8   : > { %3622 = vset.pattern.permute.xlu1 %v4762_v20  ;;  %905 = vperm.xlu0 %3627, %v3778_v11   ;;  %v3996_v20 = vrot.slane %v3147_v54, 7 }
  0xa9   : > { %884 = vperm.xlu1 %3622, %v3747_v6  }
  0xaa   : > { %v3948_v46 = vpop.permute.xlu1 %403  ;;  %v3950_v47 = vpop.permute.xlu0 %398 }
  0xab   : > { %4780 = vst [vmem:[#allocation11_spill] sm:$0xff] %v3948_v46  ;;  %4781 = vst [vmem:[#allocation12_spill] sm:$0xff] %v3950_v47 }
  0xac   : > { %917 = vperm.xlu0 %3627, %v3802_v15  }
  0xad   : > { %887 = vperm.xlu1 %3622, %v3742_v5  }
  0xaf   : > { %v435_v59 = vpop.permute.xlu1 %434  ;;  %v432_v60 = vpop.permute.xlu0 %431 }
  0xb0   : > { %v479_v62 = vrot.slane %v435_v59, 7  ;;  %v478_v63 = vrot.slane %v432_v60, 7  ;;  %3632 = vset.pattern.permute.xlu0 %v4760_v2  ;;  %v3144_v59 = vunpack.c.h.bf16 %v3200_v56 }
  0xb1   : > { %3623 = vset.pattern.permute.xlu1 %v4759_v27  ;;  %2236 = vperm.xlu0 %3632, %v3723_v1   ;;  %v266_v27 = vrot.slane %v3143_v23, 7  ;;  %v3203_v1 = vld [vmem:[%s3934_s10 + $0x38] sm:$0xff]  }
  0xb2   : > { %v480_v44 = vsel %vm250_vm1, %v478_v63, %v479_v62  ;;  %v526_v45 = vmul.f32 0.0, %v478_v63  ;;  %2044 = vperm.xlu1 %3623, %v3766_v9   ;;  %v3976_v63 = vsel %vm250_vm1, %v254_v58, %v256_v17  ;;  %v3989_v58 = vsel %vm250_vm1, %v258_v18, %v260_v42 }
  0xb3   : > { %v527_v50 = vmul.f32 %v480_v44, %v3957_v61  ;;  %v438_v51 = vpop.permute.xlu1 %437  ;;  %v441_v52 = vpop.permute.xlu0 %440  ;;  %v3983_v44 = vsel %vm250_vm1, %v260_v42, %v262_v43  ;;  %v4002_v18 = vsel %vm250_vm1, %v262_v43, %v264_v21 }
  0xb4   : > { %v481_v55 = vrot.slane %v438_v51, 7  ;;  %v483_v60 = vrot.slane %v441_v52, 7  ;;  %v268_v52 = vrot.slane %v3144_v59, 7 }
  0xb5   : > { %v543_v53 = vpack.c.bf16 %v527_v50, %v526_v45  ;;  %2245 = vperm.xlu0 %3632, %v3730_v3  }
  0xb6   : > { %v482_v56 = vsel %vm250_vm1, %v479_v62, %v481_v55  ;;  %v484_v2 = vsel %vm250_vm1, %v481_v55, %v483_v60  ;;  %2048 = vperm.xlu1 %3623, %v3783_v12   ;;  %v3999_v55 = vsel %vm250_vm1, %v264_v21, %v266_v27 }
  0xb7   : > { %v528_v23 = vmul.f32 %v482_v56, %v3968_v48  ;;  %v529_v45 = vmul.f32 %v484_v2, %v3971_v49  ;;  %v444_v17 = vpop.permute.xlu1 %443  ;;  %v447_v50 = vpop.permute.xlu0 %446  ;;  %v556_v51 = vshll.u32 %v543_v53, 16  ;;  %v3148_v2 = vunpack.c.h.bf16 %v3961_v24 }
  0xb8   : > { %v485_v62 = vrot.slane %v444_v17, 7  ;;  %v487_v25 = vrot.slane %v447_v50, 7  ;;  %v3151_v56 = vunpack.c.l.bf16 %v3992_v19  ;;  %v4782_v17 = vmov 2  }
  0xb9   : > { %v544_v42 = vpack.c.bf16 %v529_v45, %v528_v23  ;;  %v558_v47 = vrot.slane %v556_v51, 1  ;;  %2248 = vperm.xlu0 %3632, %v3747_v6   ;;  %v554_v23 = vshrl.u32 %v543_v53, 16  ;;  %v4015_v24 = vsel %vm250_vm1, %v268_v52, %v3996_v20 }
  0xba   : > { %v486_v59 = vsel %vm250_vm1, %v483_v60, %v485_v62  ;;  %v488_v54 = vsel %vm250_vm1, %v485_v62, %v487_v25  ;;  %3624 = vset.pattern.permute.xlu1 %v4782_v17  ;;  %v4024_v41 = vrot.slane %v3151_v56, 7  ;;  %v3156_v56 = vunpack.c.h.bf16 %v3203_v1 }
  0xbb   : > { %v530_v50 = vmul.f32 %v486_v59, %v3976_v63  ;;  %v531_v46 = vmul.f32 %v488_v54, %v3980_v57  ;;  %v450_v21 = vpop.permute.xlu1 %449  ;;  %890 = vperm.xlu1 %3624, %v3759_v8   ;;  %v453_v43 = vpop.permute.xlu0 %452  ;;  %v561_v45 = vshll.u32 %v544_v42, 16  ;;  %v559_v3 = vor.u32 %v558_v47, %v554_v23 }
  0xbc   : > { %v489_v60 = vrot.slane %v450_v21, 7  ;;  %v491_v51 = vrot.slane %v453_v43, 7  ;;  %v4019_v59 = vsel %vm250_vm1, %v266_v27, %v268_v52  ;;  %v272_v54 = vrot.slane %v3148_v2, 7 }
  0xbd   : > { %v545_v62 = vpack.c.bf16 %v531_v46, %v530_v50  ;;  %v563_v7 = vrot.slane %v561_v45, 1  ;;  %2254 = vperm.xlu0 %3632, %v3759_v8   ;;  %v565_v2 = vshrl.u32 %v544_v42, 16  ;;  %v3155_v23 = vunpack.c.l.bf16 %v3203_v1 }
  0xbe   : > { %v490_v53 = vsel %vm250_vm1, %v487_v25, %v489_v60  ;;  %v492_v26 = vsel %vm250_vm1, %v489_v60, %v491_v51  ;;  %v772_v60 = vsel %vm646_vm0, %v3846_v22, 0  ;;  %v3152_v22 = vunpack.c.h.bf16 %v3992_v19 }
  0xbf   : > { %v532_v21 = vmul.f32 %v490_v53, %v3989_v58  ;;  %v533_v46 = vmul.f32 %v492_v26, %v3983_v44  ;;  %v456_v47 = vpop.permute.xlu1 %455  ;;  %896 = vperm.xlu1 %3624, %v3771_v10   ;;  %v459_v50 = vpop.permute.xlu0 %458  ;;  %v564_v43 = vsel %vm552_vm2, %v559_v3, %v563_v7  ;;  %v569_v25 = vshll.u32 %v545_v62, 16 }
  0xc0   : > { %v493_v27 = vrot.slane %v456_v47, 7  ;;  %v495_v52 = vrot.slane %v459_v50, 7  ;;  %3294 = vmatprep.mubr.msk.bf16.mxu1 %vm621_vm3, %v564_v43  ;;  %v567_v10 = vor.u32 %v565_v2, %v563_v7  ;;  %v573_v1 = vshrl.u32 %v545_v62, 16 }
  0xc1   : > { %v546_v45 = vpack.c.bf16 %v533_v46, %v532_v21  ;;  %2263 = vperm.xlu0 %3632, %v3766_v9   ;;  %v571_v3 = vrot.slane %v569_v25, 1  ;;  %v4042_v2 = vrot.slane %v3156_v56, 7  ;;  %v4047_v25 = vsel %vm250_vm1, %v272_v54, %v4024_v41  ;;  %v4058_v56 = vld [vmem:[%s4753_s1 + $0x8] sm:$0xf] }
  0xc2   : > { %v494_v26 = vsel %vm250_vm1, %v491_v51, %v493_v27  ;;  %v496_v53 = vsel %vm250_vm1, %v493_v27, %v495_v52  ;;  %v4051_v19 = vsel %vm250_vm1, %v3996_v20, %v272_v54 }
  0xc3   : > { %v534_v47 = vmul.f32 %v494_v26, %v4002_v18  ;;  %v535_v42 = vmul.f32 %v496_v53, %v3999_v55  ;;  %v462_v50 = vpop.permute.xlu1 %461  ;;  %899 = vperm.xlu1 %3624, %v3766_v9   ;;  %v465_v21 = vpop.permute.xlu0 %464  ;;  %v577_v46 = vshll.u32 %v546_v45, 16  ;;  %v572_v51 = vsel %vm552_vm2, %v567_v10, %v571_v3  ;;  %4783 = vst [vmem:[#allocation13_spill] sm:$0xff] %v4042_v2 }
  0xc4   : > { %v497_v43 = vrot.slane %v462_v50, 7  ;;  %v499_v40 = vrot.slane %v465_v21, 7  ;;  %3295 = vmatmul.mubr.msk.bf16.vlgmr.msra.gmra.mrb[0].mxu1 %vm621_vm3, %v572_v51  ;;  %v575_v7 = vor.u32 %v573_v1, %v571_v3  ;;  %v278_v26 = vrot.slane %v3155_v23, 7 }
  0xc5   : > { %v547_v39 = vpack.c.bf16 %v535_v42, %v534_v47  ;;  %v579_v27 = vrot.slane %v577_v46, 1  ;;  %2272 = vperm.xlu0 %3632, %v3795_v14   ;;  %3311 = vmatpush3.bf16.msra.mxu1 %v772_v60  ;;  %v4784_v42 = vmov 7   ;;  %v581_v60 = vshrl.u32 %v546_v45, 16 }
  0xc6   : > { %v498_v62 = vsel %vm250_vm1, %v495_v52, %v497_v43  ;;  %v500_v10 = vsel %vm250_vm1, %v497_v43, %v499_v40  ;;  %v276_v1 = vrot.slane %v3152_v22, 7  ;;  %v4068_v46 = vsel %vm250_vm1, %v278_v26, %v4042_v2  ;;  %3586 = vmatprep.subr.msk.bf16.mxu1 %vm646_vm0, %v4058_v56 }
  0xc7   : > { %v536_v53 = vmul.f32 %v498_v62, %v4019_v59  ;;  %v537_v3 = vmul.f32 %v500_v10, %v4015_v24  ;;  %v468_v47 = vpop.permute.xlu1 %467  ;;  %3625 = vset.pattern.permute.xlu1 %v4784_v42  ;;  %v471_v20 = vpop.permute.xlu0 %470  ;;  %v580_v54 = vsel %vm552_vm2, %v575_v7, %v579_v27  ;;  %v585_v21 = vshll.u32 %v547_v39, 16 }
  0xc8   : > { %v501_v52 = vrot.slane %v468_v47, 7  ;;  %v503_v50 = vrot.slane %v471_v20, 7  ;;  %2239 = vperm.xlu1 %3625, %v3735_v4   ;;  %3298 = vmatprep.mubr.msk.bf16.mxu1 %vm621_vm3, %v580_v54  ;;  %v583_v7 = vor.u32 %v581_v60, %v579_v27 }
  0xc9   : > { %v548_v23 = vpack.c.bf16 %v537_v3, %v536_v53  ;;  %2281 = vperm.xlu0 %3632, %v3802_v15   ;;  %v587_v62 = vrot.slane %v585_v21, 1  ;;  %v589_v3 = vshrl.u32 %v547_v39, 16  ;;  %v3680_v21 = vmov 3  }
  0xca   : > { %v502_v43 = vsel %vm250_vm1, %v499_v40, %v501_v52  ;;  %v504_v51 = vsel %vm250_vm1, %v501_v52, %v503_v50  ;;  %v4080_v40 = vsel %vm250_vm1, %v276_v1, %v278_v26  ;;  %v4086_v39 = vsel %vm250_vm1, %v4024_v41, %v276_v1 }
  0xcb   : > { %v538_v45 = vmul.f32 %v502_v43, %v4051_v19  ;;  %v539_v22 = vmul.f32 %v504_v51, %v4047_v25  ;;  %v474_v10 = vpop.permute.xlu1 %473  ;;  %v477_v53 = vpop.permute.xlu0 %476  ;;  %v593_v47 = vshll.u32 %v548_v23, 16  ;;  %v588_v2 = vsel %vm552_vm2, %v583_v7, %v587_v62 }
  0xcc   : > { %v505_v20 = vrot.slane %v474_v10, 7  ;;  %v507_v54 = vrot.slane %v477_v53, 7  ;;  %2242 = vperm.xlu1 %3625, %v3718_v0   ;;  %3299 = vmatmul.mubr.msk.bf16.gmra.mrb[4].mxu1 %vm621_vm3, %v588_v2  ;;  %v591_v27 = vor.u32 %v589_v3, %v587_v62 }
  0xcd   : > { %v549_v52 = vpack.c.bf16 %v539_v22, %v538_v45  ;;  %v595_v60 = vrot.slane %v593_v47, 1  ;;  %3635 = vset.pattern.permute.xlu0 %v3680_v21  ;;  %v4785_v45 = vmov 6  }
  0xce   : > { %v506_v43 = vsel %vm250_vm1, %v503_v50, %v505_v20  ;;  %v508_v0 = vsel %vm250_vm1, %v505_v20, %v507_v54  ;;  %v542_v51 = vmul.f32 %v507_v54, %v4068_v46  ;;  %1166 = vperm.xlu0 %3635, %v3735_v4   ;;  %v597_v50 = vshrl.u32 %v548_v23, 16 }
  0xcf   : > { %v540_v26 = vmul.f32 %v506_v43, %v4086_v39  ;;  %v541_v2 = vmul.f32 %v508_v0, %v4080_v40  ;;  %v596_v7 = vsel %vm552_vm2, %v591_v27, %v595_v60  ;;  %v601_v1 = vshll.u32 %v549_v52, 16 }
  0xd0   : > { %v551_v62 = vpack.c.bf16 %v542_v51, %v542_v51  ;;  %3626 = vset.pattern.permute.xlu1 %v4785_v45  ;;  %v4096_v22 = vpop.permute.xlu1 %872  ;;  %3302 = vmatprep.mubr.msk.bf16.mxu1 %vm621_vm3, %v596_v7  ;;  %v1394_v41 = vpop.permute.xlu0 %1393  ;;  %v599_v4 = vor.u32 %v597_v50, %v595_v60  ;;  %v605_v3 = vshrl.u32 %v549_v52, 16  ;;  %v406_v60 = vmul.f32 0.0, %v3890_v29 }
  0xd1   : > { %v550_v10 = vpack.c.bf16 %v541_v2, %v540_v26  ;;  %2056 = vperm.xlu1 %3626, %v3795_v14   ;;  %v603_v53 = vrot.slane %v601_v1, 1  ;;  %v1438_v2 = vrot.slane %v1394_v41, 7 }
  0xd2   : > { %1178 = vperm.xlu0 %3635, %v3747_v6   ;;  %v617_v20 = vshll.u32 %v551_v62, 16  ;;  %v407_v6 = vmul.f32 %v3896_v31, %v3957_v61 }
  0xd3   : > { %v609_v47 = vshll.u32 %v550_v10, 16  ;;  %v604_v27 = vsel %vm552_vm2, %v599_v4, %v603_v53  ;;  %v607_v23 = vor.u32 %v605_v3, %v603_v53  ;;  %v613_v52 = vshrl.u32 %v550_v10, 16 }
  0xd4   : > { %v4101_v54 = vpop.permute.xlu1 %878  ;;  %v4104_v43 = vpop.permute.xlu0 %1402  ;;  %3303 = vmatmul.mubr.msk.bf16.gmra.mrb[8].mxu1 %vm621_vm3, %v604_v27  ;;  %v619_v26 = vrot.slane %v617_v20, 1  ;;  %v422_v50 = vpack.c.bf16 %v407_v6, %v406_v60  ;;  %v410_v20 = vmul.f32 %v3905_v33, %v3976_v63  ;;  %v408_v27 = vmul.f32 %v3888_v28, %v3968_v48 }
  0xd5   : > { %2064 = vperm.xlu1 %3626, %v3807_v16   ;;  %v611_v0 = vrot.slane %v609_v47, 1  ;;  %v411_v47 = vmul.f32 %v3903_v32, %v3980_v57  ;;  %v1444_v60 = vrot.slane %v4104_v43, 7  ;;  %v1046_v33 = vsel %vm646_vm0, %v4058_v56, 0 }
  0xd6   : > { %1186 = vperm.xlu0 %3635, %v3759_v8   ;;  %v412_v56 = vmul.f32 %v3911_v35, %v3989_v58 }
  0xd7   : > { %v612_v51 = vsel %vm552_vm2, %v607_v23, %v611_v0  ;;  %v615_v62 = vor.u32 %v613_v52, %v611_v0  ;;  %v424_v28 = vpack.c.bf16 %v411_v47, %v410_v20 }
  0xd8   : > { %3306 = vmatprep.mubr.msk.bf16.mxu1 %vm621_vm3, %v612_v51  ;;  %v4114_v7 = vpop.permute.xlu0 %1408  ;;  %v4786_v51 = vmov 4  }
  0xd9   : > { %2068 = vperm.xlu1 %3626, %v3802_v15   ;;  %v1391_v45 = vpop.permute.xlu1 %1390  ;;  %v620_v10 = vsel %vm552_vm2, %v615_v62, %v619_v26 }
  0xda   : > { %v1437_v29 = vrot.slane %v1391_v45, 7  ;;  %1198 = vperm.xlu0 %3635, %v3766_v9   ;;  %v409_v9 = vmul.f32 %v3894_v30, %v3971_v49 }
  0xdc   : > { %v1439_v31 = vsel %vm250_vm1, %v1437_v29, %v1438_v2  ;;  %v1485_v1 = vmul.f32 %v1437_v29, %v3957_v61  ;;  %v4121_v4 = vpop.permute.xlu0 %1414  ;;  %3307 = vmatmul.mubr.msk.bf16.gmra.mrb[12].mxu1 %vm621_vm3, %v620_v10  ;;  %v423_v52 = vpack.c.bf16 %v409_v9, %v408_v27 }
  0xdd   : > { %v1486_v41 = vmul.f32 %v1439_v31, %v3968_v48  ;;  %3628 = vset.pattern.permute.xlu1 %v4784_v42  ;;  %v1397_v15 = vpop.permute.xlu1 %1396  ;;  %3312 = vmatprep.mubr.msk.bf16.mxu1 %vm621_vm3, %v422_v50  ;;  %v1448_v50 = vrot.slane %v4114_v7, 7  ;;  %v414_v7 = vmul.f32 %v3920_v37, %v4002_v18  ;;  %v1452_v20 = vrot.slane %v4121_v4, 7  ;;  %v4787_v4 = vld [vmem:[#allocation8_spill] sm:$0xff] }
  0xde   : > { %v1440_v53 = vrot.slane %v1397_v15, 7  ;;  %2251 = vperm.xlu1 %3628, %v3742_v5   ;;  %1218 = vperm.xlu0 %3635, %v3807_v16  }
  0xdf   : > { %v1502_v3 = vpack.c.bf16 %v1486_v41, %v1485_v1  ;;  %v415_v41 = vmul.f32 %v3918_v36, %v3999_v55 }
  0xe0   : > { %v1441_v6 = vsel %vm250_vm1, %v1438_v2, %v1440_v53 }
  0xe1   : > { %v1400_v23 = vpop.permute.xlu1 %1399  ;;  %v4137_v0 = vpop.permute.xlu0 %1720  ;;  %v1514_v32 = vshll.u32 %v1502_v3, 16  ;;  %v1487_v43 = vmul.f32 %v1441_v6, %v3971_v49 }
  0xe2   : > { %v1442_v30 = vrot.slane %v1400_v23, 7  ;;  %3629 = vset.pattern.permute.xlu1 %v4782_v17  ;;  %3641 = vset.pattern.permute.xlu0 %v4786_v51 }
  0xe3   : > { %902 = vperm.xlu1 %3629, %v3783_v12   ;;  %1423 = vperm.xlu0 %3641, %v3778_v11   ;;  %v413_v11 = vmul.f32 %v3909_v34, %v3983_v44  ;;  %v1516_v10 = vrot.slane %v1514_v32, 1 }
  0xe4   : > { %v1443_v26 = vsel %vm250_vm1, %v1440_v53, %v1442_v30  ;;  %3313 = vmatmul.mubr.msk.bf16.vlgmr.msra.gmra.mrb[0].mxu1 %vm621_vm3, %v423_v52  ;;  %v1445_v29 = vsel %vm250_vm1, %v1442_v30, %v1444_v60  ;;  %v426_v30 = vpack.c.bf16 %v415_v41, %v414_v7  ;;  %v417_v52 = vmul.f32 %v3925_v38, %v4015_v24  ;;  %v4790_v7 = vld [vmem:[#allocation7_spill] sm:$0xff] }
  0xe5   : > { %v1488_v2 = vmul.f32 %v1443_v26, %v3976_v63  ;;  %v1406_v62 = vpop.permute.xlu1 %1405  ;;  %v4151_v45 = vpop.permute.xlu0 %1729  ;;  %3316 = vmatprep.mubr.msk.bf16.mxu1 %vm621_vm3, %v424_v28  ;;  %3329 = vmatpush3.bf16.msra.mxu1 %v1046_v33  ;;  %v1489_v53 = vmul.f32 %v1445_v29, %v3980_v57  ;;  %v425_v23 = vpack.c.bf16 %v413_v11, %v412_v56  ;;  %v3681_v33 = vmov 8   ;;  %v4789_v56 = vld [vmem:[#allocation10_spill] sm:$0xff] }
  0xe6   : > { %v1446_v31 = vrot.slane %v1406_v62, 7 }
  0xe7   : > { %908 = vperm.xlu1 %3629, %v3795_v14   ;;  %v1503_v1 = vpack.c.bf16 %v1488_v2, %v1487_v43  ;;  %1429 = vperm.xlu0 %3641, %v3790_v13   ;;  %v1512_v14 = vshrl.u32 %v1502_v3, 16  ;;  %v416_v3 = vmul.f32 %v4787_v4, %v4019_v59 }
  0xe8   : > { %v1447_v15 = vsel %vm250_vm1, %v1444_v60, %v1446_v31  ;;  %v1449_v36 = vsel %vm250_vm1, %v1446_v31, %v1448_v50  ;;  %v4788_v31 = vld [vmem:[#allocation9_spill] sm:$0xff] }
  0xe9   : > { %v1490_v34 = vmul.f32 %v1447_v15, %v3989_v58  ;;  %v1412_v9 = vpop.permute.xlu1 %1411  ;;  %v4169_v35 = vpop.permute.xlu0 %1735  ;;  %v1519_v47 = vshll.u32 %v1503_v1, 16  ;;  %v1517_v60 = vor.u32 %v1516_v10, %v1512_v14  ;;  %v1491_v28 = vmul.f32 %v1449_v36, %v3983_v44  ;;  %v4792_v14 = vld [vmem:[#allocation4_spill] sm:$0xff] }
  0xea   : > { %v1450_v27 = vrot.slane %v1412_v9, 7  ;;  %v419_v11 = vmul.f32 %v4788_v31, %v4047_v25  ;;  %v418_v10 = vmul.f32 %v4789_v56, %v4051_v19  ;;  %v1892_v15 = vsel %vm646_vm0, %v4790_v7, 0 }
  0xeb   : > { %v1504_v37 = vpack.c.bf16 %v1490_v34, %v1489_v53  ;;  %911 = vperm.xlu1 %3629, %v3790_v13   ;;  %v1521_v6 = vrot.slane %v1519_v47, 1  ;;  %3643 = vset.pattern.permute.xlu0 %v3681_v33  ;;  %v4791_v53 = vld [vmem:[#allocation2_spill] sm:$0xff]  ;;  %v1767_v34 = vrot.slane %v4137_v0, 6 }
  0xec   : > { %v1451_v32 = vsel %vm250_vm1, %v1448_v50, %v1450_v27  ;;  %3317 = vmatmul.mubr.msk.bf16.gmra.mrb[4].mxu1 %vm621_vm3, %v425_v23  ;;  %v1453_v38 = vsel %vm250_vm1, %v1450_v27, %v1452_v20  ;;  %v1523_v50 = vshrl.u32 %v1503_v1, 16  ;;  %2566 = vperm.xlu0 %3643, %v4791_v53  }
  0xed   : > { %v1492_v26 = vmul.f32 %v1451_v32, %v4002_v18  ;;  %v4183_v13 = vpop.permute.xlu1 %1417  ;;  %v1522_v43 = vsel %vm552_vm2, %v1517_v60, %v1521_v6  ;;  %v4186_v2 = vpop.permute.xlu0 %1741  ;;  %3320 = vmatprep.mubr.msk.bf16.mxu1 %vm621_vm3, %v426_v30  ;;  %v1527_v29 = vshll.u32 %v1504_v37, 16  ;;  %v1493_v36 = vmul.f32 %v1453_v38, %v3999_v55  ;;  %v4793_v38 = vld [vmem:[#allocation3_spill] sm:$0xff] }
  0xee   : > { %v1454_v62 = vrot.slane %v4183_v13, 7  ;;  %3366 = vmatprep.mubr.msk.bf16.mxu0 %vm621_vm3, %v1522_v43  ;;  %v1525_v9 = vor.u32 %v1523_v50, %v1521_v6  ;;  %v1531_v60 = vshrl.u32 %v1504_v37, 16  ;;  %v427_v32 = vpack.c.bf16 %v417_v52, %v416_v3  ;;  %v4794_v52 = vld [vmem:[#allocation11_spill] sm:$0xff] }
  0xef   : > { %v1505_v41 = vpack.c.bf16 %v1492_v26, %v1491_v28  ;;  %3630 = vset.pattern.permute.xlu1 %v4784_v42  ;;  %v1529_v47 = vrot.slane %v1527_v29, 1  ;;  %v428_v37 = vpack.c.bf16 %v419_v11, %v418_v10  ;;  %v421_v3 = vmul.f32 %v4794_v52, %v4080_v40  ;;  %v4795_v29 = vld [vmem:[#allocation5_spill] sm:$0xff]  ;;  %v4796_v11 = vld [vmem:[#allocation12_spill] sm:$0xff] }
  0xf0   : > { %v1455_v1 = vsel %vm250_vm1, %v1452_v20, %v1454_v62  ;;  %2257 = vperm.xlu1 %3630, %v4792_v14   ;;  %v4213_v20 = vld [vmem:[%s4753_s1 + $0x18] sm:$0xf]  ;;  %2575 = vperm.xlu0 %3643, %v4793_v38   ;;  %v1772_v50 = vrot.slane %v4151_v45, 6  ;;  %v420_v10 = vmul.f32 %v4796_v11, %v4086_v39  ;;  %v1815_v45 = vmul.f32 %v1767_v34, %v3957_v61 }
  0xf1   : > { %v1494_v27 = vmul.f32 %v1455_v1, %v4019_v59  ;;  %v4207_v23 = vpop.permute.xlu0 %1747  ;;  %v1535_v30 = vshll.u32 %v1505_v41, 16  ;;  %v1530_v0 = vsel %vm552_vm2, %v1525_v9, %v1529_v47  ;;  %v1533_v26 = vor.u32 %v1531_v60, %v1529_v47 }
  0xf2   : > { %v1724_v4 = vpop.permute.xlu1 %1723  ;;  %3367 = vmatmul.mubr.msk.bf16.vlgmr.msra.gmra.mrb[0].mxu0 %vm621_vm3, %v1530_v0  ;;  %v1539_v53 = vshrl.u32 %v1505_v41, 16 }
  0xf3   : > { %v1506_v6 = vpack.c.bf16 %v1494_v27, %v1493_v36  ;;  %v1768_v28 = vrot.slane %v1724_v4, 6  ;;  %v1537_v43 = vrot.slane %v1535_v30, 1  ;;  %3383 = vmatpush3.bf16.msra.mxu0 %v1892_v15  ;;  %v1776_v27 = vrot.slane %v4169_v35, 6 }
  0xf4   : > { %2260 = vperm.xlu1 %3630, %v4795_v29   ;;  %3321 = vmatmul.mubr.msk.bf16.gmra.mrb[8].mxu1 %vm621_vm3, %v427_v32 }
  0xf5   : > { %v1769_v31 = vsel %vm919_vm4, %v1767_v34, %v1768_v28  ;;  %v1538_v56 = vsel %vm552_vm2, %v1533_v26, %v1537_v43  ;;  %v4224_v7 = vpop.permute.xlu0 %1753  ;;  %v1543_v1 = vshll.u32 %v1506_v6, 16  ;;  %3591 = vmatprep.subr.msk.bf16.mxu0 %vm646_vm0, %v4213_v20  ;;  %3324 = vmatprep.mubr.msk.bf16.mxu1 %vm621_vm3, %v428_v37  ;;  %v1541_v47 = vor.u32 %v1539_v53, %v1537_v43 }
  0xf6   : > { %v1816_v15 = vmul.f32 %v1769_v31, %v3968_v48  ;;  %v1727_v9 = vpop.permute.xlu1 %1726  ;;  %3370 = vmatprep.mubr.msk.bf16.mxu0 %vm621_vm3, %v1538_v56  ;;  %2581 = vperm.xlu0 %3643, %v3742_v5   ;;  %v1547_v41 = vshrl.u32 %v1506_v6, 16  ;;  %v429_v26 = vpack.c.bf16 %v421_v3, %v420_v10  ;;  %v1784_v53 = vrot.slane %v4207_v23, 6 }
  0xf7   : > { %v1770_v14 = vrot.slane %v1727_v9, 6  ;;  %v1545_v36 = vrot.slane %v1543_v1, 1 }
  0xf8   : > { %3631 = vset.pattern.permute.xlu1 %v4782_v17  ;;  %v1832_v35 = vpack.c.bf16 %v1816_v15, %v1815_v45  ;;  %v4272_v15 = vld [vmem:[%s4754_s2 + $0x58] sm:$0xff] }
  0xf9   : > { %v1771_v60 = vsel %vm919_vm4, %v1768_v28, %v1770_v14  ;;  %v1773_v34 = vsel %vm919_vm4, %v1770_v14, %v1772_v50  ;;  %914 = vperm.xlu1 %3631, %v3807_v16   ;;  %v1546_v30 = vsel %vm552_vm2, %v1541_v47, %v1545_v36  ;;  %v4241_v32 = vpop.permute.xlu0 %1759  ;;  %v4243_v4 = vor.u32 %v1547_v41, %v1545_v36  ;;  %v4282_v36 = vld [vmem:[%s4754_s2 + $0x60] sm:$0xff] }
  0xfa   : > { %v1817_v0 = vmul.f32 %v1771_v60, %v3971_v49  ;;  %v1818_v5 = vmul.f32 %v1773_v34, %v3976_v63  ;;  %v1733_v6 = vpop.permute.xlu1 %1732  ;;  %3371 = vmatmul.mubr.msk.bf16.gmra.mrb[4].mxu0 %vm621_vm3, %v1546_v30  ;;  %2584 = vperm.xlu0 %3643, %v3759_v8   ;;  %v1780_v16 = vrot.slane %v4186_v2, 6  ;;  %v1850_v29 = vrot.slane %v1832_v35, 1  ;;  %v4289_v60 = vld [vmem:[%s4753_s1 + $0x1c] sm:$0xf] }
  0xfb   : > { %v1774_v17 = vrot.slane %v1733_v6, 6  ;;  %v2120_v47 = vsel %vm646_vm0, %v4213_v20, 0  ;;  %v1788_v34 = vrot.slane %v4224_v7, 6  ;;  %v4300_v6 = vld [vmem:[%s4754_s2 + $0x68] sm:$0xff] }
  0xfc   : > { %v1833_v28 = vpack.c.bf16 %v1818_v5, %v1817_v0  ;;  %3325 = vmatmul.mubr.msk.bf16.gmra.mrb[12].mxu1 %vm621_vm3, %v429_v26 }
  0xfd   : > { %v1775_v43 = vsel %vm919_vm4, %v1772_v50, %v1774_v17  ;;  %v1777_v38 = vsel %vm919_vm4, %v1774_v17, %v1776_v27  ;;  %3633 = vset.pattern.permute.xlu1 %v4784_v42  ;;  %v4254_v37 = vpop.permute.xlu0 %1765  ;;  %v3649_v50 = vld [vmem:[%s4754_s2 + $0x48] sm:$0xff] }
  0xfe   : > { %v1819_v52 = vmul.f32 %v1775_v43, %v3980_v57  ;;  %v1820_v3 = vmul.f32 %v1777_v38, %v3989_v58  ;;  %2266 = vperm.xlu1 %3633, %v3783_v12   ;;  %v1739_v8 = vpop.permute.xlu1 %1738  ;;  %v1851_v2 = vrot.slane %v1833_v28, 1  ;;  %2593 = vperm.xlu0 %3643, %v3649_v50   ;;  %v4312_v43 = vld [vmem:[%s4754_s2 + $0x78] sm:$0xff]  ;;  %v1792_v38 = vrot.slane %v4241_v32, 6 }
  0xff   : > { %v1778_v31 = vrot.slane %v1739_v8, 6 }
 0x100   : > { %v1834_v56 = vpack.c.bf16 %v1820_v3, %v1819_v52  ;;  %v1852_v42 = vsel %vm1003_vm5, %v1850_v29, %v1851_v2 }
 0x101   : > { %v1779_v1 = vsel %vm919_vm4, %v1776_v27, %v1778_v31  ;;  %v1781_v11 = vsel %vm919_vm4, %v1778_v31, %v1780_v16  ;;  %3384 = vmatprep.mubr.msk.bf16.mxu0 %vm621_vm3, %v1852_v42  ;;  %v1796_v42 = vrot.slane %v4254_v37, 6 }
 0x102   : > { %v1853_v12 = vrot.slane %v1834_v56, 1  ;;  %v1821_v10 = vmul.f32 %v1779_v1, %v3983_v44  ;;  %v1822_v45 = vmul.f32 %v1781_v11, %v4002_v18  ;;  %2269 = vperm.xlu1 %3633, %v4272_v15   ;;  %v1745_v9 = vpop.permute.xlu1 %1744  ;;  %v4275_v23 = vpop.permute.xlu0 %2012  ;;  %2602 = vperm.xlu0 %3643, %v4282_v36   ;;  %v4797_v11 = vld [vmem:[#allocation13_spill] sm:$0xff] }
 0x103   : > { %v1782_v14 = vrot.slane %v1745_v9, 6 }
 0x104   : > { %v1854_v41 = vsel %vm1003_vm5, %v1851_v2, %v1853_v12  ;;  %v1835_v27 = vpack.c.bf16 %v1822_v45, %v1821_v10  ;;  %v4324_v2 = vld [vmem:[%s4754_s2 + $0x70] sm:$0xff] }
 0x105   : > { %v1783_v30 = vsel %vm919_vm4, %v1780_v16, %v1782_v14  ;;  %v1785_v20 = vsel %vm919_vm4, %v1782_v14, %v1784_v53  ;;  %3385 = vmatmul.mubr.msk.bf16.vlgmr.msra.gmra.mrb[0].mxu0 %vm621_vm3, %v1854_v41 }
 0x106   : > { %v1823_v0 = vmul.f32 %v1783_v30, %v3999_v55  ;;  %v1824_v5 = vmul.f32 %v1785_v20, %v4019_v59  ;;  %2275 = vperm.xlu1 %3633, %v4300_v6   ;;  %v1751_v35 = vpop.permute.xlu1 %1750  ;;  %v4303_v26 = vpop.permute.xlu0 %2024  ;;  %v1855_v7 = vrot.slane %v1835_v27, 1  ;;  %3401 = vmatpush3.bf16.msra.mxu0 %v2120_v47  ;;  %v3655_v30 = vld [vmem:[%s4754_s2] sm:$0xff] }
 0x107   : > { %v1786_v17 = vrot.slane %v1751_v35, 6  ;;  %3592 = vmatprep.subr.msk.bf16.mxu0 %vm646_vm0, %v4289_v60  ;;  %3646 = vset.pattern.permute.xlu0 %v4786_v51 }
 0x108   : > { %v1856_v28 = vsel %vm1003_vm5, %v1853_v12, %v1855_v7  ;;  %v1836_v16 = vpack.c.bf16 %v1824_v5, %v1823_v0  ;;  %1435 = vperm.xlu0 %3646, %v4312_v43   ;;  %v4334_v12 = vsel %vm250_vm1, %v4797_v11, 0.0  ;;  %v2072_v11 = vmul.f32 %v4275_v23, %v3971_v49 }
 0x109   : > { %v1787_v52 = vsel %vm919_vm4, %v1784_v53, %v1786_v17  ;;  %v1789_v3 = vsel %vm919_vm4, %v1786_v17, %v1788_v34  ;;  %3388 = vmatprep.mubr.msk.bf16.mxu0 %vm621_vm3, %v1856_v28 }
 0x10a   : > { %v1825_v8 = vmul.f32 %v1787_v52, %v4015_v24  ;;  %v1826_v29 = vmul.f32 %v1789_v3, %v4051_v19  ;;  %2278 = vperm.xlu1 %3633, %v4324_v2   ;;  %v1757_v31 = vpop.permute.xlu1 %1756  ;;  %v4327_v50 = vpop.permute.xlu0 %2032  ;;  %v1857_v32 = vrot.slane %v1836_v16, 1  ;;  %v3656_v52 = vld [vmem:[%s4754_s2 + $0x10] sm:$0xff] }
 0x10b   : > { %v1790_v56 = vrot.slane %v1757_v31, 6 }
 0x10c   : > { %v1858_v53 = vsel %vm1003_vm5, %v1855_v7, %v1857_v32  ;;  %v1837_v1 = vpack.c.bf16 %v1826_v29, %v1825_v8  ;;  %3648 = vset.pattern.permute.xlu0 %v3681_v33 }
 0x10d   : > { %v1791_v10 = vsel %vm919_vm4, %v1788_v34, %v1790_v56  ;;  %v1793_v45 = vsel %vm919_vm4, %v1790_v56, %v1792_v38  ;;  %3389 = vmatmul.mubr.msk.bf16.gmra.mrb[4].mxu0 %vm621_vm3, %v1858_v53  ;;  %v1831_v34 = vmul.f32 %v1796_v42, %v4334_v12  ;;  %v3657_v56 = vld [vmem:[%s4754_s2 + $0x18] sm:$0xff]  ;;  %v4369_v53 = vld [vmem:[%s4753_s1 + $0xc] sm:$0xf] }
 0x10e   : > { %v1827_v9 = vmul.f32 %v1791_v10, %v4047_v25  ;;  %v1828_v14 = vmul.f32 %v1793_v45, %v4086_v39  ;;  %3634 = vset.pattern.permute.xlu1 %v3680_v21  ;;  %v1763_v37 = vpop.permute.xlu1 %1762  ;;  %v4342_v47 = vpop.permute.xlu0 %2040  ;;  %v1859_v41 = vrot.slane %v1837_v1, 1  ;;  %3587 = vmatprep.subr.msk.bf16.mxu1 %vm646_vm0, %v4369_v53 }
 0x10f   : > { %v1794_v27 = vrot.slane %v1763_v37, 6  ;;  %1162 = vperm.xlu1 %3634, %v3655_v30   ;;  %v1840_v8 = vpack.c.bf16 %v1831_v34, %v1831_v34  ;;  %v923_v34 = vrot.slane %v4101_v54, 6  ;;  %v2075_v54 = vmul.f32 %v4303_v26, %v3989_v58 }
 0x110   : > { %v1860_v20 = vsel %vm1003_vm5, %v1857_v32, %v1859_v41  ;;  %v1838_v0 = vpack.c.bf16 %v1828_v14, %v1827_v9  ;;  %v3658_v9 = vld [vmem:[%s4754_s2 + $0x28] sm:$0xff] }
 0x111   : > { %v1795_v5 = vsel %vm919_vm4, %v1792_v38, %v1794_v27  ;;  %v1797_v35 = vsel %vm919_vm4, %v1794_v27, %v1796_v42  ;;  %3392 = vmatprep.mubr.msk.bf16.mxu0 %vm621_vm3, %v1860_v20  ;;  %v1865_v1 = vrot.slane %v1840_v8, 1 }
 0x112   : > { %v1829_v7 = vmul.f32 %v1795_v5, %v4080_v40  ;;  %v1830_v17 = vmul.f32 %v1797_v35, %v4068_v46  ;;  %v4354_v28 = vpop.permute.xlu0 %2052  ;;  %v1861_v16 = vrot.slane %v1838_v0, 1 }
 0x113   : > { %1170 = vperm.xlu1 %3634, %v3656_v52   ;;  %v2009_v3 = vpop.permute.xlu1 %2008 }
 0x114   : > { %v1862_v38 = vsel %vm1003_vm5, %v1859_v41, %v1861_v16  ;;  %v1839_v29 = vpack.c.bf16 %v1830_v17, %v1829_v7  ;;  %v2071_v10 = vmul.f32 %v2009_v3, %v3968_v48  ;;  %v920_v41 = vrot.slane %v4096_v22, 6  ;;  %v4392_v22 = vld [vmem:[%s4754_s2 + $0x38] sm:$0xff] }
 0x115   : > { %3393 = vmatmul.mubr.msk.bf16.gmra.mrb[8].mxu0 %vm621_vm3, %v1862_v38 }
 0x116   : > { %v4361_v31 = vpop.permute.xlu0 %2060  ;;  %v1863_v32 = vrot.slane %v1839_v29, 1  ;;  %v2087_v27 = vpack.c.bf16 %v2072_v11, %v2071_v10  ;;  %v968_v8 = vmul.f32 0.0, %v920_v41 }
 0x117   : > { %1174 = vperm.xlu1 %3634, %v3657_v56   ;;  %v2017_v42 = vpop.permute.xlu1 %2016 }
 0x118   : > { %v1864_v45 = vsel %vm1003_vm5, %v1861_v16, %v1863_v32  ;;  %v1866_v30 = vsel %vm1003_vm5, %v1863_v32, %v1865_v1  ;;  %v2073_v38 = vmul.f32 %v2017_v42, %v3976_v63  ;;  %v2450_v32 = vsel %vm646_vm0, %v4289_v60, 0 }
 0x119   : > { %3396 = vmatprep.mubr.msk.bf16.mxu0 %vm621_vm3, %v1864_v45  ;;  %v2077_v60 = vmul.f32 %v4327_v50, %v4002_v18 }
 0x11b   : > { %1182 = vperm.xlu1 %3634, %v3658_v9   ;;  %v2021_v14 = vpop.permute.xlu1 %2020  ;;  %v876_v37 = vpop.permute.xlu0 %875  ;;  %v3660_v9 = vld [vmem:[%s4754_s2 + $0x8] sm:$0xff] }
 0x11c   : > { %v921_v23 = vrot.slane %v876_v37, 6  ;;  %v2074_v0 = vmul.f32 %v2021_v14, %v3980_v57 }
 0x11d   : > { %3397 = vmatmul.mubr.msk.bf16.gmra.mrb[12].mxu0 %vm621_vm3, %v1866_v30 }
 0x11e   : > { %v922_v20 = vsel %vm919_vm4, %v920_v41, %v921_v23  ;;  %3402 = vmatprep.mubr.msk.bf16.mxu0 %vm621_vm3, %v2087_v27  ;;  %v924_v17 = vsel %vm919_vm4, %v921_v23, %v923_v34  ;;  %v2088_v56 = vpack.c.bf16 %v2074_v0, %v2073_v38 }
 0x11f   : > { %v969_v5 = vmul.f32 %v922_v20, %v3957_v61  ;;  %1190 = vperm.xlu1 %3634, %v4392_v22   ;;  %v2029_v35 = vpop.permute.xlu1 %2028  ;;  %v882_v7 = vpop.permute.xlu0 %881  ;;  %v970_v1 = vmul.f32 %v924_v17, %v3968_v48  ;;  %v3661_v20 = vld [vmem:[%s4754_s2 + $0x20] sm:$0xff] }
 0x120   : > { %v2076_v16 = vmul.f32 %v2029_v35, %v3983_v44  ;;  %v925_v3 = vrot.slane %v882_v7, 6  ;;  %v2079_v7 = vmul.f32 %v4342_v47, %v4019_v59  ;;  %v2082_v47 = vmul.f32 %v4354_v28, %v4047_v25 }
 0x121   : > { %v985_v11 = vpack.c.bf16 %v969_v5, %v968_v8 }
 0x122   : > { %v926_v29 = vsel %vm919_vm4, %v923_v34, %v925_v3  ;;  %v2089_v45 = vpack.c.bf16 %v2076_v16, %v2075_v54  ;;  %v3662_v16 = vld [vmem:[%s4754_s2 + $0x40] sm:$0xff] }
 0x123   : > { %v971_v10 = vmul.f32 %v926_v29, %v3971_v49  ;;  %3636 = vset.pattern.permute.xlu1 %v3681_v33  ;;  %v2037_v26 = vpop.permute.xlu1 %2036  ;;  %v1004_v37 = vrot.slane %v985_v11, 1  ;;  %v894_v35 = vpop.permute.xlu0 %893  ;;  %v4434_v29 = vld [vmem:[%s4753_s1 + $0x20] sm:$0xf] }
 0x124   : > { %2569 = vperm.xlu1 %3636, %v3660_v9   ;;  %v2078_v14 = vmul.f32 %v2037_v26, %v3999_v55  ;;  %v1274_v26 = vsel %vm646_vm0, %v4369_v53, 0 }
 0x125   : > { %v986_v42 = vpack.c.bf16 %v971_v10, %v970_v1  ;;  %3403 = vmatmul.mubr.msk.bf16.vlgmr.msra.gmra.mrb[0].mxu0 %vm621_vm3, %v2088_v56  ;;  %v4443_v1 = vld [vmem:[%s4754_s2 + $0x50] sm:$0xff] }
 0x126   : > { %3406 = vmatprep.mubr.msk.bf16.mxu0 %vm621_vm3, %v2089_v45  ;;  %3419 = vmatpush3.bf16.msra.mxu0 %v2450_v32  ;;  %v2090_v34 = vpack.c.bf16 %v2078_v14, %v2077_v60  ;;  %v3664_v60 = vld [vmem:[%s4753_s1 + $0x10] sm:$0xf] }
 0x127   : > { %v1005_v41 = vrot.slane %v986_v42, 1  ;;  %3593 = vmatprep.subr.msk.bf16.mxu0 %vm646_vm0, %v4434_v29  ;;  %v4446_v10 = vpop.permute.xlu0 %905  ;;  %v933_v42 = vrot.slane %v894_v35, 6 }
 0x128   : > { %2572 = vperm.xlu1 %3636, %v3656_v52   ;;  %v885_v27 = vpop.permute.xlu1 %884 }
 0x129   : > { %v927_v23 = vrot.slane %v885_v27, 6  ;;  %v1006_v30 = vsel %vm1003_vm5, %v1004_v37, %v1005_v41 }
 0x12a   : > { %3330 = vmatprep.mubr.msk.bf16.mxu1 %vm621_vm3, %v1006_v30 }
 0x12b   : > { %v928_v50 = vsel %vm919_vm4, %v925_v3, %v927_v23  ;;  %v4460_v37 = vpop.permute.xlu0 %917 }
 0x12c   : > { %2578 = vperm.xlu1 %3636, %v3661_v20   ;;  %v888_v0 = vpop.permute.xlu1 %887  ;;  %v972_v54 = vmul.f32 %v928_v50, %v3976_v63 }
 0x12d   : > { %v929_v5 = vrot.slane %v888_v0, 6  ;;  %3407 = vmatmul.mubr.msk.bf16.gmra.mrb[4].mxu0 %vm621_vm3, %v2090_v34 }
 0x12f   : > { %v930_v52 = vsel %vm919_vm4, %v927_v23, %v929_v5 }
 0x130   : > { %v973_v17 = vmul.f32 %v930_v52, %v3980_v57  ;;  %3637 = vset.pattern.permute.xlu1 %v3680_v21  ;;  %v2237_v50 = vpop.permute.xlu0 %2236 }
 0x131   : > { %1194 = vperm.xlu1 %3637, %v3662_v16   ;;  %v2045_v3 = vpop.permute.xlu1 %2044 }
 0x132   : > { %v987_v8 = vpack.c.bf16 %v973_v17, %v972_v54  ;;  %v2080_v38 = vmul.f32 %v2045_v3, %v4015_v24 }
 0x134   : > { %v1007_v32 = vrot.slane %v987_v8, 1  ;;  %v2091_v56 = vpack.c.bf16 %v2080_v38, %v2079_v7  ;;  %v2246_v38 = vpop.permute.xlu0 %2245 }
 0x135   : > { %1202 = vperm.xlu1 %3637, %v4443_v1   ;;  %v2049_v11 = vpop.permute.xlu1 %2048 }
 0x136   : > { %v2081_v45 = vmul.f32 %v2049_v11, %v4051_v19  ;;  %3410 = vmatprep.mubr.msk.bf16.mxu0 %vm621_vm3, %v2091_v56  ;;  %v1008_v28 = vsel %vm1003_vm5, %v1005_v41, %v1007_v32  ;;  %v2288_v11 = vrot.slane %v2246_v38, 7 }
 0x137   : > { %3331 = vmatmul.mubr.msk.bf16.vlgmr.msra.gmra.mrb[0].mxu1 %vm621_vm3, %v1008_v28 }
 0x138   : > { %v2092_v9 = vpack.c.bf16 %v2082_v47, %v2081_v45  ;;  %3347 = vmatpush3.bf16.msra.mxu1 %v1274_v26 }
 0x139   : > { %1206 = vperm.xlu1 %3637, %v4272_v15   ;;  %3589 = vmatprep.subr.msk.bf16.mxu1 %vm646_vm0, %v3664_v60 }
 0x13a   : > { %v891_v53 = vpop.permute.xlu1 %890  ;;  %3411 = vmatmul.mubr.msk.bf16.gmra.mrb[8].mxu0 %vm621_vm3, %v2092_v9 }
 0x13b   : > { %v931_v14 = vrot.slane %v891_v53, 6 }
 0x13d   : > { %v932_v41 = vsel %vm919_vm4, %v929_v5, %v931_v14  ;;  %v934_v27 = vsel %vm919_vm4, %v931_v14, %v933_v42  ;;  %3638 = vset.pattern.permute.xlu1 %v3681_v33 }
 0x13e   : > { %v974_v23 = vmul.f32 %v932_v41, %v3989_v58  ;;  %v975_v30 = vmul.f32 %v934_v27, %v3983_v44  ;;  %2587 = vperm.xlu1 %3638, %v4392_v22   ;;  %v897_v34 = vpop.permute.xlu1 %896  ;;  %v2084_v41 = vmul.f32 %v4361_v31, %v4080_v40 }
 0x13f   : > { %v935_v20 = vrot.slane %v897_v34, 6 }
 0x140   : > { %v988_v0 = vpack.c.bf16 %v975_v30, %v974_v23 }
 0x141   : > { %v936_v5 = vsel %vm919_vm4, %v933_v42, %v935_v20 }
 0x142   : > { %2590 = vperm.xlu1 %3638, %v3662_v16   ;;  %v4468_v52 = vpop.permute.xlu1 %899  ;;  %v1009_v35 = vrot.slane %v988_v0, 1  ;;  %v976_v22 = vmul.f32 %v936_v5, %v4002_v18  ;;  %v2283_v16 = vrot.slane %v2237_v50, 7 }
 0x143   : > { %v937_v7 = vrot.slane %v4468_v52, 6  ;;  %v2738_v52 = vsel %vm646_vm0, %v4434_v29, 0 }
 0x144   : > { %v1010_v54 = vsel %vm1003_vm5, %v1007_v32, %v1009_v35  ;;  %v2331_v45 = vmul.f32 %v2283_v16, %v3968_v48 }
 0x145   : > { %v938_v17 = vsel %vm919_vm4, %v935_v20, %v937_v7  ;;  %3334 = vmatprep.mubr.msk.bf16.mxu1 %vm621_vm3, %v1010_v54  ;;  %v2249_v54 = vpop.permute.xlu0 %2248 }
 0x146   : > { %v977_v3 = vmul.f32 %v938_v17, %v3999_v55  ;;  %3639 = vset.pattern.permute.xlu1 %v4786_v51 }
 0x147   : > { %1420 = vperm.xlu1 %3639, %v4443_v1   ;;  %v2240_v8 = vpop.permute.xlu1 %2239 }
 0x148   : > { %v989_v47 = vpack.c.bf16 %v977_v3, %v976_v22  ;;  %v2284_v56 = vrot.slane %v2240_v8, 7  ;;  %v2290_v22 = vrot.slane %v2249_v54, 7 }
 0x14a   : > { %v2285_v32 = vsel %vm250_vm1, %v2283_v16, %v2284_v56  ;;  %v4482_v26 = vrot.slane %v989_v47, 1 }
 0x14b   : > { %v2332_v28 = vmul.f32 %v2285_v32, %v3971_v49  ;;  %3640 = vset.pattern.permute.xlu1 %v3680_v21  ;;  %v2243_v9 = vpop.permute.xlu1 %2242  ;;  %v2291_v32 = vsel %vm250_vm1, %v2288_v11, %v2290_v22 }
 0x14c   : > { %v2286_v42 = vrot.slane %v2243_v9, 7  ;;  %1210 = vperm.xlu1 %3640, %v4282_v36   ;;  %v1012_v60 = vsel %vm1003_vm5, %v1009_v35, %v4482_v26 }
 0x14d   : > { %3335 = vmatmul.mubr.msk.bf16.gmra.mrb[4].mxu1 %vm621_vm3, %v1012_v60  ;;  %v2348_v27 = vpack.c.bf16 %v2332_v28, %v2331_v45  ;;  %v2255_v28 = vpop.permute.xlu0 %2254 }
 0x14e   : > { %v2287_v53 = vsel %vm250_vm1, %v2284_v56, %v2286_v42  ;;  %v2289_v14 = vsel %vm250_vm1, %v2286_v42, %v2288_v11 }
 0x14f   : > { %v2333_v23 = vmul.f32 %v2287_v53, %v3976_v63  ;;  %v2334_v21 = vmul.f32 %v2289_v14, %v3980_v57  ;;  %v2360_v0 = vshll.u32 %v2348_v27, 16  ;;  %v2358_v3 = vshrl.u32 %v2348_v27, 16 }
 0x150   : > { %1214 = vperm.xlu1 %3640, %v4300_v6   ;;  %v2057_v30 = vpop.permute.xlu1 %2056  ;;  %v941_v53 = vrot.slane %v4446_v10, 6 }
 0x151   : > { %v2349_v34 = vpack.c.bf16 %v2334_v21, %v2333_v23  ;;  %v2083_v20 = vmul.f32 %v2057_v30, %v4086_v39  ;;  %v2362_v31 = vrot.slane %v2360_v0, 1  ;;  %v4515_v14 = vpop.permute.xlu0 %2263 }
 0x153   : > { %v2093_v50 = vpack.c.bf16 %v2084_v41, %v2083_v20  ;;  %v2365_v5 = vshll.u32 %v2349_v34, 16  ;;  %v2363_v56 = vor.u32 %v2362_v31, %v2358_v3  ;;  %v2369_v21 = vshrl.u32 %v2349_v34, 16 }
 0x154   : > { %1222 = vperm.xlu1 %3640, %v4312_v43   ;;  %v2065_v35 = vpop.permute.xlu1 %2064 }
 0x155   : > { %3414 = vmatprep.mubr.msk.bf16.mxu0 %vm621_vm3, %v2093_v50  ;;  %v2085_v16 = vmul.f32 %v2065_v35, %v4068_v46  ;;  %v2367_v38 = vrot.slane %v2365_v5, 1  ;;  %v4525_v10 = vpop.permute.xlu0 %2272 }
 0x157   : > { %v2368_v9 = vsel %vm552_vm2, %v2363_v56, %v2367_v38  ;;  %v2371_v5 = vor.u32 %v2369_v21, %v2367_v38  ;;  %v949_v56 = vrot.slane %v4460_v37, 6 }
 0x158   : > { %3642 = vset.pattern.permute.xlu1 %v4786_v51  ;;  %v2069_v17 = vpop.permute.xlu1 %2068 }
 0x159   : > { %v2086_v8 = vmul.f32 %v2069_v17, %v4334_v12  ;;  %1426 = vperm.xlu1 %3642, %v4282_v36   ;;  %v2335_v36 = vmul.f32 %v2291_v32, %v3989_v58  ;;  %v984_v37 = vmul.f32 %v949_v56, %v4068_v46 }
 0x15b   : > { %v2094_v47 = vpack.c.bf16 %v2086_v8, %v2085_v16  ;;  %v2294_v16 = vrot.slane %v2255_v28, 7 }
 0x15d   : > { %3644 = vset.pattern.permute.xlu1 %v3681_v33  ;;  %v2252_v45 = vpop.permute.xlu1 %2251  ;;  %3415 = vmatmul.mubr.msk.bf16.gmra.mrb[12].mxu0 %vm621_vm3, %v2094_v47 }
 0x15e   : > { %v2292_v42 = vrot.slane %v2252_v45, 7  ;;  %2596 = vperm.xlu1 %3644, %v4443_v1   ;;  %3420 = vmatprep.mubr.msk.bf16.mxu0 %vm621_vm3, %v2368_v9 }
 0x160   : > { %v2293_v60 = vsel %vm250_vm1, %v2290_v22, %v2292_v42  ;;  %v2295_v32 = vsel %vm250_vm1, %v2292_v42, %v2294_v16 }
 0x161   : > { %v2336_v11 = vmul.f32 %v2293_v60, %v3983_v44 }
 0x162   : > { %2599 = vperm.xlu1 %3644, %v4272_v15   ;;  %v903_v41 = vpop.permute.xlu1 %902 }
 0x163   : > { %v4518_v27 = vpack.c.bf16 %v2336_v11, %v2335_v36  ;;  %v939_v23 = vrot.slane %v903_v41, 6  ;;  %v2300_v36 = vrot.slane %v4515_v14, 7 }
 0x165   : > { %v2373_v1 = vshll.u32 %v4518_v27, 16  ;;  %v940_v30 = vsel %vm919_vm4, %v937_v7, %v939_v23  ;;  %v942_v20 = vsel %vm919_vm4, %v939_v23, %v941_v53 }
 0x166   : > { %v978_v0 = vmul.f32 %v940_v30, %v4019_v59  ;;  %v979_v50 = vmul.f32 %v942_v20, %v4015_v24  ;;  %2605 = vperm.xlu1 %3644, %v4300_v6   ;;  %v909_v15 = vpop.permute.xlu1 %908  ;;  %v4537_v6 = vpop.permute.xlu0 %2281  ;;  %v2377_v30 = vshrl.u32 %v4518_v27, 16 }
 0x167   : > { %v2375_v35 = vrot.slane %v2373_v1, 1  ;;  %v943_v34 = vrot.slane %v909_v15, 6 }
 0x168   : > { %v990_v31 = vpack.c.bf16 %v979_v50, %v978_v0  ;;  %v993_v50 = vpack.c.bf16 %v984_v37, %v984_v37 }
 0x169   : > { %v2376_v7 = vsel %vm552_vm2, %v2371_v5, %v2375_v35  ;;  %v944_v22 = vsel %vm919_vm4, %v941_v53, %v943_v34  ;;  %v2337_v53 = vmul.f32 %v2295_v32, %v4002_v18 }
 0x16a   : > { %3645 = vset.pattern.permute.xlu1 %v4786_v51  ;;  %v912_v54 = vpop.permute.xlu1 %911  ;;  %3421 = vmatmul.mubr.msk.bf16.vlgmr.msra.gmra.mrb[0].mxu0 %vm621_vm3, %v2376_v7  ;;  %v1013_v17 = vrot.slane %v990_v31, 1  ;;  %v980_v51 = vmul.f32 %v944_v22, %v4051_v19 }
 0x16b   : > { %v945_v3 = vrot.slane %v912_v54, 6  ;;  %1432 = vperm.xlu1 %3645, %v4324_v2   ;;  %3437 = vmatpush3.bf16.msra.mxu0 %v2738_v52 }
 0x16c   : > { %v1014_v29 = vsel %vm1003_vm5, %v4482_v26, %v1013_v17  ;;  %v4549_v26 = vpop.permute.xlu0 %1166 }
 0x16d   : > { %v946_v8 = vsel %vm919_vm4, %v943_v34, %v945_v3  ;;  %3338 = vmatprep.mubr.msk.bf16.mxu1 %vm621_vm3, %v1014_v29  ;;  %v2379_v34 = vor.u32 %v2377_v30, %v2375_v35  ;;  %v1019_v29 = vrot.slane %v993_v50, 1 }
 0x16e   : > { %v981_v38 = vmul.f32 %v946_v8, %v4047_v25 }
 0x16f   : > { %3647 = vset.pattern.permute.xlu1 %v3681_v33  ;;  %v2258_v47 = vpop.permute.xlu1 %2257 }
 0x170   : > { %v991_v45 = vpack.c.bf16 %v981_v38, %v980_v51  ;;  %v2296_v28 = vrot.slane %v2258_v47, 7  ;;  %2608 = vperm.xlu1 %3647, %v4324_v2   ;;  %v4564_v0 = vpop.permute.xlu0 %1178 }
 0x172   : > { %v2297_v9 = vsel %vm250_vm1, %v2294_v16, %v2296_v28  ;;  %v1015_v60 = vrot.slane %v991_v45, 1  ;;  %v2306_v45 = vrot.slane %v4525_v10, 7 }
 0x173   : > { %v2338_v33 = vmul.f32 %v2297_v9, %v3999_v55  ;;  %v2261_v11 = vpop.permute.xlu1 %2260 }
 0x174   : > { %v2298_v41 = vrot.slane %v2261_v11, 7  ;;  %2611 = vperm.xlu1 %3647, %v4312_v43   ;;  %v1016_v42 = vsel %vm1003_vm5, %v1013_v17, %v1015_v60  ;;  %v4572_v51 = vpop.permute.xlu0 %1186 }
 0x175   : > { %v2351_v2 = vpack.c.bf16 %v2338_v33, %v2337_v53  ;;  %3339 = vmatmul.mubr.msk.bf16.gmra.mrb[8].mxu1 %vm621_vm3, %v1016_v42 }
 0x176   : > { %v2299_v23 = vsel %vm250_vm1, %v2296_v28, %v2298_v41  ;;  %v2301_v14 = vsel %vm250_vm1, %v2298_v41, %v2300_v36 }
 0x177   : > { %v2339_v21 = vmul.f32 %v2299_v23, %v4019_v59  ;;  %v2340_v1 = vmul.f32 %v2301_v14, %v4015_v24  ;;  %v2381_v20 = vshll.u32 %v2351_v2, 16  ;;  %v2385_v27 = vshrl.u32 %v2351_v2, 16 }
 0x178   : > { %v915_v43 = vpop.permute.xlu1 %914  ;;  %v4581_v37 = vpop.permute.xlu0 %1198 }
 0x179   : > { %v2352_v15 = vpack.c.bf16 %v2340_v1, %v2339_v21  ;;  %v947_v5 = vrot.slane %v915_v43, 6  ;;  %v2383_v31 = vrot.slane %v2381_v20, 1 }
 0x17b   : > { %v948_v52 = vsel %vm919_vm4, %v945_v3, %v947_v5  ;;  %v950_v7 = vsel %vm919_vm4, %v947_v5, %v949_v56  ;;  %v2384_v54 = vsel %vm552_vm2, %v2379_v34, %v2383_v31  ;;  %v2389_v16 = vshll.u32 %v2352_v15, 16 }
 0x17c   : > { %v982_v17 = vmul.f32 %v948_v52, %v4086_v39  ;;  %v983_v22 = vmul.f32 %v950_v7, %v4080_v40  ;;  %3424 = vmatprep.mubr.msk.bf16.mxu0 %vm621_vm3, %v2384_v54  ;;  %v2387_v47 = vor.u32 %v2385_v27, %v2383_v31  ;;  %v2393_v50 = vshrl.u32 %v2352_v15, 16  ;;  %v4592_v5 = vpop.permute.xlu0 %1218 }
 0x17d   : > { %v2267_v8 = vpop.permute.xlu1 %2266  ;;  %v2391_v3 = vrot.slane %v2389_v16, 1 }
 0x17e   : > { %v992_v35 = vpack.c.bf16 %v983_v22, %v982_v17  ;;  %v2302_v38 = vrot.slane %v2267_v8, 7  ;;  %v1226_v22 = vmul.f32 %v4549_v26, %v3968_v48 }
 0x17f   : > { %v2392_v56 = vsel %vm552_vm2, %v2387_v47, %v2391_v3  ;;  %v2395_v7 = vor.u32 %v2393_v50, %v2391_v3 }
 0x180   : > { %v1017_v32 = vrot.slane %v992_v35, 1  ;;  %3425 = vmatmul.mubr.msk.bf16.gmra.mrb[4].mxu0 %vm621_vm3, %v2392_v56  ;;  %v2303_v9 = vsel %vm250_vm1, %v2300_v36, %v2302_v38  ;;  %v4603_v56 = vpop.permute.xlu0 %1423 }
 0x181   : > { %v2270_v28 = vpop.permute.xlu1 %2269  ;;  %v2341_v10 = vmul.f32 %v2303_v9, %v4051_v19 }
 0x182   : > { %v2304_v53 = vrot.slane %v2270_v28, 7  ;;  %v1018_v33 = vsel %vm1003_vm5, %v1015_v60, %v1017_v32  ;;  %v1020_v11 = vsel %vm1003_vm5, %v1017_v32, %v1019_v29  ;;  %v2312_v60 = vrot.slane %v4537_v6, 7 }
 0x183   : > { %3342 = vmatprep.mubr.msk.bf16.mxu1 %vm621_vm3, %v1018_v33 }
 0x184   : > { %v2305_v41 = vsel %vm250_vm1, %v2302_v38, %v2304_v53  ;;  %3343 = vmatmul.mubr.msk.bf16.gmra.mrb[12].mxu1 %vm621_vm3, %v1020_v11  ;;  %v2307_v36 = vsel %vm250_vm1, %v2304_v53, %v2306_v45  ;;  %v2347_v34 = vmul.f32 0.0, %v2312_v60 }
 0x185   : > { %v2342_v42 = vmul.f32 %v2305_v41, %v4047_v25  ;;  %v2276_v2 = vpop.permute.xlu1 %2275  ;;  %v2343_v1 = vmul.f32 %v2307_v36, %v4086_v39 }
 0x186   : > { %v2308_v23 = vrot.slane %v2276_v2, 7  ;;  %v2356_v29 = vpack.c.bf16 %v2347_v34, %v2347_v34  ;;  %v4609_v2 = vpop.permute.xlu0 %1429 }
 0x187   : > { %v2353_v14 = vpack.c.bf16 %v2342_v42, %v2341_v10 }
 0x188   : > { %v2309_v21 = vsel %vm250_vm1, %v2306_v45, %v2308_v23  ;;  %v2421_v53 = vshll.u32 %v2356_v29, 16 }
 0x189   : > { %v2344_v30 = vmul.f32 %v2309_v21, %v4080_v40  ;;  %v2279_v20 = vpop.permute.xlu1 %2278  ;;  %v2397_v43 = vshll.u32 %v2353_v14, 16  ;;  %v2401_v35 = vshrl.u32 %v2353_v14, 16 }
 0x18a   : > { %v2310_v31 = vrot.slane %v2279_v20, 7  ;;  %v2423_v36 = vrot.slane %v2421_v53, 1  ;;  %v2567_v34 = vpop.permute.xlu0 %2566 }
 0x18b   : > { %v2354_v52 = vpack.c.bf16 %v2344_v30, %v2343_v1  ;;  %v2399_v54 = vrot.slane %v2397_v43, 1  ;;  %v1229_v1 = vmul.f32 %v4564_v0, %v3980_v57 }
 0x18c   : > { %v2311_v17 = vsel %vm250_vm1, %v2308_v23, %v2310_v31  ;;  %v2313_v6 = vsel %vm250_vm1, %v2310_v31, %v2312_v60  ;;  %v4798_v31 = vld [vmem:[#allocation6_spill] sm:$0xff] }
 0x18d   : > { %v2345_v27 = vmul.f32 %v2311_v17, %v4068_v46  ;;  %v2346_v16 = vmul.f32 %v2313_v6, %v4334_v12  ;;  %v2400_v15 = vsel %vm552_vm2, %v2395_v7, %v2399_v54  ;;  %v2405_v38 = vshll.u32 %v2354_v52, 16 }
 0x18e   : > { %v1163_v8 = vpop.permute.xlu1 %1162  ;;  %3428 = vmatprep.mubr.msk.bf16.mxu0 %vm621_vm3, %v2400_v15  ;;  %v2403_v32 = vor.u32 %v2401_v35, %v2399_v54  ;;  %v2409_v28 = vshrl.u32 %v2354_v52, 16  ;;  %v1231_v52 = vmul.f32 %v4572_v51, %v3983_v44  ;;  %v2576_v6 = vpop.permute.xlu0 %2575 }
 0x18f   : > { %v2355_v47 = vpack.c.bf16 %v2346_v16, %v2345_v27  ;;  %v1225_v3 = vmul.f32 %v1163_v8, %v3957_v61  ;;  %v2407_v45 = vrot.slane %v2405_v38, 1  ;;  %v2618_v29 = vrot.slane %v2576_v6, 6 }
 0x191   : > { %v1241_v26 = vpack.c.bf16 %v1226_v22, %v1225_v3  ;;  %v2413_v9 = vshll.u32 %v2355_v47, 16  ;;  %v2408_v11 = vsel %vm552_vm2, %v2403_v32, %v2407_v45  ;;  %v2411_v41 = vor.u32 %v2409_v28, %v2407_v45 }
 0x192   : > { %v1171_v33 = vpop.permute.xlu1 %1170  ;;  %3429 = vmatmul.mubr.msk.bf16.gmra.mrb[8].mxu0 %vm621_vm3, %v2408_v11  ;;  %v2417_v42 = vshrl.u32 %v2355_v47, 16  ;;  %v2613_v22 = vrot.slane %v2567_v34, 6  ;;  %v2582_v38 = vpop.permute.xlu0 %2581 }
 0x193   : > { %3348 = vmatprep.mubr.msk.bf16.mxu1 %vm621_vm3, %v1241_v26  ;;  %v2415_v10 = vrot.slane %v2413_v9, 1  ;;  %v1227_v60 = vmul.f32 %v1171_v33, %v3971_v49  ;;  %v2622_v45 = vrot.slane %v2582_v38, 6 }
 0x194   : > { %v2661_v8 = vmul.f32 %v2613_v22, %v3968_v48  ;;  %v1234_v48 = vmul.f32 %v4581_v37, %v4019_v59 }
 0x195   : > { %v2416_v61 = vsel %vm552_vm2, %v2411_v41, %v2415_v10  ;;  %v2419_v14 = vor.u32 %v2417_v42, %v2415_v10 }
 0x196   : > { %v1175_v23 = vpop.permute.xlu1 %1174  ;;  %3432 = vmatprep.mubr.msk.bf16.mxu0 %vm621_vm3, %v2416_v61 }
 0x197   : > { %v1228_v21 = vmul.f32 %v1175_v23, %v3976_v63  ;;  %v2424_v50 = vsel %vm552_vm2, %v2419_v14, %v2423_v36 }
 0x199   : > { %v1242_v30 = vpack.c.bf16 %v1228_v21, %v1227_v60 }
 0x19a   : > { %v1183_v20 = vpop.permute.xlu1 %1182  ;;  %3433 = vmatmul.mubr.msk.bf16.gmra.mrb[12].mxu0 %vm621_vm3, %v2424_v50 }
 0x19b   : > { %v1230_v43 = vmul.f32 %v1183_v20, %v3989_v58  ;;  %3349 = vmatmul.mubr.msk.bf16.vlgmr.msra.gmra.mrb[0].mxu1 %vm621_vm3, %v1242_v30  ;;  %v2585_v30 = vpop.permute.xlu0 %2584 }
 0x19c   : > { %3455 = vmatpush3.bf16.msra.mxu1 %v4798_v31 }
 0x19d   : > { %v1243_v7 = vpack.c.bf16 %v1230_v43, %v1229_v1 }
 0x19e   : > { %v1191_v54 = vpop.permute.xlu1 %1190 }
 0x19f   : > { %v1232_v0 = vmul.f32 %v1191_v54, %v4002_v18  ;;  %3352 = vmatprep.mubr.msk.bf16.mxu1 %vm621_vm3, %v1243_v7 }
 0x1a1   : > { %v1244_v17 = vpack.c.bf16 %v1232_v0, %v1231_v52  ;;  %v2594_v52 = vpop.permute.xlu0 %2593 }
 0x1a3   : > { %v2570_v27 = vpop.permute.xlu1 %2569  ;;  %3353 = vmatmul.mubr.msk.bf16.gmra.mrb[4].mxu1 %vm621_vm3, %v1244_v17  ;;  %v2630_v17 = vrot.slane %v2594_v52, 6 }
 0x1a4   : > { %v2614_v16 = vrot.slane %v2570_v27, 6 }
 0x1a6   : > { %v2615_v15 = vsel %vm919_vm4, %v2613_v22, %v2614_v16 }
 0x1a7   : > { %v2662_v51 = vmul.f32 %v2615_v15, %v3971_v49  ;;  %v2573_v35 = vpop.permute.xlu1 %2572 }
 0x1a8   : > { %v2616_v47 = vrot.slane %v2573_v35, 6 }
 0x1a9   : > { %v2678_v26 = vpack.c.bf16 %v2662_v51, %v2661_v8  ;;  %v1458_v8 = vrot.slane %v4603_v56, 7 }
 0x1aa   : > { %v2617_v3 = vsel %vm919_vm4, %v2614_v16, %v2616_v47  ;;  %v2619_v32 = vsel %vm919_vm4, %v2616_v47, %v2618_v29 }
 0x1ab   : > { %v2663_v28 = vmul.f32 %v2617_v3, %v3976_v63  ;;  %v2664_v9 = vmul.f32 %v2619_v32, %v3980_v57  ;;  %v2579_v53 = vpop.permute.xlu1 %2578  ;;  %v2696_v10 = vrot.slane %v2678_v26, 1 }
 0x1ac   : > { %v2620_v33 = vrot.slane %v2579_v53, 6 }
 0x1ad   : > { %v2679_v11 = vpack.c.bf16 %v2664_v9, %v2663_v28 }
 0x1ae   : > { %v2621_v49 = vsel %vm919_vm4, %v2618_v29, %v2620_v33  ;;  %v2623_v41 = vsel %vm919_vm4, %v2620_v33, %v2622_v45 }
 0x1af   : > { %v2665_v42 = vmul.f32 %v2621_v49, %v3989_v58  ;;  %v2666_v61 = vmul.f32 %v2623_v41, %v3983_v44  ;;  %v2697_v36 = vrot.slane %v2679_v11, 1  ;;  %v2624_v58 = vrot.slane %v2585_v30, 6 }
 0x1b0   : > { %v1195_v23 = vpop.permute.xlu1 %1194  ;;  %v1239_v41 = vmul.f32 %v4592_v5, %v4080_v40 }
 0x1b1   : > { %v2680_v63 = vpack.c.bf16 %v2666_v61, %v2665_v42  ;;  %v1233_v57 = vmul.f32 %v1195_v23, %v3999_v55  ;;  %v2698_v14 = vsel %vm1003_vm5, %v2696_v10, %v2697_v36  ;;  %v2625_v34 = vsel %vm919_vm4, %v2622_v45, %v2624_v58 }
 0x1b2   : > { %3438 = vmatprep.mubr.msk.bf16.mxu0 %vm621_vm3, %v2698_v14  ;;  %v2667_v54 = vmul.f32 %v2625_v34, %v4002_v18  ;;  %v1462_v23 = vrot.slane %v4609_v2, 7 }
 0x1b3   : > { %v2699_v60 = vrot.slane %v2680_v63, 1  ;;  %v1245_v37 = vpack.c.bf16 %v1234_v48, %v1233_v57 }
 0x1b4   : > { %v1203_v21 = vpop.permute.xlu1 %1202 }
 0x1b5   : > { %3356 = vmatprep.mubr.msk.bf16.mxu1 %vm621_vm3, %v1245_v37  ;;  %v2700_v1 = vsel %vm1003_vm5, %v2697_v36, %v2699_v60  ;;  %v1235_v20 = vmul.f32 %v1203_v21, %v4015_v24  ;;  %v2603_v21 = vpop.permute.xlu0 %2602 }
 0x1b6   : > { %3439 = vmatmul.mubr.msk.bf16.vlgmr.msra.gmra.mrb[0].mxu0 %vm621_vm3, %v2700_v1 }
 0x1b8   : > { %v1207_v44 = vpop.permute.xlu1 %1206 }
 0x1b9   : > { %v1236_v50 = vmul.f32 %v1207_v44, %v4051_v19  ;;  %v1436_v34 = vpop.permute.xlu0 %1435 }
 0x1bb   : > { %v1246_v43 = vpack.c.bf16 %v1236_v50, %v1235_v20 }
 0x1bd   : > { %v2588_v31 = vpop.permute.xlu1 %2587  ;;  %3357 = vmatmul.mubr.msk.bf16.gmra.mrb[8].mxu1 %vm621_vm3, %v1246_v43 }
 0x1be   : > { %v2626_v7 = vrot.slane %v2588_v31, 6  ;;  %v2636_v31 = vrot.slane %v2603_v21, 6 }
 0x1c0   : > { %v2627_v0 = vsel %vm919_vm4, %v2624_v58, %v2626_v7 }
 0x1c1   : > { %v2668_v6 = vmul.f32 %v2627_v0, %v3999_v55  ;;  %v2591_v22 = vpop.permute.xlu1 %2590 }
 0x1c2   : > { %v2628_v27 = vrot.slane %v2591_v22, 6  ;;  %v1466_v22 = vrot.slane %v1436_v34, 7  ;;  %v2853_v34 = vld [vmem:[%s4755_s3] sm:$0xf] }
 0x1c3   : > { %v2681_v16 = vpack.c.bf16 %v2668_v6, %v2667_v54 }
 0x1c4   : > { %v2629_v15 = vsel %vm919_vm4, %v2626_v7, %v2628_v27  ;;  %v2631_v29 = vsel %vm919_vm4, %v2628_v27, %v2630_v17 }
 0x1c5   : > { %v2669_v51 = vmul.f32 %v2629_v15, %v4019_v59  ;;  %v2670_v35 = vmul.f32 %v2631_v29, %v4015_v24  ;;  %v2701_v38 = vrot.slane %v2681_v16, 1 }
 0x1c6   : > { %v1421_v18 = vpop.permute.xlu1 %1420 }
 0x1c7   : > { %v2682_v47 = vpack.c.bf16 %v2670_v35, %v2669_v51  ;;  %v1456_v3 = vrot.slane %v1421_v18, 7  ;;  %v2702_v32 = vsel %vm1003_vm5, %v2699_v60, %v2701_v38 }
 0x1c8   : > { %3442 = vmatprep.mubr.msk.bf16.mxu0 %vm621_vm3, %v2702_v32 }
 0x1c9   : > { %v1457_v55 = vsel %vm250_vm1, %v1454_v62, %v1456_v3  ;;  %v1459_v45 = vsel %vm250_vm1, %v1456_v3, %v1458_v8  ;;  %v2703_v26 = vrot.slane %v2682_v47, 1 }
 0x1ca   : > { %v1495_v56 = vmul.f32 %v1457_v55, %v4015_v24  ;;  %v1496_v59 = vmul.f32 %v1459_v45, %v4051_v19 }
 0x1cb   : > { %v1211_v28 = vpop.permute.xlu1 %1210  ;;  %v2704_v9 = vsel %vm1003_vm5, %v2701_v38, %v2703_v26 }
 0x1cc   : > { %v1507_v53 = vpack.c.bf16 %v1496_v59, %v1495_v56  ;;  %3443 = vmatmul.mubr.msk.bf16.gmra.mrb[4].mxu0 %vm621_vm3, %v2704_v9  ;;  %v1237_v11 = vmul.f32 %v1211_v28, %v4047_v25 }
 0x1ce   : > { %v1551_v48 = vshll.u32 %v1507_v53, 16  ;;  %v1555_v44 = vshrl.u32 %v1507_v53, 16 }
 0x1cf   : > { %v1215_v33 = vpop.permute.xlu1 %1214 }
 0x1d0   : > { %v1238_v13 = vmul.f32 %v1215_v33, %v4086_v39  ;;  %v1553_v10 = vrot.slane %v1551_v48, 1 }
 0x1d2   : > { %v1247_v62 = vpack.c.bf16 %v1238_v13, %v1237_v11  ;;  %v1554_v36 = vsel %vm552_vm2, %v4243_v4, %v1553_v10  ;;  %v1557_v2 = vor.u32 %v1555_v44, %v1553_v10 }
 0x1d3   : > { %v1223_v49 = vpop.permute.xlu1 %1222 }
 0x1d4   : > { %v1240_v24 = vmul.f32 %v1223_v49, %v4068_v46  ;;  %3360 = vmatprep.mubr.msk.bf16.mxu1 %vm621_vm3, %v1247_v62 }
 0x1d6   : > { %v1248_v42 = vpack.c.bf16 %v1240_v24, %v1239_v41 }
 0x1d8   : > { %v1427_v61 = vpop.permute.xlu1 %1426  ;;  %3361 = vmatmul.mubr.msk.bf16.gmra.mrb[12].mxu1 %vm621_vm3, %v1248_v42 }
 0x1d9   : > { %v1460_v63 = vrot.slane %v1427_v61, 7  ;;  %3374 = vmatprep.mubr.msk.bf16.mxu1 %vm621_vm3, %v1554_v36 }
 0x1db   : > { %v1461_v57 = vsel %vm250_vm1, %v1458_v8, %v1460_v63  ;;  %v1463_v5 = vsel %vm250_vm1, %v1460_v63, %v1462_v23 }
 0x1dc   : > { %v1497_v14 = vmul.f32 %v1461_v57, %v4047_v25  ;;  %v1498_v60 = vmul.f32 %v1463_v5, %v4086_v39 }
 0x1dd   : > { %v2597_v37 = vpop.permute.xlu1 %2596 }
 0x1de   : > { %v1508_v1 = vpack.c.bf16 %v1498_v60, %v1497_v14  ;;  %v2632_v30 = vrot.slane %v2597_v37, 6 }
 0x1e0   : > { %v1559_v58 = vshll.u32 %v1508_v1, 16  ;;  %v2633_v50 = vsel %vm919_vm4, %v2630_v17, %v2632_v30  ;;  %v1501_v17 = vmul.f32 %v1466_v22, %v4334_v12 }
 0x1e1   : > { %v2600_v4 = vpop.permute.xlu1 %2599  ;;  %v2671_v54 = vmul.f32 %v2633_v50, %v4051_v19 }
 0x1e2   : > { %v1561_v20 = vrot.slane %v1559_v58, 1  ;;  %v2634_v43 = vrot.slane %v2600_v4, 6  ;;  %v1510_v18 = vpack.c.bf16 %v1501_v17, %v1501_v17 }
 0x1e4   : > { %v2635_v52 = vsel %vm919_vm4, %v2632_v30, %v2634_v43  ;;  %v1562_v7 = vsel %vm552_vm2, %v1557_v2, %v1561_v20  ;;  %v2637_v27 = vsel %vm919_vm4, %v2634_v43, %v2636_v31  ;;  %v1575_v56 = vshll.u32 %v1510_v18, 16 }
 0x1e5   : > { %v2672_v0 = vmul.f32 %v2635_v52, %v4047_v25  ;;  %v2606_v6 = vpop.permute.xlu1 %2605  ;;  %3375 = vmatmul.mubr.msk.bf16.vlgmr.msra.gmra.mrb[8].mxu1 %vm621_vm3, %v1562_v7  ;;  %v2673_v8 = vmul.f32 %v2637_v27, %v4086_v39  ;;  %v2854_v2 = vlaneseq }
 0x1e6   : > { %v2638_v16 = vrot.slane %v2606_v6, 6  ;;  %v1577_v11 = vrot.slane %v1575_v56, 1 }
 0x1e7   : > { %v2683_v15 = vpack.c.bf16 %v2672_v0, %v2671_v54  ;;  %v2855_v50 = vshrl.u32 %v2854_v2, 7 }
 0x1e8   : > { %v2639_v29 = vsel %vm919_vm4, %v2636_v31, %v2638_v16 }
 0x1e9   : > { %v2674_v51 = vmul.f32 %v2639_v29, %v4080_v40  ;;  %v2705_v35 = vrot.slane %v2683_v15, 1  ;;  %v2856_v43 = vsub.s32 0, %v2855_v50 }
 0x1ea   : > { %v1433_v19 = vpop.permute.xlu1 %1432 }
 0x1eb   : > { %v2684_v38 = vpack.c.bf16 %v2674_v51, %v2673_v8  ;;  %v1464_v25 = vrot.slane %v1433_v19, 7  ;;  %v2706_v47 = vsel %vm1003_vm5, %v2703_v26, %v2705_v35  ;;  %v1563_v26 = vshrl.u32 %v1508_v1, 16 }
 0x1ec   : > { %3446 = vmatprep.mubr.msk.bf16.mxu0 %vm621_vm3, %v2706_v47  ;;  %v4716_v7 = vrot.slane %v2853_v34, %v2856_v43 }
 0x1ed   : > { %v1465_v3 = vsel %vm250_vm1, %v1462_v23, %v1464_v25  ;;  %v1467_v32 = vsel %vm250_vm1, %v1464_v25, %v1466_v22  ;;  %v2707_v55 = vrot.slane %v2684_v38, 1  ;;  %v1565_v48 = vor.u32 %v1563_v26, %v1561_v20 }
 0x1ee   : > { %v1499_v45 = vmul.f32 %v1465_v3, %v4080_v40  ;;  %v1500_v39 = vmul.f32 %v1467_v32, %v4068_v46 }
 0x1ef   : > { %v2609_v59 = vpop.permute.xlu1 %2608  ;;  %v2708_v28 = vsel %vm1003_vm5, %v2705_v35, %v2707_v55 }
 0x1f0   : > { %v1509_v9 = vpack.c.bf16 %v1500_v39, %v1499_v45  ;;  %v2640_v53 = vrot.slane %v2609_v59, 6  ;;  %3447 = vmatmul.mubr.msk.bf16.gmra.mrb[8].mxu0 %vm621_vm3, %v2708_v28 }
 0x1f2   : > { %v1567_v33 = vshll.u32 %v1509_v9, 16  ;;  %v1571_v62 = vshrl.u32 %v1509_v9, 16  ;;  %v2641_v49 = vsel %vm919_vm4, %v2638_v16, %v2640_v53 }
 0x1f3   : > { %v2612_v13 = vpop.permute.xlu1 %2611  ;;  %v2675_v36 = vmul.f32 %v2641_v49, %v4068_v46 }
 0x1f4   : > { %v2642_v41 = vrot.slane %v2612_v13, 6  ;;  %v1569_v40 = vrot.slane %v1567_v33, 1 }
 0x1f6   : > { %v2643_v24 = vsel %vm919_vm4, %v2640_v53, %v2642_v41  ;;  %v2677_v10 = vmul.f32 0.0, %v2642_v41  ;;  %v1570_v42 = vsel %vm552_vm2, %v1565_v48, %v1569_v40  ;;  %v1573_v61 = vor.u32 %v1571_v62, %v1569_v40 }
 0x1f7   : > { %v2676_v23 = vmul.f32 %v2643_v24, %v4334_v12  ;;  %3378 = vmatprep.mubr.msk.bf16.mxu1 %vm621_vm3, %v1570_v42 }
 0x1f8   : > { %v2686_v63 = vpack.c.bf16 %v2677_v10, %v2677_v10  ;;  %v1578_v57 = vsel %vm552_vm2, %v1573_v61, %v1577_v11 }
 0x1f9   : > { %v2685_v5 = vpack.c.bf16 %v2676_v23, %v2675_v36  ;;  %3379 = vmatmul.mubr.msk.bf16.gmra.mrb[12].mxu1 %vm621_vm3, %v1578_v57 }
 0x1fa   : > { %v2711_v14 = vrot.slane %v2686_v63, 1 }
 0x1fb   : > { %v2709_v60 = vrot.slane %v2685_v5, 1 }
 0x1fd   : > { %v2710_v37 = vsel %vm1003_vm5, %v2707_v55, %v2709_v60  ;;  %v2712_v21 = vsel %vm1003_vm5, %v2709_v60, %v2711_v14 }
 0x1fe   : > { %3450 = vmatprep.mubr.msk.bf16.mxu0 %vm621_vm3, %v2710_v37 }
 0x1ff   : > { %3451 = vmatmul.mubr.msk.bf16.gmra.mrb[12].mxu0 %vm621_vm3, %v2712_v21 }
 0x26e   : > { %v3350_v46 = vpop.f32.mrb[0].mxu1 }
 0x26f   : > { %v1310_v12 = vpop.f32.mrb[1].mxu1 }
 0x270   : > { %v3351_v1 = vpop.f32.mrb[2].mxu1 }
 0x271   : > { %v1313_v30 = vpop.f32.mrb[3].mxu1 }
 0x276   : > { %v3354_v44 = vpop.f32.mrb[4].mxu1 }
 0x277   : > { %v1326_v58 = vpop.f32.mrb[5].mxu1 }
 0x278   : > { %v3355_v4 = vpop.f32.mrb[6].mxu1 }
 0x279   : > { %v1329_v20 = vpop.f32.mrb[7].mxu1 }
 0x289   : > { %v3440_v31 = vpop.f32.mrb[0].mxu0 }
 0x28a   : > { %v3456_v52 = vadd.f32 %v3440_v31, %v3350_v46  ;;  %v2774_v54 = vpop.f32.mrb[1].mxu0 }
 0x28b   : > { %v3457_v0 = vadd.f32 %v2774_v54, %v1310_v12  ;;  %v3441_v6 = vpop.f32.mrb[2].mxu0 }
 0x28c   : > { %v3458_v22 = vadd.f32 %v3441_v6, %v3351_v1  ;;  %v2777_v27 = vpop.f32.mrb[3].mxu0  ;;  %v2860_v15 = vadd.f32 %v3456_v52, %v4716_v7 }
 0x28d   : > { %v3459_v16 = vadd.f32 %v2777_v27, %v1313_v30  ;;  %v2858_v29 = vadd.f32 %v3457_v0, %v4716_v7 }
 0x28e   : > { %v2861_v17 = vadd.f32 %v3458_v22, %v4716_v7 }
 0x28f   : > { %v2859_v8 = vadd.f32 %v3459_v16, %v4716_v7 }
 0x290   : > { %v3165_v51 = vpack.c.bf16 %v2861_v17, %v2860_v15 }
 0x291   : > { %v3160_v35 = vpack.c.bf16 %v2859_v8, %v2858_v29 }
 0x292   : > { %3204 = vst [vmem:[%s4726_s11 + $0x8] sm:$0xff] %v3165_v51  }
 0x293   : > { %3161 = vst [vmem:[%s4726_s11] sm:$0xff] %v3160_v35  }
 0x29f   : > { %v3444_v19 = vpop.f32.mrb[4].mxu0 }
 0x2a0   : > { %v3460_v38 = vadd.f32 %v3444_v19, %v3354_v44  ;;  %v2790_v25 = vpop.f32.mrb[5].mxu0 }
 0x2a1   : > { %v3461_v18 = vadd.f32 %v2790_v25, %v1326_v58  ;;  %v3445_v47 = vpop.f32.mrb[6].mxu0 }
 0x2a2   : > { %v3462_v3 = vadd.f32 %v3445_v47, %v3355_v4  ;;  %v2793_v32 = vpop.f32.mrb[7].mxu0  ;;  %v2864_v45 = vadd.f32 %v3460_v38, %v4716_v7 }
 0x2a3   : > { %v3463_v55 = vadd.f32 %v2793_v32, %v1329_v20  ;;  %v2862_v56 = vadd.f32 %v3461_v18, %v4716_v7 }
 0x2a4   : > { %v2865_v39 = vadd.f32 %v3462_v3, %v4716_v7 }
 0x2a5   : > { %v2863_v59 = vadd.f32 %v3463_v55, %v4716_v7 }
 0x2a6   : > { %v3175_v28 = vpack.c.bf16 %v2865_v39, %v2864_v45 }
 0x2a7   : > { %v3170_v9 = vpack.c.bf16 %v2863_v59, %v2862_v56 }
 0x2a8   : > { %3206 = vst [vmem:[%s4726_s11 + $0x18] sm:$0xff] %v3175_v28  }
 0x2a9   : > { %3205 = vst [vmem:[%s4726_s11 + $0x10] sm:$0xff] %v3170_v9  }
 0x2b8   : > { %v3376_v53 = vpop.f32.mrb[8].mxu1 }
 0x2b9   : > { %v1672_v26 = vpop.f32.mrb[9].mxu1 }
 0x2ba   : > { %v3377_v33 = vpop.f32.mrb[10].mxu1 }
 0x2bb   : > { %v1675_v11 = vpop.f32.mrb[11].mxu1 }
 0x2c3   : > { %v3448_v13 = vpop.f32.mrb[8].mxu0 }
 0x2c4   : > { %v3464_v48 = vadd.f32 %v3448_v13, %v3376_v53  ;;  %v2806_v62 = vpop.f32.mrb[9].mxu0 }
 0x2c5   : > { %v3465_v49 = vadd.f32 %v2806_v62, %v1672_v26  ;;  %v3449_v41 = vpop.f32.mrb[10].mxu0 }
 0x2c6   : > { %v3466_v40 = vadd.f32 %v3449_v41, %v3377_v33  ;;  %v2809_v24 = vpop.f32.mrb[11].mxu0  ;;  %v2868_v42 = vadd.f32 %v3464_v48, %v4716_v7 }
 0x2c7   : > { %v3467_v10 = vadd.f32 %v2809_v24, %v1675_v11  ;;  %v2866_v36 = vadd.f32 %v3465_v49, %v4716_v7 }
 0x2c8   : > { %v2869_v61 = vadd.f32 %v3466_v40, %v4716_v7 }
 0x2c9   : > { %v2867_v23 = vadd.f32 %v3467_v10, %v4716_v7 }
 0x2ca   : > { %v3185_v63 = vpack.c.bf16 %v2869_v61, %v2868_v42 }
 0x2cb   : > { %v3180_v57 = vpack.c.bf16 %v2867_v23, %v2866_v36 }
 0x2cc   : > { %3208 = vst [vmem:[%s4726_s11 + $0x28] sm:$0xff] %v3185_v63   ;;  %v3380_v5 = vpop.f32.mrb[12].mxu1 }
 0x2cd   : > { %3207 = vst [vmem:[%s4726_s11 + $0x20] sm:$0xff] %v3180_v57   ;;  %v1688_v14 = vpop.f32.mrb[13].mxu1 }
 0x2ce   : > { %v3381_v60 = vpop.f32.mrb[14].mxu1 }
 0x2cf   : > { %v1691_v37 = vpop.f32.mrb[15].mxu1 }
 0x2d2   : > { %v3452_v21 = vpop.f32.mrb[12].mxu0 }
 0x2d3   : > { %v3468_v46 = vadd.f32 %v3452_v21, %v3380_v5  ;;  %v2822_v12 = vpop.f32.mrb[13].mxu0 }
 0x2d4   : > { %v3469_v1 = vadd.f32 %v2822_v12, %v1688_v14  ;;  %v3453_v30 = vpop.f32.mrb[14].mxu0 }
 0x2d5   : > { %v3470_v44 = vadd.f32 %v3453_v30, %v3381_v60  ;;  %v2825_v58 = vpop.f32.mrb[15].mxu0  ;;  %v2872_v20 = vadd.f32 %v3468_v46, %v4716_v7 }
 0x2d6   : > { %v3471_v4 = vadd.f32 %v2825_v58, %v1691_v37  ;;  %v2870_v50 = vadd.f32 %v3469_v1, %v4716_v7 }
 0x2d7   : > { %v2873_v2 = vadd.f32 %v3470_v44, %v4716_v7 }
 0x2d8   : > { %v2871_v43 = vadd.f32 %v3471_v4, %v4716_v7 }
 0x2d9   : > { %v3195_v34 = vpack.c.bf16 %v2873_v2, %v2872_v20 }
 0x2da   : > { %v3190_v31 = vpack.c.bf16 %v2871_v43, %v2870_v50 }
 0x2db   : > { %3210 = vst [vmem:[%s4726_s11 + $0x38] sm:$0xff] %v3195_v34  }
 0x2dc   : > { %3209 = vst [vmem:[%s4726_s11 + $0x30] sm:$0xff] %v3190_v31  }
 0x2dd PF: > { %s14_s15 = sadd.s32 1, %s3671_s15  }
 0x2de   : > { %p11_p4 = scmp.ge.s32.totalorder %s14_s15, 4  }
 0x2e0   :  { %13 = sbr.rel (!%p11_p4) target bundleno = 1 (0x1), region = 66 }

// kernel: ffcnet_forward.15
= control target key start
LH: loop header
LB: loop body
LE: loop exit
PB: predicated region body
PF: predicated region fallthrough
CT: control target
= control target key end

     0   :  { %s1897_s18 = smov 0   ;;  %s2472_s0 = inlined_call_operand.vmem [shape: bf16[256,128], index: 0, kind: input, shape index: {}]   ;;  %s2473_s1 = inlined_call_operand.vmem [shape: f32[256,128], index: 1, kind: input, shape index: {}]   ;;  %s2474_s2 = inlined_call_operand.vmem [shape: bf16[256,128], index: 2, kind: input, shape index: {}]   ;;  %s2475_s3 = inlined_call_operand.vmem [shape: bf16[128,128], index: 3, kind: input, shape index: {}]   ;;  %s2476_s4 = inlined_call_operand.vmem [shape: f32[8,128], index: 4, kind: input, shape index: {}]   ;;  %s2477_s5 = inlined_call_operand.vmem [shape: bf16[256,128], index: 5, kind: output, shape index: {}]  }
   0x1 LB: > { %s1455_s19 = sadd.s32 4294967295, %s1865_s18   ;;  %p1459_p0 = scmp.ge.s32.totalorder %s1865_s18, 1  ;;  %s1865_s18 = sphi %s1897_s18, %s15_s18  }
   0x2   : > { %p210_p1 = scmp.lt.s32.totalorder %s1865_s18, 3 }
   0x4   : > { %p211_p2 = pnand %p1459_p0, %p210_p1 }
   0x5   : > { %v1723_v0 = vld [vmem:[%s2475_s3] sm:$0xff] (!%p211_p2)   ;;  %s1460_s22 = sshll.u32 (!%p211_p2), %s1455_s19, 4  ;;  %v1724_v1 = vld [vmem:[%s2475_s3 + $0x8] sm:$0xff] (!%p211_p2)   ;;  %v1725_v2 = vld [vmem:[%s2475_s3 + $0x10] sm:$0xff] (!%p211_p2)   ;;  %v507_v32 = vlaneseq (!%p211_p2) }
   0x6   : > { %214 = sbr.rel (%p211_p2) target bundleno = 691 (0x2b3), region = 40  ;;  %p249_p3 = scmp.lt.s32.totalorder (!%p211_p2), %s1460_s22, 31  ;;  %1667 = vmatprep.subr.bf16.mxu0 (!%p211_p2), %v1723_v0  ;;  %1699 = vmatprep.subr.bf16.mxu1 (!%p211_p2), %v1723_v0  ;;  %v1726_v3 = vld [vmem:[%s2475_s3 + $0x18] sm:$0xff] (!%p211_p2)   ;;  %v1727_v10 = vld [vmem:[%s2475_s3 + $0x20] sm:$0xff] (!%p211_p2)   ;;  %v1728_v11 = vld [vmem:[%s2475_s3 + $0x28] sm:$0xff] (!%p211_p2)  }
   0x7   : > { %1668 = vmatpush3.bf16.msra.mxu0 (!%p211_p2), %v1723_v0  ;;  %1707 = vmatpush3.bf16.msra.mxu1 (!%p211_p2), %v1723_v0  ;;  %v1729_v12 = vld [vmem:[%s2475_s3 + $0x30] sm:$0xff] (!%p211_p2)   ;;  %v1730_v13 = vld [vmem:[%s2475_s3 + $0x38] sm:$0xff] (!%p211_p2)   ;;  %v508_v33 = vshrl.u32 (!%p211_p2), %v507_v32, 7  ;;  %v273_v36 = vld [vmem:[%s2476_s4] sm:$0xff] (!%p211_p2) }
   0x8   : > { %1669 = vmatprep.subr.bf16.mxu0 (!%p211_p2), %v1724_v1  ;;  %1700 = vmatprep.subr.bf16.mxu1 (!%p211_p2), %v1724_v1 }
   0x9   : > { %v1049_v34 = vsub.s32 (!%p211_p2), 0, %v508_v33  ;;  %v1069_v35 = vsub.s32 (!%p211_p2), 1, %v508_v33  ;;  %v509_v41 = vsub.s32 (!%p211_p2), 4, %v508_v33  ;;  %v529_v45 = vsub.s32 (!%p211_p2), 2, %v508_v33 }
   0xa   : > { %v725_v53 = vsub.s32 (!%p211_p2), 3, %v508_v33 }
   0xb   : > { %1670 = vmatpush3.bf16.msra.mxu0 (!%p211_p2), %v1724_v1  ;;  %1708 = vmatpush3.bf16.msra.mxu1 (!%p211_p2), %v1724_v1  ;;  %v1956_v37 = vrot.slane (!%p211_p2), %v273_v36, %v1049_v34  ;;  %v1958_v38 = vrot.slane (!%p211_p2), %v273_v36, %v1069_v35  ;;  %v1973_v49 = vrot.slane (!%p211_p2), %v273_v36, %v509_v41 }
   0xc   : > { %1671 = vmatprep.subr.bf16.mxu0 (!%p211_p2), %v1725_v2  ;;  %1701 = vmatprep.subr.bf16.mxu1 (!%p211_p2), %v1725_v2  ;;  %v1975_v58 = vrot.slane (!%p211_p2), %v273_v36, %v529_v45 }
   0xd   : > { %s2482_s22 = smov (!%p249_p3, %s1460_s22), 31 }
   0xe   : > { %s1463_s27 = sshll.u32 %s2482_s22, 3  ;;  %s1961_s19 = sshll.u32 %s2482_s22, 2 }
   0xf   : > { %s1920_s30 = scalar_lea.vmem %s2473_s1, %s1463_s27  ;;  %1672 = vmatpush3.bf16.msra.mxu0 %v1725_v2  ;;  %1709 = vmatpush3.bf16.msra.mxu1 %v1725_v2  ;;  %s1967_s23 = scalar_lea.vmem %s2472_s0, %s1961_s19 }
  0x10   : > { %v306_v4 = vld [vmem:[%s1920_s30] sm:$0xff]  ;;  %v307_v5 = vld [vmem:[%s1920_s30 + $0x8] sm:$0xff]  ;;  %1673 = vmatprep.subr.bf16.mxu0 %v1726_v3  ;;  %1702 = vmatprep.subr.bf16.mxu1 %v1726_v3  ;;  %v308_v14 = vld [vmem:[%s1920_s30 + $0x10] sm:$0xff]  ;;  %s2275_s25 = scalar_lea.vmem %s2474_s2, %s1961_s19  ;;  %s2352_s28 = scalar_lea.vmem %s2477_s5, %s1961_s19 }
  0x11   : > { %v314_v6 = vld [vmem:[%s1920_s30 + $0x40] sm:$0xff]  ;;  %v322_v7 = vpack.c.bf16 %v307_v5, %v306_v4  ;;  %v315_v8 = vld [vmem:[%s1920_s30 + $0x48] sm:$0xff]  ;;  %v309_v15 = vld [vmem:[%s1920_s30 + $0x18] sm:$0xff] }
  0x12   : > { %v326_v9 = vpack.c.bf16 %v315_v8, %v314_v6  ;;  %v316_v16 = vld [vmem:[%s1920_s30 + $0x50] sm:$0xff]  ;;  %v317_v17 = vld [vmem:[%s1920_s30 + $0x58] sm:$0xff]  ;;  %v310_v18 = vld [vmem:[%s1920_s30 + $0x20] sm:$0xff]  ;;  %v323_v22 = vpack.c.bf16 %v309_v15, %v308_v14 }
  0x13   : > { %1683 = vmatprep.mubr.bf16.mxu0 %v322_v7  ;;  %1674 = vmatpush3.bf16.msra.mxu0 %v1726_v3  ;;  %v311_v19 = vld [vmem:[%s1920_s30 + $0x28] sm:$0xff]  ;;  %v318_v20 = vld [vmem:[%s1920_s30 + $0x60] sm:$0xff]  ;;  %v327_v23 = vpack.c.bf16 %v317_v17, %v316_v16  ;;  %v312_v26 = vld [vmem:[%s1920_s30 + $0x30] sm:$0xff] }
  0x14   : > { %1691 = vmatprep.mubr.bf16.mxu1 %v326_v9  ;;  %1710 = vmatpush3.bf16.msra.mxu1 %v1726_v3  ;;  %v319_v21 = vld [vmem:[%s1920_s30 + $0x68] sm:$0xff]  ;;  %v324_v24 = vpack.c.bf16 %v311_v19, %v310_v18  ;;  %v313_v27 = vld [vmem:[%s1920_s30 + $0x38] sm:$0xff]  ;;  %v320_v28 = vld [vmem:[%s1920_s30 + $0x70] sm:$0xff] }
  0x15   : > { %1675 = vmatprep.subr.bf16.mxu0 %v1727_v10  ;;  %1703 = vmatprep.subr.bf16.mxu1 %v1727_v10  ;;  %v328_v25 = vpack.c.bf16 %v319_v21, %v318_v20  ;;  %v321_v29 = vld [vmem:[%s1920_s30 + $0x78] sm:$0xff]  ;;  %v325_v30 = vpack.c.bf16 %v313_v27, %v312_v26  ;;  %v1630_v39 = vld [vmem:[%s1967_s23 + $0x8] sm:$0xff]   ;;  %v1633_v42 = vld [vmem:[%s1967_s23 + $0x20] sm:$0xff]  }
  0x16   : > { %v329_v31 = vpack.c.bf16 %v321_v29, %v320_v28  ;;  %v1634_v40 = vld [vmem:[%s1967_s23 + $0x28] sm:$0xff]   ;;  %v1527_v43 = vld [vmem:[%s1967_s23] sm:$0xff]   ;;  %v1532_v44 = vunpack.c.l.bf16 %v1630_v39  ;;  %v1544_v47 = vunpack.c.l.bf16 %v1633_v42  ;;  %v1533_v51 = vunpack.c.h.bf16 %v1630_v39  ;;  %v1632_v2 = vld [vmem:[%s1967_s23 + $0x18] sm:$0xff]  }
  0x17   : > { %1676 = vmatpush3.bf16.msra.mxu0 %v1727_v10  ;;  %v1548_v46 = vunpack.c.l.bf16 %v1634_v40  ;;  %v1528_v48 = vunpack.c.l.bf16 %v1527_v43  ;;  %v1549_v50 = vunpack.c.h.bf16 %v1634_v40  ;;  %v1545_v55 = vunpack.c.h.bf16 %v1633_v42  ;;  %v1631_v9 = vld [vmem:[%s1967_s23 + $0x10] sm:$0xff]  }
  0x18   : > { %1711 = vmatpush3.bf16.msra.mxu1 %v1727_v10  ;;  %1677 = vmatprep.subr.bf16.mxu0 %v1728_v11  ;;  %v1529_v56 = vunpack.c.h.bf16 %v1527_v43  ;;  %v1636_v10 = vld [vmem:[%s1967_s23 + $0x38] sm:$0xff]   ;;  %v1540_v18 = vunpack.c.l.bf16 %v1632_v2  ;;  %v1536_v19 = vunpack.c.l.bf16 %v1631_v9  ;;  %v1537_v32 = vunpack.c.h.bf16 %v1631_v9 }
  0x19   : > { %1704 = vmatprep.subr.bf16.mxu1 %v1728_v11  ;;  %v1556_v20 = vunpack.c.l.bf16 %v1636_v10  ;;  %v1557_v27 = vunpack.c.h.bf16 %v1636_v10 }
  0x1b   : > { %1678 = vmatpush3.bf16.msra.mxu0 %v1728_v11 }
  0x1c   : > { %1712 = vmatpush3.bf16.msra.mxu1 %v1728_v11  ;;  %1679 = vmatprep.subr.bf16.mxu0 %v1729_v12  ;;  %v1635_v11 = vld [vmem:[%s1967_s23 + $0x30] sm:$0xff]  }
  0x1d   : > { %1705 = vmatprep.subr.bf16.mxu1 %v1729_v12  ;;  %v1552_v21 = vunpack.c.l.bf16 %v1635_v11  ;;  %v1553_v33 = vunpack.c.h.bf16 %v1635_v11 }
  0x1f   : > { %1680 = vmatpush3.bf16.msra.mxu0 %v1729_v12 }
  0x20   : > { %1713 = vmatpush3.bf16.msra.mxu1 %v1729_v12  ;;  %1681 = vmatprep.subr.bf16.mxu0 %v1730_v13  ;;  %v1987_v12 = vrot.slane %v273_v36, %v725_v53 }
  0x21   : > { %1706 = vmatprep.subr.bf16.mxu1 %v1730_v13 }
  0x23   : > { %1682 = vmatpush3.bf16.msra.mxu0 %v1730_v13 }
  0x24   : > { %1714 = vmatpush3.bf16.msra.mxu1 %v1730_v13 }
  0x26   : > { %1684 = vmatmul.mubr.bf16.vlgmr.msra.gmra.mrb[0].mxu0 %v323_v22 }
  0x27   : > { %1692 = vmatmul.mubr.bf16.vlgmr.msra.gmra.mrb[0].mxu1 %v327_v23  ;;  %1687 = vmatprep.mubr.bf16.mxu0 %v324_v24  ;;  %v1541_v24 = vunpack.c.h.bf16 %v1632_v2 }
  0x28   : > { %1695 = vmatprep.mubr.bf16.mxu1 %v328_v25 }
  0x2e   : > { %1688 = vmatmul.mubr.bf16.gmra.mrb[4].mxu0 %v325_v30 }
  0x2f   : > { %1696 = vmatmul.mubr.bf16.gmra.mrb[4].mxu1 %v329_v31 }
  0xf9   : > { %v1685_v52 = vpop.f32.mrb[0].mxu0 }
  0xfa   : > { %v1693_v54 = vpop.f32.mrb[0].mxu1  ;;  %v493_v57 = vadd.f32 %v1685_v52, %v1532_v44  ;;  %v428_v61 = vpop.f32.mrb[1].mxu0 }
  0xfb   : > { %v501_v59 = vadd.f32 %v1693_v54, %v1548_v46  ;;  %v460_v60 = vpop.f32.mrb[1].mxu1  ;;  %v491_v63 = vadd.f32 %v1528_v48, %v428_v61  ;;  %v1686_v1 = vpop.f32.mrb[2].mxu0 }
  0xfc   : > { %v499_v62 = vadd.f32 %v1544_v47, %v460_v60  ;;  %v1694_v0 = vpop.f32.mrb[2].mxu1  ;;  %v1979_v3 = vadd.f32 %v1973_v49, %v493_v57  ;;  %v494_v6 = vadd.f32 %v1686_v1, %v1533_v51  ;;  %v431_v8 = vpop.f32.mrb[3].mxu0 }
  0xfd   : > { %v1982_v4 = vadd.f32 %v1973_v49, %v501_v59  ;;  %v502_v5 = vadd.f32 %v1694_v0, %v1549_v50  ;;  %v463_v7 = vpop.f32.mrb[3].mxu1  ;;  %v492_v14 = vadd.f32 %v1529_v56, %v431_v8  ;;  %v2004_v44 = vadd.f32 %v1973_v49, %v491_v63 }
  0xfe   : > { %v500_v13 = vadd.f32 %v1545_v55, %v463_v7  ;;  %v1990_v15 = vadd.f32 %v1973_v49, %v494_v6  ;;  %v533_v17 = vmul.f32 %v1975_v58, %v1979_v3  ;;  %v729_v22 = vmul.f32 %v1987_v12, %v1979_v3 }
  0xff   : > { %v541_v16 = vmul.f32 %v1975_v58, %v1982_v4  ;;  %v2001_v28 = vadd.f32 %v1973_v49, %v502_v5  ;;  %v737_v46 = vmul.f32 %v1987_v12, %v1982_v4  ;;  %v2011_v51 = vadd.f32 %v1973_v49, %v499_v62 }
 0x100   : > { %551 = vadd.xlane.f32.xlu1 %v533_v17  ;;  %v534_v23 = vmul.f32 %v1975_v58, %v1990_v15  ;;  %v730_v52 = vmul.f32 %v1987_v12, %v1990_v15  ;;  %v531_v53 = vmul.f32 %v1975_v58, %v2004_v44  ;;  %v2018_v54 = vadd.f32 %v1973_v49, %v500_v13 }
 0x101   : > { %567 = vadd.xlane.f32.xlu0 %v541_v16  ;;  %v1689_v25 = vpop.f32.mrb[4].mxu0  ;;  %v542_v47 = vmul.f32 %v1975_v58, %v2001_v28  ;;  %v738_v55 = vmul.f32 %v1987_v12, %v2001_v28  ;;  %v539_v56 = vmul.f32 %v1975_v58, %v2011_v51  ;;  %v2025_v57 = vadd.f32 %v1973_v49, %v492_v14 }
 0x102   : > { %v1697_v26 = vpop.f32.mrb[4].mxu1  ;;  %v497_v29 = vadd.f32 %v1689_v25, %v1540_v18  ;;  %v444_v30 = vpop.f32.mrb[5].mxu0  ;;  %v540_v59 = vmul.f32 %v1975_v58, %v2018_v54  ;;  %v727_v60 = vmul.f32 %v1987_v12, %v2004_v44  ;;  %v735_v62 = vmul.f32 %v1987_v12, %v2011_v51 }
 0x103   : > { %v476_v31 = vpop.f32.mrb[5].mxu1  ;;  %v495_v34 = vadd.f32 %v1536_v19, %v444_v30  ;;  %v1690_v35 = vpop.f32.mrb[6].mxu0  ;;  %v505_v36 = vadd.f32 %v1697_v26, %v1556_v20  ;;  %v728_v61 = vmul.f32 %v1987_v12, %v2025_v57  ;;  %v736_v1 = vmul.f32 %v1987_v12, %v2018_v54 }
 0x104   : > { %v503_v39 = vadd.f32 %v1552_v21, %v476_v31  ;;  %v1698_v40 = vpop.f32.mrb[6].mxu1  ;;  %553 = vadd.xlane.f32.xlu1 %v534_v23  ;;  %v498_v41 = vadd.f32 %v1690_v35, %v1541_v24  ;;  %v447_v42 = vpop.f32.mrb[7].mxu0  ;;  %v2036_v63 = vadd.f32 %v1973_v49, %v497_v29  ;;  %v532_v2 = vmul.f32 %v1975_v58, %v2025_v57 }
 0x105   : > { %747 = vadd.xlane.f32.xlu0 %v729_v22  ;;  %v479_v43 = vpop.f32.mrb[7].mxu1  ;;  %v506_v45 = vadd.f32 %v1698_v40, %v1557_v27  ;;  %v496_v48 = vadd.f32 %v1537_v32, %v447_v42  ;;  %v2046_v5 = vadd.f32 %v1973_v49, %v505_v36  ;;  %v2064_v14 = vadd.f32 %v1973_v49, %v495_v34 }
 0x106   : > { %v504_v50 = vadd.f32 %v1553_v33, %v479_v43  ;;  %v2039_v0 = vadd.f32 %v1973_v49, %v498_v41  ;;  %v537_v8 = vmul.f32 %v1975_v58, %v2036_v63  ;;  %v733_v13 = vmul.f32 %v1987_v12, %v2036_v63 }
 0x107   : > { %v2049_v6 = vadd.f32 %v1973_v49, %v506_v45  ;;  %v545_v10 = vmul.f32 %v1975_v58, %v2046_v5  ;;  %v2067_v16 = vadd.f32 %v1973_v49, %v496_v48  ;;  %v2070_v17 = vadd.f32 %v1973_v49, %v503_v39 }
 0x108   : > { %569 = vadd.xlane.f32.xlu1 %v542_v47  ;;  %v538_v7 = vmul.f32 %v1975_v58, %v2039_v0  ;;  %v734_v11 = vmul.f32 %v1987_v12, %v2039_v0  ;;  %v2073_v18 = vadd.f32 %v1973_v49, %v504_v50  ;;  %v535_v20 = vmul.f32 %v1975_v58, %v2064_v14 }
 0x109   : > { %763 = vadd.xlane.f32.xlu0 %v737_v46  ;;  %v546_v9 = vmul.f32 %v1975_v58, %v2049_v6  ;;  %v536_v19 = vmul.f32 %v1975_v58, %v2067_v16  ;;  %v543_v22 = vmul.f32 %v1975_v58, %v2070_v17  ;;  %v732_v49 = vmul.f32 %v1987_v12, %v2067_v16 }
 0x10a   : > { %v544_v21 = vmul.f32 %v1975_v58, %v2073_v18  ;;  %v731_v23 = vmul.f32 %v1987_v12, %v2064_v14  ;;  %v740_v24 = vmul.f32 %v1987_v12, %v2073_v18  ;;  %v739_v25 = vmul.f32 %v1987_v12, %v2070_v17 }
 0x10b   : > { %v742_v26 = vmul.f32 %v1987_v12, %v2049_v6  ;;  %v741_v27 = vmul.f32 %v1987_v12, %v2046_v5 }
 0x10c   : > { %749 = vadd.xlane.f32.xlu1 %v730_v52 }
 0x10d   : > { %547 = vadd.xlane.f32.xlu0 %v531_v53 }
 0x110   : > { %765 = vadd.xlane.f32.xlu1 %v738_v55 }
 0x111   : > { %563 = vadd.xlane.f32.xlu0 %v539_v56 }
 0x114   : > { %565 = vadd.xlane.f32.xlu1 %v540_v59 }
 0x115   : > { %743 = vadd.xlane.f32.xlu0 %v727_v60 }
 0x118   : > { %745 = vadd.xlane.f32.xlu1 %v728_v61 }
 0x119   : > { %759 = vadd.xlane.f32.xlu0 %v735_v62 }
 0x11c   : > { %761 = vadd.xlane.f32.xlu1 %v736_v1 }
 0x11d   : > { %549 = vadd.xlane.f32.xlu0 %v532_v2 }
 0x120   : > { %561 = vadd.xlane.f32.xlu1 %v538_v7 }
 0x121   : > { %559 = vadd.xlane.f32.xlu0 %v537_v8 }
 0x124   : > { %577 = vadd.xlane.f32.xlu1 %v546_v9 }
 0x125   : > { %575 = vadd.xlane.f32.xlu0 %v545_v10 }
 0x128   : > { %757 = vadd.xlane.f32.xlu1 %v734_v11 }
 0x129   : > { %755 = vadd.xlane.f32.xlu0 %v733_v13 }
 0x12c   : > { %557 = vadd.xlane.f32.xlu1 %v536_v19 }
 0x12d   : > { %555 = vadd.xlane.f32.xlu0 %v535_v20 }
 0x130   : > { %573 = vadd.xlane.f32.xlu1 %v544_v21 }
 0x131   : > { %571 = vadd.xlane.f32.xlu0 %v543_v22 }
 0x134   : > { %753 = vadd.xlane.f32.xlu1 %v732_v49 }
 0x135   : > { %751 = vadd.xlane.f32.xlu0 %v731_v23 }
 0x138   : > { %769 = vadd.xlane.f32.xlu1 %v740_v24 }
 0x139   : > { %767 = vadd.xlane.f32.xlu0 %v739_v25 }
 0x13c   : > { %773 = vadd.xlane.f32.xlu1 %v742_v26 }
 0x13d   : > { %771 = vadd.xlane.f32.xlu0 %v741_v27 }
 0x18d   : > { %v552_v30 = vpop.xlane.xlu1 %551 }
 0x18e   : > { %v568_v29 = vpop.xlane.xlu0 %567  ;;  %v581_v32 = vmul.f32 0.25, %v552_v30 }
 0x18f   : > { %v589_v31 = vmul.f32 0.25, %v568_v29 }
 0x190   : > { %v597_v33 = vsub.f32 %v1979_v3, %v581_v32  ;;  %v921_v39 = vmul.f32 %v581_v32, %v1975_v58 }
 0x191   : > { %v605_v34 = vsub.f32 %v1982_v4, %v589_v31  ;;  %v554_v36 = vpop.xlane.xlu1 %553  ;;  %v929_v60 = vmul.f32 %v589_v31, %v1975_v58 }
 0x192   : > { %v748_v35 = vpop.xlane.xlu0 %747  ;;  %v582_v41 = vmul.f32 0.25, %v554_v36  ;;  %v613_v42 = vmul.f32 %v597_v33, %v1975_v58 }
 0x193   : > { %v777_v40 = vmul.f32 0.25, %v748_v35  ;;  %v621_v52 = vmul.f32 %v605_v34, %v1975_v58 }
 0x194   : > { %v598_v45 = vsub.f32 %v1990_v15, %v582_v41  ;;  %v629_v50 = vmul.f32 %v613_v42, %v613_v42  ;;  %v922_v21 = vmul.f32 %v582_v41, %v1975_v58 }
 0x195   : > { %v937_v43 = vmul.f32 %v777_v40, %v1987_v12  ;;  %v793_v46 = vsub.f32 %v1979_v3, %v777_v40  ;;  %v570_v48 = vpop.xlane.xlu1 %569  ;;  %v637_v9 = vmul.f32 %v621_v52, %v621_v52 }
 0x196   : > { %v764_v47 = vpop.xlane.xlu0 %763  ;;  %v590_v56 = vmul.f32 0.25, %v570_v48  ;;  %v614_v59 = vmul.f32 %v598_v45, %v1975_v58  ;;  %647 = vadd.xlane.f32.xlu0 %v629_v50 }
 0x197   : > { %v2103_v53 = vadd.f32 %v937_v43, %v921_v39  ;;  %v785_v55 = vmul.f32 0.25, %v764_v47  ;;  %v809_v10 = vmul.f32 %v793_v46, %v1987_v12 }
 0x198   : > { %v606_v62 = vsub.f32 %v2001_v28, %v590_v56  ;;  %v630_v8 = vmul.f32 %v614_v59, %v614_v59  ;;  %v930_v34 = vmul.f32 %v590_v56, %v1975_v58 }
 0x199   : > { %v945_v61 = vmul.f32 %v785_v55, %v1987_v12  ;;  %v801_v1 = vsub.f32 %v1982_v4, %v785_v55  ;;  %v750_v2 = vpop.xlane.xlu1 %749  ;;  %v825_v27 = vmul.f32 %v809_v10, %v809_v10 }
 0x19a   : > { %v548_v7 = vpop.xlane.xlu0 %547  ;;  %v778_v13 = vmul.f32 0.25, %v750_v2  ;;  %v622_v20 = vmul.f32 %v606_v62, %v1975_v58  ;;  %649 = vadd.xlane.f32.xlu1 %v630_v8  ;;  %663 = vadd.xlane.f32.xlu0 %v637_v9 }
 0x19b   : > { %v2111_v11 = vadd.f32 %v945_v61, %v929_v60  ;;  %v579_v19 = vmul.f32 0.25, %v548_v7  ;;  %v817_v29 = vmul.f32 %v801_v1, %v1987_v12 }
 0x19c   : > { %v794_v22 = vsub.f32 %v1990_v15, %v778_v13  ;;  %v938_v49 = vmul.f32 %v778_v13, %v1987_v12  ;;  %v638_v26 = vmul.f32 %v622_v20, %v622_v20 }
 0x19d   : > { %v595_v23 = vsub.f32 %v2004_v44, %v579_v19  ;;  %v766_v24 = vpop.xlane.xlu1 %765  ;;  %v833_v45 = vmul.f32 %v817_v29, %v817_v29  ;;  %v919_v50 = vmul.f32 %v579_v19, %v1975_v58 }
 0x19e   : > { %v564_v25 = vpop.xlane.xlu0 %563  ;;  %v2119_v30 = vadd.f32 %v938_v49, %v922_v21  ;;  %v786_v31 = vmul.f32 0.25, %v766_v24  ;;  %v810_v33 = vmul.f32 %v794_v22, %v1987_v12  ;;  %665 = vadd.xlane.f32.xlu1 %v638_v26  ;;  %843 = vadd.xlane.f32.xlu0 %v825_v27 }
 0x19f   : > { %v587_v32 = vmul.f32 0.25, %v564_v25  ;;  %v611_v39 = vmul.f32 %v595_v23, %v1975_v58 }
 0x1a0   : > { %v802_v35 = vsub.f32 %v2001_v28, %v786_v31  ;;  %v946_v36 = vmul.f32 %v786_v31, %v1987_v12  ;;  %v826_v43 = vmul.f32 %v810_v33, %v810_v33 }
 0x1a1   : > { %v603_v40 = vsub.f32 %v2011_v51, %v587_v32  ;;  %v566_v41 = vpop.xlane.xlu1 %565  ;;  %v627_v52 = vmul.f32 %v611_v39, %v611_v39  ;;  %v927_v7 = vmul.f32 %v587_v32, %v1975_v58 }
 0x1a2   : > { %v744_v42 = vpop.xlane.xlu0 %743  ;;  %v2127_v46 = vadd.f32 %v946_v36, %v930_v34  ;;  %v818_v48 = vmul.f32 %v802_v35, %v1987_v12  ;;  %845 = vadd.xlane.f32.xlu1 %v826_v43  ;;  %859 = vadd.xlane.f32.xlu0 %v833_v45  ;;  %v588_v8 = vmul.f32 0.25, %v566_v41 }
 0x1a3   : > { %v775_v47 = vmul.f32 0.25, %v744_v42  ;;  %v619_v62 = vmul.f32 %v603_v40, %v1975_v58 }
 0x1a4   : > { %v834_v61 = vmul.f32 %v818_v48, %v818_v48  ;;  %v604_v25 = vsub.f32 %v2018_v54, %v588_v8  ;;  %v928_v26 = vmul.f32 %v588_v8, %v1975_v58 }
 0x1a5   : > { %v791_v55 = vsub.f32 %v2004_v44, %v775_v47  ;;  %v935_v56 = vmul.f32 %v775_v47, %v1987_v12  ;;  %v746_v59 = vpop.xlane.xlu1 %745  ;;  %v635_v21 = vmul.f32 %v619_v62, %v619_v62 }
 0x1a6   : > { %v760_v60 = vpop.xlane.xlu0 %759  ;;  %861 = vadd.xlane.f32.xlu1 %v834_v61  ;;  %643 = vadd.xlane.f32.xlu0 %v627_v52  ;;  %v776_v10 = vmul.f32 0.25, %v746_v59 }
 0x1a7   : > { %v783_v1 = vmul.f32 0.25, %v760_v60  ;;  %v2134_v2 = vadd.f32 %v935_v56, %v919_v50  ;;  %v807_v22 = vmul.f32 %v791_v55, %v1987_v12  ;;  %v620_v55 = vmul.f32 %v604_v25, %v1975_v58 }
 0x1a8   : > { %v936_v31 = vmul.f32 %v776_v10, %v1987_v12  ;;  %v792_v45 = vsub.f32 %v2025_v57, %v776_v10 }
 0x1a9   : > { %v943_v9 = vmul.f32 %v783_v1, %v1987_v12  ;;  %v799_v13 = vsub.f32 %v2011_v51, %v783_v1  ;;  %v762_v19 = vpop.xlane.xlu1 %761  ;;  %v823_v35 = vmul.f32 %v807_v22, %v807_v22 }
 0x1aa   : > { %v550_v20 = vpop.xlane.xlu0 %549  ;;  %v784_v23 = vmul.f32 0.25, %v762_v19  ;;  %659 = vadd.xlane.f32.xlu0 %v635_v21 }
 0x1ab   : > { %v2140_v49 = vadd.f32 %v943_v9, %v927_v7  ;;  %v580_v24 = vmul.f32 0.25, %v550_v20  ;;  %v815_v36 = vmul.f32 %v799_v13, %v1987_v12  ;;  %v636_v9 = vmul.f32 %v620_v55, %v620_v55 }
 0x1ac   : > { %v944_v27 = vmul.f32 %v784_v23, %v1987_v12  ;;  %v800_v61 = vsub.f32 %v2018_v54, %v784_v23  ;;  %v808_v13 = vmul.f32 %v792_v45, %v1987_v12 }
 0x1ad   : > { %v596_v29 = vsub.f32 %v2025_v57, %v580_v24  ;;  %v920_v32 = vmul.f32 %v580_v24, %v1975_v58  ;;  %v562_v33 = vpop.xlane.xlu1 %561  ;;  %v831_v50 = vmul.f32 %v815_v36, %v815_v36 }
 0x1ae   : > { %v560_v34 = vpop.xlane.xlu0 %559  ;;  %v2149_v39 = vadd.f32 %v944_v27, %v928_v26  ;;  %839 = vadd.xlane.f32.xlu0 %v823_v35  ;;  %v586_v60 = vmul.f32 0.25, %v562_v33  ;;  %v816_v26 = vmul.f32 %v800_v61, %v1987_v12  ;;  %v824_v33 = vmul.f32 %v808_v13, %v808_v13 }
 0x1af   : > { %v585_v40 = vmul.f32 0.25, %v560_v34  ;;  %v612_v41 = vmul.f32 %v596_v29, %v1975_v58  ;;  %v2152_v42 = vadd.f32 %v936_v31, %v920_v32 }
 0x1b0   : > { %v926_v1 = vmul.f32 %v586_v60, %v1975_v58  ;;  %v602_v27 = vsub.f32 %v2039_v0, %v586_v60 }
 0x1b1   : > { %v601_v43 = vsub.f32 %v2036_v63, %v585_v40  ;;  %v578_v47 = vpop.xlane.xlu1 %577  ;;  %v628_v52 = vmul.f32 %v612_v41, %v612_v41  ;;  %v925_v19 = vmul.f32 %v585_v40, %v1975_v58 }
 0x1b2   : > { %v576_v48 = vpop.xlane.xlu0 %575  ;;  %855 = vadd.xlane.f32.xlu0 %v831_v50  ;;  %v2172_v29 = vmul.f32 0.25, %v578_v47  ;;  %v618_v55 = vmul.f32 %v602_v27, %v1975_v58 }
 0x1b3   : > { %v2157_v56 = vmul.f32 0.25, %v576_v48  ;;  %v617_v59 = vmul.f32 %v601_v43, %v1975_v58  ;;  %645 = vadd.xlane.f32.xlu1 %v628_v52  ;;  %v832_v43 = vmul.f32 %v816_v26, %v816_v26 }
 0x1b4   : > { %v610_v45 = vsub.f32 %v2049_v6, %v2172_v29 }
 0x1b5   : > { %v609_v62 = vsub.f32 %v2046_v5, %v2157_v56  ;;  %v758_v7 = vpop.xlane.xlu1 %757  ;;  %v633_v10 = vmul.f32 %v617_v59, %v617_v59 }
 0x1b6   : > { %v756_v8 = vpop.xlane.xlu0 %755  ;;  %v782_v20 = vmul.f32 0.25, %v758_v7  ;;  %v626_v13 = vmul.f32 %v610_v45, %v1975_v58 }
 0x1b7   : > { %v781_v21 = vmul.f32 0.25, %v756_v8  ;;  %v625_v22 = vmul.f32 %v609_v62, %v1975_v58  ;;  %661 = vadd.xlane.f32.xlu1 %v636_v9  ;;  %655 = vadd.xlane.f32.xlu0 %v633_v10  ;;  %v634_v9 = vmul.f32 %v618_v55, %v618_v55 }
 0x1b8   : > { %v942_v23 = vmul.f32 %v782_v20, %v1987_v12  ;;  %v798_v59 = vsub.f32 %v2039_v0, %v782_v20 }
 0x1b9   : > { %v797_v24 = vsub.f32 %v2036_v63, %v781_v21  ;;  %v941_v25 = vmul.f32 %v781_v21, %v1987_v12  ;;  %v558_v31 = vpop.xlane.xlu1 %557  ;;  %v641_v34 = vmul.f32 %v625_v22, %v625_v22 }
 0x1ba   : > { %v556_v32 = vpop.xlane.xlu0 %555  ;;  %v2174_v35 = vadd.f32 %v942_v23, %v926_v1  ;;  %v584_v61 = vmul.f32 0.25, %v558_v31  ;;  %v814_v20 = vmul.f32 %v798_v59, %v1987_v12 }
 0x1bb   : > { %v2176_v36 = vadd.f32 %v941_v25, %v925_v19  ;;  %v583_v40 = vmul.f32 0.25, %v556_v32  ;;  %841 = vadd.xlane.f32.xlu1 %v824_v33  ;;  %671 = vadd.xlane.f32.xlu0 %v641_v34  ;;  %v813_v41 = vmul.f32 %v797_v24, %v1987_v12 }
 0x1bc   : > { %v600_v23 = vsub.f32 %v2067_v16, %v584_v61  ;;  %v924_v24 = vmul.f32 %v584_v61, %v1975_v58 }
 0x1bd   : > { %v599_v47 = vsub.f32 %v2064_v14, %v583_v40  ;;  %v574_v48 = vpop.xlane.xlu1 %573  ;;  %v829_v52 = vmul.f32 %v813_v41, %v813_v41  ;;  %v923_v25 = vmul.f32 %v583_v40, %v1975_v58  ;;  %v642_v41 = vmul.f32 %v626_v13, %v626_v13 }
 0x1be   : > { %v572_v50 = vpop.xlane.xlu0 %571  ;;  %v592_v26 = vmul.f32 0.25, %v574_v48  ;;  %v830_v40 = vmul.f32 %v814_v20, %v814_v20 }
 0x1bf   : > { %v591_v60 = vmul.f32 0.25, %v572_v50  ;;  %857 = vadd.xlane.f32.xlu1 %v832_v43  ;;  %851 = vadd.xlane.f32.xlu0 %v829_v52  ;;  %v615_v62 = vmul.f32 %v599_v47, %v1975_v58 }
 0x1c0   : > { %v608_v55 = vsub.f32 %v2073_v18, %v592_v26  ;;  %v932_v59 = vmul.f32 %v592_v26, %v1975_v58 }
 0x1c1   : > { %v607_v1 = vsub.f32 %v2070_v17, %v591_v60  ;;  %v754_v7 = vpop.xlane.xlu1 %753  ;;  %v631_v10 = vmul.f32 %v615_v62, %v615_v62  ;;  %v616_v62 = vmul.f32 %v600_v23, %v1975_v58  ;;  %v933_v23 = vmul.f32 %v2157_v56, %v1975_v58 }
 0x1c2   : > { %v752_v8 = vpop.xlane.xlu0 %751  ;;  %v780_v19 = vmul.f32 0.25, %v754_v7 }
 0x1c3   : > { %v779_v21 = vmul.f32 0.25, %v752_v8  ;;  %v623_v22 = vmul.f32 %v607_v1, %v1975_v58  ;;  %657 = vadd.xlane.f32.xlu1 %v634_v9  ;;  %651 = vadd.xlane.f32.xlu0 %v631_v10  ;;  %v931_v1 = vmul.f32 %v591_v60, %v1975_v58 }
 0x1c4   : > { %v940_v27 = vmul.f32 %v780_v19, %v1987_v12 }
 0x1c5   : > { %v795_v31 = vsub.f32 %v2064_v14, %v779_v21  ;;  %v939_v32 = vmul.f32 %v779_v21, %v1987_v12  ;;  %v770_v33 = vpop.xlane.xlu1 %769  ;;  %v639_v43 = vmul.f32 %v623_v22, %v623_v22 }
 0x1c6   : > { %v768_v34 = vpop.xlane.xlu0 %767  ;;  %v2195_v45 = vadd.f32 %v940_v27, %v924_v24  ;;  %v788_v50 = vmul.f32 0.25, %v770_v33  ;;  %v934_v24 = vmul.f32 %v2172_v29, %v1975_v58  ;;  %v624_v29 = vmul.f32 %v608_v55, %v1975_v58 }
 0x1c7   : > { %v2197_v47 = vadd.f32 %v939_v32, %v923_v25  ;;  %v787_v52 = vmul.f32 0.25, %v768_v34  ;;  %673 = vadd.xlane.f32.xlu1 %v642_v41  ;;  %667 = vadd.xlane.f32.xlu0 %v639_v43  ;;  %v811_v48 = vmul.f32 %v795_v31, %v1987_v12  ;;  %v632_v31 = vmul.f32 %v616_v62, %v616_v62 }
 0x1c8   : > { %v948_v61 = vmul.f32 %v788_v50, %v1987_v12  ;;  %v796_v32 = vsub.f32 %v2067_v16, %v780_v19 }
 0x1c9   : > { %v803_v7 = vsub.f32 %v2070_v17, %v787_v52  ;;  %v947_v8 = vmul.f32 %v787_v52, %v1987_v12  ;;  %v774_v9 = vpop.xlane.xlu1 %773  ;;  %v827_v13 = vmul.f32 %v811_v48, %v811_v48  ;;  %v640_v48 = vmul.f32 %v624_v29, %v624_v29 }
 0x1ca   : > { %v772_v10 = vpop.xlane.xlu0 %771  ;;  %v2207_v21 = vadd.f32 %v948_v61, %v932_v59  ;;  %v790_v22 = vmul.f32 0.25, %v774_v9  ;;  %v812_v59 = vmul.f32 %v796_v32, %v1987_v12 }
 0x1cb   : > { %v789_v20 = vmul.f32 0.25, %v772_v10  ;;  %v2211_v25 = vadd.f32 %v947_v8, %v931_v1  ;;  %853 = vadd.xlane.f32.xlu1 %v830_v40  ;;  %847 = vadd.xlane.f32.xlu0 %v827_v13  ;;  %v819_v60 = vmul.f32 %v803_v7, %v1987_v12  ;;  %v804_v40 = vsub.f32 %v2073_v18, %v788_v50 }
 0x1cc   : > { %v950_v26 = vmul.f32 %v790_v22, %v1987_v12  ;;  %v806_v19 = vsub.f32 %v2049_v6, %v790_v22  ;;  %v828_v61 = vmul.f32 %v812_v59, %v812_v59 }
 0x1cd   : > { %v805_v27 = vsub.f32 %v2046_v5, %v789_v20  ;;  %v949_v33 = vmul.f32 %v789_v20, %v1987_v12  ;;  %v835_v34 = vmul.f32 %v819_v60, %v819_v60  ;;  %v820_v55 = vmul.f32 %v804_v40, %v1987_v12 }
 0x1ce   : > { %v2221_v41 = vadd.f32 %v950_v26, %v934_v24  ;;  %v822_v1 = vmul.f32 %v806_v19, %v1987_v12 }
 0x1cf   : > { %v821_v43 = vmul.f32 %v805_v27, %v1987_v12  ;;  %v2224_v52 = vadd.f32 %v949_v33, %v933_v23  ;;  %653 = vadd.xlane.f32.xlu1 %v632_v31  ;;  %863 = vadd.xlane.f32.xlu0 %v835_v34  ;;  %v836_v62 = vmul.f32 %v820_v55, %v820_v55 }
 0x1d0   : > { %v838_v7 = vmul.f32 %v822_v1, %v822_v1 }
 0x1d1   : > { %v837_v56 = vmul.f32 %v821_v43, %v821_v43 }
 0x1d3   : > { %669 = vadd.xlane.f32.xlu1 %v640_v48  ;;  %867 = vadd.xlane.f32.xlu0 %v837_v56 }
 0x1d7   : > { %849 = vadd.xlane.f32.xlu1 %v828_v61 }
 0x1db   : > { %865 = vadd.xlane.f32.xlu1 %v836_v62 }
 0x1df   : > { %869 = vadd.xlane.f32.xlu1 %v838_v7 }
 0x223   : > { %v648_v8 = vpop.xlane.xlu0 %647 }
 0x224   : > { %v677_v9 = vmul.f32 0.25, %v648_v8 }
 0x226   : > { %v693_v24 = vadd.f32 1e-05, %v677_v9 }
 0x227   : > { %v650_v50 = vpop.xlane.xlu1 %649  ;;  %v664_v10 = vpop.xlane.xlu0 %663 }
 0x228   : > { %v678_v13 = vmul.f32 0.25, %v650_v50  ;;  %v685_v20 = vmul.f32 0.25, %v664_v10  ;;  %1731 = vrsqrt.f32 %v693_v24 }
 0x22a   : > { %v694_v22 = vadd.f32 1e-05, %v678_v13  ;;  %v701_v31 = vadd.f32 1e-05, %v685_v20 }
 0x22b   : > { %v666_v60 = vpop.xlane.xlu1 %665  ;;  %v844_v23 = vpop.xlane.xlu0 %843 }
 0x22c   : > { %v686_v26 = vmul.f32 0.25, %v666_v60  ;;  %v873_v27 = vmul.f32 0.25, %v844_v23  ;;  %1733 = vrsqrt.f32 %v694_v22 }
 0x22e   : > { %v889_v32 = vadd.f32 1e-05, %v873_v27  ;;  %v702_v33 = vadd.f32 1e-05, %v686_v26  ;;  %v1017_v27 = vsub.f32 %v1979_v3, %v2103_v53  ;;  %v1025_v3 = vsub.f32 %v1982_v4, %v2111_v11 }
 0x22f   : > { %v846_v34 = vpop.xlane.xlu1 %845  ;;  %v860_v29 = vpop.xlane.xlu0 %859  ;;  %v1018_v53 = vsub.f32 %v1990_v15, %v2119_v30  ;;  %v1026_v4 = vsub.f32 %v2001_v28, %v2127_v46 }
 0x230   : > { %v874_v43 = vmul.f32 0.25, %v846_v34  ;;  %v881_v56 = vmul.f32 0.25, %v860_v29  ;;  %1735 = vrsqrt.f32 %v889_v32 }
 0x231   : > { %1737 = vrsqrt.f32 %v701_v31 }
 0x232   : > { %v890_v40 = vadd.f32 1e-05, %v874_v43  ;;  %v897_v48 = vadd.f32 1e-05, %v881_v56  ;;  %1739 = vrsqrt.f32 %v702_v33  ;;  %v1732_v7 = vpop.eup %1731 }
 0x233   : > { %v862_v59 = vpop.xlane.xlu1 %861  ;;  %v644_v19 = vpop.xlane.xlu0 %643  ;;  %v969_v24 = vmul.f32 %v1732_v7, %v1975_v58 }
 0x234   : > { %1741 = vrsqrt.f32 %v890_v40  ;;  %v882_v61 = vmul.f32 0.25, %v862_v59  ;;  %v675_v55 = vmul.f32 0.25, %v644_v19 }
 0x235   : > { %1743 = vrsqrt.f32 %v897_v48 }
 0x236   : > { %v898_v62 = vadd.f32 1e-05, %v882_v61  ;;  %v691_v8 = vadd.f32 1e-05, %v675_v55  ;;  %v1734_v9 = vpop.eup %1733 }
 0x237   : > { %v660_v1 = vpop.xlane.xlu0 %659  ;;  %v970_v29 = vmul.f32 %v1734_v9, %v1975_v58 }
 0x238   : > { %1745 = vrsqrt.f32 %v898_v62  ;;  %v683_v50 = vmul.f32 0.25, %v660_v1 }
 0x239   : > { %1747 = vrsqrt.f32 %v691_v8 }
 0x23a   : > { %v1736_v10 = vpop.eup %1735  ;;  %v699_v32 = vadd.f32 1e-05, %v683_v50 }
 0x23b   : > { %v840_v13 = vpop.xlane.xlu0 %839  ;;  %v1738_v20 = vpop.eup %1737  ;;  %v985_v60 = vmul.f32 %v1736_v10, %v1987_v12 }
 0x23c   : > { %v871_v23 = vmul.f32 0.25, %v840_v13  ;;  %v1740_v22 = vpop.eup %1739  ;;  %v977_v43 = vmul.f32 %v1738_v20, %v1975_v58 }
 0x23d   : > { %v1001_v31 = vadd.f32 %v985_v60, %v969_v24  ;;  %v978_v7 = vmul.f32 %v1740_v22, %v1975_v58 }
 0x23e   : > { %v1742_v26 = vpop.eup %1741  ;;  %v887_v33 = vadd.f32 1e-05, %v871_v23 }
 0x23f   : > { %v1744_v34 = vpop.eup %1743  ;;  %v986_v56 = vmul.f32 %v1742_v26, %v1987_v12  ;;  %v856_v48 = vpop.xlane.xlu0 %855  ;;  %v1033_v59 = vmul.f32 %v1017_v27, %v1001_v31 }
 0x240   : > { %v646_v40 = vpop.xlane.xlu1 %645  ;;  %v993_v19 = vmul.f32 %v1744_v34, %v1987_v12  ;;  %1749 = vrsqrt.f32 %v887_v33  ;;  %v879_v62 = vmul.f32 0.25, %v856_v48 }
 0x241   : > { %v676_v61 = vmul.f32 0.25, %v646_v40  ;;  %v1002_v55 = vadd.f32 %v986_v56, %v970_v29  ;;  %v1053_v8 = vmul.f32 %v1956_v37, %v1033_v59  ;;  %1751 = vrsqrt.f32 %v699_v32 }
 0x242   : > { %v1746_v1 = vpop.eup %1745  ;;  %v1009_v9 = vadd.f32 %v993_v19, %v977_v43  ;;  %v895_v20 = vadd.f32 1e-05, %v879_v62 }
 0x243   : > { %v1034_v50 = vmul.f32 %v1018_v53, %v1002_v55  ;;  %v994_v10 = vmul.f32 %v1746_v1, %v1987_v12  ;;  %v692_v13 = vadd.f32 1e-05, %v676_v61  ;;  %v2249_v15 = vadd.f32 %v1958_v38, %v1053_v8  ;;  %v1748_v32 = vpop.eup %1747 }
 0x244   : > { %v662_v24 = vpop.xlane.xlu1 %661  ;;  %v656_v60 = vpop.xlane.xlu0 %655  ;;  %v1041_v11 = vmul.f32 %v1025_v3, %v1009_v9  ;;  %1753 = vrsqrt.f32 %v895_v20  ;;  %v967_v53 = vmul.f32 %v1748_v32, %v1975_v58 }
 0x245   : > { %v1054_v30 = vmul.f32 %v1956_v37, %v1034_v50  ;;  %v1010_v23 = vadd.f32 %v994_v10, %v978_v7  ;;  %v684_v22 = vmul.f32 0.25, %v662_v24  ;;  %v1121_v26 = vmin.f32 %v2249_v15, 20.0 }
 0x246   : > { %v1061_v27 = vmul.f32 %v1956_v37, %v1041_v11  ;;  %v681_v31 = vmul.f32 0.25, %v656_v60  ;;  %1755 = vrsqrt.f32 %v692_v13  ;;  %v1015_v10 = vsub.f32 %v2004_v44, %v2134_v2 }
 0x247   : > { %v2255_v33 = vadd.f32 %v1958_v38, %v1054_v30  ;;  %v1042_v34 = vmul.f32 %v1026_v4, %v1010_v23  ;;  %v700_v28 = vadd.f32 1e-05, %v684_v22  ;;  %v1139_v43 = vmul.f32 1.442695, %v1121_v26 }
 0x248   : > { %v842_v46 = vpop.xlane.xlu1 %841  ;;  %v672_v29 = vpop.xlane.xlu0 %671  ;;  %v2258_v56 = vadd.f32 %v1958_v38, %v1061_v27  ;;  %v697_v40 = vadd.f32 1e-05, %v681_v31 }
 0x249   : > { %v872_v48 = vmul.f32 0.25, %v842_v46  ;;  %v1122_v59 = vmin.f32 %v2255_v33, 20.0  ;;  %v1062_v19 = vmul.f32 %v1956_v37, %v1042_v34  ;;  %1757 = vrsqrt.f32 %v700_v28  ;;  %v2280_v46 = vld [vmem:[%s2275_s25 + $0x8] sm:$0xff]  }
 0x24a   : > { %v1750_v61 = vpop.eup %1749  ;;  %1759 = vpow2.f32 %v1139_v43  ;;  %v1129_v3 = vmin.f32 %v2258_v56, 20.0  ;;  %v689_v11 = vmul.f32 0.25, %v672_v29 }
 0x24b   : > { %v888_v55 = vadd.f32 1e-05, %v872_v48  ;;  %v1141_v62 = vmul.f32 1.442695, %v1122_v59  ;;  %v2265_v1 = vadd.f32 %v1958_v38, %v1062_v19  ;;  %v983_v7 = vmul.f32 %v1750_v61, %v1987_v12  ;;  %v1752_v50 = vpop.eup %1751  ;;  %v2286_v48 = vld [vmem:[%s2275_s25 + $0x28] sm:$0xff]  }
 0x24c   : > { %1761 = vrsqrt.f32 %v697_v40  ;;  %v858_v8 = vpop.xlane.xlu1 %857  ;;  %v852_v9 = vpop.xlane.xlu0 %851  ;;  %v1155_v13 = vmul.f32 1.442695, %v1129_v3  ;;  %v975_v2 = vmul.f32 %v1752_v50, %v1975_v58  ;;  %v1023_v40 = vsub.f32 %v2011_v51, %v2140_v49 }
 0x24d   : > { %1763 = vrsqrt.f32 %v888_v55  ;;  %v880_v20 = vmul.f32 0.25, %v858_v8  ;;  %v1130_v24 = vmin.f32 %v2265_v1, 20.0  ;;  %v999_v60 = vadd.f32 %v983_v7, %v967_v53 }
 0x24e   : > { %1765 = vpow2.f32 %v1141_v62  ;;  %v877_v4 = vmul.f32 0.25, %v852_v9  ;;  %v1754_v23 = vpop.eup %1753  ;;  %v705_v19 = vadd.f32 1e-05, %v689_v11  ;;  %v1024_v3 = vsub.f32 %v2018_v54, %v2149_v39 }
 0x24f   : > { %1767 = vpow2.f32 %v1155_v13  ;;  %v896_v30 = vadd.f32 1e-05, %v880_v20  ;;  %v1157_v44 = vmul.f32 1.442695, %v1130_v24  ;;  %v1031_v22 = vmul.f32 %v1015_v10, %v999_v60 }
 0x250   : > { %v658_v26 = vpop.xlane.xlu1 %657  ;;  %v652_v27 = vpop.xlane.xlu0 %651  ;;  %v991_v31 = vmul.f32 %v1754_v23, %v1987_v12  ;;  %v893_v32 = vadd.f32 1e-05, %v877_v4  ;;  %v1016_v53 = vsub.f32 %v2025_v57, %v2152_v42  ;;  %v1021_v51 = vsub.f32 %v2036_v63, %v2176_v36 }
 0x251   : > { %1769 = vrsqrt.f32 %v896_v30  ;;  %v682_v34 = vmul.f32 0.25, %v658_v26  ;;  %v1756_v28 = vpop.eup %1755  ;;  %v1051_v29 = vmul.f32 %v1956_v37, %v1031_v22  ;;  %v679_v43 = vmul.f32 0.25, %v652_v27 }
 0x252   : > { %1771 = vpow2.f32 %v1157_v44  ;;  %v1007_v59 = vadd.f32 %v991_v31, %v975_v2  ;;  %v1564_v49 = vunpack.c.l.bf16 %v2280_v46  ;;  %v968_v11 = vmul.f32 %v1756_v28, %v1975_v58 }
 0x253   : > { %1773 = vrsqrt.f32 %v893_v32  ;;  %v1758_v61 = vpop.eup %1757  ;;  %v2293_v55 = vadd.f32 %v1958_v38, %v1051_v29  ;;  %v698_v62 = vadd.f32 1e-05, %v682_v34  ;;  %v695_v50 = vadd.f32 1e-05, %v679_v43 }
 0x254   : > { %v674_v7 = vpop.xlane.xlu1 %673  ;;  %v1760_v8 = vpop.eup %1759  ;;  %v1039_v9 = vmul.f32 %v1023_v40, %v1007_v59  ;;  %1775 = vrsqrt.f32 %v705_v19  ;;  %v976_v28 = vmul.f32 %v1758_v61, %v1975_v58 }
 0x255   : > { %v1169_v13 = vadd.f32 1.0, %v1760_v8  ;;  %v1119_v57 = vmin.f32 %v2293_v55, 20.0  ;;  %v668_v42 = vpop.xlane.xlu0 %667  ;;  %1777 = vrsqrt.f32 %v698_v62  ;;  %v690_v34 = vmul.f32 0.25, %v674_v7 }
 0x256   : > { %v1762_v10 = vpop.eup %1761  ;;  %v1059_v30 = vmul.f32 %v1956_v37, %v1039_v9  ;;  %1779 = vrsqrt.f32 %v695_v50  ;;  %v687_v9 = vmul.f32 0.25, %v668_v42 }
 0x257   : > { %v1764_v60 = vpop.eup %1763  ;;  %v1185_v44 = vmul.f32 %v1169_v13, %v1169_v13  ;;  %v1135_v2 = vmul.f32 1.442695, %v1119_v57  ;;  %v973_v57 = vmul.f32 %v1762_v10, %v1975_v58  ;;  %v706_v61 = vadd.f32 1e-05, %v690_v34 }
 0x258   : > { %v1766_v23 = vpop.eup %1765  ;;  %v984_v22 = vmul.f32 %v1764_v60, %v1987_v12  ;;  %v854_v26 = vpop.xlane.xlu1 %853  ;;  %v2306_v32 = vadd.f32 %v1958_v38, %v1059_v30 }
 0x259   : > { %v1768_v27 = vpop.eup %1767  ;;  %v1170_v31 = vadd.f32 1.0, %v1766_v23  ;;  %v1233_v29 = vadd.f32 1.0, %v1185_v44  ;;  %1781 = vpow2.f32 %v1135_v2  ;;  %v848_v50 = vpop.xlane.xlu0 %847  ;;  %v878_v20 = vmul.f32 0.25, %v854_v26 }
 0x25a   : > { %v1177_v43 = vadd.f32 1.0, %v1768_v27  ;;  %v1127_v19 = vmin.f32 %v2306_v32, 20.0  ;;  %v1000_v8 = vadd.f32 %v984_v22, %v968_v11  ;;  %v1478_v11 = vadd.f32 -1.0, %v1185_v44 }
 0x25b   : > { %v1770_v40 = vpop.eup %1769  ;;  %v1186_v59 = vmul.f32 %v1170_v31, %v1170_v31  ;;  %1783 = vrcp.f32 %v1233_v29  ;;  %v703_v26 = vadd.f32 1e-05, %v687_v9 }
 0x25c   : > { %v1772_v62 = vpop.eup %1771  ;;  %v1193_v13 = vmul.f32 %v1177_v43, %v1177_v43  ;;  %v992_v60 = vmul.f32 %v1770_v40, %v1987_v12  ;;  %v654_v7 = vpop.xlane.xlu1 %653  ;;  %v1151_v27 = vmul.f32 1.442695, %v1127_v19  ;;  %v1032_v31 = vmul.f32 %v1016_v53, %v1000_v8 }
 0x25d   : > { %v1774_v30 = vpop.eup %1773  ;;  %v1234_v23 = vadd.f32 1.0, %v1186_v59  ;;  %v1178_v2 = vadd.f32 1.0, %v1772_v62  ;;  %v1479_v29 = vadd.f32 -1.0, %v1186_v59  ;;  %v864_v59 = vpop.xlane.xlu0 %863  ;;  %v1217_v9 = vmul.f32 %v1478_v11, %v2249_v15 }
 0x25e   : > { %v1241_v4 = vadd.f32 1.0, %v1193_v13  ;;  %v1008_v24 = vadd.f32 %v992_v60, %v976_v28  ;;  %v989_v22 = vmul.f32 %v1774_v30, %v1987_v12  ;;  %v1052_v10 = vmul.f32 %v1956_v37, %v1032_v31  ;;  %v2317_v19 = vpop.eup %1775 }
 0x25f   : > { %1785 = vrcp.f32 %v1234_v23  ;;  %v1194_v42 = vmul.f32 %v1178_v2, %v1178_v2  ;;  %v1778_v44 = vpop.eup %1777  ;;  %v1486_v28 = vadd.f32 -1.0, %v1193_v13  ;;  %v1218_v13 = vmul.f32 %v1479_v29, %v2255_v33 }
 0x260   : > { %1787 = vrcp.f32 %v1241_v4  ;;  %v1040_v43 = vmul.f32 %v1024_v3, %v1008_v24  ;;  %v670_v40 = vpop.xlane.xlu1 %669  ;;  %v1005_v53 = vadd.f32 %v989_v22, %v973_v57  ;;  %v2320_v8 = vadd.f32 %v1958_v38, %v1052_v10  ;;  %v2323_v62 = vpop.eup %1779 }
 0x261   : > { %v1242_v34 = vadd.f32 1.0, %v1194_v42  ;;  %1789 = vpow2.f32 %v1151_v27  ;;  %v1487_v54 = vadd.f32 -1.0, %v1194_v42  ;;  %v894_v3 = vadd.f32 1e-05, %v878_v20  ;;  %v868_v10 = vpop.xlane.xlu0 %867 }
 0x262   : > { %v1060_v4 = vmul.f32 %v1956_v37, %v1040_v43  ;;  %1791 = vrsqrt.f32 %v706_v61  ;;  %v1037_v39 = vmul.f32 %v1021_v51, %v1005_v53  ;;  %v1120_v57 = vmin.f32 %v2320_v8, 20.0 }
 0x263   : > { %1793 = vrcp.f32 %v1242_v34  ;;  %v1782_v24 = vpop.eup %1781  ;;  %v875_v27 = vmul.f32 0.25, %v848_v50  ;;  %v680_v51 = vmul.f32 0.25, %v654_v7  ;;  %v883_v20 = vmul.f32 0.25, %v864_v59 }
 0x264   : > { %v2332_v60 = vadd.f32 %v1958_v38, %v1060_v4  ;;  %v850_v30 = vpop.xlane.xlu1 %849  ;;  %v1167_v23 = vadd.f32 1.0, %v1782_v24  ;;  %v1057_v2 = vmul.f32 %v1956_v37, %v1037_v39  ;;  %1795 = vrsqrt.f32 %v894_v3 }
 0x265   : > { %v1784_v61 = vpop.eup %1783  ;;  %v1137_v63 = vmul.f32 1.442695, %v1120_v57  ;;  %v1225_v15 = vmul.f32 %v1486_v28, %v2258_v56  ;;  %v1226_v33 = vmul.f32 %v1487_v54, %v2265_v1  ;;  %v891_v29 = vadd.f32 1e-05, %v875_v27 }
 0x266   : > { %v1128_v36 = vmin.f32 %v2332_v60, 20.0  ;;  %v1183_v31 = vmul.f32 %v1167_v23, %v1167_v23  ;;  %v2339_v11 = vadd.f32 %v1958_v38, %v1057_v2  ;;  %v1265_v42 = vmul.f32 %v1784_v61, %v1217_v9 }
 0x267   : > { %1797 = vpow2.f32 %v1137_v63  ;;  %v696_v7 = vadd.f32 1e-05, %v680_v51  ;;  %v899_v1 = vadd.f32 1e-05, %v883_v20  ;;  %v688_v28 = vmul.f32 0.25, %v670_v40 }
 0x268   : > { %v1153_v22 = vmul.f32 1.442695, %v1128_v36  ;;  %v866_v50 = vpop.xlane.xlu1 %865  ;;  %v1231_v34 = vadd.f32 1.0, %v1183_v31  ;;  %v1125_v53 = vmin.f32 %v2339_v11, 20.0  ;;  %1799 = vrsqrt.f32 %v703_v26 }
 0x269   : > { %v1786_v43 = vpop.eup %1785  ;;  %v885_v3 = vmul.f32 0.25, %v868_v10  ;;  %v1281_v9 = vadd.f32 %v1564_v49, %v1265_v42  ;;  %v2478_v57 = vunpack.c.h.bf16 %v2280_v46  ;;  %v974_v40 = vmul.f32 %v1778_v44, %v1975_v58 }
 0x26a   : > { %v1788_v4 = vpop.eup %1787  ;;  %v1266_v56 = vmul.f32 %v1786_v43, %v1218_v13  ;;  %1801 = vpow2.f32 %v1153_v22  ;;  %v1147_v39 = vmul.f32 1.442695, %v1125_v53  ;;  %v704_v13 = vadd.f32 1e-05, %v688_v28 }
 0x26b   : > { %v1790_v59 = vpop.eup %1789  ;;  %v1273_v54 = vmul.f32 %v1788_v4, %v1225_v15  ;;  %1803 = vrcp.f32 %v1231_v34  ;;  %v876_v27 = vmul.f32 0.25, %v850_v30  ;;  %v2479_v51 = vunpack.c.l.bf16 %v2286_v48 }
 0x26c   : > { %v2342_v24 = vpop.eup %1791  ;;  %v1282_v26 = vadd.f32 %v2478_v57, %v1266_v56  ;;  %v1175_v23 = vadd.f32 1.0, %v1790_v59  ;;  %1805 = vrsqrt.f32 %v891_v29  ;;  %v870_v46 = vpop.xlane.xlu1 %869  ;;  %v901_v15 = vadd.f32 1e-05, %v885_v3 }
 0x26d   : > { %v1794_v2 = vpop.eup %1793  ;;  %1807 = vpow2.f32 %v1147_v39  ;;  %v1289_v20 = vadd.f32 %v2479_v51, %v1273_v54  ;;  %v884_v42 = vmul.f32 0.25, %v866_v50  ;;  %v2480_v22 = vunpack.c.h.bf16 %v2286_v48 }
 0x26e   : > { %v1598_v61 = vpack.c.bf16 %v1282_v26, %v1281_v9  ;;  %v1274_v63 = vmul.f32 %v1794_v2, %v1226_v33  ;;  %v1191_v49 = vmul.f32 %v1175_v23, %v1175_v23  ;;  %1809 = vrsqrt.f32 %v696_v7  ;;  %v1796_v36 = vpop.eup %1795  ;;  %v2373_v9 = vld [vmem:[%s2275_s25] sm:$0xff]  }
 0x26f   : > { %1811 = vrsqrt.f32 %v899_v1  ;;  %v990_v44 = vmul.f32 %v1796_v36, %v1987_v12  ;;  %v892_v30 = vadd.f32 1e-05, %v876_v27  ;;  %v1022_v33 = vsub.f32 %v2039_v0, %v2174_v35 }
 0x270   : > { %1644 = vst [vmem:[%s2352_s28 + $0x8] sm:$0xff] %v1598_v61   ;;  %v1290_v29 = vadd.f32 %v2480_v22, %v1274_v63  ;;  %v1239_v10 = vadd.f32 1.0, %v1191_v49  ;;  %1813 = vrsqrt.f32 %v704_v13  ;;  %v900_v43 = vadd.f32 1e-05, %v884_v42 }
 0x271   : > { %v886_v34 = vmul.f32 0.25, %v870_v46  ;;  %v1798_v53 = vpop.eup %1797  ;;  %v1020_v7 = vsub.f32 %v2067_v16, %v2195_v45  ;;  %v1006_v48 = vadd.f32 %v990_v44, %v974_v40  ;;  %v1476_v56 = vadd.f32 -1.0, %v1183_v31  ;;  %v2376_v31 = vld [vmem:[%s2275_s25 + $0x20] sm:$0xff]  }
 0x272   : > { %v1618_v50 = vpack.c.bf16 %v1290_v29, %v1289_v20  ;;  %1815 = vrcp.f32 %v1239_v10  ;;  %v1800_v4 = vpop.eup %1799  ;;  %v1168_v1 = vadd.f32 1.0, %v1798_v53  ;;  %v1019_v0 = vsub.f32 %v2064_v14, %v2197_v47 }
 0x273   : > { %1817 = vrsqrt.f32 %v901_v15  ;;  %v902_v28 = vadd.f32 1e-05, %v886_v34  ;;  %v1028_v35 = vsub.f32 %v2073_v18, %v2207_v21  ;;  %v1038_v54 = vmul.f32 %v1022_v33, %v1006_v48 }
 0x274   : > { %v1802_v59 = vpop.eup %1801  ;;  %1648 = vst [vmem:[%s2352_s28 + $0x28] sm:$0xff] %v1618_v50   ;;  %1819 = vrsqrt.f32 %v892_v30  ;;  %v1027_v3 = vsub.f32 %v2070_v17, %v2211_v25  ;;  %v1184_v57 = vmul.f32 %v1168_v1, %v1168_v1  ;;  %v1030_v14 = vsub.f32 %v2049_v6, %v2221_v41 }
 0x275   : > { %v1804_v39 = vpop.eup %1803  ;;  %v1176_v26 = vadd.f32 1.0, %v1802_v59  ;;  %1821 = vrsqrt.f32 %v900_v43  ;;  %v1029_v47 = vsub.f32 %v2046_v5, %v2224_v52  ;;  %v1058_v2 = vmul.f32 %v1956_v37, %v1038_v54 }
 0x276   : > { %v1806_v23 = vpop.eup %1805  ;;  %1823 = vrsqrt.f32 %v902_v28  ;;  %v1215_v17 = vmul.f32 %v1476_v56, %v2293_v55  ;;  %v1232_v25 = vadd.f32 1.0, %v1184_v57  ;;  %v1560_v63 = vunpack.c.l.bf16 %v2373_v9 }
 0x277   : > { %v1808_v40 = vpop.eup %1807  ;;  %v1192_v13 = vmul.f32 %v1176_v26, %v1176_v26  ;;  %v987_v27 = vmul.f32 %v1806_v23, %v1987_v12  ;;  %v1576_v46 = vunpack.c.l.bf16 %v2376_v31  ;;  %v971_v36 = vmul.f32 %v2323_v62, %v1975_v58 }
 0x278   : > { %v1810_v61 = vpop.eup %1809  ;;  %v2390_v5 = vadd.f32 %v1958_v38, %v1058_v2  ;;  %v1263_v51 = vmul.f32 %v1804_v39, %v1215_v17  ;;  %v1484_v20 = vadd.f32 -1.0, %v1191_v49  ;;  %1825 = vrcp.f32 %v1232_v25 }
 0x279   : > { %v1812_v52 = vpop.eup %1811  ;;  %v1240_v55 = vadd.f32 1.0, %v1192_v13  ;;  %v1561_v15 = vunpack.c.h.bf16 %v2373_v9  ;;  %v1477_v42 = vadd.f32 -1.0, %v1184_v57  ;;  %v1003_v29 = vadd.f32 %v987_v27, %v971_v36 }
 0x27a   : > { %v1126_v22 = vmin.f32 %v2390_v5, 20.0  ;;  %v1814_v10 = vpop.eup %1813  ;;  %v1577_v44 = vunpack.c.h.bf16 %v2376_v31  ;;  %v979_v62 = vmul.f32 %v1800_v4, %v1975_v58  ;;  %v995_v30 = vmul.f32 %v1812_v52, %v1987_v12 }
 0x27b   : > { %1827 = vrcp.f32 %v1240_v55  ;;  %v981_v49 = vmul.f32 %v2317_v19, %v1975_v58  ;;  %v982_v43 = vmul.f32 %v2342_v24, %v1975_v58  ;;  %v1035_v53 = vmul.f32 %v1019_v0, %v1003_v29 }
 0x27c   : > { %v1816_v33 = vpop.eup %1815  ;;  %v1149_v34 = vmul.f32 1.442695, %v1126_v22  ;;  %v1279_v48 = vadd.f32 %v1560_v63, %v1263_v51  ;;  %v1223_v56 = vmul.f32 %v1484_v20, %v2306_v32  ;;  %v1173_v1 = vadd.f32 1.0, %v1808_v40 }
 0x27d   : > { %v1818_v50 = vpop.eup %1817  ;;  %v1011_v28 = vadd.f32 %v995_v30, %v979_v62  ;;  %v1216_v4 = vmul.f32 %v1477_v42, %v2320_v8  ;;  %v1485_v54 = vadd.f32 -1.0, %v1192_v13  ;;  %v1055_v39 = vmul.f32 %v1956_v37, %v1035_v53 }
 0x27e   : > { %v1820_v59 = vpop.eup %1819  ;;  %v997_v9 = vmul.f32 %v1818_v50, %v1987_v12  ;;  %1829 = vpow2.f32 %v1149_v34  ;;  %v972_v24 = vmul.f32 %v1810_v61, %v1975_v58  ;;  %v980_v23 = vmul.f32 %v1814_v10, %v1975_v58 }
 0x27f   : > { %v1822_v19 = vpop.eup %1821  ;;  %v1043_v57 = vmul.f32 %v1027_v3, %v1011_v28  ;;  %v988_v0 = vmul.f32 %v1820_v59, %v1987_v12  ;;  %v2408_v32 = vadd.f32 %v1958_v38, %v1055_v39  ;;  %v1189_v40 = vmul.f32 %v1173_v1, %v1173_v1 }
 0x280   : > { %v1824_v26 = vpop.eup %1823  ;;  %v1013_v2 = vadd.f32 %v997_v9, %v981_v49  ;;  %v996_v8 = vmul.f32 %v1822_v19, %v1987_v12  ;;  %v1224_v27 = vmul.f32 %v1485_v54, %v2332_v60  ;;  %v1271_v52 = vmul.f32 %v1816_v33, %v1223_v56 }
 0x281   : > { %v1063_v17 = vmul.f32 %v1956_v37, %v1043_v57  ;;  %v1004_v25 = vadd.f32 %v988_v0, %v972_v24  ;;  %v998_v13 = vmul.f32 %v1824_v26, %v1987_v12  ;;  %v1123_v3 = vmin.f32 %v2408_v32, 20.0  ;;  %v1639_v24 = vld [vmem:[%s2275_s25 + $0x18] sm:$0xff]  }
 0x282   : > { %v1045_v61 = vmul.f32 %v1029_v47, %v1013_v2  ;;  %v1012_v63 = vadd.f32 %v996_v8, %v980_v23  ;;  %v1826_v36 = vpop.eup %1825  ;;  %v1237_v22 = vadd.f32 1.0, %v1189_v40  ;;  %v1287_v33 = vadd.f32 %v1576_v46, %v1271_v52 }
 0x283   : > { %v2417_v51 = vadd.f32 %v1958_v38, %v1063_v17  ;;  %v1036_v58 = vmul.f32 %v1020_v7, %v1004_v25  ;;  %v1014_v20 = vadd.f32 %v998_v13, %v982_v43  ;;  %v1264_v55 = vmul.f32 %v1826_v36, %v1216_v4 }
 0x284   : > { %v1143_v42 = vmul.f32 1.442695, %v1123_v3  ;;  %v1065_v12 = vmul.f32 %v1956_v37, %v1045_v61  ;;  %v1044_v60 = vmul.f32 %v1028_v35, %v1012_v63  ;;  %v1482_v54 = vadd.f32 -1.0, %v1189_v40 }
 0x285   : > { %v1828_v47 = vpop.eup %1827  ;;  %v1131_v29 = vmin.f32 %v2417_v51, 20.0  ;;  %v1056_v10 = vmul.f32 %v1956_v37, %v1036_v58  ;;  %v1046_v16 = vmul.f32 %v1030_v14, %v1014_v20  ;;  %v1280_v45 = vadd.f32 %v1561_v15, %v1264_v55 }
 0x286   : > { %v1272_v7 = vmul.f32 %v1828_v47, %v1224_v27  ;;  %1831 = vpow2.f32 %v1143_v42  ;;  %v2432_v62 = vadd.f32 %v1958_v38, %v1065_v12  ;;  %v1064_v21 = vmul.f32 %v1956_v37, %v1044_v60 }
 0x287   : > { %v1159_v30 = vmul.f32 1.442695, %v1131_v29  ;;  %v2435_v18 = vadd.f32 %v1958_v38, %v1056_v10  ;;  %v1066_v35 = vmul.f32 %v1956_v37, %v1046_v16  ;;  %v1593_v6 = vpack.c.bf16 %v1280_v45, %v1279_v48 }
 0x288   : > { %v1288_v41 = vadd.f32 %v1577_v44, %v1272_v7  ;;  %v1133_v14 = vmin.f32 %v2432_v62, 20.0  ;;  %v1830_v15 = vpop.eup %1829  ;;  %v2444_v43 = vadd.f32 %v1958_v38, %v1064_v21  ;;  %v1221_v8 = vmul.f32 %v1482_v54, %v2339_v11 }
 0x289   : > { %1833 = vpow2.f32 %v1159_v30  ;;  %v1124_v49 = vmin.f32 %v2435_v18, 20.0  ;;  %1594 = vst [vmem:[%s2352_s28] sm:$0xff] %v1593_v6   ;;  %v1174_v53 = vadd.f32 1.0, %v1830_v15  ;;  %v2448_v37 = vadd.f32 %v1958_v38, %v1066_v35  ;;  %v1638_v30 = vld [vmem:[%s2275_s25 + $0x10] sm:$0xff]  }
 0x28a   : > { %v1613_v34 = vpack.c.bf16 %v1288_v41, %v1287_v33  ;;  %v1163_v50 = vmul.f32 1.442695, %v1133_v14  ;;  %1835 = vrcp.f32 %v1237_v22  ;;  %v1132_v46 = vmin.f32 %v2444_v43, 20.0  ;;  %v1642_v41 = vld [vmem:[%s2275_s25 + $0x30] sm:$0xff]  }
 0x28b   : > { %v1145_v31 = vmul.f32 1.442695, %v1124_v49  ;;  %v1190_v44 = vmul.f32 %v1174_v53, %v1174_v53  ;;  %v1134_v48 = vmin.f32 %v2448_v37, 20.0  ;;  %v1572_v25 = vunpack.c.l.bf16 %v1639_v24 }
 0x28c   : > { %1647 = vst [vmem:[%s2352_s28 + $0x20] sm:$0xff] %v1613_v34   ;;  %1837 = vpow2.f32 %v1163_v50  ;;  %v1161_v56 = vmul.f32 1.442695, %v1132_v46  ;;  %v1573_v63 = vunpack.c.h.bf16 %v1639_v24  ;;  %v1568_v49 = vunpack.c.l.bf16 %v1638_v30 }
 0x28d   : > { %1839 = vpow2.f32 %v1145_v31  ;;  %v1238_v1 = vadd.f32 1.0, %v1190_v44  ;;  %v1165_v28 = vmul.f32 1.442695, %v1134_v48  ;;  %v1483_v57 = vadd.f32 -1.0, %v1190_v44 }
 0x28e   : > { %1841 = vpow2.f32 %v1161_v56  ;;  %v1569_v31 = vunpack.c.h.bf16 %v1638_v30  ;;  %v1584_v48 = vunpack.c.l.bf16 %v1642_v41 }
 0x28f   : > { %1843 = vrcp.f32 %v1238_v1  ;;  %v1222_v40 = vmul.f32 %v1483_v57, %v2390_v5 }
 0x290   : > { %v1832_v59 = vpop.eup %1831  ;;  %1845 = vpow2.f32 %v1165_v28 }
 0x291   : > { %v1171_v4 = vadd.f32 1.0, %v1832_v59  ;;  %v1643_v59 = vld [vmem:[%s2275_s25 + $0x38] sm:$0xff]  }
 0x292   : > { %v1589_v57 = vunpack.c.h.bf16 %v1643_v59 }
 0x293   : > { %v1834_v38 = vpop.eup %1833  ;;  %v1187_v39 = vmul.f32 %v1171_v4, %v1171_v4 }
 0x294   : > { %v1179_v9 = vadd.f32 1.0, %v1834_v38  ;;  %v1836_v19 = vpop.eup %1835  ;;  %v1585_v38 = vunpack.c.h.bf16 %v1642_v41 }
 0x295   : > { %v1235_v26 = vadd.f32 1.0, %v1187_v39  ;;  %v1269_v61 = vmul.f32 %v1836_v19, %v1221_v8  ;;  %v1480_v45 = vadd.f32 -1.0, %v1187_v39 }
 0x296   : > { %v1838_v0 = vpop.eup %1837  ;;  %v1195_v23 = vmul.f32 %v1179_v9, %v1179_v9 }
 0x297   : > { %v1840_v2 = vpop.eup %1839  ;;  %v1181_v17 = vadd.f32 1.0, %v1838_v0  ;;  %1847 = vrcp.f32 %v1235_v26  ;;  %v1285_v22 = vadd.f32 %v1572_v25, %v1269_v61  ;;  %v1219_v6 = vmul.f32 %v1480_v45, %v2408_v32 }
 0x298   : > { %v1243_v13 = vadd.f32 1.0, %v1195_v23  ;;  %v1172_v27 = vadd.f32 1.0, %v1840_v2  ;;  %v1842_v3 = vpop.eup %1841  ;;  %v1488_v21 = vadd.f32 -1.0, %v1195_v23 }
 0x299   : > { %v1197_v36 = vmul.f32 %v1181_v17, %v1181_v17  ;;  %v1844_v52 = vpop.eup %1843  ;;  %v1180_v20 = vadd.f32 1.0, %v1842_v3 }
 0x29a   : > { %v1188_v58 = vmul.f32 %v1172_v27, %v1172_v27  ;;  %v1846_v55 = vpop.eup %1845  ;;  %v1270_v42 = vmul.f32 %v1844_v52, %v1222_v40  ;;  %1849 = vrcp.f32 %v1243_v13  ;;  %v1227_v50 = vmul.f32 %v1488_v21, %v2417_v51 }
 0x29b   : > { %v1245_v12 = vadd.f32 1.0, %v1197_v36  ;;  %v1196_v60 = vmul.f32 %v1180_v20, %v1180_v20  ;;  %v1182_v47 = vadd.f32 1.0, %v1846_v55  ;;  %v1490_v34 = vadd.f32 -1.0, %v1197_v36 }
 0x29c   : > { %v1236_v11 = vadd.f32 1.0, %v1188_v58  ;;  %v1286_v29 = vadd.f32 %v1573_v63, %v1270_v42  ;;  %v1481_v35 = vadd.f32 -1.0, %v1188_v58 }
 0x29d   : > { %v1244_v10 = vadd.f32 1.0, %v1196_v60  ;;  %v1198_v16 = vmul.f32 %v1182_v47, %v1182_v47  ;;  %v1489_v14 = vadd.f32 -1.0, %v1196_v60  ;;  %v1229_v39 = vmul.f32 %v1490_v34, %v2432_v62 }
 0x29e   : > { %1851 = vrcp.f32 %v1236_v11  ;;  %v1608_v5 = vpack.c.bf16 %v1286_v29, %v1285_v22  ;;  %v1220_v46 = vmul.f32 %v1481_v35, %v2435_v18  ;;  %v1588_v18 = vunpack.c.l.bf16 %v1643_v59 }
 0x29f   : > { %1853 = vrcp.f32 %v1245_v12  ;;  %v1246_v7 = vadd.f32 1.0, %v1198_v16  ;;  %v1491_v56 = vadd.f32 -1.0, %v1198_v16  ;;  %v1228_v32 = vmul.f32 %v1489_v14, %v2444_v43 }
 0x2a0   : > { %1855 = vrcp.f32 %v1244_v10  ;;  %1646 = vst [vmem:[%s2352_s28 + $0x18] sm:$0xff] %v1608_v5  }
 0x2a1   : > { %1857 = vrcp.f32 %v1246_v7  ;;  %v1848_v33 = vpop.eup %1847  ;;  %v1230_v0 = vmul.f32 %v1491_v56, %v2448_v37 }
 0x2a2   : > { %v1267_v53 = vmul.f32 %v1848_v33, %v1219_v6 }
 0x2a4   : > { %v1850_v15 = vpop.eup %1849  ;;  %v1283_v9 = vadd.f32 %v1568_v49, %v1267_v53 }
 0x2a5   : > { %v1275_v28 = vmul.f32 %v1850_v15, %v1227_v50 }
 0x2a7   : > { %v1291_v23 = vadd.f32 %v1584_v48, %v1275_v28 }
 0x2a8   : > { %v1852_v44 = vpop.eup %1851 }
 0x2a9   : > { %v1854_v1 = vpop.eup %1853  ;;  %v1268_v4 = vmul.f32 %v1852_v44, %v1220_v46 }
 0x2aa   : > { %v1856_v54 = vpop.eup %1855  ;;  %v1277_v24 = vmul.f32 %v1854_v1, %v1229_v39 }
 0x2ab   : > { %v1284_v51 = vadd.f32 %v1569_v31, %v1268_v4  ;;  %v1276_v19 = vmul.f32 %v1856_v54, %v1228_v32  ;;  %v1858_v26 = vpop.eup %1857 }
 0x2ac   : > { %v1278_v17 = vmul.f32 %v1858_v26, %v1230_v0  ;;  %v1293_v25 = vadd.f32 %v1588_v18, %v1277_v24 }
 0x2ad   : > { %v1603_v2 = vpack.c.bf16 %v1284_v51, %v1283_v9  ;;  %v1292_v8 = vadd.f32 %v1585_v38, %v1276_v19 }
 0x2ae   : > { %v1294_v13 = vadd.f32 %v1589_v57, %v1278_v17 }
 0x2af   : > { %1645 = vst [vmem:[%s2352_s28 + $0x10] sm:$0xff] %v1603_v2   ;;  %v1623_v43 = vpack.c.bf16 %v1292_v8, %v1291_v23 }
 0x2b0   : > { %v1628_v62 = vpack.c.bf16 %v1294_v13, %v1293_v25 }
 0x2b1   : > { %1649 = vst [vmem:[%s2352_s28 + $0x30] sm:$0xff] %v1623_v43  }
 0x2b2   : > { %1650 = vst [vmem:[%s2352_s28 + $0x38] sm:$0xff] %v1628_v62  }
 0x2b3 PF: > { %s15_s18 = sadd.s32 1, %s1865_s18  }
 0x2b4   : > { %p12_p4 = scmp.ge.s32.totalorder %s15_s18, 4  }
 0x2b6   :  { %14 = sbr.rel (!%p12_p4) target bundleno = 1 (0x1), region = 76 }

</bundles_post_ra>
